<compile_context>
chip_gen: v7x
topology: tpu7x:2x2x1
jax: 0.10.0
libtpu: 0.0.40
codegen_flags: <defaults>
</compile_context>

<pallas_src>
import functools

import jax
import jax.numpy as jnp
from jax import lax
from jax.experimental import pallas as pl
from jax.experimental.pallas import tpu as pltpu
import numpy as np

_BIG = 1e10    # sentinel: cross-batch / already-selected (same as reference)
_INIT = 3e38   # carried-state init, strictly larger than _BIG


def _graphconv_up_kernel(q_slab_ref, ref_slab_ref, ref_feat_ref, q_skip_ref,
                         w_ref_ref, w_skip_ref, b_ref, out_ref,
                         best_d_ref, best_f_ref, *, k):
    """One (query tile, reference chunk) grid step with a carried running top-k."""
    c_id = pl.program_id(1)
    n_chunks = pl.num_programs(1)

    # ---- init carried top-k state at the first reference chunk ----
    @pl.when(c_id == 0)
    def _():
        best_d_ref[...] = jnp.full(best_d_ref.shape, _INIT, jnp.float32)
        best_f_ref[...] = jnp.zeros(best_f_ref.shape, jnp.float32)

    # ---- query tile (prep hoisted to wrapper: cols = x, y, z, ||q||^2, batch) ----
    qs = q_slab_ref[...]                       # [tm, 8]
    q_xyz = qs[:, 0:3]                         # [tm, 3]
    qn = qs[:, 3:4]                            # [tm, 1]
    qb = qs[:, 4:5]                            # [tm, 1]

    # ---- reference chunk slab (rows = x, y, z, ||r||^2, batch), pre-transposed ----
    rs = ref_slab_ref[...]                     # [8, nc]
    r_xyz_t = rs[0:3, :]                       # [3, nc]
    rn = rs[3:4, :]                            # [1, nc]
    rb = rs[4:5, :]                            # [1, nc]

    cross = jnp.dot(q_xyz, r_xyz_t, preferred_element_type=jnp.float32)   # [tm, nc]
    d2 = qn + rn - 2.0 * cross
    dist = jnp.where(qb == rb, d2, _BIG)       # mask cross-batch pairs

    nc = dist.shape[1]
    col = lax.broadcasted_iota(jnp.int32, dist.shape, 1)
    feat = ref_feat_ref[...]                   # [nc, c_in] bf16

    # ---- chunk-local top-k candidates (distance + gathered feature) ----
    cand_d, cand_f = [], []
    for _ in range(k):
        mind = jnp.min(dist, axis=1, keepdims=True)                            # [tm,1]
        idx = jnp.min(jnp.where(dist <= mind, col, nc), axis=1, keepdims=True)  # tie -> lowest col
        onehot = (col == idx).astype(jnp.bfloat16)                              # [tm,nc]
        cand_d.append(mind)
        cand_f.append(jnp.dot(onehot, feat, preferred_element_type=jnp.float32))
        dist = jnp.where(col == idx, _BIG, dist)

    # ---- merge carried top-k with the chunk candidates ----
    # Preference order on ties = [carried 0..k-1, chunk 0..k-1]; carried entries come
    # from earlier chunks, so this reproduces the global lowest-index tie-break.
    all_d = [best_d_ref[j, :, :] for j in range(k)] + cand_d    # 2k x [tm, 1]
    all_f = [best_f_ref[j, :, :] for j in range(k)] + cand_f    # 2k x [tm, c_in]
    new_d, new_f = [], []
    for _slot in range(k):
        best = all_d[0]
        sel = jnp.zeros_like(best, dtype=jnp.int32)
        for i in range(1, 2 * k):
            better = all_d[i] < best
            best = jnp.where(better, all_d[i], best)
            sel = jnp.where(better, i, sel)
        fsel = jnp.zeros_like(all_f[0])
        for i in range(2 * k):
            fsel = fsel + (sel == i).astype(jnp.float32) * all_f[i]
        new_d.append(best)
        new_f.append(fsel)
        all_d = [jnp.where(sel == i, _INIT, all_d[i]) for i in range(2 * k)]
    for j in range(k):
        best_d_ref[j, :, :] = new_d[j]
        best_f_ref[j, :, :] = new_f[j]

    # ---- finalize on the last chunk: mean-aggregate + fused linears + ReLU ----
    @pl.when(c_id == n_chunks - 1)
    def _():
        interp = new_f[0]
        for j in range(1, k):
            interp = interp + new_f[j]
        interp = interp * (1.0 / k)
        out = (jnp.dot(interp, w_ref_ref[...], preferred_element_type=jnp.float32)
               + jnp.dot(q_skip_ref[...], w_skip_ref[...],
                         preferred_element_type=jnp.float32)
               + b_ref[...])
        out_ref[...] = jnp.maximum(out, 0.0)


def graph_conv_up(ref_bxyz, ref_feat, query_bxyz, query_skip_feat,
                  w_ref, w_skip, bias, *, tm=128, nc=512, k=3):
    """Pallas GraphConvUp forward.

    ref_bxyz [N,4] (b,x,y,z), ref_feat [N,C_in], query_bxyz [M,4],
    query_skip_feat [M,C_skip], w_ref [C_in,C_out], w_skip [C_skip,C_out],
    bias [1,C_out] -> query_feat [M,C_out].
    """
    assert nc % 128 == 0 and tm % 8 == 0
    n, c_in = ref_feat.shape
    m = query_bxyz.shape[0]
    c_skip = query_skip_feat.shape[1]
    c_out = w_ref.shape[1]

    n_pad = ((n + nc - 1) // nc) * nc
    m_pad = ((m + tm - 1) // tm) * tm

    # ---- hoisted, grid-invariant reference prep (done once, wrapper side) ----
    # lane-dense slab [8, N_pad]: rows 0-2 xyz^T, row 3 ||r||^2, row 4 batch id.
    r_xyz = ref_bxyz[:, 1:4].astype(jnp.float32)
    ref_slab = jnp.zeros((8, n_pad), jnp.float32)
    ref_slab = ref_slab.at[0:3, :n].set(r_xyz.T)
    ref_slab = ref_slab.at[3, :n].set(jnp.sum(r_xyz * r_xyz, axis=-1))
    ref_slab = ref_slab.at[4, :].set(-1.0)                 # padded refs: impossible batch
    ref_slab = ref_slab.at[4, :n].set(ref_bxyz[:, 0].astype(jnp.float32))

    ref_feat_p = jnp.zeros((n_pad, c_in), jnp.bfloat16)
    ref_feat_p = ref_feat_p.at[:n, :].set(ref_feat.astype(jnp.bfloat16))

    # ---- query-side prep: [M_pad, 8] slab (x, y, z, ||q||^2, batch, pad) ----
    q_xyz = query_bxyz[:, 1:4].astype(jnp.float32)
    q_slab = jnp.zeros((m_pad, 8), jnp.float32)
    q_slab = q_slab.at[:m, 0:3].set(q_xyz)
    q_slab = q_slab.at[:m, 3].set(jnp.sum(q_xyz * q_xyz, axis=-1))
    q_slab = q_slab.at[:, 4].set(-2.0)                     # padded queries match nothing
    q_slab = q_slab.at[:m, 4].set(query_bxyz[:, 0].astype(jnp.float32))

    q_skip_p = jnp.zeros((m_pad, c_skip), jnp.float32)
    q_skip_p = q_skip_p.at[:m, :].set(query_skip_feat.astype(jnp.float32))

    grid = (m_pad // tm, n_pad // nc)

    # explicit VMEM budget: double-buffered blocks + carried scratch + headroom
    block_bytes = 2 * (tm * 8 * 4 + 8 * nc * 4 + nc * c_in * 2 + tm * c_skip * 4
                       + c_in * c_out * 4 + c_skip * c_out * 4 + c_out * 4
                       + tm * c_out * 4)
    scratch_bytes = k * tm * 4 + k * tm * c_in * 4
    vmem_limit = int(min(block_bytes + scratch_bytes + (16 << 20), 96 << 20))

    kernel = functools.partial(_graphconv_up_kernel, k=k)
    out = pl.pallas_call(
        kernel,
        out_shape=jax.ShapeDtypeStruct((m_pad, c_out), jnp.float32),
        grid_spec=pltpu.PrefetchScalarGridSpec(
            num_scalar_prefetch=0,
            grid=grid,
            in_specs=[
                pl.BlockSpec((tm, 8), lambda i, c: (i, 0)),         # query slab tile
                pl.BlockSpec((8, nc), lambda i, c: (0, c)),         # ref slab chunk
                pl.BlockSpec((nc, c_in), lambda i, c: (c, 0)),      # ref feat chunk (bf16)
                pl.BlockSpec((tm, c_skip), lambda i, c: (i, 0)),    # query skip tile
                pl.BlockSpec((c_in, c_out), lambda i, c: (0, 0)),   # W_ref
                pl.BlockSpec((c_skip, c_out), lambda i, c: (0, 0)), # W_skip
                pl.BlockSpec((1, c_out), lambda i, c: (0, 0)),      # bias
            ],
            out_specs=pl.BlockSpec((tm, c_out), lambda i, c: (i, 0)),
            scratch_shapes=[
                pltpu.VMEM((k, tm, 1), jnp.float32),      # carried top-k distances
                pltpu.VMEM((k, tm, c_in), jnp.float32),   # carried top-k features
            ],
        ),
        compiler_params=pltpu.CompilerParams(
            dimension_semantics=("parallel", "arbitrary"),
            vmem_limit_bytes=vmem_limit),
    )(q_slab, ref_slab, ref_feat_p, q_skip_p, w_ref, w_skip, bias)
    return out[:m]


def graph_conv_up_reference(ref_bxyz, ref_feat, query_bxyz, query_skip_feat,
                            w_ref, w_skip, bias, k=3):
    """Pure-JAX reference for correctness checking."""
    q_xyz, r_xyz = query_bxyz[:, 1:4], ref_bxyz[:, 1:4]
    d2 = (jnp.sum(q_xyz * q_xyz, -1, keepdims=True)
          + jnp.sum(r_xyz * r_xyz, -1)[None, :]
          - 2.0 * jnp.dot(q_xyz, r_xyz.T, precision=lax.Precision.HIGHEST))
    same = query_bxyz[:, 0:1] == ref_bxyz[None, :, 0]
    d2 = jnp.where(same, d2, _BIG)
    _, idx = lax.top_k(-d2, k)                 # k nearest ref points per query
    interp = ref_feat[idx].mean(axis=1)        # [M, C_in]
    out = interp @ w_ref + query_skip_feat @ w_skip + bias
    return jnp.maximum(out, 0.0)


if __name__ == "__main__":
    key = jax.random.PRNGKey(0)
    k_rx, k_rf, k_qx, k_qs, k_w1, k_w2, k_b = jax.random.split(key, 7)

    # Small deterministic shapes; non-multiple-of-tile sizes exercise the internal
    # padding and the multi-chunk running-top-k merge path.
    N, M = 320, 200
    C_IN, C_SKIP, C_OUT = 64, 32, 64
    K = 3

    ref_batch = jnp.repeat(jnp.arange(2, dtype=jnp.float32), N // 2)[:, None]
    ref_xyz = jax.random.uniform(k_rx, (N, 3), jnp.float32)
    ref_bxyz = jnp.concatenate([ref_batch, ref_xyz], axis=1)          # [N, 4]
    ref_feat = jax.random.normal(k_rf, (N, C_IN), jnp.float32)        # [N, C_in]

    q_batch = jnp.repeat(jnp.arange(2, dtype=jnp.float32), M // 2)[:, None]
    q_xyz = jax.random.uniform(k_qx, (M, 3), jnp.float32)
    query_bxyz = jnp.concatenate([q_batch, q_xyz], axis=1)            # [M, 4]
    query_skip_feat = jax.random.normal(k_qs, (M, C_SKIP), jnp.float32)

    # Deterministic synthetic parameters (no checkpoint load).
    w_ref = jax.random.normal(k_w1, (C_IN, C_OUT), jnp.float32) * 0.1
    w_skip = jax.random.normal(k_w2, (C_SKIP, C_OUT), jnp.float32) * 0.1
    bias = jax.random.normal(k_b, (1, C_OUT), jnp.float32) * 0.01

    out = graph_conv_up(ref_bxyz, ref_feat, query_bxyz, query_skip_feat,
                        w_ref, w_skip, bias, tm=128, nc=128, k=K)
    jax.block_until_ready(out)

    expected = graph_conv_up_reference(ref_bxyz, ref_feat, query_bxyz,
                                       query_skip_feat, w_ref, w_skip, bias, k=K)
    np.testing.assert_allclose(np.asarray(out), np.asarray(expected),
                               rtol=2e-2, atol=2e-2)

    print("KERNEL_OK")
</pallas_src>

<mosaic_0001>
module attributes {stable_mosaic.version = 11 : i64} {
  func.func @_graphconv_up_kernel(%arg0: i32, %arg1: i32, %arg2: memref<128x8xf32, #tpu.memory_space<vmem>>, %arg3: memref<8x128xf32, #tpu.memory_space<vmem>>, %arg4: memref<128x64xbf16, #tpu.memory_space<vmem>>, %arg5: memref<128x32xf32, #tpu.memory_space<vmem>>, %arg6: memref<64x64xf32, #tpu.memory_space<vmem>>, %arg7: memref<32x64xf32, #tpu.memory_space<vmem>>, %arg8: memref<1x64xf32, #tpu.memory_space<vmem>>, %arg9: memref<128x64xf32, #tpu.memory_space<vmem>>, %arg10: memref<3x128x1xf32, #tpu.memory_space<vmem>>, %arg11: memref<3x128x64xf32, #tpu.memory_space<vmem>>) attributes {dimension_semantics = [#tpu.dimension_semantics<parallel>, #tpu.dimension_semantics<arbitrary>], iteration_bounds = array<i64: 2, 3>, scalar_prefetch = 0 : i64, scratch_operands = 2 : i64, tpu.core_type = #tpu.core_type<tc>, window_params = [{transform_indices = @transform_0, window_bounds = array<i64: 128, 8>}, {transform_indices = @transform_1, window_bounds = array<i64: 8, 128>}, {transform_indices = @transform_2, window_bounds = array<i64: 128, 64>}, {transform_indices = @transform_3, window_bounds = array<i64: 128, 32>}, {pipeline_mode = #tpu.pipeline_mode<synchronous>, transform_indices = @transform_4, window_bounds = array<i64: 64, 64>}, {pipeline_mode = #tpu.pipeline_mode<synchronous>, transform_indices = @transform_5, window_bounds = array<i64: 32, 64>}, {pipeline_mode = #tpu.pipeline_mode<synchronous>, transform_indices = @transform_6, window_bounds = array<i64: 1, 64>}, {transform_indices = @transform_7, window_bounds = array<i64: 128, 64>}]} {
    %c0_i32 = arith.constant 0 : i32
    %0 = arith.cmpi eq, %arg1, %c0_i32 : i32
    %1 = arith.extui %0 : i1 to i32
    %c0_i32_0 = arith.constant 0 : i32
    %2 = arith.cmpi ne, %1, %c0_i32_0 : i32
    scf.if %2 {
      %cst_115 = arith.constant 3.000000e+38 : f32
      %348 = vector.broadcast %cst_115 : f32 to vector<3x128x1xf32>
      %c0_116 = arith.constant 0 : index
      %c0_117 = arith.constant 0 : index
      %c0_118 = arith.constant 0 : index
      %349 = vector.load %arg10[%c0_116, %c0_117, %c0_118] : memref<3x128x1xf32, #tpu.memory_space<vmem>>, vector<3x128x1xf32>
      tpu.vector_store %arg10[%c0_116, %c0_117, %c0_118], %348 {strides = array<i32>} : memref<3x128x1xf32, #tpu.memory_space<vmem>>, vector<3x128x1xf32>,
      %cst_119 = arith.constant 0.000000e+00 : f32
      %350 = vector.broadcast %cst_119 : f32 to vector<3x128x64xf32>
      %c0_120 = arith.constant 0 : index
      %c0_121 = arith.constant 0 : index
      %c0_122 = arith.constant 0 : index
      %351 = vector.load %arg11[%c0_120, %c0_121, %c0_122] : memref<3x128x64xf32, #tpu.memory_space<vmem>>, vector<3x128x64xf32>
      tpu.vector_store %arg11[%c0_120, %c0_121, %c0_122], %350 {strides = array<i32>} : memref<3x128x64xf32, #tpu.memory_space<vmem>>, vector<3x128x64xf32>,
    } else {
    }
    %c0 = arith.constant 0 : index
    %c0_1 = arith.constant 0 : index
    %3 = vector.load %arg2[%c0, %c0_1] : memref<128x8xf32, #tpu.memory_space<vmem>>, vector<128x8xf32>
    %4 = vector.extract_strided_slice %3 {offsets = [0, 0], sizes = [128, 3], strides = [1, 1]} : vector<128x8xf32> to vector<128x3xf32>
    %5 = vector.extract_strided_slice %3 {offsets = [0, 3], sizes = [128, 1], strides = [1, 1]} : vector<128x8xf32> to vector<128x1xf32>
    %6 = vector.extract_strided_slice %3 {offsets = [0, 4], sizes = [128, 1], strides = [1, 1]} : vector<128x8xf32> to vector<128x1xf32>
    %c0_2 = arith.constant 0 : index
    %c0_3 = arith.constant 0 : index
    %7 = vector.load %arg3[%c0_2, %c0_3] : memref<8x128xf32, #tpu.memory_space<vmem>>, vector<8x128xf32>
    %8 = vector.extract_strided_slice %7 {offsets = [0, 0], sizes = [3, 128], strides = [1, 1]} : vector<8x128xf32> to vector<3x128xf32>
    %9 = vector.extract_strided_slice %7 {offsets = [3, 0], sizes = [1, 128], strides = [1, 1]} : vector<8x128xf32> to vector<1x128xf32>
    %10 = vector.extract_strided_slice %7 {offsets = [4, 0], sizes = [1, 128], strides = [1, 1]} : vector<8x128xf32> to vector<1x128xf32>
    %cst = arith.constant dense<0.000000e+00> : vector<128x128xf32>
    %11 = tpu.matmul %4, %8, %cst {dimension_numbers = #tpu.dot_dimension_numbers<[1], [0], [0], [1], [0, 0, 1, 1], [], []>} : vector<128x3xf32>, vector<3x128xf32>, vector<128x128xf32> -> vector<128x128xf32>
    %12 = vector.broadcast %5 : vector<128x1xf32> to vector<128x128xf32>
    %13 = vector.broadcast %9 : vector<1x128xf32> to vector<128x128xf32>
    %14 = arith.addf %12, %13 : vector<128x128xf32>
    %cst_4 = arith.constant 2.000000e+00 : f32
    %15 = vector.broadcast %cst_4 : f32 to vector<128x128xf32>
    %16 = arith.mulf %15, %11 : vector<128x128xf32>
    %17 = arith.subf %14, %16 : vector<128x128xf32>
    %18 = vector.broadcast %6 : vector<128x1xf32> to vector<128x128xf32>
    %19 = vector.broadcast %10 : vector<1x128xf32> to vector<128x128xf32>
    %20 = arith.cmpf oeq, %18, %19 : vector<128x128xf32>
    %cst_5 = arith.constant 1.000000e+10 : f32
    %21 = vector.broadcast %cst_5 : f32 to vector<128x128xf32>
    %22 = arith.select %20, %17, %21 : vector<128x128xi1>, vector<128x128xf32>
    %23 = tpu.iota {dimensions = array<i32: 1>} : vector<128x128xi32>
    %c0_6 = arith.constant 0 : index
    %c0_7 = arith.constant 0 : index
    %24 = vector.load %arg4[%c0_6, %c0_7] : memref<128x64xbf16, #tpu.memory_space<vmem>>, vector<128x64xbf16>
    %cst_8 = arith.constant dense<0x7F800000> : vector<128xf32>
    %25 = vector.multi_reduction <minimumf>, %22, %cst_8 [1] : vector<128x128xf32> to vector<128xf32>
    %26 = vector.shape_cast %25 : vector<128xf32> to vector<128x1xf32>
    %27 = vector.broadcast %26 : vector<128x1xf32> to vector<128x128xf32>
    %28 = arith.cmpf ole, %22, %27 : vector<128x128xf32>
    %c128_i32 = arith.constant 128 : i32
    %29 = vector.broadcast %c128_i32 : i32 to vector<128x128xi32>
    %30 = arith.select %28, %23, %29 : vector<128x128xi1>, vector<128x128xi32>
    %cst_9 = arith.constant dense<2147483647> : vector<128xi32>
    %31 = vector.multi_reduction <minsi>, %30, %cst_9 [1] : vector<128x128xi32> to vector<128xi32>
    %32 = vector.shape_cast %31 : vector<128xi32> to vector<128x1xi32>
    %33 = vector.broadcast %32 : vector<128x1xi32> to vector<128x128xi32>
    %34 = arith.cmpi eq, %23, %33 : vector<128x128xi32>
    %35 = arith.extui %34 : vector<128x128xi1> to vector<128x128xi32>
    %36 = arith.sitofp %35 : vector<128x128xi32> to vector<128x128xf32>
    %37 = arith.truncf %36 : vector<128x128xf32> to vector<128x128xbf16>
    %cst_10 = arith.constant dense<0.000000e+00> : vector<128x64xf32>
    %38 = tpu.matmul %37, %24, %cst_10 {dimension_numbers = #tpu.dot_dimension_numbers<[1], [0], [0], [1], [0, 0, 1, 1], [], []>} : vector<128x128xbf16>, vector<128x64xbf16>, vector<128x64xf32> -> vector<128x64xf32>
    %39 = vector.broadcast %32 : vector<128x1xi32> to vector<128x128xi32>
    %40 = arith.cmpi eq, %23, %39 : vector<128x128xi32>
    %cst_11 = arith.constant 1.000000e+10 : f32
    %41 = vector.broadcast %cst_11 : f32 to vector<128x128xf32>
    %42 = arith.select %40, %41, %22 : vector<128x128xi1>, vector<128x128xf32>
    %cst_12 = arith.constant dense<0x7F800000> : vector<128xf32>
    %43 = vector.multi_reduction <minimumf>, %42, %cst_12 [1] : vector<128x128xf32> to vector<128xf32>
    %44 = vector.shape_cast %43 : vector<128xf32> to vector<128x1xf32>
    %45 = vector.broadcast %44 : vector<128x1xf32> to vector<128x128xf32>
    %46 = arith.cmpf ole, %42, %45 : vector<128x128xf32>
    %c128_i32_13 = arith.constant 128 : i32
    %47 = vector.broadcast %c128_i32_13 : i32 to vector<128x128xi32>
    %48 = arith.select %46, %23, %47 : vector<128x128xi1>, vector<128x128xi32>
    %cst_14 = arith.constant dense<2147483647> : vector<128xi32>
    %49 = vector.multi_reduction <minsi>, %48, %cst_14 [1] : vector<128x128xi32> to vector<128xi32>
    %50 = vector.shape_cast %49 : vector<128xi32> to vector<128x1xi32>
    %51 = vector.broadcast %50 : vector<128x1xi32> to vector<128x128xi32>
    %52 = arith.cmpi eq, %23, %51 : vector<128x128xi32>
    %53 = arith.extui %52 : vector<128x128xi1> to vector<128x128xi32>
    %54 = arith.sitofp %53 : vector<128x128xi32> to vector<128x128xf32>
    %55 = arith.truncf %54 : vector<128x128xf32> to vector<128x128xbf16>
    %cst_15 = arith.constant dense<0.000000e+00> : vector<128x64xf32>
    %56 = tpu.matmul %55, %24, %cst_15 {dimension_numbers = #tpu.dot_dimension_numbers<[1], [0], [0], [1], [0, 0, 1, 1], [], []>} : vector<128x128xbf16>, vector<128x64xbf16>, vector<128x64xf32> -> vector<128x64xf32>
    %57 = vector.broadcast %50 : vector<128x1xi32> to vector<128x128xi32>
    %58 = arith.cmpi eq, %23, %57 : vector<128x128xi32>
    %cst_16 = arith.constant 1.000000e+10 : f32
    %59 = vector.broadcast %cst_16 : f32 to vector<128x128xf32>
    %60 = arith.select %58, %59, %42 : vector<128x128xi1>, vector<128x128xf32>
    %cst_17 = arith.constant dense<0x7F800000> : vector<128xf32>
    %61 = vector.multi_reduction <minimumf>, %60, %cst_17 [1] : vector<128x128xf32> to vector<128xf32>
    %62 = vector.shape_cast %61 : vector<128xf32> to vector<128x1xf32>
    %63 = vector.broadcast %62 : vector<128x1xf32> to vector<128x128xf32>
    %64 = arith.cmpf ole, %60, %63 : vector<128x128xf32>
    %c128_i32_18 = arith.constant 128 : i32
    %65 = vector.broadcast %c128_i32_18 : i32 to vector<128x128xi32>
    %66 = arith.select %64, %23, %65 : vector<128x128xi1>, vector<128x128xi32>
    %cst_19 = arith.constant dense<2147483647> : vector<128xi32>
    %67 = vector.multi_reduction <minsi>, %66, %cst_19 [1] : vector<128x128xi32> to vector<128xi32>
    %68 = vector.shape_cast %67 : vector<128xi32> to vector<128x1xi32>
    %69 = vector.broadcast %68 : vector<128x1xi32> to vector<128x128xi32>
    %70 = arith.cmpi eq, %23, %69 : vector<128x128xi32>
    %71 = arith.extui %70 : vector<128x128xi1> to vector<128x128xi32>
    %72 = arith.sitofp %71 : vector<128x128xi32> to vector<128x128xf32>
    %73 = arith.truncf %72 : vector<128x128xf32> to vector<128x128xbf16>
    %cst_20 = arith.constant dense<0.000000e+00> : vector<128x64xf32>
    %74 = tpu.matmul %73, %24, %cst_20 {dimension_numbers = #tpu.dot_dimension_numbers<[1], [0], [0], [1], [0, 0, 1, 1], [], []>} : vector<128x128xbf16>, vector<128x64xbf16>, vector<128x64xf32> -> vector<128x64xf32>
    %c0_21 = arith.constant 0 : index
    %c0_22 = arith.constant 0 : index
    %c0_23 = arith.constant 0 : index
    %75 = vector.load %arg10[%c0_21, %c0_22, %c0_23] : memref<3x128x1xf32, #tpu.memory_space<vmem>>, vector<1x128x1xf32>
    %76 = vector.shape_cast %75 : vector<1x128x1xf32> to vector<128x1xf32>
    %c1 = arith.constant 1 : index
    %c0_24 = arith.constant 0 : index
    %c0_25 = arith.constant 0 : index
    %77 = vector.load %arg10[%c1, %c0_24, %c0_25] : memref<3x128x1xf32, #tpu.memory_space<vmem>>, vector<1x128x1xf32>
    %78 = vector.shape_cast %77 : vector<1x128x1xf32> to vector<128x1xf32>
    %c2 = arith.constant 2 : index
    %c0_26 = arith.constant 0 : index
    %c0_27 = arith.constant 0 : index
    %79 = vector.load %arg10[%c2, %c0_26, %c0_27] : memref<3x128x1xf32, #tpu.memory_space<vmem>>, vector<1x128x1xf32>
    %80 = vector.shape_cast %79 : vector<1x128x1xf32> to vector<128x1xf32>
    %c0_28 = arith.constant 0 : index
    %c0_29 = arith.constant 0 : index
    %c0_30 = arith.constant 0 : index
    %81 = vector.load %arg11[%c0_28, %c0_29, %c0_30] : memref<3x128x64xf32, #tpu.memory_space<vmem>>, vector<1x128x64xf32>
    %82 = vector.shape_cast %81 : vector<1x128x64xf32> to vector<128x64xf32>
    %c1_31 = arith.constant 1 : index
    %c0_32 = arith.constant 0 : index
    %c0_33 = arith.constant 0 : index
    %83 = vector.load %arg11[%c1_31, %c0_32, %c0_33] : memref<3x128x64xf32, #tpu.memory_space<vmem>>, vector<1x128x64xf32>
    %84 = vector.shape_cast %83 : vector<1x128x64xf32> to vector<128x64xf32>
    %c2_34 = arith.constant 2 : index
    %c0_35 = arith.constant 0 : index
    %c0_36 = arith.constant 0 : index
    %85 = vector.load %arg11[%c2_34, %c0_35, %c0_36] : memref<3x128x64xf32, #tpu.memory_space<vmem>>, vector<1x128x64xf32>
    %86 = vector.shape_cast %85 : vector<1x128x64xf32> to vector<128x64xf32>
    %c0_i32_37 = arith.constant 0 : i32
    %87 = vector.broadcast %c0_i32_37 : i32 to vector<128x1xi32>
    %88 = arith.cmpf olt, %78, %76 : vector<128x1xf32>
    %89 = arith.select %88, %78, %76 : vector<128x1xi1>, vector<128x1xf32>
    %c1_i32 = arith.constant 1 : i32
    %90 = vector.broadcast %c1_i32 : i32 to vector<128x1xi32>
    %91 = arith.select %88, %90, %87 : vector<128x1xi1>, vector<128x1xi32>
    %92 = arith.cmpf olt, %80, %89 : vector<128x1xf32>
    %93 = arith.select %92, %80, %89 : vector<128x1xi1>, vector<128x1xf32>
    %c2_i32 = arith.constant 2 : i32
    %94 = vector.broadcast %c2_i32 : i32 to vector<128x1xi32>
    %95 = arith.select %92, %94, %91 : vector<128x1xi1>, vector<128x1xi32>
    %96 = arith.cmpf olt, %26, %93 : vector<128x1xf32>
    %97 = arith.select %96, %26, %93 : vector<128x1xi1>, vector<128x1xf32>
    %c3_i32 = arith.constant 3 : i32
    %98 = vector.broadcast %c3_i32 : i32 to vector<128x1xi32>
    %99 = arith.select %96, %98, %95 : vector<128x1xi1>, vector<128x1xi32>
    %100 = arith.cmpf olt, %44, %97 : vector<128x1xf32>
    %101 = arith.select %100, %44, %97 : vector<128x1xi1>, vector<128x1xf32>
    %c4_i32 = arith.constant 4 : i32
    %102 = vector.broadcast %c4_i32 : i32 to vector<128x1xi32>
    %103 = arith.select %100, %102, %99 : vector<128x1xi1>, vector<128x1xi32>
    %104 = arith.cmpf olt, %62, %101 : vector<128x1xf32>
    %105 = arith.select %104, %62, %101 : vector<128x1xi1>, vector<128x1xf32>
    %c5_i32 = arith.constant 5 : i32
    %106 = vector.broadcast %c5_i32 : i32 to vector<128x1xi32>
    %107 = arith.select %104, %106, %103 : vector<128x1xi1>, vector<128x1xi32>
    %cst_38 = arith.constant 0.000000e+00 : f32
    %108 = vector.broadcast %cst_38 : f32 to vector<128x64xf32>
    %c0_i32_39 = arith.constant 0 : i32
    %109 = vector.broadcast %c0_i32_39 : i32 to vector<128x1xi32>
    %110 = arith.cmpi eq, %107, %109 : vector<128x1xi32>
    %111 = arith.extui %110 : vector<128x1xi1> to vector<128x1xi32>
    %112 = arith.sitofp %111 : vector<128x1xi32> to vector<128x1xf32>
    %113 = vector.broadcast %112 : vector<128x1xf32> to vector<128x64xf32>
    %114 = arith.mulf %113, %82 : vector<128x64xf32>
    %115 = arith.addf %108, %114 : vector<128x64xf32>
    %c1_i32_40 = arith.constant 1 : i32
    %116 = vector.broadcast %c1_i32_40 : i32 to vector<128x1xi32>
    %117 = arith.cmpi eq, %107, %116 : vector<128x1xi32>
    %118 = arith.extui %117 : vector<128x1xi1> to vector<128x1xi32>
    %119 = arith.sitofp %118 : vector<128x1xi32> to vector<128x1xf32>
    %120 = vector.broadcast %119 : vector<128x1xf32> to vector<128x64xf32>
    %121 = arith.mulf %120, %84 : vector<128x64xf32>
    %122 = arith.addf %115, %121 : vector<128x64xf32>
    %c2_i32_41 = arith.constant 2 : i32
    %123 = vector.broadcast %c2_i32_41 : i32 to vector<128x1xi32>
    %124 = arith.cmpi eq, %107, %123 : vector<128x1xi32>
    %125 = arith.extui %124 : vector<128x1xi1> to vector<128x1xi32>
    %126 = arith.sitofp %125 : vector<128x1xi32> to vector<128x1xf32>
    %127 = vector.broadcast %126 : vector<128x1xf32> to vector<128x64xf32>
    %128 = arith.mulf %127, %86 : vector<128x64xf32>
    %129 = arith.addf %122, %128 : vector<128x64xf32>
    %c3_i32_42 = arith.constant 3 : i32
    %130 = vector.broadcast %c3_i32_42 : i32 to vector<128x1xi32>
    %131 = arith.cmpi eq, %107, %130 : vector<128x1xi32>
    %132 = arith.extui %131 : vector<128x1xi1> to vector<128x1xi32>
    %133 = arith.sitofp %132 : vector<128x1xi32> to vector<128x1xf32>
    %134 = vector.broadcast %133 : vector<128x1xf32> to vector<128x64xf32>
    %135 = arith.mulf %134, %38 : vector<128x64xf32>
    %136 = arith.addf %129, %135 : vector<128x64xf32>
    %c4_i32_43 = arith.constant 4 : i32
    %137 = vector.broadcast %c4_i32_43 : i32 to vector<128x1xi32>
    %138 = arith.cmpi eq, %107, %137 : vector<128x1xi32>
    %139 = arith.extui %138 : vector<128x1xi1> to vector<128x1xi32>
    %140 = arith.sitofp %139 : vector<128x1xi32> to vector<128x1xf32>
    %141 = vector.broadcast %140 : vector<128x1xf32> to vector<128x64xf32>
    %142 = arith.mulf %141, %56 : vector<128x64xf32>
    %143 = arith.addf %136, %142 : vector<128x64xf32>
    %c5_i32_44 = arith.constant 5 : i32
    %144 = vector.broadcast %c5_i32_44 : i32 to vector<128x1xi32>
    %145 = arith.cmpi eq, %107, %144 : vector<128x1xi32>
    %146 = arith.extui %145 : vector<128x1xi1> to vector<128x1xi32>
    %147 = arith.sitofp %146 : vector<128x1xi32> to vector<128x1xf32>
    %148 = vector.broadcast %147 : vector<128x1xf32> to vector<128x64xf32>
    %149 = arith.mulf %148, %74 : vector<128x64xf32>
    %150 = arith.addf %143, %149 : vector<128x64xf32>
    %c0_i32_45 = arith.constant 0 : i32
    %151 = vector.broadcast %c0_i32_45 : i32 to vector<128x1xi32>
    %152 = arith.cmpi eq, %107, %151 : vector<128x1xi32>
    %cst_46 = arith.constant 3.000000e+38 : f32
    %153 = vector.broadcast %cst_46 : f32 to vector<128x1xf32>
    %154 = arith.select %152, %153, %76 : vector<128x1xi1>, vector<128x1xf32>
    %c1_i32_47 = arith.constant 1 : i32
    %155 = vector.broadcast %c1_i32_47 : i32 to vector<128x1xi32>
    %156 = arith.cmpi eq, %107, %155 : vector<128x1xi32>
    %cst_48 = arith.constant 3.000000e+38 : f32
    %157 = vector.broadcast %cst_48 : f32 to vector<128x1xf32>
    %158 = arith.select %156, %157, %78 : vector<128x1xi1>, vector<128x1xf32>
    %c2_i32_49 = arith.constant 2 : i32
    %159 = vector.broadcast %c2_i32_49 : i32 to vector<128x1xi32>
    %160 = arith.cmpi eq, %107, %159 : vector<128x1xi32>
    %cst_50 = arith.constant 3.000000e+38 : f32
    %161 = vector.broadcast %cst_50 : f32 to vector<128x1xf32>
    %162 = arith.select %160, %161, %80 : vector<128x1xi1>, vector<128x1xf32>
    %c3_i32_51 = arith.constant 3 : i32
    %163 = vector.broadcast %c3_i32_51 : i32 to vector<128x1xi32>
    %164 = arith.cmpi eq, %107, %163 : vector<128x1xi32>
    %cst_52 = arith.constant 3.000000e+38 : f32
    %165 = vector.broadcast %cst_52 : f32 to vector<128x1xf32>
    %166 = arith.select %164, %165, %26 : vector<128x1xi1>, vector<128x1xf32>
    %c4_i32_53 = arith.constant 4 : i32
    %167 = vector.broadcast %c4_i32_53 : i32 to vector<128x1xi32>
    %168 = arith.cmpi eq, %107, %167 : vector<128x1xi32>
    %cst_54 = arith.constant 3.000000e+38 : f32
    %169 = vector.broadcast %cst_54 : f32 to vector<128x1xf32>
    %170 = arith.select %168, %169, %44 : vector<128x1xi1>, vector<128x1xf32>
    %c5_i32_55 = arith.constant 5 : i32
    %171 = vector.broadcast %c5_i32_55 : i32 to vector<128x1xi32>
    %172 = arith.cmpi eq, %107, %171 : vector<128x1xi32>
    %cst_56 = arith.constant 3.000000e+38 : f32
    %173 = vector.broadcast %cst_56 : f32 to vector<128x1xf32>
    %174 = arith.select %172, %173, %62 : vector<128x1xi1>, vector<128x1xf32>
    %c0_i32_57 = arith.constant 0 : i32
    %175 = vector.broadcast %c0_i32_57 : i32 to vector<128x1xi32>
    %176 = arith.cmpf olt, %158, %154 : vector<128x1xf32>
    %177 = arith.select %176, %158, %154 : vector<128x1xi1>, vector<128x1xf32>
    %c1_i32_58 = arith.constant 1 : i32
    %178 = vector.broadcast %c1_i32_58 : i32 to vector<128x1xi32>
    %179 = arith.select %176, %178, %175 : vector<128x1xi1>, vector<128x1xi32>
    %180 = arith.cmpf olt, %162, %177 : vector<128x1xf32>
    %181 = arith.select %180, %162, %177 : vector<128x1xi1>, vector<128x1xf32>
    %c2_i32_59 = arith.constant 2 : i32
    %182 = vector.broadcast %c2_i32_59 : i32 to vector<128x1xi32>
    %183 = arith.select %180, %182, %179 : vector<128x1xi1>, vector<128x1xi32>
    %184 = arith.cmpf olt, %166, %181 : vector<128x1xf32>
    %185 = arith.select %184, %166, %181 : vector<128x1xi1>, vector<128x1xf32>
    %c3_i32_60 = arith.constant 3 : i32
    %186 = vector.broadcast %c3_i32_60 : i32 to vector<128x1xi32>
    %187 = arith.select %184, %186, %183 : vector<128x1xi1>, vector<128x1xi32>
    %188 = arith.cmpf olt, %170, %185 : vector<128x1xf32>
    %189 = arith.select %188, %170, %185 : vector<128x1xi1>, vector<128x1xf32>
    %c4_i32_61 = arith.constant 4 : i32
    %190 = vector.broadcast %c4_i32_61 : i32 to vector<128x1xi32>
    %191 = arith.select %188, %190, %187 : vector<128x1xi1>, vector<128x1xi32>
    %192 = arith.cmpf olt, %174, %189 : vector<128x1xf32>
    %193 = arith.select %192, %174, %189 : vector<128x1xi1>, vector<128x1xf32>
    %c5_i32_62 = arith.constant 5 : i32
    %194 = vector.broadcast %c5_i32_62 : i32 to vector<128x1xi32>
    %195 = arith.select %192, %194, %191 : vector<128x1xi1>, vector<128x1xi32>
    %cst_63 = arith.constant 0.000000e+00 : f32
    %196 = vector.broadcast %cst_63 : f32 to vector<128x64xf32>
    %c0_i32_64 = arith.constant 0 : i32
    %197 = vector.broadcast %c0_i32_64 : i32 to vector<128x1xi32>
    %198 = arith.cmpi eq, %195, %197 : vector<128x1xi32>
    %199 = arith.extui %198 : vector<128x1xi1> to vector<128x1xi32>
    %200 = arith.sitofp %199 : vector<128x1xi32> to vector<128x1xf32>
    %201 = vector.broadcast %200 : vector<128x1xf32> to vector<128x64xf32>
    %202 = arith.mulf %201, %82 : vector<128x64xf32>
    %203 = arith.addf %196, %202 : vector<128x64xf32>
    %c1_i32_65 = arith.constant 1 : i32
    %204 = vector.broadcast %c1_i32_65 : i32 to vector<128x1xi32>
    %205 = arith.cmpi eq, %195, %204 : vector<128x1xi32>
    %206 = arith.extui %205 : vector<128x1xi1> to vector<128x1xi32>
    %207 = arith.sitofp %206 : vector<128x1xi32> to vector<128x1xf32>
    %208 = vector.broadcast %207 : vector<128x1xf32> to vector<128x64xf32>
    %209 = arith.mulf %208, %84 : vector<128x64xf32>
    %210 = arith.addf %203, %209 : vector<128x64xf32>
    %c2_i32_66 = arith.constant 2 : i32
    %211 = vector.broadcast %c2_i32_66 : i32 to vector<128x1xi32>
    %212 = arith.cmpi eq, %195, %211 : vector<128x1xi32>
    %213 = arith.extui %212 : vector<128x1xi1> to vector<128x1xi32>
    %214 = arith.sitofp %213 : vector<128x1xi32> to vector<128x1xf32>
    %215 = vector.broadcast %214 : vector<128x1xf32> to vector<128x64xf32>
    %216 = arith.mulf %215, %86 : vector<128x64xf32>
    %217 = arith.addf %210, %216 : vector<128x64xf32>
    %c3_i32_67 = arith.constant 3 : i32
    %218 = vector.broadcast %c3_i32_67 : i32 to vector<128x1xi32>
    %219 = arith.cmpi eq, %195, %218 : vector<128x1xi32>
    %220 = arith.extui %219 : vector<128x1xi1> to vector<128x1xi32>
    %221 = arith.sitofp %220 : vector<128x1xi32> to vector<128x1xf32>
    %222 = vector.broadcast %221 : vector<128x1xf32> to vector<128x64xf32>
    %223 = arith.mulf %222, %38 : vector<128x64xf32>
    %224 = arith.addf %217, %223 : vector<128x64xf32>
    %c4_i32_68 = arith.constant 4 : i32
    %225 = vector.broadcast %c4_i32_68 : i32 to vector<128x1xi32>
    %226 = arith.cmpi eq, %195, %225 : vector<128x1xi32>
    %227 = arith.extui %226 : vector<128x1xi1> to vector<128x1xi32>
    %228 = arith.sitofp %227 : vector<128x1xi32> to vector<128x1xf32>
    %229 = vector.broadcast %228 : vector<128x1xf32> to vector<128x64xf32>
    %230 = arith.mulf %229, %56 : vector<128x64xf32>
    %231 = arith.addf %224, %230 : vector<128x64xf32>
    %c5_i32_69 = arith.constant 5 : i32
    %232 = vector.broadcast %c5_i32_69 : i32 to vector<128x1xi32>
    %233 = arith.cmpi eq, %195, %232 : vector<128x1xi32>
    %234 = arith.extui %233 : vector<128x1xi1> to vector<128x1xi32>
    %235 = arith.sitofp %234 : vector<128x1xi32> to vector<128x1xf32>
    %236 = vector.broadcast %235 : vector<128x1xf32> to vector<128x64xf32>
    %237 = arith.mulf %236, %74 : vector<128x64xf32>
    %238 = arith.addf %231, %237 : vector<128x64xf32>
    %c0_i32_70 = arith.constant 0 : i32
    %239 = vector.broadcast %c0_i32_70 : i32 to vector<128x1xi32>
    %240 = arith.cmpi eq, %195, %239 : vector<128x1xi32>
    %cst_71 = arith.constant 3.000000e+38 : f32
    %241 = vector.broadcast %cst_71 : f32 to vector<128x1xf32>
    %242 = arith.select %240, %241, %154 : vector<128x1xi1>, vector<128x1xf32>
    %c1_i32_72 = arith.constant 1 : i32
    %243 = vector.broadcast %c1_i32_72 : i32 to vector<128x1xi32>
    %244 = arith.cmpi eq, %195, %243 : vector<128x1xi32>
    %cst_73 = arith.constant 3.000000e+38 : f32
    %245 = vector.broadcast %cst_73 : f32 to vector<128x1xf32>
    %246 = arith.select %244, %245, %158 : vector<128x1xi1>, vector<128x1xf32>
    %c2_i32_74 = arith.constant 2 : i32
    %247 = vector.broadcast %c2_i32_74 : i32 to vector<128x1xi32>
    %248 = arith.cmpi eq, %195, %247 : vector<128x1xi32>
    %cst_75 = arith.constant 3.000000e+38 : f32
    %249 = vector.broadcast %cst_75 : f32 to vector<128x1xf32>
    %250 = arith.select %248, %249, %162 : vector<128x1xi1>, vector<128x1xf32>
    %c3_i32_76 = arith.constant 3 : i32
    %251 = vector.broadcast %c3_i32_76 : i32 to vector<128x1xi32>
    %252 = arith.cmpi eq, %195, %251 : vector<128x1xi32>
    %cst_77 = arith.constant 3.000000e+38 : f32
    %253 = vector.broadcast %cst_77 : f32 to vector<128x1xf32>
    %254 = arith.select %252, %253, %166 : vector<128x1xi1>, vector<128x1xf32>
    %c4_i32_78 = arith.constant 4 : i32
    %255 = vector.broadcast %c4_i32_78 : i32 to vector<128x1xi32>
    %256 = arith.cmpi eq, %195, %255 : vector<128x1xi32>
    %cst_79 = arith.constant 3.000000e+38 : f32
    %257 = vector.broadcast %cst_79 : f32 to vector<128x1xf32>
    %258 = arith.select %256, %257, %170 : vector<128x1xi1>, vector<128x1xf32>
    %c5_i32_80 = arith.constant 5 : i32
    %259 = vector.broadcast %c5_i32_80 : i32 to vector<128x1xi32>
    %260 = arith.cmpi eq, %195, %259 : vector<128x1xi32>
    %cst_81 = arith.constant 3.000000e+38 : f32
    %261 = vector.broadcast %cst_81 : f32 to vector<128x1xf32>
    %262 = arith.select %260, %261, %174 : vector<128x1xi1>, vector<128x1xf32>
    %c0_i32_82 = arith.constant 0 : i32
    %263 = vector.broadcast %c0_i32_82 : i32 to vector<128x1xi32>
    %264 = arith.cmpf olt, %246, %242 : vector<128x1xf32>
    %265 = arith.select %264, %246, %242 : vector<128x1xi1>, vector<128x1xf32>
    %c1_i32_83 = arith.constant 1 : i32
    %266 = vector.broadcast %c1_i32_83 : i32 to vector<128x1xi32>
    %267 = arith.select %264, %266, %263 : vector<128x1xi1>, vector<128x1xi32>
    %268 = arith.cmpf olt, %250, %265 : vector<128x1xf32>
    %269 = arith.select %268, %250, %265 : vector<128x1xi1>, vector<128x1xf32>
    %c2_i32_84 = arith.constant 2 : i32
    %270 = vector.broadcast %c2_i32_84 : i32 to vector<128x1xi32>
    %271 = arith.select %268, %270, %267 : vector<128x1xi1>, vector<128x1xi32>
    %272 = arith.cmpf olt, %254, %269 : vector<128x1xf32>
    %273 = arith.select %272, %254, %269 : vector<128x1xi1>, vector<128x1xf32>
    %c3_i32_85 = arith.constant 3 : i32
    %274 = vector.broadcast %c3_i32_85 : i32 to vector<128x1xi32>
    %275 = arith.select %272, %274, %271 : vector<128x1xi1>, vector<128x1xi32>
    %276 = arith.cmpf olt, %258, %273 : vector<128x1xf32>
    %277 = arith.select %276, %258, %273 : vector<128x1xi1>, vector<128x1xf32>
    %c4_i32_86 = arith.constant 4 : i32
    %278 = vector.broadcast %c4_i32_86 : i32 to vector<128x1xi32>
    %279 = arith.select %276, %278, %275 : vector<128x1xi1>, vector<128x1xi32>
    %280 = arith.cmpf olt, %262, %277 : vector<128x1xf32>
    %281 = arith.select %280, %262, %277 : vector<128x1xi1>, vector<128x1xf32>
    %c5_i32_87 = arith.constant 5 : i32
    %282 = vector.broadcast %c5_i32_87 : i32 to vector<128x1xi32>
    %283 = arith.select %280, %282, %279 : vector<128x1xi1>, vector<128x1xi32>
    %cst_88 = arith.constant 0.000000e+00 : f32
    %284 = vector.broadcast %cst_88 : f32 to vector<128x64xf32>
    %c0_i32_89 = arith.constant 0 : i32
    %285 = vector.broadcast %c0_i32_89 : i32 to vector<128x1xi32>
    %286 = arith.cmpi eq, %283, %285 : vector<128x1xi32>
    %287 = arith.extui %286 : vector<128x1xi1> to vector<128x1xi32>
    %288 = arith.sitofp %287 : vector<128x1xi32> to vector<128x1xf32>
    %289 = vector.broadcast %288 : vector<128x1xf32> to vector<128x64xf32>
    %290 = arith.mulf %289, %82 : vector<128x64xf32>
    %291 = arith.addf %284, %290 : vector<128x64xf32>
    %c1_i32_90 = arith.constant 1 : i32
    %292 = vector.broadcast %c1_i32_90 : i32 to vector<128x1xi32>
    %293 = arith.cmpi eq, %283, %292 : vector<128x1xi32>
    %294 = arith.extui %293 : vector<128x1xi1> to vector<128x1xi32>
    %295 = arith.sitofp %294 : vector<128x1xi32> to vector<128x1xf32>
    %296 = vector.broadcast %295 : vector<128x1xf32> to vector<128x64xf32>
    %297 = arith.mulf %296, %84 : vector<128x64xf32>
    %298 = arith.addf %291, %297 : vector<128x64xf32>
    %c2_i32_91 = arith.constant 2 : i32
    %299 = vector.broadcast %c2_i32_91 : i32 to vector<128x1xi32>
    %300 = arith.cmpi eq, %283, %299 : vector<128x1xi32>
    %301 = arith.extui %300 : vector<128x1xi1> to vector<128x1xi32>
    %302 = arith.sitofp %301 : vector<128x1xi32> to vector<128x1xf32>
    %303 = vector.broadcast %302 : vector<128x1xf32> to vector<128x64xf32>
    %304 = arith.mulf %303, %86 : vector<128x64xf32>
    %305 = arith.addf %298, %304 : vector<128x64xf32>
    %c3_i32_92 = arith.constant 3 : i32
    %306 = vector.broadcast %c3_i32_92 : i32 to vector<128x1xi32>
    %307 = arith.cmpi eq, %283, %306 : vector<128x1xi32>
    %308 = arith.extui %307 : vector<128x1xi1> to vector<128x1xi32>
    %309 = arith.sitofp %308 : vector<128x1xi32> to vector<128x1xf32>
    %310 = vector.broadcast %309 : vector<128x1xf32> to vector<128x64xf32>
    %311 = arith.mulf %310, %38 : vector<128x64xf32>
    %312 = arith.addf %305, %311 : vector<128x64xf32>
    %c4_i32_93 = arith.constant 4 : i32
    %313 = vector.broadcast %c4_i32_93 : i32 to vector<128x1xi32>
    %314 = arith.cmpi eq, %283, %313 : vector<128x1xi32>
    %315 = arith.extui %314 : vector<128x1xi1> to vector<128x1xi32>
    %316 = arith.sitofp %315 : vector<128x1xi32> to vector<128x1xf32>
    %317 = vector.broadcast %316 : vector<128x1xf32> to vector<128x64xf32>
    %318 = arith.mulf %317, %56 : vector<128x64xf32>
    %319 = arith.addf %312, %318 : vector<128x64xf32>
    %c5_i32_94 = arith.constant 5 : i32
    %320 = vector.broadcast %c5_i32_94 : i32 to vector<128x1xi32>
    %321 = arith.cmpi eq, %283, %320 : vector<128x1xi32>
    %322 = arith.extui %321 : vector<128x1xi1> to vector<128x1xi32>
    %323 = arith.sitofp %322 : vector<128x1xi32> to vector<128x1xf32>
    %324 = vector.broadcast %323 : vector<128x1xf32> to vector<128x64xf32>
    %325 = arith.mulf %324, %74 : vector<128x64xf32>
    %326 = arith.addf %319, %325 : vector<128x64xf32>
    %c0_95 = arith.constant 0 : index
    %c0_96 = arith.constant 0 : index
    %c0_97 = arith.constant 0 : index
    %327 = vector.load %arg10[%c0_95, %c0_96, %c0_97] : memref<3x128x1xf32, #tpu.memory_space<vmem>>, vector<1x128x1xf32>
    %328 = vector.shape_cast %327 : vector<1x128x1xf32> to vector<128x1xf32>
    %329 = vector.shape_cast %105 : vector<128x1xf32> to vector<1x128x1xf32>
    tpu.vector_store %arg10[%c0_95, %c0_96, %c0_97], %329 {strides = array<i32>} : memref<3x128x1xf32, #tpu.memory_space<vmem>>, vector<1x128x1xf32>,
    %c0_98 = arith.constant 0 : index
    %c0_99 = arith.constant 0 : index
    %c0_100 = arith.constant 0 : index
    %330 = vector.load %arg11[%c0_98, %c0_99, %c0_100] : memref<3x128x64xf32, #tpu.memory_space<vmem>>, vector<1x128x64xf32>
    %331 = vector.shape_cast %330 : vector<1x128x64xf32> to vector<128x64xf32>
    %332 = vector.shape_cast %150 : vector<128x64xf32> to vector<1x128x64xf32>
    tpu.vector_store %arg11[%c0_98, %c0_99, %c0_100], %332 {strides = array<i32>} : memref<3x128x64xf32, #tpu.memory_space<vmem>>, vector<1x128x64xf32>,
    %c1_101 = arith.constant 1 : index
    %c0_102 = arith.constant 0 : index
    %c0_103 = arith.constant 0 : index
    %333 = vector.load %arg10[%c1_101, %c0_102, %c0_103] : memref<3x128x1xf32, #tpu.memory_space<vmem>>, vector<1x128x1xf32>
    %334 = vector.shape_cast %333 : vector<1x128x1xf32> to vector<128x1xf32>
    %335 = vector.shape_cast %193 : vector<128x1xf32> to vector<1x128x1xf32>
    tpu.vector_store %arg10[%c1_101, %c0_102, %c0_103], %335 {strides = array<i32>} : memref<3x128x1xf32, #tpu.memory_space<vmem>>, vector<1x128x1xf32>,
    %c1_104 = arith.constant 1 : index
    %c0_105 = arith.constant 0 : index
    %c0_106 = arith.constant 0 : index
    %336 = vector.load %arg11[%c1_104, %c0_105, %c0_106] : memref<3x128x64xf32, #tpu.memory_space<vmem>>, vector<1x128x64xf32>
    %337 = vector.shape_cast %336 : vector<1x128x64xf32> to vector<128x64xf32>
    %338 = vector.shape_cast %238 : vector<128x64xf32> to vector<1x128x64xf32>
    tpu.vector_store %arg11[%c1_104, %c0_105, %c0_106], %338 {strides = array<i32>} : memref<3x128x64xf32, #tpu.memory_space<vmem>>, vector<1x128x64xf32>,
    %c2_107 = arith.constant 2 : index
    %c0_108 = arith.constant 0 : index
    %c0_109 = arith.constant 0 : index
    %339 = vector.load %arg10[%c2_107, %c0_108, %c0_109] : memref<3x128x1xf32, #tpu.memory_space<vmem>>, vector<1x128x1xf32>
    %340 = vector.shape_cast %339 : vector<1x128x1xf32> to vector<128x1xf32>
    %341 = vector.shape_cast %281 : vector<128x1xf32> to vector<1x128x1xf32>
    tpu.vector_store %arg10[%c2_107, %c0_108, %c0_109], %341 {strides = array<i32>} : memref<3x128x1xf32, #tpu.memory_space<vmem>>, vector<1x128x1xf32>,
    %c2_110 = arith.constant 2 : index
    %c0_111 = arith.constant 0 : index
    %c0_112 = arith.constant 0 : index
    %342 = vector.load %arg11[%c2_110, %c0_111, %c0_112] : memref<3x128x64xf32, #tpu.memory_space<vmem>>, vector<1x128x64xf32>
    %343 = vector.shape_cast %342 : vector<1x128x64xf32> to vector<128x64xf32>
    %344 = vector.shape_cast %326 : vector<128x64xf32> to vector<1x128x64xf32>
    tpu.vector_store %arg11[%c2_110, %c0_111, %c0_112], %344 {strides = array<i32>} : memref<3x128x64xf32, #tpu.memory_space<vmem>>, vector<1x128x64xf32>,
    %c2_i32_113 = arith.constant 2 : i32
    %345 = arith.cmpi eq, %arg1, %c2_i32_113 : i32
    %346 = arith.extui %345 : i1 to i32
    %c0_i32_114 = arith.constant 0 : i32
    %347 = arith.cmpi ne, %346, %c0_i32_114 : i32
    scf.if %347 {
      %348 = arith.addf %150, %238 : vector<128x64xf32>
      %349 = arith.addf %348, %326 : vector<128x64xf32>
      %cst_115 = arith.constant 0.333333343 : f32
      %350 = vector.broadcast %cst_115 : f32 to vector<128x64xf32>
      %351 = arith.mulf %349, %350 : vector<128x64xf32>
      %c0_116 = arith.constant 0 : index
      %c0_117 = arith.constant 0 : index
      %352 = vector.load %arg6[%c0_116, %c0_117] : memref<64x64xf32, #tpu.memory_space<vmem>>, vector<64x64xf32>
      %cst_118 = arith.constant dense<0.000000e+00> : vector<128x64xf32>
      %353 = tpu.matmul %351, %352, %cst_118 {dimension_numbers = #tpu.dot_dimension_numbers<[1], [0], [0], [1], [0, 0, 1, 1], [], []>} : vector<128x64xf32>, vector<64x64xf32>, vector<128x64xf32> -> vector<128x64xf32>
      %c0_119 = arith.constant 0 : index
      %c0_120 = arith.constant 0 : index
      %354 = vector.load %arg5[%c0_119, %c0_120] : memref<128x32xf32, #tpu.memory_space<vmem>>, vector<128x32xf32>
      %c0_121 = arith.constant 0 : index
      %c0_122 = arith.constant 0 : index
      %355 = vector.load %arg7[%c0_121, %c0_122] : memref<32x64xf32, #tpu.memory_space<vmem>>, vector<32x64xf32>
      %cst_123 = arith.constant dense<0.000000e+00> : vector<128x64xf32>
      %356 = tpu.matmul %354, %355, %cst_123 {dimension_numbers = #tpu.dot_dimension_numbers<[1], [0], [0], [1], [0, 0, 1, 1], [], []>} : vector<128x32xf32>, vector<32x64xf32>, vector<128x64xf32> -> vector<128x64xf32>
      %357 = arith.addf %353, %356 : vector<128x64xf32>
      %c0_124 = arith.constant 0 : index
      %c0_125 = arith.constant 0 : index
      %358 = vector.load %arg8[%c0_124, %c0_125] : memref<1x64xf32, #tpu.memory_space<vmem>>, vector<1x64xf32>
      %359 = vector.broadcast %358 : vector<1x64xf32> to vector<128x64xf32>
      %360 = arith.addf %357, %359 : vector<128x64xf32>
      %cst_126 = arith.constant 0.000000e+00 : f32
      %361 = vector.broadcast %cst_126 : f32 to vector<128x64xf32>
      %362 = arith.maximumf %360, %361 : vector<128x64xf32>
      %c0_127 = arith.constant 0 : index
      %c0_128 = arith.constant 0 : index
      %363 = vector.load %arg9[%c0_127, %c0_128] : memref<128x64xf32, #tpu.memory_space<vmem>>, vector<128x64xf32>
      tpu.vector_store %arg9[%c0_127, %c0_128], %362 {strides = array<i32>} : memref<128x64xf32, #tpu.memory_space<vmem>>, vector<128x64xf32>,
    } else {
    }
    return
  }
  func.func @transform_0(%arg0: i32, %arg1: i32) -> (i32, i32) {
    %c0_i32 = arith.constant 0 : i32
    %c0_i32_0 = arith.constant 0 : i32
    return %arg0, %c0_i32 : i32, i32
  }
  func.func @transform_1(%arg0: i32, %arg1: i32) -> (i32, i32) {
    %c0_i32 = arith.constant 0 : i32
    %c0_i32_0 = arith.constant 0 : i32
    return %c0_i32, %arg1 : i32, i32
  }
  func.func @transform_2(%arg0: i32, %arg1: i32) -> (i32, i32) {
    %c0_i32 = arith.constant 0 : i32
    %c0_i32_0 = arith.constant 0 : i32
    return %arg1, %c0_i32 : i32, i32
  }
  func.func @transform_3(%arg0: i32, %arg1: i32) -> (i32, i32) {
    %c0_i32 = arith.constant 0 : i32
    %c0_i32_0 = arith.constant 0 : i32
    return %arg0, %c0_i32 : i32, i32
  }
  func.func @transform_4(%arg0: i32, %arg1: i32) -> (i32, i32) {
    %c0_i32 = arith.constant 0 : i32
    %c0_i32_0 = arith.constant 0 : i32
    %c0_i32_1 = arith.constant 0 : i32
    return %c0_i32, %c0_i32_0 : i32, i32
  }
  func.func @transform_5(%arg0: i32, %arg1: i32) -> (i32, i32) {
    %c0_i32 = arith.constant 0 : i32
    %c0_i32_0 = arith.constant 0 : i32
    %c0_i32_1 = arith.constant 0 : i32
    return %c0_i32, %c0_i32_0 : i32, i32
  }
  func.func @transform_6(%arg0: i32, %arg1: i32) -> (i32, i32) {
    %c0_i32 = arith.constant 0 : i32
    %c0_i32_0 = arith.constant 0 : i32
    %c0_i32_1 = arith.constant 0 : i32
    return %c0_i32, %c0_i32_0 : i32, i32
  }
  func.func @transform_7(%arg0: i32, %arg1: i32) -> (i32, i32) {
    %c0_i32 = arith.constant 0 : i32
    %c0_i32_0 = arith.constant 0 : i32
    return %arg0, %c0_i32 : i32, i32
  }
}

</mosaic_0001>

<bundles_post_ra>
// kernel: tpu_custom_call.1
= control target key start
LH: loop header
LB: loop body
LE: loop exit
PB: predicated region body
PF: predicated region fallthrough
CT: control target
= control target key end

     0   :  { %s8710_s24 = smov 0   ;;  %s8712_s25 = smov 0   ;;  %s16263_s0 = inlined_call_operand.vmem [shape: f32[256,8], index: 0, kind: input, shape index: {}]   ;;  %s16264_s1 = inlined_call_operand.vmem [shape: f32[8,384], index: 1, kind: input, shape index: {}]   ;;  %s16265_s2 = inlined_call_operand.vmem [shape: bf16[384,64], index: 2, kind: input, shape index: {}]   ;;  %s16266_s3 = inlined_call_operand.vmem [shape: f32[256,32], index: 3, kind: input, shape index: {}]   ;;  %s16267_s4 = inlined_call_operand.vmem [shape: f32[64,64], index: 4, kind: input, shape index: {}]   ;;  %s16268_s5 = inlined_call_operand.vmem [shape: f32[32,64], index: 5, kind: input, shape index: {}]   ;;  %s16269_s6 = inlined_call_operand.vmem [shape: f32[1,64], index: 6, kind: input, shape index: {}]   ;;  %s16270_s7 = inlined_call_operand.vmem [shape: f32[256,64], index: 7, kind: output, shape index: {}]  }
   0x1   :  { %s8714_s26 = smov 0   ;;  %s8716_s27 = smov 0  }
   0x2   :  { %s8718_s28 = smov 0  }
   0x3 LB: > { %s26_s29 = sadd.s32 1, %s8653_s26  ;;  %s29_s30 = sadd.s32 1, %s8657_s27  ;;  %s8661_s28 = sphi %s8718_s28, %s17_s28   ;;  %s8657_s27 = sphi %s8716_s27, %s17861_s27   ;;  %s8653_s26 = sphi %s8714_s26, %s17860_s26   ;;  %s8649_s25 = sphi %s8712_s25, %s17859_s25   ;;  %s8645_s24 = sphi %s8710_s24, %s17858_s24  }
   0x4   : > { %p27_p0 = scmp.ge.s32.totalorder %s26_s29, 3  ;;  %p6930_p1 = scmp.ge.s32.totalorder %s8661_s28, 1 }
   0x5   : > { %p281_p2 = scmp.lt.s32.totalorder %s8661_s28, 7 }
   0x6   : > { %s17863_s29 = smov (%p27_p0, %s26_s29), 0  ;;  %s17865_s30 = smov (!%p27_p0, %s29_s30), %s8657_s27 }
   0x7   : > { %p282_p3 = pnand %p6930_p1, %p281_p2  ;;  %p31_p4 = scmp.ge.s32.totalorder %s17865_s30, 2 }
   0x9   : > { %s17867_s30 = smov (%p31_p4, %s17865_s30), 0  ;;  %285 = sbr.rel (%p282_p3) target bundleno = 2296 (0x8f8), region = 48 }
  0x10   : > { %s6931_s8 = sshll.u32 %s8649_s25, 4  ;;  %p333_p5 = scmp.lt.s32.totalorder %s8645_s24, 2 }
  0x11   : > { %p328_p6 = scmp.lt.s32.totalorder %s6931_s8, 31  ;;  %s6934_s9 = sshll.u32 %s8645_s24, 4 }
  0x12   : > { %s334_s10 = scalar_select %p333_p5, %s8645_s24, 2 }
  0x13   : > { %s17869_s8 = smov (!%p328_p6, %s6931_s8), 31  ;;  %p338_p7 = scmp.lt.s32.totalorder %s6934_s9, 47 }
  0x14   : > { %s6933_s11 = sshll.u32 %s334_s10, 3  ;;  %s6932_s12 = sshll.u32 %s17869_s8, 3 }
  0x15   : > { %s8748_s15 = scalar_lea.vmem %s16264_s1, %s6933_s11  ;;  %s8753_s18 = scalar_lea.vmem %s16263_s0, %s6932_s12 }
  0x16   : > { %s8758_s21 = scalar_lea.vmem %s16266_s3, %s6932_s12  ;;  %s17871_s9 = smov (!%p338_p7, %s6934_s9), 47 }
  0x17   : > { %s8763_s25 = scalar_lea.vmem %s16270_s7, %s6932_s12  ;;  %s6935_s8 = sshll.u32 %s17871_s9, 2 }
  0x18   : > { %s8768_s13 = scalar_lea.vmem %s16265_s2, %s6935_s8  ;;  %p6940_p8 = scmp.ne.s32.totalorder %s8645_s24, 0 }
  0x19   : > { %vm360_vm0 = vcmask (!%p6940_p8), 7168   ;;  %vm409_vm1 = vcmask (!%p6940_p8), 523264   ;;  %v8663_v0 = vmov (!%p6940_p8), 3e+38   ;;  %v8664_v1 = vmov (!%p6940_p8), 0.0  }
  0x1a   : > { %359 = sbr.rel (%p6940_p8) target bundleno = 74 (0x4a), region = 52  ;;  %361 = vst.msk [vmem:[#allocation2] sm:$0xff] (!%p6940_p8), %vm360_vm0, %v8663_v0  ;;  %362 = vst.msk [vmem:[#allocation2 + $0x8] sm:$0xff] (!%p6940_p8), %vm360_vm0, %v8663_v0 }
  0x1b   : > { %363 = vst.msk [vmem:[#allocation2 + $0x10] sm:$0xff] (!%p6940_p8), %vm360_vm0, %v8663_v0  ;;  %364 = vst.msk [vmem:[#allocation2 + $0x18] sm:$0xff] (!%p6940_p8), %vm360_vm0, %v8663_v0 }
  0x1c   : > { %365 = vst.msk [vmem:[#allocation2 + $0x20] sm:$0xff] (!%p6940_p8), %vm360_vm0, %v8663_v0  ;;  %366 = vst.msk [vmem:[#allocation2 + $0x28] sm:$0xff] (!%p6940_p8), %vm360_vm0, %v8663_v0 }
  0x1d   : > { %367 = vst.msk [vmem:[#allocation2 + $0x30] sm:$0xff] (!%p6940_p8), %vm360_vm0, %v8663_v0  ;;  %368 = vst.msk [vmem:[#allocation2 + $0x38] sm:$0xff] (!%p6940_p8), %vm360_vm0, %v8663_v0 }
  0x1e   : > { %369 = vst.msk [vmem:[#allocation2 + $0x40] sm:$0xff] (!%p6940_p8), %vm360_vm0, %v8663_v0  ;;  %370 = vst.msk [vmem:[#allocation2 + $0x48] sm:$0xff] (!%p6940_p8), %vm360_vm0, %v8663_v0 }
  0x1f   : > { %371 = vst.msk [vmem:[#allocation2 + $0x50] sm:$0xff] (!%p6940_p8), %vm360_vm0, %v8663_v0  ;;  %372 = vst.msk [vmem:[#allocation2 + $0x58] sm:$0xff] (!%p6940_p8), %vm360_vm0, %v8663_v0 }
  0x20   : > { %373 = vst.msk [vmem:[#allocation2 + $0x60] sm:$0xff] (!%p6940_p8), %vm360_vm0, %v8663_v0  ;;  %374 = vst.msk [vmem:[#allocation2 + $0x68] sm:$0xff] (!%p6940_p8), %vm360_vm0, %v8663_v0 }
  0x21   : > { %375 = vst.msk [vmem:[#allocation2 + $0x70] sm:$0xff] %vm360_vm0, %v8663_v0  ;;  %376 = vst.msk [vmem:[#allocation2 + $0x78] sm:$0xff] %vm360_vm0, %v8663_v0 }
  0x22   : > { %377 = vst.msk [vmem:[#allocation2 + $0x80] sm:$0xff] %vm360_vm0, %v8663_v0  ;;  %378 = vst.msk [vmem:[#allocation2 + $0x88] sm:$0xff] %vm360_vm0, %v8663_v0 }
  0x23   : > { %379 = vst.msk [vmem:[#allocation2 + $0x90] sm:$0xff] %vm360_vm0, %v8663_v0  ;;  %380 = vst.msk [vmem:[#allocation2 + $0x98] sm:$0xff] %vm360_vm0, %v8663_v0 }
  0x24   : > { %381 = vst.msk [vmem:[#allocation2 + $0xa0] sm:$0xff] %vm360_vm0, %v8663_v0  ;;  %382 = vst.msk [vmem:[#allocation2 + $0xa8] sm:$0xff] %vm360_vm0, %v8663_v0 }
  0x25   : > { %383 = vst.msk [vmem:[#allocation2 + $0xb0] sm:$0xff] %vm360_vm0, %v8663_v0  ;;  %384 = vst.msk [vmem:[#allocation2 + $0xb8] sm:$0xff] %vm360_vm0, %v8663_v0 }
  0x26   : > { %385 = vst.msk [vmem:[#allocation2 + $0xc0] sm:$0xff] %vm360_vm0, %v8663_v0  ;;  %386 = vst.msk [vmem:[#allocation2 + $0xc8] sm:$0xff] %vm360_vm0, %v8663_v0 }
  0x27   : > { %387 = vst.msk [vmem:[#allocation2 + $0xd0] sm:$0xff] %vm360_vm0, %v8663_v0  ;;  %388 = vst.msk [vmem:[#allocation2 + $0xd8] sm:$0xff] %vm360_vm0, %v8663_v0 }
  0x28   : > { %389 = vst.msk [vmem:[#allocation2 + $0xe0] sm:$0xff] %vm360_vm0, %v8663_v0  ;;  %390 = vst.msk [vmem:[#allocation2 + $0xe8] sm:$0xff] %vm360_vm0, %v8663_v0 }
  0x29   : > { %391 = vst.msk [vmem:[#allocation2 + $0xf0] sm:$0xff] %vm360_vm0, %v8663_v0  ;;  %392 = vst.msk [vmem:[#allocation2 + $0xf8] sm:$0xff] %vm360_vm0, %v8663_v0 }
  0x2a   : > { %393 = vst.msk [vmem:[#allocation2 + $0x100] sm:$0xff] %vm360_vm0, %v8663_v0  ;;  %394 = vst.msk [vmem:[#allocation2 + $0x108] sm:$0xff] %vm360_vm0, %v8663_v0 }
  0x2b   : > { %395 = vst.msk [vmem:[#allocation2 + $0x110] sm:$0xff] %vm360_vm0, %v8663_v0  ;;  %396 = vst.msk [vmem:[#allocation2 + $0x118] sm:$0xff] %vm360_vm0, %v8663_v0 }
  0x2c   : > { %397 = vst.msk [vmem:[#allocation2 + $0x120] sm:$0xff] %vm360_vm0, %v8663_v0  ;;  %398 = vst.msk [vmem:[#allocation2 + $0x128] sm:$0xff] %vm360_vm0, %v8663_v0 }
  0x2d   : > { %399 = vst.msk [vmem:[#allocation2 + $0x130] sm:$0xff] %vm360_vm0, %v8663_v0  ;;  %400 = vst.msk [vmem:[#allocation2 + $0x138] sm:$0xff] %vm360_vm0, %v8663_v0 }
  0x2e   : > { %401 = vst.msk [vmem:[#allocation2 + $0x140] sm:$0xff] %vm360_vm0, %v8663_v0  ;;  %402 = vst.msk [vmem:[#allocation2 + $0x148] sm:$0xff] %vm360_vm0, %v8663_v0 }
  0x2f   : > { %403 = vst.msk [vmem:[#allocation2 + $0x150] sm:$0xff] %vm360_vm0, %v8663_v0  ;;  %404 = vst.msk [vmem:[#allocation2 + $0x158] sm:$0xff] %vm360_vm0, %v8663_v0 }
  0x30   : > { %405 = vst.msk [vmem:[#allocation2 + $0x160] sm:$0xff] %vm360_vm0, %v8663_v0  ;;  %406 = vst.msk [vmem:[#allocation2 + $0x168] sm:$0xff] %vm360_vm0, %v8663_v0 }
  0x31   : > { %407 = vst.msk [vmem:[#allocation2 + $0x170] sm:$0xff] %vm360_vm0, %v8663_v0  ;;  %408 = vst.msk [vmem:[#allocation2 + $0x178] sm:$0xff] %vm360_vm0, %v8663_v0 }
  0x32   : > { %410 = vst.msk [vmem:[#allocation3] sm:$0xff] %vm409_vm1, %v8664_v1  ;;  %411 = vst.msk [vmem:[#allocation3 + $0x8] sm:$0xff] %vm409_vm1, %v8664_v1 }
  0x33   : > { %412 = vst.msk [vmem:[#allocation3 + $0x10] sm:$0xff] %vm409_vm1, %v8664_v1  ;;  %413 = vst.msk [vmem:[#allocation3 + $0x18] sm:$0xff] %vm409_vm1, %v8664_v1 }
  0x34   : > { %414 = vst.msk [vmem:[#allocation3 + $0x20] sm:$0xff] %vm409_vm1, %v8664_v1  ;;  %415 = vst.msk [vmem:[#allocation3 + $0x28] sm:$0xff] %vm409_vm1, %v8664_v1 }
  0x35   : > { %416 = vst.msk [vmem:[#allocation3 + $0x30] sm:$0xff] %vm409_vm1, %v8664_v1  ;;  %417 = vst.msk [vmem:[#allocation3 + $0x38] sm:$0xff] %vm409_vm1, %v8664_v1 }
  0x36   : > { %418 = vst.msk [vmem:[#allocation3 + $0x40] sm:$0xff] %vm409_vm1, %v8664_v1  ;;  %419 = vst.msk [vmem:[#allocation3 + $0x48] sm:$0xff] %vm409_vm1, %v8664_v1 }
  0x37   : > { %420 = vst.msk [vmem:[#allocation3 + $0x50] sm:$0xff] %vm409_vm1, %v8664_v1  ;;  %421 = vst.msk [vmem:[#allocation3 + $0x58] sm:$0xff] %vm409_vm1, %v8664_v1 }
  0x38   : > { %422 = vst.msk [vmem:[#allocation3 + $0x60] sm:$0xff] %vm409_vm1, %v8664_v1  ;;  %423 = vst.msk [vmem:[#allocation3 + $0x68] sm:$0xff] %vm409_vm1, %v8664_v1 }
  0x39   : > { %424 = vst.msk [vmem:[#allocation3 + $0x70] sm:$0xff] %vm409_vm1, %v8664_v1  ;;  %425 = vst.msk [vmem:[#allocation3 + $0x78] sm:$0xff] %vm409_vm1, %v8664_v1 }
  0x3a   : > { %426 = vst.msk [vmem:[#allocation3 + $0x80] sm:$0xff] %vm409_vm1, %v8664_v1  ;;  %427 = vst.msk [vmem:[#allocation3 + $0x88] sm:$0xff] %vm409_vm1, %v8664_v1 }
  0x3b   : > { %428 = vst.msk [vmem:[#allocation3 + $0x90] sm:$0xff] %vm409_vm1, %v8664_v1  ;;  %429 = vst.msk [vmem:[#allocation3 + $0x98] sm:$0xff] %vm409_vm1, %v8664_v1 }
  0x3c   : > { %430 = vst.msk [vmem:[#allocation3 + $0xa0] sm:$0xff] %vm409_vm1, %v8664_v1  ;;  %431 = vst.msk [vmem:[#allocation3 + $0xa8] sm:$0xff] %vm409_vm1, %v8664_v1 }
  0x3d   : > { %432 = vst.msk [vmem:[#allocation3 + $0xb0] sm:$0xff] %vm409_vm1, %v8664_v1  ;;  %433 = vst.msk [vmem:[#allocation3 + $0xb8] sm:$0xff] %vm409_vm1, %v8664_v1 }
  0x3e   : > { %434 = vst.msk [vmem:[#allocation3 + $0xc0] sm:$0xff] %vm409_vm1, %v8664_v1  ;;  %435 = vst.msk [vmem:[#allocation3 + $0xc8] sm:$0xff] %vm409_vm1, %v8664_v1 }
  0x3f   : > { %436 = vst.msk [vmem:[#allocation3 + $0xd0] sm:$0xff] %vm409_vm1, %v8664_v1  ;;  %437 = vst.msk [vmem:[#allocation3 + $0xd8] sm:$0xff] %vm409_vm1, %v8664_v1 }
  0x40   : > { %438 = vst.msk [vmem:[#allocation3 + $0xe0] sm:$0xff] %vm409_vm1, %v8664_v1  ;;  %439 = vst.msk [vmem:[#allocation3 + $0xe8] sm:$0xff] %vm409_vm1, %v8664_v1 }
  0x41   : > { %440 = vst.msk [vmem:[#allocation3 + $0xf0] sm:$0xff] %vm409_vm1, %v8664_v1  ;;  %441 = vst.msk [vmem:[#allocation3 + $0xf8] sm:$0xff] %vm409_vm1, %v8664_v1 }
  0x42   : > { %442 = vst.msk [vmem:[#allocation3 + $0x100] sm:$0xff] %vm409_vm1, %v8664_v1  ;;  %443 = vst.msk [vmem:[#allocation3 + $0x108] sm:$0xff] %vm409_vm1, %v8664_v1 }
  0x43   : > { %444 = vst.msk [vmem:[#allocation3 + $0x110] sm:$0xff] %vm409_vm1, %v8664_v1  ;;  %445 = vst.msk [vmem:[#allocation3 + $0x118] sm:$0xff] %vm409_vm1, %v8664_v1 }
  0x44   : > { %446 = vst.msk [vmem:[#allocation3 + $0x120] sm:$0xff] %vm409_vm1, %v8664_v1  ;;  %447 = vst.msk [vmem:[#allocation3 + $0x128] sm:$0xff] %vm409_vm1, %v8664_v1 }
  0x45   : > { %448 = vst.msk [vmem:[#allocation3 + $0x130] sm:$0xff] %vm409_vm1, %v8664_v1  ;;  %449 = vst.msk [vmem:[#allocation3 + $0x138] sm:$0xff] %vm409_vm1, %v8664_v1 }
  0x46   : > { %450 = vst.msk [vmem:[#allocation3 + $0x140] sm:$0xff] %vm409_vm1, %v8664_v1  ;;  %451 = vst.msk [vmem:[#allocation3 + $0x148] sm:$0xff] %vm409_vm1, %v8664_v1 }
  0x47   : > { %452 = vst.msk [vmem:[#allocation3 + $0x150] sm:$0xff] %vm409_vm1, %v8664_v1  ;;  %453 = vst.msk [vmem:[#allocation3 + $0x158] sm:$0xff] %vm409_vm1, %v8664_v1 }
  0x48   : > { %454 = vst.msk [vmem:[#allocation3 + $0x160] sm:$0xff] %vm409_vm1, %v8664_v1  ;;  %455 = vst.msk [vmem:[#allocation3 + $0x168] sm:$0xff] %vm409_vm1, %v8664_v1 }
  0x49   : > { %456 = vst.msk [vmem:[#allocation3 + $0x170] sm:$0xff] %vm409_vm1, %v8664_v1  ;;  %457 = vst.msk [vmem:[#allocation3 + $0x178] sm:$0xff] %vm409_vm1, %v8664_v1 }
  0x4a PF: > { %v8868_v2 = vld [vmem:[%s8748_s15] sm:$0xff]  ;;  %vm524_vm2 = vcmask 1042432   ;;  %vm475_vm3 = vcmask 23552   ;;  %v459_v4 = vld [vmem:[%s8753_s18 + $0x8] sm:$0xff]  ;;  %v460_v5 = vld [vmem:[%s8753_s18 + $0x10] sm:$0xff]  ;;  %v8665_v6 = vmov 3   ;;  %v737_v44 = vlaneseq }
  0x4b   : > { %v458_v3 = vld [vmem:[%s8753_s18] sm:$0xff]  ;;  %7495 = vmatprep.subr.msk.mxu0 %vm524_vm2, %v8868_v2  ;;  %7801 = vset.pattern.permute.xlu1 %v8665_v6  ;;  %v461_v7 = vld [vmem:[%s8753_s18 + $0x18] sm:$0xff]  ;;  %v463_v9 = vld [vmem:[%s8753_s18 + $0x28] sm:$0xff]  ;;  %v8666_v20 = vmov 4   ;;  %v16271_v24 = vmov 0   ;;  %p7350_p9 = scmp.ne.s32.totalorder %s8645_s24, 2 }
  0x4c   : > { %7497 = vmatprep.mubr.msk.f32.mxu0 %vm475_vm3, %v458_v3  ;;  %7496 = vmatpush3.msk.msra.mxu0 %vm524_vm2, %v8868_v2  ;;  %v462_v8 = vld [vmem:[%s8753_s18 + $0x20] sm:$0xff]  ;;  %v464_v10 = vld [vmem:[%s8753_s18 + $0x30] sm:$0xff]  ;;  %v465_v11 = vld [vmem:[%s8753_s18 + $0x38] sm:$0xff]  ;;  %v738_v47 = vshrl.u32 %v737_v44, 7 }
  0x4d   : > { %7498 = vmatmul.mubr.msk.f32.vlgmr.msra.gmra.mrb[0].mxu0 %vm475_vm3, %v459_v4  ;;  %682 = vperm.xlu1 %7801, %v460_v5   ;;  %v466_v12 = vld [vmem:[%s8753_s18 + $0x40] sm:$0xff]  ;;  %v467_v13 = vld [vmem:[%s8753_s18 + $0x48] sm:$0xff]  ;;  %v468_v14 = vld [vmem:[%s8753_s18 + $0x50] sm:$0xff] }
  0x4e   : > { %7500 = vmatprep.mubr.msk.f32.mxu0 %vm475_vm3, %v460_v5  ;;  %7800 = vset.pattern.permute.xlu0 %v8665_v6  ;;  %v469_v15 = vld [vmem:[%s8753_s18 + $0x58] sm:$0xff]  ;;  %v470_v16 = vld [vmem:[%s8753_s18 + $0x60] sm:$0xff]  ;;  %v471_v17 = vld [vmem:[%s8753_s18 + $0x68] sm:$0xff]  ;;  %v855_v49 = vsub.s32 4, %v738_v47  ;;  %v739_v51 = vsub.s32 3, %v738_v47 }
  0x4f   : > { %674 = vperm.xlu0 %7800, %v458_v3   ;;  %v472_v18 = vld [vmem:[%s8753_s18 + $0x70] sm:$0xff]  ;;  %v473_v19 = vld [vmem:[%s8753_s18 + $0x78] sm:$0xff]  ;;  %v8904_v21 = vld [vmem:[#allocation2 + $0x8] sm:$0xff] }
  0x50   : > { %16774 = vst [vmem:[#allocation4_spill] sm:$0xff] %v8904_v21  ;;  %v2328_v22 = vld [vmem:[#allocation2 + $0x88] sm:$0xff]  ;;  %v8944_v52 = vrot.slane %v8868_v2, %v855_v49  ;;  %v8947_v53 = vrot.slane %v8868_v2, %v739_v51  ;;  %v8986_v51 = vld [vmem:[#allocation2] sm:$0xff] }
  0x51   : > { %7501 = vmatmul.mubr.msk.f32.gmra.mrb[2].mxu0 %vm475_vm3, %v461_v7  ;;  %686 = vperm.xlu1 %7801, %v461_v7   ;;  %v8906_v23 = vld [vmem:[#allocation2 + $0x108] sm:$0xff]  ;;  %vm2411_vm4 = vcmp.lt.f32.partialorder %v2328_v22, %v8904_v21  ;;  %16775 = vst [vmem:[#allocation5_spill] sm:$0xff] %v8986_v51 }
  0x52   : > { %7503 = vmatprep.mubr.msk.f32.mxu0 %vm475_vm3, %v462_v8  ;;  %v8912_v25 = vsel %vm2411_vm4, %v2328_v22, %v8904_v21  ;;  %v2443_v26 = vsel %vm2411_vm4, 1, %v16271_v24 }
  0x53   : > { %678 = vperm.xlu0 %7800, %v459_v4   ;;  %vm2459_vm5 = vcmp.lt.f32.partialorder %v8906_v23, %v8912_v25 }
  0x54   : > { %v8920_v27 = vsel %vm2459_vm5, 2, %v2443_v26 }
  0x55   : > { %7504 = vmatmul.mubr.msk.f32.gmra.mrb[4].mxu0 %vm475_vm3, %v463_v9  ;;  %694 = vperm.xlu1 %7801, %v463_v9  }
  0x56   : > { %7506 = vmatprep.mubr.msk.f32.mxu0 %vm475_vm3, %v464_v10 }
  0x57   : > { %690 = vperm.xlu0 %7800, %v462_v8  }
  0x59   : > { %7507 = vmatmul.mubr.msk.f32.gmra.mrb[6].mxu0 %vm475_vm3, %v465_v11  ;;  %702 = vperm.xlu1 %7801, %v465_v11  }
  0x5a   : > { %7509 = vmatprep.mubr.msk.f32.mxu0 %vm475_vm3, %v466_v12 }
  0x5b   : > { %698 = vperm.xlu0 %7800, %v464_v10  }
  0x5d   : > { %7510 = vmatmul.mubr.msk.f32.gmra.mrb[8].mxu0 %vm475_vm3, %v467_v13  ;;  %710 = vperm.xlu1 %7801, %v467_v13  }
  0x5e   : > { %7512 = vmatprep.mubr.msk.f32.mxu0 %vm475_vm3, %v468_v14 }
  0x5f   : > { %706 = vperm.xlu0 %7800, %v466_v12  }
  0x61   : > { %7513 = vmatmul.mubr.msk.f32.gmra.mrb[10].mxu0 %vm475_vm3, %v469_v15  ;;  %718 = vperm.xlu1 %7801, %v469_v15  }
  0x62   : > { %7515 = vmatprep.mubr.msk.f32.mxu0 %vm475_vm3, %v470_v16 }
  0x63   : > { %714 = vperm.xlu0 %7800, %v468_v14  }
  0x65   : > { %7516 = vmatmul.mubr.msk.f32.gmra.mrb[12].mxu0 %vm475_vm3, %v471_v17  ;;  %726 = vperm.xlu1 %7801, %v471_v17  }
  0x66   : > { %7518 = vmatprep.mubr.msk.f32.mxu0 %vm475_vm3, %v472_v18 }
  0x67   : > { %722 = vperm.xlu0 %7800, %v470_v16  }
  0x69   : > { %7519 = vmatmul.mubr.msk.f32.gmra.mrb[14].mxu0 %vm475_vm3, %v473_v19  ;;  %734 = vperm.xlu1 %7801, %v473_v19  }
  0x6b   : > { %730 = vperm.xlu0 %7800, %v472_v18  }
  0x6d   : > { %7803 = vset.pattern.permute.xlu1 %v8666_v20 }
  0x6e   : > { %794 = vperm.xlu1 %7803, %v459_v4  }
  0x6f   : > { %7802 = vset.pattern.permute.xlu0 %v8666_v20 }
  0x70   : > { %790 = vperm.xlu0 %7802, %v458_v3  }
  0x72   : > { %798 = vperm.xlu1 %7803, %v460_v5  }
  0x74   : > { %802 = vperm.xlu0 %7802, %v461_v7  }
  0x76   : > { %806 = vperm.xlu1 %7803, %v462_v8  }
  0x78   : > { %810 = vperm.xlu0 %7802, %v463_v9  }
  0x7a   : > { %814 = vperm.xlu1 %7803, %v464_v10  }
  0x7c   : > { %818 = vperm.xlu0 %7802, %v465_v11  }
  0x7e   : > { %822 = vperm.xlu1 %7803, %v466_v12  }
  0x80   : > { %826 = vperm.xlu0 %7802, %v467_v13  }
  0x82   : > { %830 = vperm.xlu1 %7803, %v468_v14  }
  0x84   : > { %834 = vperm.xlu0 %7802, %v469_v15  }
  0x86   : > { %838 = vperm.xlu1 %7803, %v470_v16  }
  0x88   : > { %842 = vperm.xlu0 %7802, %v471_v17  }
  0x8a   : > { %846 = vperm.xlu1 %7803, %v472_v18  }
  0x8c   : > { %850 = vperm.xlu0 %7802, %v473_v19  }
  0x8e   : > { %7810 = vset.pattern.permute.xlu1 %v16271_v24 }
  0x90   : > { %7804 = vset.pattern.permute.xlu0 %v16271_v24 }
  0xcc   : > { %v683_v29 = vpop.permute.xlu1 %682 }
  0xcd   : > { %v743_v6 = vadd.f32 %v8947_v53, %v683_v29 }
  0xce   : > { %v675_v28 = vpop.permute.xlu0 %674 }
  0xcf   : > { %v741_v60 = vadd.f32 %v8947_v53, %v675_v28 }
  0xd0   : > { %v687_v31 = vpop.permute.xlu1 %686 }
  0xd1   : > { %v744_v1 = vadd.f32 %v8947_v53, %v687_v31 }
  0xd2   : > { %v679_v30 = vpop.permute.xlu0 %678 }
  0xd3   : > { %v742_v57 = vadd.f32 %v8947_v53, %v679_v30 }
  0xd4   : > { %v695_v33 = vpop.permute.xlu1 %694 }
  0xd5   : > { %v746_v13 = vadd.f32 %v8947_v53, %v695_v33 }
  0xd6   : > { %v691_v32 = vpop.permute.xlu0 %690 }
  0xd7   : > { %v745_v17 = vadd.f32 %v8947_v53, %v691_v32 }
  0xd8   : > { %v8924_v35 = vpop.permute.xlu1 %702 }
  0xd9   : > { %v748_v30 = vadd.f32 %v8947_v53, %v8924_v35 }
  0xda   : > { %v8922_v34 = vpop.permute.xlu0 %698 }
  0xdc   : > { %v8928_v37 = vpop.permute.xlu1 %710 }
  0xdd   : > { %v750_v35 = vadd.f32 %v8947_v53, %v8928_v37 }
  0xde   : > { %v8926_v36 = vpop.permute.xlu0 %706 }
  0xe0   : > { %v8932_v39 = vpop.permute.xlu1 %718 }
  0xe2   : > { %v8930_v38 = vpop.permute.xlu0 %714 }
  0xe4   : > { %v8936_v41 = vpop.permute.xlu1 %726 }
  0xe6   : > { %v8934_v40 = vpop.permute.xlu0 %722 }
  0xe8   : > { %v8940_v43 = vpop.permute.xlu1 %734 }
  0xea   : > { %v8938_v42 = vpop.permute.xlu0 %730 }
  0xed   : > { %v795_v46 = vpop.permute.xlu1 %794 }
  0xee   : > { %vm858_vm6 = vcmp.eq.f32.partialorder %v795_v46, %v8944_v52 }
  0xef   : > { %v791_v45 = vpop.permute.xlu0 %790 }
  0xf0   : > { %vm857_vm7 = vcmp.eq.f32.partialorder %v791_v45, %v8944_v52  ;;  %v747_v45 = vadd.f32 %v8947_v53, %v8922_v34 }
  0xf1   : > { %v799_v50 = vpop.permute.xlu1 %798 }
  0xf2   : > { %vm859_vm9 = vcmp.eq.f32.partialorder %v799_v50, %v8944_v52 }
  0xf3   : > { %v803_v48 = vpop.permute.xlu0 %802 }
  0xf4   : > { %vm860_vm8 = vcmp.eq.f32.partialorder %v803_v48, %v8944_v52 }
  0xf5   : > { %v807_v55 = vpop.permute.xlu1 %806 }
  0xf6   : > { %vm861_vm11 = vcmp.eq.f32.partialorder %v807_v55, %v8944_v52 }
  0xf7   : > { %v811_v54 = vpop.permute.xlu0 %810 }
  0xf8   : > { %vm862_vm10 = vcmp.eq.f32.partialorder %v811_v54, %v8944_v52  ;;  %v2327_v54 = vld [vmem:[#allocation2 + $0x80] sm:$0xff] }
  0xf9   : > { %v815_v7 = vpop.permute.xlu1 %814  ;;  %vm2410_vm14 = vcmp.lt.f32.partialorder %v2327_v54, %v8986_v51 }
  0xfa   : > { %vm863_vm13 = vcmp.eq.f32.partialorder %v815_v7, %v8944_v52 }
  0xfb   : > { %v819_v2 = vpop.permute.xlu0 %818 }
  0xfc   : > { %vm864_vm12 = vcmp.eq.f32.partialorder %v819_v2, %v8944_v52  ;;  %v2442_v2 = vsel %vm2410_vm14, 1, %v16271_v24 }
  0xfd   : > { %v823_v26 = vpop.permute.xlu1 %822 }
  0xfe   : > { %vm865_vm1 = vcmp.eq.f32.partialorder %v823_v26, %v8944_v52 }
  0xff   : > { %v827_v20 = vpop.permute.xlu0 %826 }
 0x100   : > { %vm866_vm0 = vcmp.eq.f32.partialorder %v827_v20, %v8944_v52 }
 0x101   : > { %v831_v37 = vpop.permute.xlu1 %830 }
 0x102   : > { %vm867_vm3 = vcmp.eq.f32.partialorder %v831_v37, %v8944_v52 }
 0x103   : > { %v835_v34 = vpop.permute.xlu0 %834 }
 0x104   : > { %vm868_vm2 = vcmp.eq.f32.partialorder %v835_v34, %v8944_v52 }
 0x120   : > { %v7499_v56 = vpop.f32.mrb[0].mxu0 }
 0x121   : > { %v758_v58 = vmul.f32 2.0, %v7499_v56  ;;  %v594_v59 = vpop.f32.mrb[1].mxu0 }
 0x122   : > { %v757_v61 = vmul.f32 2.0, %v594_v59 }
 0x123   : > { %v774_v62 = vsub.f32 %v742_v57, %v758_v58  ;;  %v749_v58 = vadd.f32 %v8947_v53, %v8926_v36  ;;  %v752_v36 = vadd.f32 %v8947_v53, %v8932_v39 }
 0x124   : > { %v773_v63 = vsub.f32 %v741_v60, %v757_v61  ;;  %v7502_v0 = vpop.f32.mrb[2].mxu0  ;;  %v8996_v61 = vld [vmem:[#allocation2 + $0x100] sm:$0xff] }
 0x125   : > { %v760_v3 = vmul.f32 2.0, %v7502_v0  ;;  %v604_v4 = vpop.f32.mrb[3].mxu0  ;;  %v8954_v5 = vsel %vm858_vm6, %v774_v62, 1e+10  ;;  %v8999_v62 = vsel %vm2410_vm14, %v2327_v54, %v8986_v51 }
 0x126   : > { %v759_v8 = vmul.f32 2.0, %v604_v4  ;;  %909 = vmin.xlane.f32.xlu0 %v8954_v5  ;;  %v8959_v9 = vsel %vm857_vm7, %v773_v63, 1e+10  ;;  %vm2458_vm15 = vcmp.lt.f32.partialorder %v8996_v61, %v8999_v62 }
 0x127   : > { %v776_v10 = vsub.f32 %v744_v1, %v760_v3  ;;  %907 = vmin.xlane.f32.xlu1 %v8959_v9  ;;  %v2490_v7 = vsel %vm2458_vm15, 2, %v2442_v2 }
 0x128   : > { %v775_v11 = vsub.f32 %v743_v6, %v759_v8  ;;  %v7505_v12 = vpop.f32.mrb[4].mxu0  ;;  %v751_v8 = vadd.f32 %v8947_v53, %v8930_v38 }
 0x129   : > { %v762_v14 = vmul.f32 2.0, %v7505_v12  ;;  %v614_v15 = vpop.f32.mrb[5].mxu0  ;;  %v8964_v16 = vsel %vm860_vm8, %v776_v10, 1e+10 }
 0x12a   : > { %v761_v18 = vmul.f32 2.0, %v614_v15  ;;  %v8967_v19 = vsel %vm859_vm9, %v775_v11, 1e+10  ;;  %v843_v11 = vpop.permute.xlu0 %842 }
 0x12b   : > { %v778_v22 = vsub.f32 %v746_v13, %v762_v14  ;;  %913 = vmin.xlane.f32.xlu1 %v8964_v16  ;;  %911 = vmin.xlane.f32.xlu0 %v8967_v19  ;;  %v839_v13 = vpop.permute.xlu1 %838  ;;  %vm870_vm4 = vcmp.eq.f32.partialorder %v843_v11, %v8944_v52 }
 0x12c   : > { %v777_v28 = vsub.f32 %v745_v17, %v761_v18  ;;  %v7508_v29 = vpop.f32.mrb[6].mxu0  ;;  %v754_v17 = vadd.f32 %v8947_v53, %v8936_v41  ;;  %vm869_vm6 = vcmp.eq.f32.partialorder %v839_v13, %v8944_v52 }
 0x12d   : > { %v764_v31 = vmul.f32 2.0, %v7508_v29  ;;  %v624_v32 = vpop.f32.mrb[7].mxu0  ;;  %v8975_v33 = vsel %vm862_vm10, %v778_v22, 1e+10  ;;  %v753_v22 = vadd.f32 %v8947_v53, %v8934_v40 }
 0x12e   : > { %v763_v46 = vmul.f32 2.0, %v624_v32  ;;  %v8979_v47 = vsel %vm861_vm11, %v777_v28, 1e+10  ;;  %v851_v32 = vpop.permute.xlu0 %850 }
 0x12f   : > { %v780_v48 = vsub.f32 %v748_v30, %v764_v31  ;;  %917 = vmin.xlane.f32.xlu1 %v8975_v33  ;;  %915 = vmin.xlane.f32.xlu0 %v8979_v47  ;;  %v756_v31 = vadd.f32 %v8947_v53, %v8940_v43  ;;  %vm872_vm7 = vcmp.eq.f32.partialorder %v851_v32, %v8944_v52 }
 0x130   : > { %v779_v49 = vsub.f32 %v747_v45, %v763_v46  ;;  %v7511_v50 = vpop.f32.mrb[8].mxu0 }
 0x131   : > { %v766_v55 = vmul.f32 2.0, %v7511_v50  ;;  %v634_v56 = vpop.f32.mrb[9].mxu0  ;;  %v8989_v57 = vsel %vm864_vm12, %v780_v48, 1e+10  ;;  %v755_v48 = vadd.f32 %v8947_v53, %v8938_v42  ;;  %v9054_v42 = vand.u32 127, %v737_v44 }
 0x132   : > { %v765_v59 = vmul.f32 2.0, %v634_v56  ;;  %v8994_v60 = vsel %vm863_vm13, %v779_v49, 1e+10  ;;  %v9061_v53 = vsel %vm2459_vm5, %v8906_v23, %v8912_v25 }
 0x133   : > { %v782_v63 = vsub.f32 %v750_v35, %v766_v55  ;;  %921 = vmin.xlane.f32.xlu1 %v8989_v57  ;;  %919 = vmin.xlane.f32.xlu0 %v8994_v60  ;;  %v847_v35 = vpop.permute.xlu1 %846  ;;  %16776 = vst [vmem:[#allocation6_spill] sm:$0xff] %v9054_v42 }
 0x134   : > { %v781_v0 = vsub.f32 %v749_v58, %v765_v59  ;;  %v7514_v1 = vpop.f32.mrb[10].mxu0  ;;  %vm871_vm8 = vcmp.eq.f32.partialorder %v847_v35, %v8944_v52  ;;  %v9068_v52 = vsel %vm2458_vm15, %v8996_v61, %v8999_v62 }
 0x135   : > { %v768_v3 = vmul.f32 2.0, %v7514_v1  ;;  %v644_v4 = vpop.f32.mrb[11].mxu0  ;;  %v9010_v6 = vsel %vm866_vm0, %v782_v63, 1e+10  ;;  %16777 = vst [vmem:[#allocation7_spill] sm:$0xff] %v9068_v52 }
 0x136   : > { %v767_v39 = vmul.f32 2.0, %v644_v4  ;;  %v9017_v10 = vsel %vm865_vm1, %v781_v0, 1e+10 }
 0x137   : > { %v784_v12 = vsub.f32 %v752_v36, %v768_v3  ;;  %925 = vmin.xlane.f32.xlu1 %v9010_v6  ;;  %923 = vmin.xlane.f32.xlu0 %v9017_v10 }
 0x138   : > { %v783_v14 = vsub.f32 %v751_v8, %v767_v39  ;;  %v7517_v15 = vpop.f32.mrb[12].mxu0 }
 0x139   : > { %v770_v38 = vmul.f32 2.0, %v7517_v15  ;;  %v654_v18 = vpop.f32.mrb[13].mxu0  ;;  %v9025_v20 = vsel %vm868_vm2, %v784_v12, 1e+10 }
 0x13a   : > { %v769_v26 = vmul.f32 2.0, %v654_v18  ;;  %v9029_v28 = vsel %vm867_vm3, %v783_v14, 1e+10 }
 0x13b   : > { %v786_v29 = vsub.f32 %v754_v17, %v770_v38  ;;  %929 = vmin.xlane.f32.xlu1 %v9025_v20  ;;  %927 = vmin.xlane.f32.xlu0 %v9029_v28 }
 0x13c   : > { %v785_v41 = vsub.f32 %v753_v22, %v769_v26  ;;  %v7520_v30 = vpop.f32.mrb[14].mxu0 }
 0x13d   : > { %v772_v45 = vmul.f32 2.0, %v7520_v30  ;;  %v664_v40 = vpop.f32.mrb[15].mxu0  ;;  %v9037_v46 = vsel %vm870_vm4, %v786_v29, 1e+10 }
 0x13e   : > { %v771_v49 = vmul.f32 2.0, %v664_v40  ;;  %v9041_v50 = vsel %vm869_vm6, %v785_v41, 1e+10 }
 0x13f   : > { %v788_v54 = vsub.f32 %v756_v31, %v772_v45  ;;  %933 = vmin.xlane.f32.xlu1 %v9037_v46  ;;  %931 = vmin.xlane.f32.xlu0 %v9041_v50 }
 0x140   : > { %v787_v43 = vsub.f32 %v755_v48, %v771_v49 }
 0x141   : > { %v9047_v34 = vsel %vm872_vm7, %v788_v54, 1e+10 }
 0x142   : > { %v9049_v55 = vsel %vm871_vm8, %v787_v43, 1e+10 }
 0x143   : > { %937 = vmin.xlane.f32.xlu1 %v9047_v34  ;;  %935 = vmin.xlane.f32.xlu0 %v9049_v55 }
 0x1b3   : > { %v9070_v56 = vpop.xlane.xlu0 %909 }
 0x1b4   : > { %16778 = vst [vmem:[#allocation8_spill] sm:$0xff] %v9070_v56  ;;  %vm2507_vm9 = vcmp.lt.f32.partialorder %v9070_v56, %v9061_v53  ;;  %v9074_v44 = vpop.xlane.xlu1 %907  ;;  %vm940_vm10 = vcmp.le.f32.partialorder %v8954_v5, %v9070_v56 }
 0x1b5   : > { %16779 = vst [vmem:[#allocation9_spill] sm:$0xff] %v9074_v44  ;;  %v9082_v23 = vsel %vm2507_vm9, 3, %v8920_v27  ;;  %vm2506_vm5 = vcmp.lt.f32.partialorder %v9074_v44, %v9068_v52  ;;  %v9087_v25 = vsel %vm940_vm10, %v9054_v42, 128  ;;  %vm939_vm11 = vcmp.le.f32.partialorder %v8959_v9, %v9074_v44 }
 0x1b6   : > { %16780 = vst [vmem:[#allocation10_spill] sm:$0xff] %v9082_v23  ;;  %v9092_v58 = vsel %vm2506_vm5, 3, %v2490_v7  ;;  %v986_v37 = vshra.s32 %v9087_v25, 16  ;;  %v9098_v59 = vsel %vm939_vm11, %v9054_v42, 128 }
 0x1b7   : > { %16781 = vst [vmem:[#allocation11_spill] sm:$0xff] %v9092_v58  ;;  %v972_v63 = vshra.s32 %v9098_v59, 16 }
 0x1b8   : > { %v9100_v27 = vpop.xlane.xlu1 %913  ;;  %v9102_v61 = vpop.xlane.xlu0 %911  ;;  %v9104_v62 = vcvt.s32.f32 %v986_v37 }
 0x1b9   : > { %16782 = vst [vmem:[#allocation12_spill] sm:$0xff] %v9100_v27  ;;  %16783 = vst [vmem:[#allocation13_spill] sm:$0xff] %v9102_v61  ;;  %vm942_vm12 = vcmp.le.f32.partialorder %v8964_v16, %v9100_v27  ;;  %vm941_vm13 = vcmp.le.f32.partialorder %v8967_v19, %v9102_v61  ;;  %v9117_v1 = vcvt.s32.f32 %v972_v63  ;;  %v971_v61 = vand.u32 65535, %v9098_v59 }
 0x1ba   : > { %989 = vmin.xlane.f32.xlu0 %v9104_v62  ;;  %v9113_v36 = vsel %vm942_vm12, %v9054_v42, 128  ;;  %v9121_v3 = vsel %vm941_vm13, %v9054_v42, 128 }
 0x1bb   : > { %v1014_v2 = vshra.s32 %v9113_v36, 16  ;;  %v1000_v8 = vshra.s32 %v9121_v3, 16  ;;  %v973_v44 = vcvt.s32.f32 %v971_v61  ;;  %v1013_v52 = vand.u32 65535, %v9113_v36 }
 0x1bc   : > { %v9115_v0 = vpop.xlane.xlu1 %917  ;;  %v9126_v4 = vpop.xlane.xlu0 %915  ;;  %v999_v59 = vand.u32 65535, %v9121_v3  ;;  %v9316_v3 = vld [vmem:[%s8768_s13 + $0x20] sm:$0xff]  }
 0x1bd   : > { %16784 = vst [vmem:[#allocation14_spill] sm:$0xff] %v9115_v0  ;;  %vm944_vm14 = vcmp.le.f32.partialorder %v8975_v33, %v9115_v0  ;;  %16785 = vst [vmem:[#allocation15_spill] sm:$0xff] %v9126_v4  ;;  %v9128_v7 = vcvt.s32.f32 %v1014_v2  ;;  %vm943_vm15 = vcmp.le.f32.partialorder %v8979_v47, %v9126_v4  ;;  %v9139_v12 = vcvt.s32.f32 %v1000_v8 }
 0x1be   : > { %975 = vmin.xlane.f32.xlu0 %v9117_v1  ;;  %v9132_v39 = vsel %vm944_vm14, %v9054_v42, 128  ;;  %v9143_v14 = vsel %vm943_vm15, %v9054_v42, 128  ;;  %v1001_v61 = vcvt.s32.f32 %v999_v59 }
 0x1bf   : > { %v1042_v13 = vshra.s32 %v9132_v39, 16  ;;  %v1028_v38 = vshra.s32 %v9143_v14, 16  ;;  %v1041_v36 = vand.u32 65535, %v9132_v39 }
 0x1c0   : > { %v9137_v11 = vpop.xlane.xlu1 %921  ;;  %v9148_v15 = vpop.xlane.xlu0 %919 }
 0x1c1   : > { %16786 = vst [vmem:[#allocation16_spill] sm:$0xff] %v9137_v11  ;;  %vm946_vm0 = vcmp.le.f32.partialorder %v8989_v57, %v9137_v11  ;;  %16787 = vst [vmem:[#allocation17_spill] sm:$0xff] %v9148_v15  ;;  %v9150_v17 = vcvt.s32.f32 %v1042_v13  ;;  %vm945_vm1 = vcmp.le.f32.partialorder %v8994_v60, %v9148_v15  ;;  %v9161_v26 = vcvt.s32.f32 %v1028_v38 }
 0x1c2   : > { %1017 = vmin.xlane.f32.xlu0 %v9128_v7  ;;  %v9154_v18 = vsel %vm946_vm0, %v9054_v42, 128  ;;  %v9165_v41 = vsel %vm945_vm1, %v9054_v42, 128  ;;  %v985_v11 = vand.u32 65535, %v9087_v25 }
 0x1c3   : > { %v1070_v29 = vshra.s32 %v9154_v18, 16  ;;  %v1056_v32 = vshra.s32 %v9165_v41, 16 }
 0x1c4   : > { %v9159_v22 = vpop.xlane.xlu1 %925  ;;  %v9170_v30 = vpop.xlane.xlu0 %923  ;;  %v987_v0 = vcvt.s32.f32 %v985_v11  ;;  %v1015_v11 = vcvt.s32.f32 %v1013_v52  ;;  %v1043_v52 = vcvt.s32.f32 %v1041_v36 }
 0x1c5   : > { %16788 = vst [vmem:[#allocation18_spill] sm:$0xff] %v9159_v22  ;;  %vm948_vm2 = vcmp.le.f32.partialorder %v9010_v6, %v9159_v22  ;;  %16789 = vst [vmem:[#allocation19_spill] sm:$0xff] %v9170_v30  ;;  %v9172_v31 = vcvt.s32.f32 %v1070_v29  ;;  %vm947_vm3 = vcmp.le.f32.partialorder %v9017_v10, %v9170_v30  ;;  %v9183_v48 = vcvt.s32.f32 %v1056_v32 }
 0x1c6   : > { %1003 = vmin.xlane.f32.xlu0 %v9139_v12  ;;  %v9176_v45 = vsel %vm948_vm2, %v9054_v42, 128  ;;  %v9187_v49 = vsel %vm947_vm3, %v9054_v42, 128 }
 0x1c7   : > { %v1098_v35 = vshra.s32 %v9176_v45, 16  ;;  %v1084_v37 = vshra.s32 %v9187_v49, 16 }
 0x1c8   : > { %v9181_v40 = vpop.xlane.xlu1 %929  ;;  %v9192_v54 = vpop.xlane.xlu0 %927 }
 0x1c9   : > { %16790 = vst [vmem:[#allocation20_spill] sm:$0xff] %v9181_v40  ;;  %vm950_vm4 = vcmp.le.f32.partialorder %v9025_v20, %v9181_v40  ;;  %16791 = vst [vmem:[#allocation21_spill] sm:$0xff] %v9192_v54  ;;  %v9194_v43 = vcvt.s32.f32 %v1098_v35  ;;  %vm949_vm6 = vcmp.le.f32.partialorder %v9029_v28, %v9192_v54  ;;  %v9205_v8 = vcvt.s32.f32 %v1084_v37 }
 0x1ca   : > { %1045 = vmin.xlane.f32.xlu0 %v9150_v17  ;;  %v9198_v63 = vsel %vm950_vm4, %v9054_v42, 128  ;;  %v9211_v29 = vsel %vm949_vm6, %v9054_v42, 128 }
 0x1cb   : > { %v1126_v13 = vshra.s32 %v9198_v63, 16  ;;  %v1112_v35 = vshra.s32 %v9211_v29, 16 }
 0x1cc   : > { %v9203_v2 = vpop.xlane.xlu1 %933  ;;  %v9208_v38 = vpop.xlane.xlu0 %931 }
 0x1cd   : > { %16792 = vst [vmem:[#allocation22_spill] sm:$0xff] %v9203_v2  ;;  %16793 = vst [vmem:[#allocation23_spill] sm:$0xff] %v9208_v38  ;;  %vm952_vm7 = vcmp.le.f32.partialorder %v9037_v46, %v9203_v2  ;;  %v9216_v32 = vcvt.s32.f32 %v1126_v13  ;;  %vm951_vm8 = vcmp.le.f32.partialorder %v9041_v50, %v9208_v38  ;;  %v9227_v21 = vcvt.s32.f32 %v1112_v35 }
 0x1ce   : > { %1031 = vmin.xlane.f32.xlu0 %v9161_v26  ;;  %v9220_v24 = vsel %vm952_vm7, %v9054_v42, 128  ;;  %v9231_v2 = vsel %vm951_vm8, %v9054_v42, 128 }
 0x1cf   : > { %v1154_v51 = vshra.s32 %v9220_v24, 16  ;;  %v1140_v38 = vshra.s32 %v9231_v2, 16 }
 0x1d0   : > { %v9225_v37 = vpop.xlane.xlu0 %935  ;;  %v9236_v13 = vpop.xlane.xlu1 %937 }
 0x1d1   : > { %16794 = vst [vmem:[#allocation24_spill] sm:$0xff] %v9225_v37  ;;  %vm953_vm10 = vcmp.le.f32.partialorder %v9049_v55, %v9225_v37  ;;  %16795 = vst [vmem:[#allocation25_spill] sm:$0xff] %v9236_v13  ;;  %v9238_v54 = vcvt.s32.f32 %v1154_v51  ;;  %vm954_vm11 = vcmp.le.f32.partialorder %v9047_v34, %v9236_v13  ;;  %v9247_v40 = vcvt.s32.f32 %v1140_v38  ;;  %v9262_v38 = vld [vmem:[%s8768_s13] sm:$0xff]   ;;  %v9265_v13 = vld [vmem:[%s8768_s13 + $0x8] sm:$0xff]  }
 0x1d2   : > { %1073 = vmin.xlane.f32.xlu0 %v9172_v31  ;;  %v9242_v35 = vsel %vm953_vm10, %v9054_v42, 128  ;;  %v9251_v30 = vsel %vm954_vm11, %v9054_v42, 128  ;;  %7521 = vmatprep.subr.bf16.mxu1 %v9262_v38 }
 0x1d3   : > { %v1168_v37 = vshra.s32 %v9242_v35, 16  ;;  %v1182_v22 = vshra.s32 %v9251_v30, 16  ;;  %7553 = vmatprep.subr.bf16.mxu0 %v9262_v38  ;;  %7522 = vmatpush3.bf16.msra.mxu1 %v9262_v38 }
 0x1d4   : > { %7554 = vmatpush3.bf16.msra.mxu0 %v9262_v38  ;;  %7523 = vmatprep.subr.bf16.mxu1 %v9265_v13 }
 0x1d5   : > { %v9254_v51 = vcvt.s32.f32 %v1168_v37  ;;  %v9258_v15 = vcvt.s32.f32 %v1182_v22  ;;  %v9273_v37 = vld [vmem:[%s8768_s13 + $0x10] sm:$0xff]   ;;  %7555 = vmatprep.subr.bf16.mxu0 %v9265_v13  ;;  %v9280_v22 = vld [vmem:[%s8768_s13 + $0x18] sm:$0xff]  }
 0x1d6   : > { %1059 = vmin.xlane.f32.xlu0 %v9183_v48 }
 0x1d7   : > { %7524 = vmatpush3.bf16.msra.mxu1 %v9265_v13 }
 0x1d8   : > { %7556 = vmatpush3.bf16.msra.mxu0 %v9265_v13  ;;  %7525 = vmatprep.subr.bf16.mxu1 %v9273_v37 }
 0x1d9   : > { %7557 = vmatprep.subr.bf16.mxu0 %v9273_v37 }
 0x1da   : > { %1101 = vmin.xlane.f32.xlu0 %v9194_v43 }
 0x1db   : > { %7526 = vmatpush3.bf16.msra.mxu1 %v9273_v37 }
 0x1dc   : > { %7558 = vmatpush3.bf16.msra.mxu0 %v9273_v37  ;;  %7527 = vmatprep.subr.bf16.mxu1 %v9280_v22 }
 0x1dd   : > { %7559 = vmatprep.subr.bf16.mxu0 %v9280_v22 }
 0x1de   : > { %1087 = vmin.xlane.f32.xlu0 %v9205_v8 }
 0x1df   : > { %7528 = vmatpush3.bf16.msra.mxu1 %v9280_v22 }
 0x1e0   : > { %7560 = vmatpush3.bf16.msra.mxu0 %v9280_v22  ;;  %7529 = vmatprep.subr.bf16.mxu1 %v9316_v3 }
 0x1e1   : > { %7561 = vmatprep.subr.bf16.mxu0 %v9316_v3 }
 0x1e2   : > { %1129 = vmin.xlane.f32.xlu0 %v9216_v32 }
 0x1e3   : > { %7530 = vmatpush3.bf16.msra.mxu1 %v9316_v3 }
 0x1e4   : > { %7562 = vmatpush3.bf16.msra.mxu0 %v9316_v3 }
 0x1e6   : > { %1115 = vmin.xlane.f32.xlu0 %v9227_v21 }
 0x1ea   : > { %1157 = vmin.xlane.f32.xlu0 %v9238_v54 }
 0x1ee   : > { %1143 = vmin.xlane.f32.xlu0 %v9247_v40 }
 0x1f2   : > { %1171 = vmin.xlane.f32.xlu0 %v9254_v51 }
 0x1f6   : > { %1185 = vmin.xlane.f32.xlu0 %v9258_v15 }
 0x247   : > { %v9290_v4 = vpop.xlane.xlu0 %989 }
 0x248   : > { %vm991_vm12 = vcmp.eq.f32.partialorder %v9104_v62, %v9290_v4 }
 0x249   : > { %v992_v27 = vsel %vm991_vm12, %v987_v0, inf  ;;  %v1027_v0 = vand.u32 65535, %v9143_v14 }
 0x24a   : > { %993 = vmin.xlane.f32.xlu1 %v992_v27 }
 0x24b   : > { %v9295_v58 = vpop.xlane.xlu0 %975  ;;  %v1029_v39 = vcvt.s32.f32 %v1027_v0 }
 0x24c   : > { %vm977_vm13 = vcmp.eq.f32.partialorder %v9117_v1, %v9295_v58 }
 0x24d   : > { %v978_v23 = vsel %vm977_vm13, %v973_v44, inf }
 0x24e   : > { %979 = vmin.xlane.f32.xlu1 %v978_v23 }
 0x24f   : > { %v9300_v25 = vpop.xlane.xlu0 %1017 }
 0x250   : > { %vm1019_vm14 = vcmp.eq.f32.partialorder %v9128_v7, %v9300_v25 }
 0x251   : > { %v1020_v27 = vsel %vm1019_vm14, %v1015_v11, inf }
 0x252   : > { %1021 = vmin.xlane.f32.xlu1 %v1020_v27  ;;  %v9340_v27 = vld [vmem:[%s8768_s13 + $0x30] sm:$0xff]  }
 0x253   : > { %v9305_v62 = vpop.xlane.xlu0 %1003 }
 0x254   : > { %vm1005_vm15 = vcmp.eq.f32.partialorder %v9139_v12, %v9305_v62  ;;  %v1069_v12 = vand.u32 65535, %v9154_v18  ;;  %v1055_v18 = vand.u32 65535, %v9165_v41  ;;  %v1097_v41 = vand.u32 65535, %v9176_v45 }
 0x255   : > { %v1006_v44 = vsel %vm1005_vm15, %v1001_v61, inf  ;;  %v1083_v45 = vand.u32 65535, %v9187_v49  ;;  %v1125_v49 = vand.u32 65535, %v9198_v63 }
 0x256   : > { %1007 = vmin.xlane.f32.xlu1 %v1006_v44  ;;  %v1071_v59 = vcvt.s32.f32 %v1069_v12  ;;  %v1057_v36 = vcvt.s32.f32 %v1055_v18  ;;  %v9352_v44 = vld [vmem:[%s8768_s13 + $0x38] sm:$0xff]   ;;  %v1099_v0 = vcvt.s32.f32 %v1097_v41 }
 0x257   : > { %v9310_v23 = vpop.xlane.xlu0 %1045 }
 0x258   : > { %vm1047_vm0 = vcmp.eq.f32.partialorder %v9150_v17, %v9310_v23  ;;  %v9328_v17 = vld [vmem:[%s8768_s13 + $0x28] sm:$0xff]  }
 0x259   : > { %v1048_v1 = vsel %vm1047_vm0, %v1043_v52, inf  ;;  %7531 = vmatprep.subr.bf16.mxu1 %v9328_v17  ;;  %7563 = vmatprep.subr.bf16.mxu0 %v9328_v17 }
 0x25a   : > { %1049 = vmin.xlane.f32.xlu1 %v1048_v1  ;;  %7532 = vmatpush3.bf16.msra.mxu1 %v9328_v17 }
 0x25b   : > { %v9318_v7 = vpop.xlane.xlu0 %1031  ;;  %7564 = vmatpush3.bf16.msra.mxu0 %v9328_v17  ;;  %7533 = vmatprep.subr.bf16.mxu1 %v9340_v27 }
 0x25c   : > { %vm1033_vm1 = vcmp.eq.f32.partialorder %v9161_v26, %v9318_v7  ;;  %7565 = vmatprep.subr.bf16.mxu0 %v9340_v27 }
 0x25d   : > { %v1034_v14 = vsel %vm1033_vm1, %v1029_v39, inf  ;;  %v1085_v39 = vcvt.s32.f32 %v1083_v45 }
 0x25e   : > { %1035 = vmin.xlane.f32.xlu1 %v1034_v14  ;;  %7534 = vmatpush3.bf16.msra.mxu1 %v9340_v27  ;;  %v1127_v14 = vcvt.s32.f32 %v1125_v49 }
 0x25f   : > { %v9330_v11 = vpop.xlane.xlu0 %1073  ;;  %7566 = vmatpush3.bf16.msra.mxu0 %v9340_v27  ;;  %7535 = vmatprep.subr.bf16.mxu1 %v9352_v44 }
 0x260   : > { %vm1075_vm2 = vcmp.eq.f32.partialorder %v9172_v31, %v9330_v11  ;;  %7567 = vmatprep.subr.bf16.mxu0 %v9352_v44 }
 0x261   : > { %v1076_v26 = vsel %vm1075_vm2, %v1071_v59, inf  ;;  %v1111_v59 = vand.u32 65535, %v9211_v29  ;;  %v1139_v29 = vand.u32 65535, %v9231_v2  ;;  %v1181_v2 = vand.u32 65535, %v9251_v30 }
 0x262   : > { %1077 = vmin.xlane.f32.xlu1 %v1076_v26  ;;  %7536 = vmatpush3.bf16.msra.mxu1 %v9352_v44 }
 0x263   : > { %v9342_v61 = vpop.xlane.xlu0 %1059  ;;  %7568 = vmatpush3.bf16.msra.mxu0 %v9352_v44  ;;  %7713 = vmatprep.subr.bf16.mxu1 %v9262_v38  ;;  %v1113_v63 = vcvt.s32.f32 %v1111_v59  ;;  %v1141_v45 = vcvt.s32.f32 %v1139_v29 }
 0x264   : > { %vm1061_vm3 = vcmp.eq.f32.partialorder %v9183_v48, %v9342_v61  ;;  %7585 = vmatprep.subr.bf16.mxu0 %v9262_v38 }
 0x265   : > { %v1062_v31 = vsel %vm1061_vm3, %v1057_v36, inf  ;;  %v1153_v36 = vand.u32 65535, %v9220_v24  ;;  %v1167_v24 = vand.u32 65535, %v9242_v35 }
 0x266   : > { %1063 = vmin.xlane.f32.xlu1 %v1062_v31 }
 0x267   : > { %v9354_v52 = vpop.xlane.xlu0 %1101  ;;  %v1155_v31 = vcvt.s32.f32 %v1153_v36 }
 0x268   : > { %vm1103_vm4 = vcmp.eq.f32.partialorder %v9194_v43, %v9354_v52 }
 0x269   : > { %v1104_v48 = vsel %vm1103_vm4, %v1099_v0, inf }
 0x26a   : > { %1105 = vmin.xlane.f32.xlu1 %v1104_v48 }
 0x26b   : > { %v9364_v1 = vpop.xlane.xlu0 %1087 }
 0x26c   : > { %vm1089_vm6 = vcmp.eq.f32.partialorder %v9205_v8, %v9364_v1 }
 0x26d   : > { %v1090_v43 = vsel %vm1089_vm6, %v1085_v39, inf  ;;  %v1169_v39 = vcvt.s32.f32 %v1167_v24 }
 0x26e   : > { %1091 = vmin.xlane.f32.xlu1 %v1090_v43  ;;  %v1183_v43 = vcvt.s32.f32 %v1181_v2  ;;  %v1052_v2 = vcvt.f32.s32 %v9310_v23 }
 0x26f   : > { %v9370_v12 = vpop.xlane.xlu0 %1129 }
 0x270   : > { %vm1131_vm7 = vcmp.eq.f32.partialorder %v9216_v32, %v9370_v12 }
 0x271   : > { %v1132_v18 = vsel %vm1131_vm7, %v1127_v14, inf }
 0x272   : > { %1133 = vmin.xlane.f32.xlu1 %v1132_v18  ;;  %v982_v18 = vcvt.f32.s32 %v9295_v58 }
 0x273   : > { %v9375_v26 = vpop.xlane.xlu0 %1115 }
 0x274   : > { %vm1117_vm8 = vcmp.eq.f32.partialorder %v9227_v21, %v9375_v26 }
 0x275   : > { %v1118_v8 = vsel %vm1117_vm8, %v1113_v63, inf }
 0x276   : > { %1119 = vmin.xlane.f32.xlu1 %v1118_v8  ;;  %v1024_v8 = vcvt.f32.s32 %v9300_v25 }
 0x277   : > { %v9380_v41 = vpop.xlane.xlu0 %1157 }
 0x278   : > { %vm1159_vm10 = vcmp.eq.f32.partialorder %v9238_v54, %v9380_v41 }
 0x279   : > { %v1160_v32 = vsel %vm1159_vm10, %v1155_v31, inf }
 0x27a   : > { %1161 = vmin.xlane.f32.xlu1 %v1160_v32  ;;  %v1025_v32 = vshll.u32 %v1024_v8, 16 }
 0x27b   : > { %v9385_v0 = vpop.xlane.xlu0 %1143 }
 0x27c   : > { %vm1145_vm11 = vcmp.eq.f32.partialorder %v9247_v40, %v9385_v0  ;;  %v996_v40 = vcvt.f32.s32 %v9290_v4 }
 0x27d   : > { %v1146_v21 = vsel %vm1145_vm11, %v1141_v45, inf  ;;  %v1010_v45 = vcvt.f32.s32 %v9305_v62 }
 0x27e   : > { %1147 = vmin.xlane.f32.xlu1 %v1146_v21  ;;  %v997_v59 = vshll.u32 %v996_v40, 16  ;;  %v16307_v21 = vmov 1.0|1.0   ;;  %v1038_v40 = vcvt.f32.s32 %v9318_v7 }
 0x27f   : > { %v9390_v48 = vpop.xlane.xlu0 %1171 }
 0x280   : > { %vm1173_vm12 = vcmp.eq.f32.partialorder %v9254_v51, %v9390_v48  ;;  %v983_v51 = vshll.u32 %v982_v18, 16  ;;  %v1039_v18 = vshll.u32 %v1038_v40, 16 }
 0x281   : > { %v1174_v54 = vsel %vm1173_vm12, %v1169_v39, inf  ;;  %v1011_v39 = vshll.u32 %v1010_v45, 16 }
 0x282   : > { %1175 = vmin.xlane.f32.xlu1 %v1174_v54 }
 0x283   : > { %v9395_v49 = vpop.xlane.xlu0 %1185 }
 0x284   : > { %vm1187_vm13 = vcmp.eq.f32.partialorder %v9258_v15, %v9395_v49 }
 0x285   : > { %v1188_v35 = vsel %vm1187_vm13, %v1183_v43, inf }
 0x286   : > { %1189 = vmin.xlane.f32.xlu1 %v1188_v35  ;;  %v1053_v35 = vshll.u32 %v1052_v2, 16 }
 0x2d7   : > { %v994_v14 = vpop.xlane.xlu1 %993 }
 0x2d8   : > { %v995_v30 = vcvt.f32.s32 %v994_v14 }
 0x2da   : > { %v998_v63 = vadd.s32 %v997_v59, %v995_v30  ;;  %v1080_v30 = vcvt.f32.s32 %v9330_v11 }
 0x2db   : > { %v980_v36 = vpop.xlane.xlu1 %979 }
 0x2dc   : > { %v981_v31 = vcvt.f32.s32 %v980_v36  ;;  %vm1196_vm14 = vcmp.eq.s32.totalorder %v9054_v42, %v998_v63 }
 0x2dd   : > { %v9404_v29 = vsel %vm1196_vm14, 1e+10, %v8954_v5 }
 0x2de   : > { %v984_v15 = vadd.s32 %v983_v51, %v981_v31  ;;  %1414 = vmin.xlane.f32.xlu1 %v9404_v29  ;;  %v1081_v51 = vshll.u32 %v1080_v30, 16 }
 0x2df   : > { %v1022_v4 = vpop.xlane.xlu1 %1021 }
 0x2e0   : > { %v1023_v58 = vcvt.f32.s32 %v1022_v4  ;;  %vm1195_vm15 = vcmp.eq.s32.totalorder %v9054_v42, %v984_v15 }
 0x2e1   : > { %v9410_v24 = vsel %vm1195_vm15, 1e+10, %v8959_v9  ;;  %vm6982_vm0 = vmpackc.low %vm1196_vm14, %vm1195_vm15 }
 0x2e2   : > { %v1026_v25 = vadd.s32 %v1025_v32, %v1023_v58  ;;  %1412 = vmin.xlane.f32.xlu0 %v9410_v24  ;;  %7537 = vmatprep.mubr.msk.bf16.mxu1 %vm6982_vm0, %v16307_v21 }
 0x2e3   : > { %v1008_v5 = vpop.xlane.xlu1 %1007 }
 0x2e4   : > { %v1009_v54 = vcvt.f32.s32 %v1008_v5  ;;  %vm1198_vm1 = vcmp.eq.s32.totalorder %v9054_v42, %v1026_v25 }
 0x2e5   : > { %v9417_v62 = vsel %vm1198_vm1, 1e+10, %v8964_v16 }
 0x2e6   : > { %v1012_v43 = vadd.s32 %v1011_v39, %v1009_v54  ;;  %1418 = vmin.xlane.f32.xlu1 %v9417_v62 }
 0x2e7   : > { %v1050_v9 = vpop.xlane.xlu1 %1049 }
 0x2e8   : > { %v1051_v14 = vcvt.f32.s32 %v1050_v9  ;;  %vm1197_vm2 = vcmp.eq.s32.totalorder %v9054_v42, %v1012_v43 }
 0x2e9   : > { %v9423_v59 = vsel %vm1197_vm2, 1e+10, %v8967_v19  ;;  %vm6984_vm3 = vmpackc.low %vm1198_vm1, %vm1197_vm2 }
 0x2ea   : > { %v1054_v23 = vadd.s32 %v1053_v35, %v1051_v14  ;;  %1416 = vmin.xlane.f32.xlu0 %v9423_v59  ;;  %7538 = vmatmul.mubr.msk.bf16.vlgmr.msra.gmra.mrb[0].mxu1 %vm6984_vm3, %v16307_v21 }
 0x2eb   : > { %v1036_v16 = vpop.xlane.xlu1 %1035  ;;  %7721 = vmatpush3.bf16.msra.mxu1 %v9262_v38  ;;  %v1066_v38 = vcvt.f32.s32 %v9342_v61  ;;  %v1108_v61 = vcvt.f32.s32 %v9354_v52 }
 0x2ec   : > { %v1037_v63 = vcvt.f32.s32 %v1036_v16  ;;  %vm1200_vm4 = vcmp.eq.s32.totalorder %v9054_v42, %v1054_v23  ;;  %7714 = vmatprep.subr.bf16.mxu1 %v9265_v13 }
 0x2ed   : > { %v9432_v19 = vsel %vm1200_vm4, 1e+10, %v8975_v33  ;;  %v1109_v45 = vshll.u32 %v1108_v61, 16 }
 0x2ee   : > { %v1040_v7 = vadd.s32 %v1039_v18, %v1037_v63  ;;  %1422 = vmin.xlane.f32.xlu1 %v9432_v19  ;;  %v1178_v63 = vcvt.f32.s32 %v9390_v48 }
 0x2ef   : > { %v1078_v36 = vpop.xlane.xlu1 %1077  ;;  %7722 = vmatpush3.bf16.msra.mxu1 %v9265_v13  ;;  %v1067_v13 = vshll.u32 %v1066_v38, 16 }
 0x2f0   : > { %v1079_v8 = vcvt.f32.s32 %v1078_v36  ;;  %vm1199_vm6 = vcmp.eq.s32.totalorder %v9054_v42, %v1040_v7  ;;  %7715 = vmatprep.subr.bf16.mxu1 %v9273_v37  ;;  %v1179_v36 = vshll.u32 %v1178_v63, 16 }
 0x2f1   : > { %v9440_v11 = vsel %vm1199_vm6, 1e+10, %v8979_v47  ;;  %vm6986_vm7 = vmpackc.low %vm1200_vm4, %vm1199_vm6 }
 0x2f2   : > { %v1082_v33 = vadd.s32 %v1081_v51, %v1079_v8  ;;  %1420 = vmin.xlane.f32.xlu0 %v9440_v11  ;;  %7541 = vmatprep.mubr.msk.bf16.mxu1 %vm6986_vm7, %v16307_v21  ;;  %v1192_v51 = vcvt.f32.s32 %v9395_v49 }
 0x2f3   : > { %v1064_v31 = vpop.xlane.xlu1 %1063  ;;  %7723 = vmatpush3.bf16.msra.mxu1 %v9273_v37  ;;  %v1094_v37 = vcvt.f32.s32 %v9364_v1  ;;  %v1136_v1 = vcvt.f32.s32 %v9370_v12 }
 0x2f4   : > { %v1065_v15 = vcvt.f32.s32 %v1064_v31  ;;  %vm1202_vm8 = vcmp.eq.s32.totalorder %v9054_v42, %v1082_v33  ;;  %7716 = vmatprep.subr.bf16.mxu1 %v9280_v22  ;;  %v1193_v33 = vshll.u32 %v1192_v51, 16 }
 0x2f5   : > { %v9449_v47 = vsel %vm1202_vm8, 1e+10, %v8989_v57  ;;  %v1137_v54 = vshll.u32 %v1136_v1, 16 }
 0x2f6   : > { %v1068_v4 = vadd.s32 %v1067_v13, %v1065_v15  ;;  %1426 = vmin.xlane.f32.xlu1 %v9449_v47 }
 0x2f7   : > { %v1106_v32 = vpop.xlane.xlu1 %1105  ;;  %7724 = vmatpush3.bf16.msra.mxu1 %v9280_v22  ;;  %v1095_v22 = vshll.u32 %v1094_v37, 16 }
 0x2f8   : > { %v1107_v58 = vcvt.f32.s32 %v1106_v32  ;;  %vm1201_vm10 = vcmp.eq.s32.totalorder %v9054_v42, %v1068_v4  ;;  %7717 = vmatprep.subr.bf16.mxu1 %v9316_v3  ;;  %v16798_v32 = vld [vmem:[#allocation7_spill] sm:$0xff] }
 0x2f9   : > { %v9457_v52 = vsel %vm1201_vm10, 1e+10, %v8994_v60  ;;  %vm6988_vm11 = vmpackc.low %vm1202_vm8, %vm1201_vm10 }
 0x2fa   : > { %v1110_v57 = vadd.s32 %v1109_v45, %v1107_v58  ;;  %1424 = vmin.xlane.f32.xlu0 %v9457_v52  ;;  %7542 = vmatmul.mubr.msk.bf16.gmra.mrb[4].mxu1 %vm6988_vm11, %v16307_v21  ;;  %v16799_v45 = vld [vmem:[#allocation9_spill] sm:$0xff] }
 0x2fb   : > { %v1092_v25 = vpop.xlane.xlu1 %1091  ;;  %7725 = vmatpush3.bf16.msra.mxu1 %v9316_v3  ;;  %v1122_v3 = vcvt.f32.s32 %v9375_v26  ;;  %v1164_v26 = vcvt.f32.s32 %v9380_v41  ;;  %v9546_v37 = vsel %vm2506_vm5, %v16799_v45, %v16798_v32 }
 0x2fc   : > { %v1093_v5 = vcvt.f32.s32 %v1092_v25  ;;  %vm1204_vm12 = vcmp.eq.s32.totalorder %v9054_v42, %v1110_v57  ;;  %7718 = vmatprep.subr.bf16.mxu1 %v9328_v17  ;;  %v16802_v25 = vld [vmem:[#allocation11_spill] sm:$0xff] }
 0x2fd   : > { %v9466_v60 = vsel %vm1204_vm12, 1e+10, %v9010_v6  ;;  %v1165_v23 = vshll.u32 %v1164_v26, 16 }
 0x2fe   : > { %v1096_v39 = vadd.s32 %v1095_v22, %v1093_v5  ;;  %1430 = vmin.xlane.f32.xlu1 %v9466_v60 }
 0x2ff   : > { %v1134_v2 = vpop.xlane.xlu1 %1133  ;;  %7726 = vmatpush3.bf16.msra.mxu1 %v9328_v17  ;;  %v1123_v17 = vshll.u32 %v1122_v3, 16 }
 0x300   : > { %v1135_v43 = vcvt.f32.s32 %v1134_v2  ;;  %vm1203_vm13 = vcmp.eq.s32.totalorder %v9054_v42, %v1096_v39  ;;  %7719 = vmatprep.subr.bf16.mxu1 %v9340_v27 }
 0x301   : > { %v9474_v12 = vsel %vm1203_vm13, 1e+10, %v9017_v10  ;;  %vm6990_vm14 = vmpackc.low %vm1204_vm12, %vm1203_vm13 }
 0x302   : > { %v1138_v6 = vadd.s32 %v1137_v54, %v1135_v43  ;;  %1428 = vmin.xlane.f32.xlu0 %v9474_v12  ;;  %7545 = vmatprep.mubr.msk.bf16.mxu1 %vm6990_vm14, %v16307_v21 }
 0x303   : > { %v1120_v9 = vpop.xlane.xlu1 %1119  ;;  %7727 = vmatpush3.bf16.msra.mxu1 %v9340_v27  ;;  %v1150_v27 = vcvt.f32.s32 %v9385_v0 }
 0x304   : > { %v1121_v35 = vcvt.f32.s32 %v1120_v9  ;;  %vm1206_vm15 = vcmp.eq.s32.totalorder %v9054_v42, %v1138_v6  ;;  %7720 = vmatprep.subr.bf16.mxu1 %v9352_v44 }
 0x305   : > { %v9483_v10 = vsel %vm1206_vm15, 1e+10, %v9025_v20  ;;  %v1151_v30 = vshll.u32 %v1150_v27, 16 }
 0x306   : > { %v1124_v40 = vadd.s32 %v1123_v17, %v1121_v35  ;;  %1434 = vmin.xlane.f32.xlu1 %v9483_v10 }
 0x307   : > { %v1162_v14 = vpop.xlane.xlu1 %1161  ;;  %7728 = vmatpush3.bf16.msra.mxu1 %v9352_v44 }
 0x308   : > { %v1163_v16 = vcvt.f32.s32 %v1162_v14  ;;  %vm1205_vm0 = vcmp.eq.s32.totalorder %v9054_v42, %v1124_v40 }
 0x309   : > { %v9490_v41 = vsel %vm1205_vm0, 1e+10, %v9029_v28  ;;  %vm6992_vm1 = vmpackc.low %vm1206_vm15, %vm1205_vm0 }
 0x30a   : > { %v1166_v18 = vadd.s32 %v1165_v23, %v1163_v16  ;;  %1432 = vmin.xlane.f32.xlu0 %v9490_v41  ;;  %7546 = vmatmul.mubr.msk.bf16.gmra.mrb[8].mxu1 %vm6992_vm1, %v16307_v21 }
 0x30b   : > { %v1148_v20 = vpop.xlane.xlu1 %1147 }
 0x30c   : > { %v1149_v44 = vcvt.f32.s32 %v1148_v20  ;;  %vm1208_vm2 = vcmp.eq.s32.totalorder %v9054_v42, %v1166_v18 }
 0x30d   : > { %v9497_v0 = vsel %vm1208_vm2, 1e+10, %v9037_v46 }
 0x30e   : > { %v1152_v7 = vadd.s32 %v1151_v30, %v1149_v44  ;;  %1438 = vmin.xlane.f32.xlu1 %v9497_v0 }
 0x30f   : > { %v1176_v28 = vpop.xlane.xlu1 %1175 }
 0x310   : > { %v1177_v38 = vcvt.f32.s32 %v1176_v28  ;;  %vm1207_vm3 = vcmp.eq.s32.totalorder %v9054_v42, %v1152_v7 }
 0x311   : > { %v9503_v8 = vsel %vm1207_vm3, 1e+10, %v9041_v50  ;;  %vm6994_vm4 = vmpackc.low %vm1208_vm2, %vm1207_vm3 }
 0x312   : > { %v1180_v48 = vadd.s32 %v1179_v36, %v1177_v38  ;;  %1436 = vmin.xlane.f32.xlu0 %v9503_v8  ;;  %7549 = vmatprep.mubr.msk.bf16.mxu1 %vm6994_vm4, %v16307_v21 }
 0x313   : > { %v1190_v46 = vpop.xlane.xlu1 %1189 }
 0x314   : > { %v1191_v31 = vcvt.f32.s32 %v1190_v46  ;;  %vm1209_vm6 = vcmp.eq.s32.totalorder %v9054_v42, %v1180_v48 }
 0x315   : > { %v9509_v13 = vsel %vm1209_vm6, 1e+10, %v9049_v55  ;;  %v9523_v55 = vsel %vm2507_vm9, %v9070_v56, %v9061_v53 }
 0x316   : > { %v1194_v49 = vadd.s32 %v1193_v33, %v1191_v31  ;;  %1440 = vmin.xlane.f32.xlu0 %v9509_v13 }
 0x318   : > { %vm1210_vm7 = vcmp.eq.s32.totalorder %v9054_v42, %v1194_v49 }
 0x319   : > { %v9514_v50 = vsel %vm1210_vm7, 1e+10, %v9047_v34  ;;  %vm6996_vm8 = vmpackc.low %vm1210_vm7, %vm1209_vm6  ;;  %v16797_v34 = vld [vmem:[#allocation10_spill] sm:$0xff] }
 0x31a   : > { %1442 = vmin.xlane.f32.xlu1 %v9514_v50  ;;  %7550 = vmatmul.mubr.msk.bf16.gmra.mrb[12].mxu1 %vm6996_vm8, %v16307_v21  ;;  %16800 = vst [vmem:[#allocation10_spill] sm:$0xff] %v9546_v37 }
 0x36b   : > { %v9525_v61 = vpop.xlane.xlu1 %1414 }
 0x36c   : > { %16796 = vst [vmem:[#allocation26_spill] sm:$0xff] %v9525_v61  ;;  %vm2555_vm10 = vcmp.lt.f32.partialorder %v9525_v61, %v9523_v55  ;;  %vm1445_vm11 = vcmp.le.f32.partialorder %v9404_v29, %v9525_v61 }
 0x36d   : > { %v9535_v15 = vsel %vm2555_vm10, 4, %v16797_v34  ;;  %v9538_v4 = vsel %vm1445_vm11, %v9054_v42, 128 }
 0x36e   : > { %v1491_v53 = vshra.s32 %v9538_v4, 16 }
 0x36f   : > { %v9548_v58 = vpop.xlane.xlu0 %1412 }
 0x370   : > { %16801 = vst [vmem:[#allocation7_spill] sm:$0xff] %v9548_v58  ;;  %vm2554_vm9 = vcmp.lt.f32.partialorder %v9548_v58, %v9546_v37  ;;  %v9552_v57 = vcvt.s32.f32 %v1491_v53  ;;  %vm1444_vm12 = vcmp.le.f32.partialorder %v9410_v24, %v9548_v58 }
 0x371   : > { %v9560_v22 = vsel %vm2554_vm9, 4, %v16802_v25  ;;  %v9563_v1 = vsel %vm1444_vm12, %v9054_v42, 128 }
 0x372   : > { %16803 = vst [vmem:[#allocation11_spill] sm:$0xff] %v9560_v22  ;;  %1494 = vmin.xlane.f32.xlu0 %v9552_v57  ;;  %v1477_v5 = vshra.s32 %v9563_v1, 16 }
 0x373   : > { %v9567_v39 = vpop.xlane.xlu1 %1418 }
 0x374   : > { %16804 = vst [vmem:[#allocation27_spill] sm:$0xff] %v9567_v39  ;;  %v9569_v2 = vcvt.s32.f32 %v1477_v5  ;;  %vm1447_vm5 = vcmp.le.f32.partialorder %v9417_v62, %v9567_v39 }
 0x375   : > { %v9574_v54 = vsel %vm1447_vm5, %v9054_v42, 128 }
 0x376   : > { %1480 = vmin.xlane.f32.xlu0 %v9569_v2  ;;  %v1519_v3 = vshra.s32 %v9574_v54, 16 }
 0x377   : > { %v9578_v43 = vpop.xlane.xlu0 %1416 }
 0x378   : > { %16805 = vst [vmem:[#allocation28_spill] sm:$0xff] %v9578_v43  ;;  %v9580_v6 = vcvt.s32.f32 %v1519_v3  ;;  %vm1446_vm13 = vcmp.le.f32.partialorder %v9423_v59, %v9578_v43 }
 0x379   : > { %v9585_v9 = vsel %vm1446_vm13, %v9054_v42, 128 }
 0x37a   : > { %1522 = vmin.xlane.f32.xlu0 %v9580_v6  ;;  %v1505_v17 = vshra.s32 %v9585_v9, 16 }
 0x37b   : > { %v9589_v26 = vpop.xlane.xlu1 %1422 }
 0x37c   : > { %16806 = vst [vmem:[#allocation29_spill] sm:$0xff] %v9589_v26  ;;  %v9591_v35 = vcvt.s32.f32 %v1505_v17  ;;  %vm1449_vm14 = vcmp.le.f32.partialorder %v9432_v19, %v9589_v26 }
 0x37d   : > { %v9596_v40 = vsel %vm1449_vm14, %v9054_v42, 128 }
 0x37e   : > { %1508 = vmin.xlane.f32.xlu0 %v9591_v35  ;;  %v1547_v14 = vshra.s32 %v9596_v40, 16 }
 0x37f   : > { %v9600_v23 = vpop.xlane.xlu0 %1420 }
 0x380   : > { %16807 = vst [vmem:[#allocation30_spill] sm:$0xff] %v9600_v23  ;;  %v9602_v27 = vcvt.s32.f32 %v1547_v14  ;;  %vm1448_vm15 = vcmp.le.f32.partialorder %v9440_v11, %v9600_v23 }
 0x381   : > { %v9607_v16 = vsel %vm1448_vm15, %v9054_v42, 128 }
 0x382   : > { %1550 = vmin.xlane.f32.xlu0 %v9602_v27  ;;  %v1533_v18 = vshra.s32 %v9607_v16, 16 }
 0x383   : > { %v9611_v20 = vpop.xlane.xlu1 %1426 }
 0x384   : > { %16808 = vst [vmem:[#allocation31_spill] sm:$0xff] %v9611_v20  ;;  %v9613_v30 = vcvt.s32.f32 %v1533_v18  ;;  %vm1451_vm0 = vcmp.le.f32.partialorder %v9449_v47, %v9611_v20 }
 0x385   : > { %v9618_v63 = vsel %vm1451_vm0, %v9054_v42, 128 }
 0x386   : > { %1536 = vmin.xlane.f32.xlu0 %v9613_v30  ;;  %v1575_v44 = vshra.s32 %v9618_v63, 16 }
 0x387   : > { %v9622_v7 = vpop.xlane.xlu0 %1424 }
 0x388   : > { %16809 = vst [vmem:[#allocation32_spill] sm:$0xff] %v9622_v7  ;;  %v9624_v28 = vcvt.s32.f32 %v1575_v44  ;;  %vm1450_vm1 = vcmp.le.f32.partialorder %v9457_v52, %v9622_v7 }
 0x389   : > { %v9629_v36 = vsel %vm1450_vm1, %v9054_v42, 128 }
 0x38a   : > { %1578 = vmin.xlane.f32.xlu0 %v9624_v28  ;;  %v1561_v51 = vshra.s32 %v9629_v36, 16 }
 0x38b   : > { %v9633_v38 = vpop.xlane.xlu1 %1430 }
 0x38c   : > { %16810 = vst [vmem:[#allocation33_spill] sm:$0xff] %v9633_v38  ;;  %v9635_v48 = vcvt.s32.f32 %v1561_v51  ;;  %vm1453_vm2 = vcmp.le.f32.partialorder %v9466_v60, %v9633_v38 }
 0x38d   : > { %v9640_v46 = vsel %vm1453_vm2, %v9054_v42, 128 }
 0x38e   : > { %1564 = vmin.xlane.f32.xlu0 %v9635_v48  ;;  %v1603_v33 = vshra.s32 %v9640_v46, 16 }
 0x38f   : > { %v9644_v31 = vpop.xlane.xlu0 %1428 }
 0x390   : > { %16811 = vst [vmem:[#allocation34_spill] sm:$0xff] %v9644_v31  ;;  %v9646_v49 = vcvt.s32.f32 %v1603_v33  ;;  %vm1452_vm3 = vcmp.le.f32.partialorder %v9474_v12, %v9644_v31 }
 0x391   : > { %v9651_v34 = vsel %vm1452_vm3, %v9054_v42, 128 }
 0x392   : > { %1606 = vmin.xlane.f32.xlu0 %v9646_v49  ;;  %v1589_v53 = vshra.s32 %v9651_v34, 16 }
 0x393   : > { %v9655_v32 = vpop.xlane.xlu1 %1434 }
 0x394   : > { %16812 = vst [vmem:[#allocation35_spill] sm:$0xff] %v9655_v32  ;;  %v9657_v25 = vcvt.s32.f32 %v1589_v53  ;;  %vm1455_vm4 = vcmp.le.f32.partialorder %v9483_v10, %v9655_v32 }
 0x395   : > { %v9662_v5 = vsel %vm1455_vm4, %v9054_v42, 128 }
 0x396   : > { %1592 = vmin.xlane.f32.xlu0 %v9657_v25  ;;  %v1631_v3 = vshra.s32 %v9662_v5, 16 }
 0x397   : > { %v9666_v17 = vpop.xlane.xlu0 %1432 }
 0x398   : > { %16813 = vst [vmem:[#allocation36_spill] sm:$0xff] %v9666_v17  ;;  %v9668_v14 = vcvt.s32.f32 %v1631_v3  ;;  %vm1454_vm6 = vcmp.le.f32.partialorder %v9490_v41, %v9666_v17 }
 0x399   : > { %v9673_v18 = vsel %vm1454_vm6, %v9054_v42, 128 }
 0x39a   : > { %1634 = vmin.xlane.f32.xlu0 %v9668_v14  ;;  %v1617_v44 = vshra.s32 %v9673_v18, 16 }
 0x39b   : > { %v9677_v51 = vpop.xlane.xlu1 %1438 }
 0x39c   : > { %16814 = vst [vmem:[#allocation37_spill] sm:$0xff] %v9677_v51  ;;  %v9679_v33 = vcvt.s32.f32 %v1617_v44  ;;  %vm1457_vm7 = vcmp.le.f32.partialorder %v9497_v0, %v9677_v51 }
 0x39d   : > { %v9684_v53 = vsel %vm1457_vm7, %v9054_v42, 128 }
 0x39e   : > { %1620 = vmin.xlane.f32.xlu0 %v9679_v33  ;;  %v1659_v3 = vshra.s32 %v9684_v53, 16 }
 0x39f   : > { %v9688_v21 = vpop.xlane.xlu0 %1436 }
 0x3a0   : > { %16815 = vst [vmem:[#allocation38_spill] sm:$0xff] %v9688_v21  ;;  %v9690_v56 = vcvt.s32.f32 %v1659_v3  ;;  %vm1456_vm8 = vcmp.le.f32.partialorder %v9503_v8, %v9688_v21 }
 0x3a1   : > { %v9695_v44 = vsel %vm1456_vm8, %v9054_v42, 128 }
 0x3a2   : > { %1662 = vmin.xlane.f32.xlu0 %v9690_v56  ;;  %v1645_v45 = vshra.s32 %v9695_v44, 16 }
 0x3a3   : > { %v9699_v51 = vpop.xlane.xlu0 %1440 }
 0x3a4   : > { %16816 = vst [vmem:[#allocation39_spill] sm:$0xff] %v9699_v51  ;;  %v9701_v17 = vcvt.s32.f32 %v1645_v45  ;;  %vm1458_vm11 = vcmp.le.f32.partialorder %v9509_v13, %v9699_v51 }
 0x3a5   : > { %v9706_v3 = vsel %vm1458_vm11, %v9054_v42, 128 }
 0x3a6   : > { %1648 = vmin.xlane.f32.xlu0 %v9701_v17  ;;  %v1673_v21 = vshra.s32 %v9706_v3, 16 }
 0x3a7   : > { %v9710_v32 = vpop.xlane.xlu1 %1442 }
 0x3a8   : > { %16817 = vst [vmem:[#allocation40_spill] sm:$0xff] %v9710_v32  ;;  %v9712_v31 = vcvt.s32.f32 %v1673_v21  ;;  %vm1459_vm12 = vcmp.le.f32.partialorder %v9514_v50, %v9710_v32 }
 0x3a9   : > { %v9717_v45 = vsel %vm1459_vm12, %v9054_v42, 128 }
 0x3aa   : > { %1676 = vmin.xlane.f32.xlu0 %v9712_v31  ;;  %v1687_v51 = vshra.s32 %v9717_v45, 16 }
 0x3ac   : > { %v9721_v38 = vcvt.s32.f32 %v1687_v51 }
 0x3ae   : > { %1690 = vmin.xlane.f32.xlu0 %v9721_v38 }
 0x3bd   : > { %v9724_v7 = vpop.f32.mrb[0].mxu1 }
 0x3be   : > { %16818 = vst [vmem:[#allocation41_spill] sm:$0xff] %v9724_v7  ;;  %v9726_v20 = vpop.f32.mrb[1].mxu1 }
 0x3bf   : > { %16819 = vst [vmem:[#allocation42_spill] sm:$0xff] %v9726_v20  ;;  %v9728_v21 = vpop.f32.mrb[2].mxu1 }
 0x3c0   : > { %16820 = vst [vmem:[#allocation43_spill] sm:$0xff] %v9728_v21  ;;  %v9730_v23 = vpop.f32.mrb[3].mxu1 }
 0x3c1   : > { %16821 = vst [vmem:[#allocation44_spill] sm:$0xff] %v9730_v23 }
 0x3cd   : > { %v9732_v32 = vpop.f32.mrb[4].mxu1 }
 0x3ce   : > { %16822 = vst [vmem:[#allocation45_spill] sm:$0xff] %v9732_v32  ;;  %v9734_v26 = vpop.f32.mrb[5].mxu1 }
 0x3cf   : > { %16823 = vst [vmem:[#allocation46_spill] sm:$0xff] %v9734_v26  ;;  %v9736_v43 = vpop.f32.mrb[6].mxu1 }
 0x3d0   : > { %16824 = vst [vmem:[#allocation47_spill] sm:$0xff] %v9736_v43  ;;  %v9738_v22 = vpop.f32.mrb[7].mxu1  ;;  %v1490_v43 = vand.u32 65535, %v9538_v4 }
 0x3d1   : > { %16825 = vst [vmem:[#allocation48_spill] sm:$0xff] %v9738_v22 }
 0x3d2   : > { %v1492_v22 = vcvt.s32.f32 %v1490_v43 }
 0x3dd   : > { %v9740_v51 = vpop.f32.mrb[8].mxu1 }
 0x3de   : > { %16826 = vst [vmem:[#allocation49_spill] sm:$0xff] %v9740_v51  ;;  %v9742_v58 = vpop.f32.mrb[9].mxu1  ;;  %v1476_v51 = vand.u32 65535, %v9563_v1  ;;  %v1504_v1 = vand.u32 65535, %v9585_v9  ;;  %v1532_v9 = vand.u32 65535, %v9607_v16  ;;  %v1560_v16 = vand.u32 65535, %v9629_v36 }
 0x3df   : > { %16827 = vst [vmem:[#allocation50_spill] sm:$0xff] %v9742_v58  ;;  %v9744_v37 = vpop.f32.mrb[10].mxu1  ;;  %v1588_v36 = vand.u32 65535, %v9651_v34  ;;  %v1616_v34 = vand.u32 65535, %v9673_v18  ;;  %v1644_v18 = vand.u32 65535, %v9695_v44 }
 0x3e0   : > { %16828 = vst [vmem:[#allocation51_spill] sm:$0xff] %v9744_v37  ;;  %v9746_v7 = vpop.f32.mrb[11].mxu1 }
 0x3e1   : > { %16829 = vst [vmem:[#allocation52_spill] sm:$0xff] %v9746_v7 }
 0x3ed   : > { %v9748_v20 = vpop.f32.mrb[12].mxu1 }
 0x3ee   : > { %16830 = vst [vmem:[#allocation53_spill] sm:$0xff] %v9748_v20  ;;  %v9750_v21 = vpop.f32.mrb[13].mxu1  ;;  %v1478_v20 = vcvt.s32.f32 %v1476_v51  ;;  %v1534_v51 = vcvt.s32.f32 %v1532_v9  ;;  %v1590_v9 = vcvt.s32.f32 %v1588_v36 }
 0x3ef   : > { %16831 = vst [vmem:[#allocation54_spill] sm:$0xff] %v9750_v21  ;;  %v9752_v23 = vpop.f32.mrb[14].mxu1  ;;  %v1518_v21 = vand.u32 65535, %v9574_v54  ;;  %v1546_v54 = vand.u32 65535, %v9596_v40  ;;  %v1574_v40 = vand.u32 65535, %v9618_v63  ;;  %v1602_v63 = vand.u32 65535, %v9640_v46 }
 0x3f0   : > { %16832 = vst [vmem:[#allocation55_spill] sm:$0xff] %v9752_v23  ;;  %v9754_v32 = vpop.f32.mrb[15].mxu1  ;;  %v1630_v46 = vand.u32 65535, %v9662_v5  ;;  %v1658_v5 = vand.u32 65535, %v9684_v53  ;;  %v10078_v23 = vld [vmem:[#allocation2 + $0xe0] sm:$0xff] }
 0x3f1   : > { %16833 = vst [vmem:[#allocation56_spill] sm:$0xff] %v9754_v32  ;;  %v1520_v43 = vcvt.s32.f32 %v1518_v21 }
 0x3ff   : > { %v9757_v26 = vpop.xlane.xlu0 %1494 }
 0x400   : > { %vm1496_vm5 = vcmp.eq.f32.partialorder %v9552_v57, %v9757_v26 }
 0x401   : > { %v1497_v37 = vsel %vm1496_vm5, %v1492_v22, inf  ;;  %v1506_v22 = vcvt.s32.f32 %v1504_v1  ;;  %v1576_v1 = vcvt.s32.f32 %v1574_v40 }
 0x402   : > { %1498 = vmin.xlane.f32.xlu1 %v1497_v37 }
 0x403   : > { %v9762_v7 = vpop.xlane.xlu0 %1480 }
 0x404   : > { %vm1482_vm13 = vcmp.eq.f32.partialorder %v9569_v2, %v9762_v7 }
 0x405   : > { %v1483_v32 = vsel %vm1482_vm13, %v1478_v20, inf }
 0x406   : > { %1484 = vmin.xlane.f32.xlu1 %v1483_v32  ;;  %v1548_v32 = vcvt.s32.f32 %v1546_v54 }
 0x407   : > { %v9767_v4 = vpop.xlane.xlu0 %1522 }
 0x408   : > { %vm1524_vm14 = vcmp.eq.f32.partialorder %v9580_v6, %v9767_v4 }
 0x409   : > { %v1525_v57 = vsel %vm1524_vm14, %v1520_v43, inf }
 0x40a   : > { %1526 = vmin.xlane.f32.xlu1 %v1525_v57 }
 0x40b   : > { %v9772_v37 = vpop.xlane.xlu0 %1508 }
 0x40c   : > { %vm1510_vm15 = vcmp.eq.f32.partialorder %v9591_v35, %v9772_v37 }
 0x40d   : > { %v1511_v2 = vsel %vm1510_vm15, %v1506_v22, inf  ;;  %v1562_v22 = vcvt.s32.f32 %v1560_v16  ;;  %v1660_v16 = vcvt.s32.f32 %v1658_v5 }
 0x40e   : > { %1512 = vmin.xlane.f32.xlu1 %v1511_v2  ;;  %v1604_v2 = vcvt.s32.f32 %v1602_v63  ;;  %v1686_v63 = vand.u32 65535, %v9717_v45 }
 0x40f   : > { %v9777_v20 = vpop.xlane.xlu0 %1550 }
 0x410   : > { %vm1552_vm0 = vcmp.eq.f32.partialorder %v9602_v27, %v9777_v20  ;;  %v1688_v44 = vcvt.s32.f32 %v1686_v63 }
 0x411   : > { %v1553_v6 = vsel %vm1552_vm0, %v1548_v32, inf }
 0x412   : > { %1554 = vmin.xlane.f32.xlu1 %v1553_v6 }
 0x413   : > { %v9782_v21 = vpop.xlane.xlu0 %1536 }
 0x414   : > { %vm1538_vm1 = vcmp.eq.f32.partialorder %v9613_v30, %v9782_v21 }
 0x415   : > { %v1539_v35 = vsel %vm1538_vm1, %v1534_v51, inf  ;;  %v1632_v51 = vcvt.s32.f32 %v1630_v46  ;;  %v1487_v46 = vcvt.f32.s32 %v9762_v7 }
 0x416   : > { %1540 = vmin.xlane.f32.xlu1 %v1539_v35  ;;  %v1618_v35 = vcvt.s32.f32 %v1616_v34 }
 0x417   : > { %v9787_v43 = vpop.xlane.xlu0 %1578  ;;  %v1488_v34 = vshll.u32 %v1487_v46, 16 }
 0x418   : > { %vm1580_vm2 = vcmp.eq.f32.partialorder %v9624_v28, %v9787_v43 }
 0x419   : > { %v1581_v27 = vsel %vm1580_vm2, %v1576_v1, inf }
 0x41a   : > { %1582 = vmin.xlane.f32.xlu1 %v1581_v27 }
 0x41b   : > { %v9792_v57 = vpop.xlane.xlu0 %1564 }
 0x41c   : > { %vm1566_vm3 = vcmp.eq.f32.partialorder %v9635_v48, %v9792_v57 }
 0x41d   : > { %v1567_v30 = vsel %vm1566_vm3, %v1562_v22, inf  ;;  %v1646_v22 = vcvt.s32.f32 %v1644_v18  ;;  %v16834_v18 = vmov 1.0|1.0  }
 0x41e   : > { %1568 = vmin.xlane.f32.xlu1 %v1567_v30 }
 0x41f   : > { %v9797_v54 = vpop.xlane.xlu0 %1606 }
 0x420   : > { %vm1608_vm4 = vcmp.eq.f32.partialorder %v9646_v49, %v9797_v54 }
 0x421   : > { %v1609_v28 = vsel %vm1608_vm4, %v1604_v2, inf  ;;  %v1672_v2 = vand.u32 65535, %v9706_v3 }
 0x422   : > { %1610 = vmin.xlane.f32.xlu1 %v1609_v28  ;;  %v1501_v28 = vcvt.f32.s32 %v9757_v26 }
 0x423   : > { %v9802_v32 = vpop.xlane.xlu0 %1592 }
 0x424   : > { %vm1594_vm6 = vcmp.eq.f32.partialorder %v9657_v25, %v9802_v32  ;;  %v1502_v45 = vshll.u32 %v1501_v28, 16 }
 0x425   : > { %v1595_v48 = vsel %vm1594_vm6, %v1590_v9, inf }
 0x426   : > { %1596 = vmin.xlane.f32.xlu1 %v1595_v48 }
 0x427   : > { %v9807_v6 = vpop.xlane.xlu0 %1634 }
 0x428   : > { %vm1636_vm7 = vcmp.eq.f32.partialorder %v9668_v14, %v9807_v6 }
 0x429   : > { %v1637_v49 = vsel %vm1636_vm7, %v1632_v51, inf }
 0x42a   : > { %1638 = vmin.xlane.f32.xlu1 %v1637_v49 }
 0x42b   : > { %v9812_v40 = vpop.xlane.xlu0 %1620 }
 0x42c   : > { %vm1622_vm8 = vcmp.eq.f32.partialorder %v9679_v33, %v9812_v40 }
 0x42d   : > { %v1623_v25 = vsel %vm1622_vm8, %v1618_v35, inf }
 0x42e   : > { %1624 = vmin.xlane.f32.xlu1 %v1623_v25  ;;  %v1515_v25 = vcvt.f32.s32 %v9772_v37 }
 0x42f   : > { %v9817_v1 = vpop.xlane.xlu0 %1662 }
 0x430   : > { %vm1664_vm11 = vcmp.eq.f32.partialorder %v9690_v56, %v9817_v1 }
 0x431   : > { %v1665_v14 = vsel %vm1664_vm11, %v1660_v16, inf }
 0x432   : > { %1666 = vmin.xlane.f32.xlu1 %v1665_v14  ;;  %v1516_v14 = vshll.u32 %v1515_v25, 16 }
 0x433   : > { %v9822_v27 = vpop.xlane.xlu0 %1648 }
 0x434   : > { %vm1650_vm12 = vcmp.eq.f32.partialorder %v9701_v17, %v9822_v27  ;;  %v1674_v17 = vcvt.s32.f32 %v1672_v2  ;;  %v1543_v2 = vcvt.f32.s32 %v9782_v21 }
 0x435   : > { %v1651_v53 = vsel %vm1650_vm12, %v1646_v22, inf  ;;  %v1557_v22 = vcvt.f32.s32 %v9777_v20 }
 0x436   : > { %1652 = vmin.xlane.f32.xlu1 %v1651_v53  ;;  %v1544_v28 = vshll.u32 %v1543_v2, 16 }
 0x437   : > { %v9826_v33 = vpop.xlane.xlu0 %1676 }
 0x438   : > { %vm1678_vm13 = vcmp.eq.f32.partialorder %v9712_v31, %v9826_v33 }
 0x439   : > { %v1679_v36 = vsel %vm1678_vm13, %v1674_v17, inf }
 0x43b   : > { %v9829_v30 = vpop.xlane.xlu0 %1690 }
 0x43c   : > { %vm1692_vm5 = vcmp.eq.f32.partialorder %v9721_v38, %v9829_v30  ;;  %v1529_v38 = vcvt.f32.s32 %v9767_v4 }
 0x43d   : > { %v1693_v56 = vsel %vm1692_vm5, %v1688_v44, inf  ;;  %v1558_v44 = vshll.u32 %v1557_v22, 16 }
 0x43e   : > { %1694 = vmin.xlane.f32.xlu1 %v1693_v56  ;;  %v1530_v5 = vshll.u32 %v1529_v38, 16 }
 0x442   : > { %1680 = vmin.xlane.f32.xlu1 %v1679_v36  ;;  %v8534_v36 = vld [vmem:[%s8768_s13] sm:$0xff]  }
 0x48f   : > { %v1499_v9 = vpop.xlane.xlu1 %1498 }
 0x490   : > { %v1500_v48 = vcvt.f32.s32 %v1499_v9  ;;  %v1585_v9 = vcvt.f32.s32 %v9787_v43 }
 0x492   : > { %v1503_v51 = vadd.s32 %v1502_v45, %v1500_v48  ;;  %v8535_v45 = vld [vmem:[%s8768_s13 + $0x8] sm:$0xff]  }
 0x493   : > { %v1485_v3 = vpop.xlane.xlu1 %1484 }
 0x494   : > { %v1486_v49 = vcvt.f32.s32 %v1485_v3  ;;  %vm1701_vm14 = vcmp.eq.s32.totalorder %v9054_v42, %v1503_v51  ;;  %v1586_v51 = vshll.u32 %v1585_v9, 16  ;;  %v1571_v3 = vcvt.f32.s32 %v9792_v57 }
 0x495   : > { %v9841_v31 = vsel %vm1701_vm14, 1e+10, %v9404_v29 }
 0x496   : > { %v1489_v35 = vadd.s32 %v1488_v34, %v1486_v49  ;;  %1871 = vmin.xlane.f32.xlu1 %v9841_v31  ;;  %v8536_v34 = vld [vmem:[%s8768_s13 + $0x10] sm:$0xff]   ;;  %v1572_v57 = vshll.u32 %v1571_v3, 16 }
 0x497   : > { %v1527_v26 = vpop.xlane.xlu1 %1526 }
 0x498   : > { %v1528_v7 = vcvt.f32.s32 %v1527_v26  ;;  %vm1700_vm15 = vcmp.eq.s32.totalorder %v9054_v42, %v1489_v35  ;;  %v1613_v35 = vcvt.f32.s32 %v9797_v54 }
 0x499   : > { %v9847_v16 = vsel %vm1700_vm15, 1e+10, %v9410_v24  ;;  %vm7014_vm0 = vmpackc.low %vm1701_vm14, %vm1700_vm15 }
 0x49a   : > { %v1531_v4 = vadd.s32 %v1530_v5, %v1528_v7  ;;  %1869 = vmin.xlane.f32.xlu0 %v9847_v16  ;;  %7569 = vmatprep.mubr.msk.bf16.mxu0 %vm7014_vm0, %v16834_v18  ;;  %v8537_v5 = vld [vmem:[%s8768_s13 + $0x18] sm:$0xff]  }
 0x49b   : > { %v1513_v29 = vpop.xlane.xlu1 %1512 }
 0x49c   : > { %v1514_v53 = vcvt.f32.s32 %v1513_v29  ;;  %vm1703_vm1 = vcmp.eq.s32.totalorder %v9054_v42, %v1531_v4  ;;  %v1614_v4 = vshll.u32 %v1613_v35, 16  ;;  %v1599_v29 = vcvt.f32.s32 %v9802_v32 }
 0x49d   : > { %v9854_v37 = vsel %vm1703_vm1, 1e+10, %v9417_v62 }
 0x49e   : > { %v1517_v63 = vadd.s32 %v1516_v14, %v1514_v53  ;;  %1875 = vmin.xlane.f32.xlu1 %v9854_v37  ;;  %v8538_v14 = vld [vmem:[%s8768_s13 + $0x20] sm:$0xff]   ;;  %v1600_v32 = vshll.u32 %v1599_v29, 16 }
 0x49f   : > { %v1555_v24 = vpop.xlane.xlu1 %1554 }
 0x4a0   : > { %v1556_v56 = vcvt.f32.s32 %v1555_v24  ;;  %vm1702_vm2 = vcmp.eq.s32.totalorder %v9054_v42, %v1517_v63  ;;  %v1641_v63 = vcvt.f32.s32 %v9807_v6 }
 0x4a1   : > { %v9860_v20 = vsel %vm1702_vm2, 1e+10, %v9423_v59  ;;  %vm7016_vm3 = vmpackc.low %vm1703_vm1, %vm1702_vm2 }
 0x4a2   : > { %v1559_v17 = vadd.s32 %v1558_v44, %v1556_v56  ;;  %1873 = vmin.xlane.f32.xlu0 %v9860_v20  ;;  %7570 = vmatmul.mubr.msk.bf16.vlgmr.msra.gmra.mrb[16].mxu0 %vm7016_vm3, %v16834_v18  ;;  %v8539_v44 = vld [vmem:[%s8768_s13 + $0x28] sm:$0xff]  }
 0x4a3   : > { %v1541_v62 = vpop.xlane.xlu1 %1540  ;;  %7586 = vmatpush3.bf16.msra.mxu0 %v8534_v36  ;;  %v8540_v36 = vld [vmem:[%s8768_s13 + $0x30] sm:$0xff]  }
 0x4a4   : > { %v1542_v21 = vcvt.f32.s32 %v1541_v62  ;;  %vm1705_vm4 = vcmp.eq.s32.totalorder %v9054_v42, %v1559_v17  ;;  %7587 = vmatprep.subr.bf16.mxu0 %v8535_v45  ;;  %v1642_v17 = vshll.u32 %v1641_v63, 16  ;;  %v1627_v62 = vcvt.f32.s32 %v9812_v40  ;;  %v9965_v63 = vld [vmem:[#allocation2 + $0x28] sm:$0xff] }
 0x4a5   : > { %v9871_v59 = vsel %vm1705_vm4, 1e+10, %v9432_v19  ;;  %16841 = vst [vmem:[#allocation63_spill] sm:$0xff] %v9965_v63 }
 0x4a6   : > { %v1545_v46 = vadd.s32 %v1544_v28, %v1542_v21  ;;  %1879 = vmin.xlane.f32.xlu1 %v9871_v59  ;;  %v1628_v40 = vshll.u32 %v1627_v62, 16  ;;  %v1669_v21 = vcvt.f32.s32 %v9817_v1  ;;  %v2334_v62 = vld [vmem:[#allocation2 + $0xb8] sm:$0xff] }
 0x4a7   : > { %v1583_v48 = vpop.xlane.xlu1 %1582  ;;  %7588 = vmatpush3.bf16.msra.mxu0 %v8535_v45 }
 0x4a8   : > { %v1584_v43 = vcvt.f32.s32 %v1583_v48  ;;  %vm1704_vm6 = vcmp.eq.s32.totalorder %v9054_v42, %v1545_v46  ;;  %7589 = vmatprep.subr.bf16.mxu0 %v8536_v34  ;;  %v8541_v46 = vld [vmem:[%s8768_s13 + $0x38] sm:$0xff]   ;;  %v1670_v3 = vshll.u32 %v1669_v21, 16 }
 0x4a9   : > { %v9878_v38 = vsel %vm1704_vm6, 1e+10, %v9440_v11  ;;  %vm7018_vm7 = vmpackc.low %vm1705_vm4, %vm1704_vm6 }
 0x4aa   : > { %v1587_v19 = vadd.s32 %v1586_v51, %v1584_v43  ;;  %1877 = vmin.xlane.f32.xlu0 %v9878_v38  ;;  %7573 = vmatprep.mubr.msk.bf16.mxu0 %vm7018_vm7, %v16834_v18  ;;  %v1655_v43 = vcvt.f32.s32 %v9822_v27 }
 0x4ab   : > { %v1569_v49 = vpop.xlane.xlu1 %1568  ;;  %7590 = vmatpush3.bf16.msra.mxu0 %v8536_v34 }
 0x4ac   : > { %v1570_v26 = vcvt.f32.s32 %v1569_v49  ;;  %vm1707_vm8 = vcmp.eq.s32.totalorder %v9054_v42, %v1587_v19  ;;  %7591 = vmatprep.subr.bf16.mxu0 %v8537_v5  ;;  %v1656_v49 = vshll.u32 %v1655_v43, 16 }
 0x4ad   : > { %v9890_v11 = vsel %vm1707_vm8, 1e+10, %v9449_v47 }
 0x4ae   : > { %v1573_v25 = vadd.s32 %v1572_v57, %v1570_v26  ;;  %1883 = vmin.xlane.f32.xlu1 %v9890_v11 }
 0x4af   : > { %v1611_v7 = vpop.xlane.xlu1 %1610  ;;  %7592 = vmatpush3.bf16.msra.mxu0 %v8537_v5 }
 0x4b0   : > { %v1612_v54 = vcvt.f32.s32 %v1611_v7  ;;  %vm1706_vm11 = vcmp.eq.s32.totalorder %v9054_v42, %v1573_v25  ;;  %7593 = vmatprep.subr.bf16.mxu0 %v8538_v14  ;;  %v1683_v25 = vcvt.f32.s32 %v9826_v33  ;;  %v9960_v33 = vld [vmem:[#allocation2 + $0x18] sm:$0xff] }
 0x4b1   : > { %v9897_v22 = vsel %vm1706_vm11, 1e+10, %v9457_v52  ;;  %vm7020_vm12 = vmpackc.low %vm1707_vm8, %vm1706_vm11  ;;  %16839 = vst [vmem:[#allocation61_spill] sm:$0xff] %v9960_v33 }
 0x4b2   : > { %v1615_v47 = vadd.s32 %v1614_v4, %v1612_v54  ;;  %1881 = vmin.xlane.f32.xlu0 %v9897_v22  ;;  %7574 = vmatmul.mubr.msk.bf16.gmra.mrb[20].mxu0 %vm7020_vm12, %v16834_v18  ;;  %v1684_v54 = vshll.u32 %v1683_v25, 16  ;;  %v2338_v25 = vld [vmem:[#allocation2 + $0xd8] sm:$0xff] }
 0x4b3   : > { %v1597_v53 = vpop.xlane.xlu1 %1596  ;;  %7594 = vmatpush3.bf16.msra.mxu0 %v8538_v14 }
 0x4b4   : > { %v1598_v24 = vcvt.f32.s32 %v1597_v53  ;;  %vm1709_vm5 = vcmp.eq.s32.totalorder %v9054_v42, %v1615_v47  ;;  %7595 = vmatprep.subr.bf16.mxu0 %v8539_v44  ;;  %v2330_v53 = vld [vmem:[#allocation2 + $0x98] sm:$0xff] }
 0x4b5   : > { %v9909_v52 = vsel %vm1709_vm5, 1e+10, %v9466_v60  ;;  %vm2413_vm11 = vcmp.lt.f32.partialorder %v2330_v53, %v9960_v33 }
 0x4b6   : > { %v1601_v2 = vadd.s32 %v1600_v32, %v1598_v24  ;;  %1887 = vmin.xlane.f32.xlu1 %v9909_v52  ;;  %v9962_v32 = vld [vmem:[#allocation2 + $0x10] sm:$0xff]  ;;  %v9967_v24 = vld [vmem:[#allocation2 + $0xa8] sm:$0xff] }
 0x4b7   : > { %v1639_v56 = vpop.xlane.xlu1 %1638  ;;  %7596 = vmatpush3.bf16.msra.mxu0 %v8539_v44  ;;  %16840 = vst [vmem:[#allocation62_spill] sm:$0xff] %v9962_v32  ;;  %16842 = vst [vmem:[#allocation64_spill] sm:$0xff] %v9967_v24  ;;  %v9972_v44 = vld [vmem:[#allocation2 + $0xa0] sm:$0xff] }
 0x4b8   : > { %v1640_v6 = vcvt.f32.s32 %v1639_v56  ;;  %vm1708_vm13 = vcmp.eq.s32.totalorder %v9054_v42, %v1601_v2  ;;  %7597 = vmatprep.subr.bf16.mxu0 %v8540_v36  ;;  %16844 = vst [vmem:[#allocation66_spill] sm:$0xff] %v9972_v44  ;;  %v2347_v2 = vld [vmem:[#allocation2 + $0x118] sm:$0xff]  ;;  %v2429_v56 = vsel %vm2413_vm11, %v2330_v53, %v9960_v33 }
 0x4b9   : > { %v9916_v28 = vsel %vm1708_vm13, 1e+10, %v9474_v12  ;;  %vm7022_vm14 = vmpackc.low %vm1709_vm5, %vm1708_vm13  ;;  %vm2415_vm5 = vcmp.lt.f32.partialorder %v9967_v24, %v9965_v63 }
 0x4ba   : > { %v1643_v60 = vadd.s32 %v1642_v17, %v1640_v6  ;;  %1885 = vmin.xlane.f32.xlu0 %v9916_v28  ;;  %7577 = vmatprep.mubr.msk.bf16.mxu0 %vm7022_vm14, %v16834_v18  ;;  %v9977_v17 = vld [vmem:[#allocation2 + $0x38] sm:$0xff]  ;;  %v9981_v6 = vld [vmem:[#allocation2 + $0x30] sm:$0xff]  ;;  %vm2461_vm14 = vcmp.lt.f32.partialorder %v2347_v2, %v2429_v56 }
 0x4bb   : > { %v1625_v9 = vpop.xlane.xlu1 %1624  ;;  %7598 = vmatpush3.bf16.msra.mxu0 %v8540_v36  ;;  %16845 = vst [vmem:[#allocation67_spill] sm:$0xff] %v9977_v17  ;;  %16846 = vst [vmem:[#allocation68_spill] sm:$0xff] %v9981_v6  ;;  %v2333_v36 = vld [vmem:[#allocation2 + $0xb0] sm:$0xff] }
 0x4bc   : > { %v1626_v45 = vcvt.f32.s32 %v1625_v9  ;;  %vm1711_vm15 = vcmp.eq.s32.totalorder %v9054_v42, %v1643_v60  ;;  %7599 = vmatprep.subr.bf16.mxu0 %v8541_v46  ;;  %v2346_v60 = vld [vmem:[#allocation2 + $0x110] sm:$0xff] }
 0x4bd   : > { %v9926_v12 = vsel %vm1711_vm15, 1e+10, %v9483_v10 }
 0x4be   : > { %v1629_v48 = vadd.s32 %v1628_v40, %v1626_v45  ;;  %1891 = vmin.xlane.f32.xlu1 %v9926_v12  ;;  %v16847_v40 = vmov 0   ;;  %v9992_v45 = vld [vmem:[#allocation2 + $0x128] sm:$0xff] }
 0x4bf   : > { %v1667_v51 = vpop.xlane.xlu1 %1666  ;;  %7600 = vmatpush3.bf16.msra.mxu0 %v8541_v46  ;;  %v2445_v21 = vsel %vm2413_vm11, 1, %v16847_v40  ;;  %16848 = vst [vmem:[#allocation69_spill] sm:$0xff] %v9992_v45  ;;  %v2431_v46 = vsel %vm2415_vm5, %v9967_v24, %v9965_v63  ;;  %v10142_v63 = vld [vmem:[#allocation2 + $0x168] sm:$0xff] }
 0x4c0   : > { %v1668_v34 = vcvt.f32.s32 %v1667_v51  ;;  %vm1710_vm0 = vcmp.eq.s32.totalorder %v9054_v42, %v1629_v48  ;;  %v10000_v48 = vld [vmem:[#allocation2 + $0x48] sm:$0xff]  ;;  %16861 = vst [vmem:[#allocation82_spill] sm:$0xff] %v10142_v63 }
 0x4c1   : > { %v9932_v1 = vsel %vm1710_vm0, 1e+10, %v9490_v41  ;;  %vm7024_vm1 = vmpackc.low %vm1711_vm15, %vm1710_vm0  ;;  %v1697_v41 = vcvt.f32.s32 %v9829_v30  ;;  %vm2417_vm15 = vcmp.lt.f32.partialorder %v2334_v62, %v9977_v17  ;;  %vm2416_vm0 = vcmp.lt.f32.partialorder %v2333_v36, %v9981_v6  ;;  %16849 = vst [vmem:[#allocation70_spill] sm:$0xff] %v10000_v48  ;;  %v10002_v51 = vld [vmem:[#allocation2 + $0xc8] sm:$0xff] }
 0x4c2   : > { %v1671_v19 = vadd.s32 %v1670_v3, %v1668_v34  ;;  %1889 = vmin.xlane.f32.xlu0 %v9932_v1  ;;  %7578 = vmatmul.mubr.msk.bf16.gmra.mrb[24].mxu0 %vm7024_vm1, %v16834_v18  ;;  %16850 = vst [vmem:[#allocation71_spill] sm:$0xff] %v10002_v51  ;;  %v10004_v3 = vld [vmem:[#allocation2 + $0x120] sm:$0xff] }
 0x4c3   : > { %v1653_v10 = vpop.xlane.xlu1 %1652  ;;  %16851 = vst [vmem:[#allocation72_spill] sm:$0xff] %v10004_v3  ;;  %v10011_v34 = vld [vmem:[#allocation2 + $0x40] sm:$0xff] }
 0x4c4   : > { %v1654_v57 = vcvt.f32.s32 %v1653_v10  ;;  %vm1713_vm2 = vcmp.eq.s32.totalorder %v9054_v42, %v1671_v19  ;;  %16852 = vst [vmem:[#allocation73_spill] sm:$0xff] %v10011_v34  ;;  %v10013_v19 = vld [vmem:[#allocation2 + $0xc0] sm:$0xff]  ;;  %v10015_v10 = vsel %vm2461_vm14, %v2347_v2, %v2429_v56  ;;  %v10055_v2 = vld [vmem:[#allocation2 + $0x148] sm:$0xff] }
 0x4c5   : > { %v9938_v35 = vsel %vm1713_vm2, 1e+10, %v9497_v0  ;;  %v1698_v0 = vshll.u32 %v1697_v41, 16  ;;  %16853 = vst [vmem:[#allocation74_spill] sm:$0xff] %v10013_v19  ;;  %v2433_v41 = vsel %vm2417_vm15, %v2334_v62, %v9977_v17  ;;  %16856 = vst [vmem:[#allocation77_spill] sm:$0xff] %v10055_v2  ;;  %v10058_v56 = vld [vmem:[#allocation2 + $0x68] sm:$0xff] }
 0x4c6   : > { %16835 = vst [vmem:[#allocation57_spill] sm:$0xff] %v9938_v35  ;;  %v1657_v27 = vadd.s32 %v1656_v49, %v1654_v57  ;;  %1895 = vmin.xlane.f32.xlu1 %v9938_v35  ;;  %v10017_v49 = vsel %vm2461_vm14, 2, %v2445_v21 }
 0x4c8   : > { %vm1712_vm3 = vcmp.eq.s32.totalorder %v9054_v42, %v1657_v27  ;;  %v2351_v27 = vld [vmem:[#allocation2 + $0x138] sm:$0xff] }
 0x4c9   : > { %v9944_v26 = vsel %vm1712_vm3, 1e+10, %v9503_v8  ;;  %vm7026_vm4 = vmpackc.low %vm1713_vm2, %vm1712_vm3  ;;  %vm2463_vm2 = vcmp.lt.f32.partialorder %v9992_v45, %v2431_v46  ;;  %vm2419_vm3 = vcmp.lt.f32.partialorder %v10002_v51, %v10000_v48 }
 0x4ca   : > { %16836 = vst [vmem:[#allocation58_spill] sm:$0xff] %v9944_v26  ;;  %1893 = vmin.xlane.f32.xlu0 %v9944_v26  ;;  %7581 = vmatprep.mubr.msk.bf16.mxu0 %vm7026_vm4, %v16834_v18  ;;  %v10063_v21 = vsel %vm2463_vm2, %v9992_v45, %v2431_v46  ;;  %v2435_v62 = vsel %vm2419_vm3, %v10002_v51, %v10000_v48  ;;  %v10097_v45 = vld [vmem:[#allocation2 + $0x78] sm:$0xff]  ;;  %v2341_v26 = vld [vmem:[#allocation2 + $0xf0] sm:$0xff] }
 0x4cb   : > { %v1695_v5 = vpop.xlane.xlu1 %1694  ;;  %16859 = vst [vmem:[#allocation80_spill] sm:$0xff] %v10097_v45 }
 0x4cc   : > { %v1696_v7 = vcvt.f32.s32 %v1695_v5  ;;  %v10025_v5 = vld [vmem:[#allocation2 + $0x58] sm:$0xff] }
 0x4cd   : > { %16854 = vst [vmem:[#allocation75_spill] sm:$0xff] %v10025_v5 }
 0x4ce   : > { %v1699_v4 = vadd.s32 %v1698_v0, %v1696_v7  ;;  %v2447_v0 = vsel %vm2415_vm5, 1, %v16847_v40  ;;  %v2350_v7 = vld [vmem:[#allocation2 + $0x130] sm:$0xff]  ;;  %vm2467_vm5 = vcmp.lt.f32.partialorder %v10055_v2, %v2435_v62 }
 0x4cf   : > { %v1681_v29 = vpop.xlane.xlu1 %1680  ;;  %v2483_v51 = vsel %vm2467_vm5, %v10055_v2, %v2435_v62 }
 0x4d0   : > { %v1682_v14 = vcvt.f32.s32 %v1681_v29  ;;  %vm1715_vm6 = vcmp.eq.s32.totalorder %v9054_v42, %v1699_v4  ;;  %v2432_v4 = vsel %vm2416_vm0, %v2333_v36, %v9981_v6  ;;  %v2451_v36 = vsel %vm2419_vm3, 1, %v16847_v40 }
 0x4d1   : > { %v9951_v30 = vsel %vm1715_vm6, 1e+10, %v9514_v50  ;;  %v2329_v50 = vld [vmem:[#allocation2 + $0x90] sm:$0xff]  ;;  %vm2464_vm11 = vcmp.lt.f32.partialorder %v2350_v7, %v2432_v4 }
 0x4d2   : > { %16837 = vst [vmem:[#allocation59_spill] sm:$0xff] %v9951_v30  ;;  %v1685_v8 = vadd.s32 %v1684_v54, %v1682_v14  ;;  %1899 = vmin.xlane.f32.xlu1 %v9951_v30  ;;  %vm2412_vm12 = vcmp.lt.f32.partialorder %v2329_v50, %v9962_v32  ;;  %v10047_v14 = vld [vmem:[#allocation2 + $0x50] sm:$0xff]  ;;  %v10114_v24 = vsel %vm2464_vm11, %v2350_v7, %v2432_v4  ;;  %v10149_v4 = vld [vmem:[#allocation2 + $0x160] sm:$0xff] }
 0x4d3   : > { %v2428_v9 = vsel %vm2412_vm12, %v2329_v50, %v9962_v32  ;;  %v2444_v57 = vsel %vm2412_vm12, 1, %v16847_v40  ;;  %16855 = vst [vmem:[#allocation76_spill] sm:$0xff] %v10047_v14  ;;  %v2449_v50 = vsel %vm2417_vm15, 1, %v16847_v40  ;;  %16862 = vst [vmem:[#allocation83_spill] sm:$0xff] %v10149_v4 }
 0x4d4   : > { %vm1714_vm7 = vcmp.eq.s32.totalorder %v9054_v42, %v1685_v8  ;;  %vm2460_vm1 = vcmp.lt.f32.partialorder %v2346_v60, %v2428_v9  ;;  %v2337_v8 = vld [vmem:[#allocation2 + $0xd0] sm:$0xff] }
 0x4d5   : > { %v9956_v47 = vsel %vm1714_vm7, 1e+10, %v9509_v13  ;;  %vm7028_vm8 = vmpackc.low %vm1715_vm6, %vm1714_vm7  ;;  %v9970_v13 = vld [vmem:[#allocation2 + $0x20] sm:$0xff]  ;;  %v10038_v29 = vsel %vm2460_vm1, %v2346_v60, %v2428_v9  ;;  %vm2418_vm6 = vcmp.lt.f32.partialorder %v10013_v19, %v10011_v34  ;;  %v10050_v53 = vsel %vm2460_vm1, 2, %v2444_v57  ;;  %v10074_v9 = vld [vmem:[#allocation2 + $0xe8] sm:$0xff] }
 0x4d6   : > { %16838 = vst [vmem:[#allocation60_spill] sm:$0xff] %v9956_v47  ;;  %1897 = vmin.xlane.f32.xlu0 %v9956_v47  ;;  %7582 = vmatmul.mubr.msk.bf16.gmra.mrb[28].mxu0 %vm7028_vm8, %v16834_v18  ;;  %16843 = vst [vmem:[#allocation65_spill] sm:$0xff] %v9970_v13  ;;  %vm2414_vm13 = vcmp.lt.f32.partialorder %v9972_v44, %v9970_v13  ;;  %vm2465_vm7 = vcmp.lt.f32.partialorder %v2351_v27, %v2433_v41  ;;  %v10067_v60 = vsel %vm2463_vm2, 2, %v2447_v0  ;;  %v10076_v57 = vld [vmem:[#allocation2 + $0x60] sm:$0xff]  ;;  %v2342_v47 = vld [vmem:[#allocation2 + $0xf8] sm:$0xff] }
 0x4d7   : > { %v2430_v43 = vsel %vm2414_vm13, %v9972_v44, %v9970_v13  ;;  %v2446_v54 = vsel %vm2414_vm13, 1, %v16847_v40  ;;  %vm2421_vm8 = vcmp.lt.f32.partialorder %v2338_v25, %v10025_v5  ;;  %16857 = vst [vmem:[#allocation78_spill] sm:$0xff] %v10074_v9  ;;  %v10089_v0 = vld [vmem:[#allocation2 + $0x140] sm:$0xff]  ;;  %v2434_v58 = vsel %vm2418_vm6, %v10013_v19, %v10011_v34  ;;  %v10111_v44 = vld [vmem:[#allocation2 + $0x70] sm:$0xff]  ;;  %v2359_v19 = vld [vmem:[#allocation2 + $0x178] sm:$0xff] }
 0x4d8   : > { %vm2462_vm4 = vcmp.lt.f32.partialorder %v10004_v3, %v2430_v43  ;;  %16858 = vst [vmem:[#allocation79_spill] sm:$0xff] %v10089_v0  ;;  %vm2420_vm12 = vcmp.lt.f32.partialorder %v2337_v8, %v10047_v14  ;;  %v10100_v30 = vsel %vm2465_vm7, %v2351_v27, %v2433_v41  ;;  %v2437_v17 = vsel %vm2421_vm8, %v2338_v25, %v10025_v5  ;;  %v2354_v27 = vld [vmem:[#allocation2 + $0x150] sm:$0xff] }
 0x4d9   : > { %v10083_v18 = vsel %vm2462_vm4, %v10004_v3, %v2430_v43  ;;  %v10087_v46 = vsel %vm2462_vm4, 2, %v2446_v54  ;;  %v10103_v43 = vsel %vm2465_vm7, 2, %v2449_v50  ;;  %v2448_v54 = vsel %vm2416_vm0, 1, %v16847_v40  ;;  %v2355_v3 = vld [vmem:[#allocation2 + $0x158] sm:$0xff]  ;;  %16860 = vst [vmem:[#allocation81_spill] sm:$0xff] %v10111_v44 }
 0x4da   : > { %vm2423_vm13 = vcmp.lt.f32.partialorder %v10074_v9, %v10058_v56  ;;  %vm2422_vm14 = vcmp.lt.f32.partialorder %v10078_v23, %v10076_v57  ;;  %vm2466_vm15 = vcmp.lt.f32.partialorder %v10089_v0, %v2434_v58  ;;  %v2436_v41 = vsel %vm2420_vm12, %v2337_v8, %v10047_v14  ;;  %v16864_v14 = vld [vmem:[#allocation13_spill] sm:$0xff] }
 0x4db   : > { %vm2425_vm0 = vcmp.lt.f32.partialorder %v2342_v47, %v10097_v45  ;;  %v2496_v50 = vsel %vm2464_vm11, 2, %v2448_v54  ;;  %v2450_v6 = vsel %vm2418_vm6, 1, %v16847_v40  ;;  %vm2469_vm1 = vcmp.lt.f32.partialorder %v2355_v3, %v2437_v17 }
 0x4dc   : > { %vm2424_vm2 = vcmp.lt.f32.partialorder %v2341_v26, %v10111_v44  ;;  %v2453_v48 = vsel %vm2421_vm8, 1, %v16847_v40  ;;  %v2439_v7 = vsel %vm2423_vm13, %v10074_v9, %v10058_v56  ;;  %v2438_v54 = vsel %vm2422_vm14, %v10078_v23, %v10076_v57 }
 0x4dd   : > { %v2499_v25 = vsel %vm2467_vm5, 2, %v2451_v36  ;;  %v2482_v5 = vsel %vm2466_vm15, %v10089_v0, %v2434_v58  ;;  %vm2468_vm3 = vcmp.lt.f32.partialorder %v2354_v27, %v2436_v41  ;;  %v2441_v34 = vsel %vm2425_vm0, %v2342_v47, %v10097_v45  ;;  %v2358_v36 = vld [vmem:[#allocation2 + $0x170] sm:$0xff] }
 0x4de   : > { %v2498_v13 = vsel %vm2466_vm15, 2, %v2450_v6  ;;  %v2485_v32 = vsel %vm2469_vm1, %v2355_v3, %v2437_v17  ;;  %v2452_v62 = vsel %vm2420_vm12, 1, %v16847_v40  ;;  %v2440_v2 = vsel %vm2424_vm2, %v2341_v26, %v10111_v44  ;;  %v16865_v45 = vld [vmem:[#allocation14_spill] sm:$0xff] }
 0x4df   : > { %v2501_v35 = vsel %vm2469_vm1, 2, %v2453_v48  ;;  %v2455_v33 = vsel %vm2423_vm13, 1, %v16847_v40  ;;  %vm2471_vm4 = vcmp.lt.f32.partialorder %v10142_v63, %v2439_v7  ;;  %vm2470_vm6 = vcmp.lt.f32.partialorder %v10149_v4, %v2438_v54  ;;  %v16863_v48 = vld [vmem:[#allocation12_spill] sm:$0xff] }
 0x4e0   : > { %v2484_v58 = vsel %vm2468_vm3, %v2354_v27, %v2436_v41  ;;  %v2454_v6 = vsel %vm2422_vm14, 1, %v16847_v40  ;;  %v2457_v17 = vsel %vm2425_vm0, 1, %v16847_v40  ;;  %vm2473_vm7 = vcmp.lt.f32.partialorder %v2359_v19, %v2441_v34 }
 0x4e1   : > { %vm2509_vm8 = vcmp.lt.f32.partialorder %v16863_v48, %v10015_v10  ;;  %v2500_v3 = vsel %vm2468_vm3, 2, %v2452_v62  ;;  %v2456_v8 = vsel %vm2424_vm2, 1, %v16847_v40  ;;  %vm2472_vm11 = vcmp.lt.f32.partialorder %v2358_v36, %v2440_v2 }
 0x4e2   : > { %vm2508_vm12 = vcmp.lt.f32.partialorder %v16864_v14, %v10038_v29  ;;  %v10197_v0 = vsel %vm2471_vm4, %v10142_v63, %v2439_v7  ;;  %v10199_v9 = vsel %vm2471_vm4, 2, %v2455_v33  ;;  %v10202_v47 = vsel %vm2470_vm6, %v10149_v4, %v2438_v54  ;;  %v16866_v33 = vld [vmem:[#allocation15_spill] sm:$0xff] }
 0x4e3   : > { %vm2511_vm5 = vcmp.lt.f32.partialorder %v16865_v45, %v10063_v21  ;;  %v10206_v27 = vsel %vm2470_vm6, 2, %v2454_v6  ;;  %v10208_v41 = vsel %vm2473_vm7, %v2359_v19, %v2441_v34  ;;  %v10210_v26 = vsel %vm2473_vm7, 2, %v2457_v17  ;;  %v16867_v6 = vld [vmem:[#allocation16_spill] sm:$0xff]  ;;  %v16870_v17 = vld [vmem:[#allocation19_spill] sm:$0xff] }
 0x4e4   : > { %v2525_v7 = vsel %vm2509_vm8, %v16863_v48, %v10015_v10  ;;  %vm2510_vm13 = vcmp.lt.f32.partialorder %v16866_v33, %v10083_v18  ;;  %v10219_v54 = vsel %vm2472_vm11, %v2358_v36, %v2440_v2  ;;  %v10221_v62 = vsel %vm2472_vm11, 2, %v2456_v8  ;;  %v16868_v2 = vld [vmem:[#allocation17_spill] sm:$0xff] }
 0x4e5   : > { %v2541_v34 = vsel %vm2509_vm8, 3, %v10017_v49  ;;  %v10232_v19 = vsel %vm2508_vm12, %v16864_v14, %v10038_v29  ;;  %vm2513_vm14 = vcmp.lt.f32.partialorder %v16867_v6, %v10100_v30  ;;  %vm2512_vm15 = vcmp.lt.f32.partialorder %v16868_v2, %v10114_v24  ;;  %v16869_v49 = vld [vmem:[#allocation18_spill] sm:$0xff]  ;;  %v16871_v14 = vld [vmem:[#allocation20_spill] sm:$0xff] }
 0x4e6   : > { %v10242_v36 = vsel %vm2508_vm12, 3, %v10050_v53  ;;  %v10249_v10 = vsel %vm2511_vm5, %v16865_v45, %v10063_v21  ;;  %vm2515_vm0 = vcmp.lt.f32.partialorder %v16869_v49, %v2483_v51  ;;  %vm2514_vm1 = vcmp.lt.f32.partialorder %v16870_v17, %v2482_v5 }
 0x4e7   : > { %v10257_v8 = vsel %vm2511_vm5, 3, %v10067_v60  ;;  %v10261_v29 = vsel %vm2510_vm13, %v16866_v33, %v10083_v18  ;;  %v10264_v53 = vsel %vm2510_vm13, 3, %v10087_v46  ;;  %vm2517_vm2 = vcmp.lt.f32.partialorder %v16871_v14, %v2485_v32 }
 0x4e8   : > { %v10269_v48 = vsel %vm2513_vm14, %v16867_v6, %v10100_v30  ;;  %v10272_v44 = vsel %vm2513_vm14, 3, %v10103_v43  ;;  %v10276_v21 = vsel %vm2512_vm15, %v16868_v2, %v10114_v24  ;;  %v10278_v60 = vsel %vm2512_vm15, 3, %v2496_v50  ;;  %v16872_v43 = vld [vmem:[#allocation21_spill] sm:$0xff] }
 0x4e9   : > { %v10281_v18 = vsel %vm2515_vm0, %v16869_v49, %v2483_v51  ;;  %v10283_v46 = vsel %vm2515_vm0, 3, %v2499_v25  ;;  %v10286_v45 = vsel %vm2514_vm1, %v16870_v17, %v2482_v5  ;;  %v10288_v33 = vsel %vm2514_vm1, 3, %v2498_v13  ;;  %v16873_v5 = vld [vmem:[#allocation22_spill] sm:$0xff] }
 0x4ea   : > { %v10293_v30 = vsel %vm2517_vm2, %v16871_v14, %v2485_v32  ;;  %vm2516_vm3 = vcmp.lt.f32.partialorder %v16872_v43, %v2484_v58  ;;  %v2571_v24 = vsel %vm2555_vm10, %v9525_v61, %v9523_v55  ;;  %vm16476_vm4 = vcmask 7168   ;;  %v16876_v61 = vld [vmem:[#allocation23_spill] sm:$0xff] }
 0x4eb   : > { %vm2519_vm6 = vcmp.lt.f32.partialorder %v16873_v5, %v10197_v0  ;;  %vm2557_vm7 = vcmp.lt.f32.partialorder %v9567_v39, %v2525_v7  ;;  %v10311_v13 = vsel %vm2517_vm2, 3, %v2501_v35  ;;  %v10321_v6 = vsel %vm2516_vm3, %v16872_v43, %v2484_v58  ;;  %v16877_v35 = vld [vmem:[#allocation10_spill] sm:$0xff]  ;;  %v16878_v32 = vld [vmem:[#allocation7_spill] sm:$0xff] }
 0x4ec   : > { %v10323_v2 = vsel %vm2516_vm3, 3, %v2500_v3  ;;  %vm2518_vm10 = vcmp.lt.f32.partialorder %v16876_v61, %v10202_v47  ;;  %v2570_v58 = vsel %vm2554_vm9, %v16878_v32, %v16877_v35  ;;  %v2573_v3 = vsel %vm2557_vm7, %v9567_v39, %v2525_v7  ;;  %v16880_v14 = vld [vmem:[#allocation11_spill] sm:$0xff] }
 0x4ed   : > { %v16400_v7 = vmov 0.0  }
 0x523   : > { %v10301_v51 = vpop.xlane.xlu1 %1871 }
 0x524   : > { %vm2603_vm8 = vcmp.lt.f32.partialorder %v10301_v51, %v2571_v24  ;;  %vm1902_vm11 = vcmp.le.f32.partialorder %v9841_v31, %v10301_v51 }
 0x525   : > { %v2619_v50 = vsel %vm2603_vm8, %v10301_v51, %v2571_v24  ;;  %v10315_v55 = vsel %vm2603_vm8, 5, %v9535_v15  ;;  %v10318_v25 = vsel %vm1902_vm11, %v9054_v42, 128  ;;  %v10334_v15 = vsel %vm2519_vm6, %v16873_v5, %v10197_v0  ;;  %v16887_v0 = vld [vmem:[#allocation25_spill] sm:$0xff] }
 0x526   : > { %16874 = vst [vmem:[#allocation84_spill] sm:$0xff] %v10315_v55  ;;  %16875 = vst [vmem:[#allocation85_spill] sm:$0xff] %v10318_v25  ;;  %v1948_v31 = vshra.s32 %v10318_v25, 16  ;;  %vm2811_vm13 = vcmp.eq.s32.totalorder %v10315_v55, 1  ;;  %v2589_v25 = vsel %vm2557_vm7, 4, %v2541_v34  ;;  %vm2971_vm15 = vcmp.eq.s32.totalorder %v10315_v55, 2 }
 0x527   : > { %6204 = vst.msk [vmem:[#allocation2 + $0x8] sm:$0xff] %vm16476_vm4, %v2619_v50  ;;  %v10344_v24 = vpop.xlane.xlu0 %1869  ;;  %v10402_v63 = vsel %vm2971_vm15, 1.0, %v16400_v7  ;;  %vm2521_vm3 = vcmp.lt.f32.partialorder %v16887_v0, %v10208_v41 }
 0x528   : > { %vm2602_vm12 = vcmp.lt.f32.partialorder %v10344_v24, %v2570_v58  ;;  %v10347_v50 = vcvt.s32.f32 %v1948_v31  ;;  %vm1901_vm5 = vcmp.le.f32.partialorder %v9847_v16, %v10344_v24  ;;  %v16882_v16 = vld [vmem:[#allocation28_spill] sm:$0xff]  ;;  %16886 = vst [vmem:[#allocation88_spill] sm:$0xff] %v10402_v63 }
 0x529   : > { %v2618_v35 = vsel %vm2602_vm12, %v10344_v24, %v2570_v58  ;;  %v10356_v43 = vsel %vm2602_vm12, 5, %v16880_v14  ;;  %v10359_v32 = vsel %vm1901_vm5, %v9054_v42, 128  ;;  %vm2556_vm0 = vcmp.lt.f32.partialorder %v16882_v16, %v10232_v19 }
 0x52a   : > { %16879 = vst [vmem:[#allocation23_spill] sm:$0xff] %v10347_v50  ;;  %16881 = vst [vmem:[#allocation10_spill] sm:$0xff] %v10359_v32  ;;  %1951 = vmin.xlane.f32.xlu0 %v10347_v50  ;;  %v1934_v31 = vshra.s32 %v10359_v32, 16  ;;  %vm2810_vm9 = vcmp.eq.s32.totalorder %v10356_v43, 1  ;;  %vm2970_vm14 = vcmp.eq.s32.totalorder %v10356_v43, 2  ;;  %v10379_v58 = vsel %vm2811_vm13, 1.0, %v16400_v7 }
 0x52b   : > { %6203 = vst.msk [vmem:[#allocation2] sm:$0xff] %vm16476_vm4, %v2618_v35  ;;  %v10369_v14 = vpop.xlane.xlu1 %1875  ;;  %v10374_v34 = vsel %vm2810_vm9, 1.0, %v16400_v7  ;;  %v10384_v35 = vsel %vm2970_vm14, 1.0, %v16400_v7  ;;  %v16888_v50 = vld [vmem:[#allocation29_spill] sm:$0xff] }
 0x52c   : > { %16883 = vst [vmem:[#allocation11_spill] sm:$0xff] %v10384_v35  ;;  %vm2605_vm1 = vcmp.lt.f32.partialorder %v10369_v14, %v2573_v3  ;;  %v10387_v32 = vcvt.s32.f32 %v1934_v31  ;;  %vm1904_vm2 = vcmp.le.f32.partialorder %v9854_v37, %v10369_v14  ;;  %v10408_v37 = vsel %vm2519_vm6, 3, %v10199_v9 }
 0x52d   : > { %v2621_v39 = vsel %vm2605_vm1, %v10369_v14, %v2573_v3  ;;  %v10394_v49 = vsel %vm2605_vm1, 5, %v2589_v25  ;;  %v10397_v17 = vsel %vm1904_vm2, %v9054_v42, 128  ;;  %v10415_v25 = vsel %vm2518_vm10, %v16876_v61, %v10202_v47 }
 0x52e   : > { %16884 = vst [vmem:[#allocation86_spill] sm:$0xff] %v10387_v32  ;;  %16885 = vst [vmem:[#allocation87_spill] sm:$0xff] %v10397_v17  ;;  %1937 = vmin.xlane.f32.xlu0 %v10387_v32  ;;  %v1976_v3 = vshra.s32 %v10397_v17, 16  ;;  %v2572_v9 = vsel %vm2556_vm0, %v16882_v16, %v10232_v19  ;;  %vm2559_vm6 = vcmp.lt.f32.partialorder %v16888_v50, %v10249_v10  ;;  %vm2653_vm8 = vcmp.eq.s32.totalorder %v10394_v49, 0  ;;  %v16890_v17 = vld [vmem:[#allocation24_spill] sm:$0xff] }
 0x52f   : > { %6206 = vst.msk [vmem:[#allocation2 + $0x18] sm:$0xff] %vm16476_vm4, %v2621_v39  ;;  %v2588_v39 = vsel %vm2556_vm0, 4, %v10242_v36  ;;  %v10435_v7 = vpop.xlane.xlu0 %1873  ;;  %vm2520_vm12 = vcmp.lt.f32.partialorder %v16890_v17, %v10219_v54  ;;  %v2575_v16 = vsel %vm2559_vm6, %v16888_v50, %v10249_v10  ;;  %v16894_v35 = vmov 0.0  }
 0x530   : > { %vm2604_vm7 = vcmp.lt.f32.partialorder %v10435_v7, %v2572_v9  ;;  %v10438_v31 = vcvt.s32.f32 %v1976_v3  ;;  %vm1903_vm11 = vcmp.le.f32.partialorder %v9860_v20, %v10435_v7  ;;  %v2591_v3 = vsel %vm2559_vm6, 4, %v10257_v8 }
 0x531   : > { %v2620_v19 = vsel %vm2604_vm7, %v10435_v7, %v2572_v9  ;;  %v10446_v36 = vsel %vm2604_vm7, 5, %v2588_v39  ;;  %v10449_v32 = vsel %vm1903_vm11, %v9054_v42, 128  ;;  %v16892_v9 = vld [vmem:[#allocation30_spill] sm:$0xff]  ;;  %v16893_v39 = vld [vmem:[#allocation31_spill] sm:$0xff]  ;;  %v7065_v8 = vsel %vm2653_vm8, 1.0, %v16894_v35 }
 0x532   : > { %16889 = vst [vmem:[#allocation89_spill] sm:$0xff] %v10438_v31  ;;  %16891 = vst [vmem:[#allocation90_spill] sm:$0xff] %v10449_v32  ;;  %1979 = vmin.xlane.f32.xlu0 %v10438_v31  ;;  %vm2652_vm5 = vcmp.eq.s32.totalorder %v10446_v36, 0  ;;  %v1962_v20 = vshra.s32 %v10449_v32, 16  ;;  %vm2558_vm0 = vcmp.lt.f32.partialorder %v16892_v9, %v10261_v29  ;;  %vm2561_vm1 = vcmp.lt.f32.partialorder %v16893_v39, %v10269_v48 }
 0x533   : > { %6205 = vst.msk [vmem:[#allocation2 + $0x10] sm:$0xff] %vm16476_vm4, %v2620_v19  ;;  %v10462_v5 = vpop.xlane.xlu1 %1879  ;;  %v7064_v10 = vsel %vm2652_vm5, 1.0, %v16894_v35  ;;  %v10479_v31 = vsel %vm2518_vm10, 3, %v10206_v27  ;;  %v10505_v47 = vsel %vm2520_vm12, %v16890_v17, %v10219_v54 }
 0x534   : > { %vm2607_vm2 = vcmp.lt.f32.partialorder %v10462_v5, %v2575_v16  ;;  %v7811_v19 = vpack.i.bf16 %v7065_v8, %v7064_v10  ;;  %v10471_v32 = vcvt.s32.f32 %v1962_v20  ;;  %vm1906_vm6 = vcmp.le.f32.partialorder %v9871_v59, %v10462_v5  ;;  %v16899_v8 = vld [vmem:[#allocation32_spill] sm:$0xff] }
 0x535   : > { %v2623_v50 = vsel %vm2607_vm2, %v10462_v5, %v2575_v16  ;;  %v10482_v63 = vsel %vm2607_vm2, 5, %v2591_v3  ;;  %v10485_v4 = vsel %vm1906_vm6, %v9054_v42, 128  ;;  %v10492_v20 = vsel %vm2521_vm3, %v16887_v0, %v10208_v41 }
 0x536   : > { %16895 = vst [vmem:[#allocation91_spill] sm:$0xff] %v10471_v32  ;;  %16896 = vst [vmem:[#allocation92_spill] sm:$0xff] %v10485_v4  ;;  %v10498_v59 = vsel %vm2521_vm3, 3, %v10210_v26  ;;  %7812 = vperm.xlu1 %7810, %v7811_v19   ;;  %1965 = vmin.xlane.f32.xlu0 %v10471_v32  ;;  %v2004_v27 = vshra.s32 %v10485_v4, 16  ;;  %v10514_v41 = vsel %vm2520_vm12, 3, %v10221_v62  ;;  %v2574_v26 = vsel %vm2558_vm0, %v16892_v9, %v10261_v29  ;;  %v16900_v19 = vld [vmem:[#allocation33_spill] sm:$0xff] }
 0x537   : > { %6208 = vst.msk [vmem:[#allocation2 + $0x28] sm:$0xff] %vm16476_vm4, %v2623_v50  ;;  %v2590_v50 = vsel %vm2558_vm0, 4, %v10264_v53  ;;  %v2577_v16 = vsel %vm2561_vm1, %v16893_v39, %v10269_v48  ;;  %v10530_v54 = vpop.xlane.xlu0 %1877  ;;  %vm16422_vm3 = vcmp.eq.s32.totalorder %v10482_v63, 0  ;;  %v2593_v29 = vsel %vm2561_vm1, 4, %v10272_v44  ;;  %v16901_v44 = vld [vmem:[#allocation34_spill] sm:$0xff]  ;;  %v16902_v48 = vld [vmem:[#allocation35_spill] sm:$0xff] }
 0x538   : > { %vm2606_vm10 = vcmp.lt.f32.partialorder %v10530_v54, %v2574_v26  ;;  %v10533_v62 = vcvt.s32.f32 %v2004_v27  ;;  %vm1905_vm7 = vcmp.le.f32.partialorder %v9878_v38, %v10530_v54  ;;  %vm2560_vm11 = vcmp.lt.f32.partialorder %v16899_v8, %v10276_v21 }
 0x539   : > { %v2622_v53 = vsel %vm2606_vm10, %v10530_v54, %v2574_v26  ;;  %v10543_v3 = vsel %vm2606_vm10, 5, %v2590_v50  ;;  %v10546_v10 = vsel %vm1905_vm7, %v9054_v42, 128  ;;  %vm2563_vm12 = vcmp.lt.f32.partialorder %v16900_v19, %v10281_v18 }
 0x53a   : > { %16897 = vst [vmem:[#allocation93_spill] sm:$0xff] %v10533_v62  ;;  %16898 = vst [vmem:[#allocation94_spill] sm:$0xff] %v10546_v10  ;;  %2007 = vmin.xlane.f32.xlu0 %v10533_v62  ;;  %vm2654_vm0 = vcmp.eq.s32.totalorder %v10543_v3, 0  ;;  %v1990_v38 = vshra.s32 %v10546_v10, 16  ;;  %vm2562_vm1 = vcmp.lt.f32.partialorder %v16901_v44, %v10286_v45  ;;  %vm2565_vm2 = vcmp.lt.f32.partialorder %v16902_v48, %v10293_v30 }
 0x53b   : > { %6207 = vst.msk [vmem:[#allocation2 + $0x20] sm:$0xff] %vm16476_vm4, %v2622_v53  ;;  %v10560_v27 = vpop.xlane.xlu1 %1883  ;;  %v7066_v26 = vsel %vm2654_vm0, 1.0, %v16894_v35  ;;  %v7067_v50 = vsel %vm16422_vm3, 1.0, %v16894_v35  ;;  %v2576_v62 = vsel %vm2560_vm11, %v16899_v8, %v10276_v21  ;;  %v2578_v21 = vsel %vm2562_vm1, %v16901_v44, %v10286_v45 }
 0x53c   : > { %vm2609_vm6 = vcmp.lt.f32.partialorder %v10560_v27, %v2577_v16  ;;  %v7816_v53 = vpack.i.bf16 %v7067_v50, %v7066_v26  ;;  %v10569_v10 = vcvt.s32.f32 %v1990_v38  ;;  %vm1908_vm10 = vcmp.le.f32.partialorder %v9890_v11, %v10560_v27 }
 0x53d   : > { %v2625_v4 = vsel %vm2609_vm6, %v10560_v27, %v2577_v16  ;;  %v10579_v32 = vsel %vm2609_vm6, 5, %v2593_v29  ;;  %v10582_v0 = vsel %vm1908_vm10, %v9054_v42, 128  ;;  %v2592_v38 = vsel %vm2560_vm11, 4, %v10278_v60 }
 0x53e   : > { %16903 = vst [vmem:[#allocation95_spill] sm:$0xff] %v10569_v10  ;;  %16904 = vst [vmem:[#allocation96_spill] sm:$0xff] %v10582_v0  ;;  %v2579_v11 = vsel %vm2563_vm12, %v16900_v19, %v10281_v18  ;;  %v2595_v16 = vsel %vm2563_vm12, 4, %v10283_v46  ;;  %7817 = vperm.xlu1 %7810, %v7816_v53   ;;  %1993 = vmin.xlane.f32.xlu0 %v10569_v10  ;;  %v2032_v29 = vshra.s32 %v10582_v0, 16  ;;  %v2594_v60 = vsel %vm2562_vm1, 4, %v10288_v33  ;;  %v16905_v18 = vld [vmem:[#allocation36_spill] sm:$0xff] }
 0x53f   : > { %6210 = vst.msk [vmem:[#allocation2 + $0x38] sm:$0xff] %vm16476_vm4, %v2625_v4  ;;  %v10614_v4 = vsel %vm2565_vm2, %v16902_v48, %v10293_v30  ;;  %vm2564_vm7 = vcmp.lt.f32.partialorder %v16905_v18, %v10321_v6  ;;  %v10618_v46 = vpop.xlane.xlu0 %1881  ;;  %vm2657_vm12 = vcmp.eq.s32.totalorder %v10579_v32, 0  ;;  %v2597_v45 = vsel %vm2565_vm2, 4, %v10311_v13  ;;  %v16909_v13 = vld [vmem:[#allocation38_spill] sm:$0xff] }
 0x540   : > { %vm2608_vm11 = vcmp.lt.f32.partialorder %v10618_v46, %v2576_v62  ;;  %v10621_v26 = vcvt.s32.f32 %v2032_v29  ;;  %vm1907_vm1 = vcmp.le.f32.partialorder %v9897_v22, %v10618_v46  ;;  %v10641_v29 = vsel %vm2564_vm7, %v16905_v18, %v10321_v6  ;;  %v16908_v22 = vld [vmem:[#allocation37_spill] sm:$0xff] }
 0x541   : > { %v2624_v33 = vsel %vm2608_vm11, %v10618_v46, %v2576_v62  ;;  %v10631_v50 = vsel %vm2608_vm11, 5, %v2592_v38  ;;  %v10634_v53 = vsel %vm1907_vm1, %v9054_v42, 128  ;;  %vm2567_vm6 = vcmp.lt.f32.partialorder %v16908_v22, %v10334_v15  ;;  %v16910_v62 = vld [vmem:[#allocation39_spill] sm:$0xff]  ;;  %v16935_v18 = vld [vmem:[#allocation5_spill] sm:$0xff] }
 0x542   : > { %16906 = vst [vmem:[#allocation97_spill] sm:$0xff] %v10621_v26  ;;  %16907 = vst [vmem:[#allocation98_spill] sm:$0xff] %v10634_v53  ;;  %2035 = vmin.xlane.f32.xlu0 %v10621_v26  ;;  %vm2656_vm2 = vcmp.eq.s32.totalorder %v10631_v50, 0  ;;  %v2018_v30 = vshra.s32 %v10634_v53, 16  ;;  %vm2566_vm10 = vcmp.lt.f32.partialorder %v16909_v13, %v10415_v25  ;;  %vm2568_vm11 = vcmp.lt.f32.partialorder %v16910_v62, %v10505_v47 }
 0x543   : > { %6209 = vst.msk [vmem:[#allocation2 + $0x30] sm:$0xff] %vm16476_vm4, %v2624_v33  ;;  %v10653_v38 = vpop.xlane.xlu1 %1887  ;;  %v7068_v0 = vsel %vm2656_vm2, 1.0, %v16894_v35  ;;  %v7069_v33 = vsel %vm2657_vm12, 1.0, %v16894_v35  ;;  %v10670_v10 = vsel %vm2564_vm7, 4, %v10323_v2  ;;  %v10696_v6 = vsel %vm2566_vm10, %v16909_v13, %v10415_v25 }
 0x544   : > { %vm2611_vm1 = vcmp.lt.f32.partialorder %v10653_v38, %v2579_v11  ;;  %v7821_v26 = vpack.i.bf16 %v7069_v33, %v7068_v0  ;;  %v10662_v53 = vcvt.s32.f32 %v2018_v30  ;;  %vm1910_vm3 = vcmp.le.f32.partialorder %v9909_v52, %v10653_v38  ;;  %v8542_v30 = vld [vmem:[#allocation2 + $0x88] sm:$0xff] }
 0x545   : > { %v2627_v48 = vsel %vm2611_vm1, %v10653_v38, %v2579_v11  ;;  %v10673_v17 = vsel %vm2611_vm1, 5, %v2595_v16  ;;  %v10676_v39 = vsel %vm1910_vm3, %v9054_v42, 128  ;;  %v10683_v0 = vsel %vm2567_vm6, %v16908_v22, %v10334_v15 }
 0x546   : > { %16911 = vst [vmem:[#allocation99_spill] sm:$0xff] %v10662_v53  ;;  %16912 = vst [vmem:[#allocation100_spill] sm:$0xff] %v10676_v39  ;;  %v10689_v52 = vsel %vm2567_vm6, 4, %v10408_v37  ;;  %7822 = vperm.xlu1 %7810, %v7821_v26   ;;  %2021 = vmin.xlane.f32.xlu0 %v10662_v53  ;;  %v2060_v2 = vshra.s32 %v10676_v39, 16  ;;  %v10705_v15 = vsel %vm2566_vm10, 4, %v10479_v31  ;;  %v10712_v37 = vsel %vm2568_vm11, %v16910_v62, %v10505_v47  ;;  %v16914_v31 = vld [vmem:[#allocation40_spill] sm:$0xff] }
 0x547   : > { %6212 = vst.msk [vmem:[#allocation2 + $0x48] sm:$0xff] %vm16476_vm4, %v2627_v48  ;;  %v10718_v48 = vsel %vm2568_vm11, 4, %v10514_v41  ;;  %vm16427_vm3 = vcmp.eq.s32.totalorder %v10315_v55, 5  ;;  %v10721_v11 = vpop.xlane.xlu0 %1885  ;;  %vm2659_vm6 = vcmp.eq.s32.totalorder %v10673_v17, 0  ;;  %vm2569_vm1 = vcmp.lt.f32.partialorder %v16914_v31, %v10492_v20  ;;  %v8543_v39 = vld [vmem:[#allocation2 + $0x108] sm:$0xff] }
 0x548   : > { %vm2610_vm7 = vcmp.lt.f32.partialorder %v10721_v11, %v2578_v21  ;;  %v10724_v25 = vcvt.s32.f32 %v2060_v2  ;;  %vm1909_vm10 = vcmp.le.f32.partialorder %v9916_v28, %v10721_v11  ;;  %v10740_v26 = vsel %vm16427_vm3, 3e+38, %v10301_v51 }
 0x549   : > { %v2626_v47 = vsel %vm2610_vm7, %v10721_v11, %v2578_v21  ;;  %v10732_v41 = vsel %vm2610_vm7, 5, %v2594_v60  ;;  %v10735_v16 = vsel %vm1909_vm10, %v9054_v42, 128  ;;  %16916 = vst [vmem:[#allocation103_spill] sm:$0xff] %v10740_v26  ;;  %v10748_v21 = vsel %vm2811_vm13, 3e+38, %v8542_v30  ;;  %v17011_v26 = vld [vmem:[#allocation80_spill] sm:$0xff] }
 0x54a   : > { %16913 = vst [vmem:[#allocation101_spill] sm:$0xff] %v10724_v25  ;;  %16915 = vst [vmem:[#allocation102_spill] sm:$0xff] %v10735_v16  ;;  %2063 = vmin.xlane.f32.xlu0 %v10724_v25  ;;  %vm2658_vm11 = vcmp.eq.s32.totalorder %v10732_v41, 0  ;;  %v2046_v28 = vshra.s32 %v10735_v16, 16  ;;  %vm16437_vm7 = vcmp.eq.s32.totalorder %v10356_v43, 5  ;;  %vm16432_vm10 = vcmp.eq.s32.totalorder %v10394_v49, 5 }
 0x54b   : > { %6211 = vst.msk [vmem:[#allocation2 + $0x40] sm:$0xff] %vm16476_vm4, %v2626_v47  ;;  %16917 = vst [vmem:[#allocation104_spill] sm:$0xff] %v10748_v21  ;;  %v10752_v60 = vpop.xlane.xlu1 %1891  ;;  %v7070_v51 = vsel %vm2658_vm11, 1.0, %v16894_v35  ;;  %v7071_v33 = vsel %vm2659_vm6, 1.0, %v16894_v35  ;;  %v10775_v53 = vsel %vm2971_vm15, 3e+38, %v8543_v39 }
 0x54c   : > { %16918 = vst [vmem:[#allocation105_spill] sm:$0xff] %v10752_v60  ;;  %vm2613_vm3 = vcmp.lt.f32.partialorder %v10752_v60, %v10614_v4  ;;  %v7826_v2 = vpack.i.bf16 %v7071_v33, %v7070_v51  ;;  %v10762_v47 = vcvt.s32.f32 %v2046_v28  ;;  %vm1912_vm13 = vcmp.le.f32.partialorder %v9926_v12, %v10752_v60  ;;  %16921 = vst [vmem:[#allocation108_spill] sm:$0xff] %v10775_v53  ;;  %v8544_v39 = vld [vmem:[#allocation2 + $0x80] sm:$0xff] }
 0x54d   : > { %v2629_v30 = vsel %vm2613_vm3, %v10752_v60, %v10614_v4  ;;  %v10768_v16 = vsel %vm2613_vm3, 5, %v2597_v45  ;;  %v10771_v25 = vsel %vm1912_vm13, %v9054_v42, 128  ;;  %v10781_v28 = vsel %vm2569_vm1, 4, %v10498_v59 }
 0x54e   : > { %16919 = vst [vmem:[#allocation106_spill] sm:$0xff] %v10762_v47  ;;  %16920 = vst [vmem:[#allocation107_spill] sm:$0xff] %v10771_v25  ;;  %v10786_v12 = vsel %vm16437_vm7, 3e+38, %v10344_v24  ;;  %7827 = vperm.xlu1 %7810, %v7826_v2   ;;  %2049 = vmin.xlane.f32.xlu0 %v10762_v47  ;;  %v2088_v4 = vshra.s32 %v10771_v25, 16  ;;  %v8545_v24 = vld [vmem:[#allocation2 + $0x100] sm:$0xff] }
 0x54f   : > { %16922 = vst [vmem:[#allocation109_spill] sm:$0xff] %v10786_v12  ;;  %6214 = vst.msk [vmem:[#allocation2 + $0x58] sm:$0xff] %vm16476_vm4, %v2629_v30  ;;  %v10793_v45 = vsel %vm2810_vm9, 3e+38, %v8544_v39  ;;  %v10798_v59 = vsel %vm16432_vm10, 3e+38, %v10369_v14  ;;  %v10800_v51 = vpop.xlane.xlu0 %1889 }
 0x550   : > { %16923 = vst [vmem:[#allocation110_spill] sm:$0xff] %v10793_v45  ;;  %16924 = vst [vmem:[#allocation111_spill] sm:$0xff] %v10798_v59  ;;  %v10804_v33 = vsel %vm2970_vm14, 3e+38, %v8545_v24  ;;  %vm2650_vm15 = vcmp.eq.s32.totalorder %v10356_v43, 0  ;;  %vm2651_vm3 = vcmp.eq.s32.totalorder %v10315_v55, 0  ;;  %vm2612_vm9 = vcmp.lt.f32.partialorder %v10800_v51, %v10641_v29 }
 0x551   : > { %16925 = vst [vmem:[#allocation112_spill] sm:$0xff] %v10800_v51  ;;  %16926 = vst [vmem:[#allocation113_spill] sm:$0xff] %v10804_v33  ;;  %v10810_v2 = vcvt.s32.f32 %v2088_v4  ;;  %vm16452_vm13 = vcmp.eq.s32.totalorder %v10768_v16, 0  ;;  %vm1911_vm10 = vcmp.le.f32.partialorder %v9932_v1, %v10800_v51  ;;  %v16928_v14 = vld [vmem:[#allocation61_spill] sm:$0xff]  ;;  %v2628_v39 = vsel %vm2612_vm9, %v10800_v51, %v10641_v29  ;;  %v8549_v12 = vld [vmem:[#allocation2 + $0xb8] sm:$0xff] }
 0x552   : > { %v10818_v30 = vsel %vm2653_vm8, 3e+38, %v16928_v14  ;;  %v10823_v24 = vsel %vm2612_vm9, 5, %v10670_v10  ;;  %v10826_v25 = vsel %vm1911_vm10, %v9054_v42, 128  ;;  %6213 = vst.msk [vmem:[#allocation2 + $0x50] sm:$0xff] %vm16476_vm4, %v2628_v39  ;;  %v10835_v4 = vsel %vm2650_vm15, 1.0, %v16894_v35 }
 0x553   : > { %16927 = vst [vmem:[#allocation114_spill] sm:$0xff] %v10810_v2  ;;  %16929 = vst [vmem:[#allocation61_spill] sm:$0xff] %v10818_v30  ;;  %2091 = vmin.xlane.f32.xlu0 %v10810_v2  ;;  %vm16448_vm14 = vcmp.eq.s32.totalorder %v10823_v24, 0  ;;  %v2074_v1 = vshra.s32 %v10826_v25, 16  ;;  %v10840_v10 = vsel %vm2651_vm3, 1.0, %v16894_v35  ;;  %vm16447_vm8 = vcmp.eq.s32.totalorder %v10446_v36, 5  ;;  %v10843_v29 = vpop.xlane.xlu1 %1895 }
 0x554   : > { %16930 = vst [vmem:[#allocation115_spill] sm:$0xff] %v10826_v25  ;;  %v7072_v14 = vsel %vm16448_vm14, 1.0, %v16894_v35  ;;  %v7073_v39 = vsel %vm16452_vm13, 1.0, %v16894_v35  ;;  %vm2815_vm10 = vcmp.eq.s32.totalorder %v10482_v63, 1  ;;  %vm2615_vm9 = vcmp.lt.f32.partialorder %v10843_v29, %v10683_v0  ;;  %v16932_v47 = vld [vmem:[#allocation57_spill] sm:$0xff] }
 0x555   : > { %v7831_v25 = vpack.i.bf16 %v7073_v39, %v7072_v14  ;;  %v10854_v2 = vcvt.s32.f32 %v2074_v1  ;;  %vm1914_vm7 = vcmp.le.f32.partialorder %v16932_v47, %v10843_v29  ;;  %v2631_v62 = vsel %vm2615_vm9, %v10843_v29, %v10683_v0  ;;  %v16938_v47 = vld [vmem:[#allocation62_spill] sm:$0xff]  ;;  %v16942_v39 = vld [vmem:[#allocation63_spill] sm:$0xff] }
 0x556   : > { %v10861_v60 = vsel %vm2615_vm9, 5, %v10689_v52  ;;  %v10864_v51 = vsel %vm1914_vm7, %v9054_v42, 128  ;;  %v10869_v8 = vsel %vm2650_vm15, 3e+38, %v16935_v18  ;;  %v10874_v1 = vsel %vm16447_vm8, 3e+38, %v10435_v7 }
 0x557   : > { %16931 = vst [vmem:[#allocation116_spill] sm:$0xff] %v10854_v2  ;;  %16933 = vst [vmem:[#allocation57_spill] sm:$0xff] %v10861_v60  ;;  %v10879_v0 = vsel %vm2652_vm5, 3e+38, %v16938_v47  ;;  %7832 = vperm.xlu1 %7810, %v7831_v25   ;;  %2077 = vmin.xlane.f32.xlu0 %v10854_v2  ;;  %v2116_v52 = vshra.s32 %v10864_v51, 16  ;;  %vm2814_vm7 = vcmp.eq.s32.totalorder %v10543_v3, 1  ;;  %v2585_v7 = vsel %vm2569_vm1, %v16914_v31, %v10492_v20  ;;  %v10900_v25 = vpop.xlane.xlu0 %1893 }
 0x558   : > { %16934 = vst [vmem:[#allocation117_spill] sm:$0xff] %v10864_v51  ;;  %16936 = vst [vmem:[#allocation5_spill] sm:$0xff] %v10869_v8  ;;  %v16940_v18 = vld [vmem:[#allocation65_spill] sm:$0xff]  ;;  %vm16943_vm5 = vcmp.eq.s32.totalorder %v10482_v63, 0  ;;  %v16945_v47 = vld [vmem:[#allocation64_spill] sm:$0xff]  ;;  %vm2614_vm1 = vcmp.lt.f32.partialorder %v10900_v25, %v10696_v6  ;;  %vm16472_vm9 = vcmp.eq.s32.totalorder %v10482_v63, 5 }
 0x559   : > { %16937 = vst [vmem:[#allocation118_spill] sm:$0xff] %v10874_v1  ;;  %16939 = vst [vmem:[#allocation62_spill] sm:$0xff] %v10879_v0  ;;  %v10893_v14 = vsel %vm2654_vm0, 3e+38, %v16940_v18  ;;  %v10905_v51 = vsel %vm2815_vm10, 3e+38, %v16945_v47  ;;  %v10909_v20 = vcvt.s32.f32 %v2116_v52 }
 0x55a   : > { %6216 = vst.msk [vmem:[#allocation2 + $0x68] sm:$0xff] %vm16476_vm4, %v2631_v62  ;;  %16941 = vst [vmem:[#allocation65_spill] sm:$0xff] %v10893_v14  ;;  %v10898_v62 = vsel %vm16943_vm5, 3e+38, %v16942_v39  ;;  %vm2663_vm0 = vcmp.eq.s32.totalorder %v10861_v60, 0  ;;  %v16948_v18 = vld [vmem:[#allocation58_spill] sm:$0xff]  ;;  %v2630_v39 = vsel %vm2614_vm1, %v10900_v25, %v10696_v6 }
 0x55b   : > { %16944 = vst [vmem:[#allocation63_spill] sm:$0xff] %v10898_v62  ;;  %16946 = vst [vmem:[#allocation64_spill] sm:$0xff] %v10905_v51  ;;  %vm1913_vm15 = vcmp.le.f32.partialorder %v16948_v18, %v10900_v25  ;;  %v10917_v2 = vsel %vm2614_vm1, 5, %v10705_v15  ;;  %v16951_v47 = vld [vmem:[#allocation66_spill] sm:$0xff]  ;;  %vm16473_vm5 = vcmp.eq.s32.totalorder %v10543_v3, 5  ;;  %2119 = vmin.xlane.f32.xlu0 %v10909_v20  ;;  %vm16467_vm1 = vcmp.eq.s32.totalorder %v10579_v32, 5 }
 0x55c   : > { %16947 = vst [vmem:[#allocation119_spill] sm:$0xff] %v10909_v20  ;;  %16949 = vst [vmem:[#allocation58_spill] sm:$0xff] %v10917_v2  ;;  %v10920_v31 = vsel %vm1913_vm15, %v9054_v42, 128  ;;  %v10925_v1 = vsel %vm2814_vm7, 3e+38, %v16951_v47  ;;  %vm2662_vm8 = vcmp.eq.s32.totalorder %v10917_v2, 0  ;;  %vm3711_vm15 = vcmp.lt.f32.partialorder %v10905_v51, %v10898_v62 }
 0x55d   : > { %16950 = vst [vmem:[#allocation120_spill] sm:$0xff] %v10920_v31  ;;  %16952 = vst [vmem:[#allocation66_spill] sm:$0xff] %v10925_v1  ;;  %v2102_v6 = vshra.s32 %v10920_v31, 16  ;;  %v7074_v15 = vsel %vm2662_vm8, 1.0, %v16894_v35  ;;  %v7075_v52 = vsel %vm2663_vm0, 1.0, %v16894_v35  ;;  %vm3710_vm14 = vcmp.lt.f32.partialorder %v10925_v1, %v10893_v14  ;;  %v16954_v47 = vld [vmem:[#allocation4_spill] sm:$0xff] }
 0x55e   : > { %6215 = vst.msk [vmem:[#allocation2 + $0x60] sm:$0xff] %vm16476_vm4, %v2630_v39  ;;  %v7836_v18 = vpack.i.bf16 %v7075_v52, %v7074_v15  ;;  %v10949_v31 = vsel %vm2651_vm3, 3e+38, %v16954_v47  ;;  %v10954_v20 = vsel %vm16472_vm9, 3e+38, %v10462_v5  ;;  %vm16468_vm13 = vcmp.eq.s32.totalorder %v10631_v50, 5 }
 0x55f   : > { %v10942_v39 = vcvt.s32.f32 %v2102_v6  ;;  %16955 = vst [vmem:[#allocation4_spill] sm:$0xff] %v10949_v31  ;;  %16956 = vst [vmem:[#allocation122_spill] sm:$0xff] %v10954_v20  ;;  %v10959_v59 = vsel %vm16473_vm5, 3e+38, %v10530_v54  ;;  %v10965_v6 = vsel %vm2815_vm10, 1.0, %v16894_v35  ;;  %v16959_v52 = vld [vmem:[#allocation67_spill] sm:$0xff]  ;;  %v10990_v47 = vpop.xlane.xlu1 %1899 }
 0x560   : > { %16957 = vst [vmem:[#allocation123_spill] sm:$0xff] %v10959_v59  ;;  %v10970_v15 = vsel %vm16467_vm1, 3e+38, %v10560_v27  ;;  %v10975_v5 = vsel %vm2657_vm12, 3e+38, %v16959_v52  ;;  %7837 = vperm.xlu1 %7810, %v7836_v18   ;;  %v10981_v54 = vsel %vm2814_vm7, 1.0, %v16894_v35  ;;  %v10988_v27 = vsel %vm3711_vm15, %v10905_v51, %v10898_v62 }
 0x561   : > { %16953 = vst [vmem:[#allocation121_spill] sm:$0xff] %v10942_v39  ;;  %16958 = vst [vmem:[#allocation124_spill] sm:$0xff] %v10970_v15  ;;  %2105 = vmin.xlane.f32.xlu0 %v10942_v39  ;;  %v3743_v18 = vsel %vm3711_vm15, 1, %v16847_v40  ;;  %v11001_v52 = vsel %vm3710_vm14, %v10925_v1, %v10893_v14  ;;  %vm2819_vm12 = vcmp.eq.s32.totalorder %v10673_v17, 1  ;;  %v11009_v15 = vsel %vm16468_vm13, 3e+38, %v10618_v46 }
 0x562   : > { %16960 = vst [vmem:[#allocation67_spill] sm:$0xff] %v10975_v5  ;;  %16961 = vst [vmem:[#allocation125_spill] sm:$0xff] %v10990_v47  ;;  %vm2617_vm3 = vcmp.lt.f32.partialorder %v10990_v47, %v2585_v7  ;;  %v16963_v51 = vld [vmem:[#allocation59_spill] sm:$0xff]  ;;  %vm2818_vm7 = vcmp.eq.s32.totalorder %v10732_v41, 1  ;;  %vm2975_vm15 = vcmp.eq.s32.totalorder %v10482_v63, 2  ;;  %v16966_v39 = vld [vmem:[#allocation70_spill] sm:$0xff] }
 0x563   : > { %16962 = vst [vmem:[#allocation126_spill] sm:$0xff] %v11009_v15  ;;  %vm1916_vm10 = vcmp.le.f32.partialorder %v16963_v51, %v10990_v47  ;;  %v2633_v62 = vsel %vm2617_vm3, %v10990_v47, %v2585_v7  ;;  %v11017_v22 = vsel %vm2617_vm3, 5, %v10781_v28  ;;  %v11026_v46 = vsel %vm2659_vm6, 3e+38, %v16966_v39  ;;  %v16968_v7 = vld [vmem:[#allocation71_spill] sm:$0xff]  ;;  %v16970_v15 = vld [vmem:[#allocation73_spill] sm:$0xff]  ;;  %v11044_v39 = vpop.xlane.xlu0 %1897 }
 0x564   : > { %16964 = vst [vmem:[#allocation59_spill] sm:$0xff] %v11017_v22  ;;  %v11020_v13 = vsel %vm1916_vm10, %v9054_v42, 128  ;;  %16967 = vst [vmem:[#allocation70_spill] sm:$0xff] %v11026_v46  ;;  %v3742_v28 = vsel %vm3710_vm14, 1, %v16847_v40  ;;  %v11037_v47 = vsel %vm2819_vm12, 3e+38, %v16968_v7  ;;  %vm2616_vm3 = vcmp.lt.f32.partialorder %v11044_v39, %v10712_v37 }
 0x565   : > { %16965 = vst [vmem:[#allocation127_spill] sm:$0xff] %v11020_v13  ;;  %6218 = vst.msk [vmem:[#allocation2 + $0x78] sm:$0xff] %vm16476_vm4, %v2633_v62  ;;  %v2144_v51 = vshra.s32 %v11020_v13, 16  ;;  %v11042_v19 = vsel %vm2658_vm11, 3e+38, %v16970_v15  ;;  %vm2665_vm6 = vcmp.eq.s32.totalorder %v11017_v22, 0  ;;  %v2632_v44 = vsel %vm2616_vm3, %v11044_v39, %v10712_v37 }
 0x566   : > { %16969 = vst [vmem:[#allocation71_spill] sm:$0xff] %v11037_v47  ;;  %16971 = vst [vmem:[#allocation73_spill] sm:$0xff] %v11042_v19  ;;  %v16973_v62 = vld [vmem:[#allocation74_spill] sm:$0xff]  ;;  %vm2974_vm14 = vcmp.eq.s32.totalorder %v10543_v3, 2  ;;  %v16976_v1 = vld [vmem:[#allocation60_spill] sm:$0xff]  ;;  %vm16478_vm1 = vcmp.eq.s32.totalorder %v10673_v17, 5 }
 0x567   : > { %16972 = vst [vmem:[#allocation128_spill] sm:$0xff] %v11044_v39  ;;  %v11050_v13 = vsel %vm2818_vm7, 3e+38, %v16973_v62  ;;  %v11055_v7 = vcvt.s32.f32 %v2144_v51  ;;  %vm1915_vm11 = vcmp.le.f32.partialorder %v16976_v1, %v11044_v39  ;;  %v16977_v15 = vld [vmem:[#allocation69_spill] sm:$0xff]  ;;  %v11067_v62 = vsel %vm2616_vm3, 5, %v10718_v48  ;;  %6217 = vst.msk [vmem:[#allocation2 + $0x70] sm:$0xff] %vm16476_vm4, %v2632_v44 }
 0x568   : > { %16974 = vst [vmem:[#allocation74_spill] sm:$0xff] %v11050_v13  ;;  %v11062_v14 = vsel %vm2975_vm15, 3e+38, %v16977_v15  ;;  %v11070_v20 = vsel %vm1915_vm11, %v9054_v42, 128  ;;  %vm16477_vm13 = vcmp.eq.s32.totalorder %v11067_v62, 0  ;;  %vm3715_vm3 = vcmp.lt.f32.partialorder %v11037_v47, %v11026_v46  ;;  %v16980_v44 = vld [vmem:[#allocation72_spill] sm:$0xff] }
 0x569   : > { %16975 = vst [vmem:[#allocation129_spill] sm:$0xff] %v11055_v7  ;;  %16978 = vst [vmem:[#allocation60_spill] sm:$0xff] %v11062_v14  ;;  %vm3759_vm10 = vcmp.lt.f32.partialorder %v11062_v14, %v10988_v27  ;;  %2147 = vmin.xlane.f32.xlu0 %v11055_v7  ;;  %v2130_v1 = vshra.s32 %v11070_v20, 16  ;;  %v7076_v37 = vsel %vm16477_vm13, 1.0, %v16894_v35  ;;  %v7077_v48 = vsel %vm2665_vm6, 1.0, %v16894_v35  ;;  %v16983_v7 = vld [vmem:[#allocation68_spill] sm:$0xff] }
 0x56a   : > { %16979 = vst [vmem:[#allocation69_spill] sm:$0xff] %v11070_v20  ;;  %vm3706_vm11 = vcmp.lt.f32.partialorder %v10793_v45, %v10869_v8  ;;  %v11092_v51 = vsel %vm2974_vm14, 3e+38, %v16980_v44  ;;  %v11097_v15 = vsel %vm3759_vm10, 2, %v3743_v18  ;;  %v7841_v42 = vpack.i.bf16 %v7077_v48, %v7076_v37 }
 0x56b   : > { %16981 = vst [vmem:[#allocation72_spill] sm:$0xff] %v11092_v51  ;;  %v11099_v20 = vcvt.s32.f32 %v2130_v1  ;;  %vm3714_vm9 = vcmp.lt.f32.partialorder %v11050_v13, %v11042_v19  ;;  %vm16484_vm5 = vcmp.lt.f32.partialorder %v11092_v51, %v11001_v52  ;;  %v11108_v39 = vsel %vm2656_vm2, 3e+38, %v16983_v7 }
 0x56c   : > { %16984 = vst [vmem:[#allocation68_spill] sm:$0xff] %v11108_v39  ;;  %vm2822_vm4 = vcmp.eq.s32.totalorder %v10917_v2, 1  ;;  %vm2823_vm13 = vcmp.eq.s32.totalorder %v10861_v60, 1  ;;  %v11115_v18 = vsel %vm16484_vm5, 2, %v3742_v28  ;;  %v11120_v1 = vsel %vm16478_vm1, 3e+38, %v10653_v38  ;;  %7842 = vperm.xlu1 %7810, %v7841_v42  }
 0x56d   : > { %16982 = vst [vmem:[#allocation130_spill] sm:$0xff] %v11099_v20  ;;  %16985 = vst [vmem:[#allocation131_spill] sm:$0xff] %v11120_v1  ;;  %2133 = vmin.xlane.f32.xlu0 %v11099_v20  ;;  %v11128_v7 = vsel %vm3715_vm3, %v11037_v47, %v11026_v46  ;;  %v3747_v28 = vsel %vm3715_vm3, 1, %v16847_v40  ;;  %vm16486_vm2 = vcmp.eq.s32.totalorder %v10732_v41, 2  ;;  %v11138_v42 = vsel %vm2663_vm0, 3e+38, %v10058_v56 }
 0x56e   : > { %16986 = vst [vmem:[#allocation132_spill] sm:$0xff] %v11138_v42  ;;  %v11142_v38 = vsel %vm3714_vm9, %v11050_v13, %v11042_v19  ;;  %v3746_v37 = vsel %vm3714_vm9, 1, %v16847_v40  ;;  %vm16483_vm1 = vcmp.eq.s32.totalorder %v10673_v17, 2  ;;  %v11149_v48 = vsel %vm2662_vm8, 3e+38, %v10076_v57  ;;  %v16989_v47 = vld [vmem:[#allocation78_spill] sm:$0xff] }
 0x56f   : > { %16987 = vst [vmem:[#allocation133_spill] sm:$0xff] %v11149_v48  ;;  %v7856_v44 = vpack.i.bf16 %v10965_v6, %v10981_v54  ;;  %v11156_v56 = vsel %vm2822_vm4, 3e+38, %v10078_v23  ;;  %v11161_v13 = vsel %vm2823_vm13, 3e+38, %v16989_v47  ;;  %vm16489_vm0 = vcmp.eq.s32.totalorder %v10732_v41, 5 }
 0x570   : > { %16988 = vst [vmem:[#allocation134_spill] sm:$0xff] %v11156_v56  ;;  %16990 = vst [vmem:[#allocation78_spill] sm:$0xff] %v11161_v13  ;;  %vm3707_vm9 = vcmp.lt.f32.partialorder %v10748_v21, %v10949_v31  ;;  %v16991_v57 = vld [vmem:[#allocation79_spill] sm:$0xff]  ;;  %v16993_v6 = vld [vmem:[#allocation77_spill] sm:$0xff]  ;;  %v16995_v54 = vpack.i.bf16 %v10379_v58, %v10374_v34  ;;  %v7086_v47 = vsel %vm2818_vm7, 1.0, %v16894_v35  ;;  %v7087_v19 = vsel %vm2819_vm12, 1.0, %v16894_v35 }
 0x571   : > { %v11169_v46 = vsel %vm16486_vm2, 3e+38, %v16991_v57  ;;  %v11174_v23 = vsel %vm16483_vm1, 3e+38, %v16993_v6  ;;  %vm3719_vm1 = vcmp.lt.f32.partialorder %v11161_v13, %v11138_v42  ;;  %vm3718_vm5 = vcmp.lt.f32.partialorder %v11156_v56, %v11149_v48  ;;  %v16997_v6 = vld [vmem:[#allocation75_spill] sm:$0xff] }
 0x572   : > { %16992 = vst [vmem:[#allocation79_spill] sm:$0xff] %v11169_v46  ;;  %16994 = vst [vmem:[#allocation77_spill] sm:$0xff] %v11174_v23  ;;  %7847 = vperm.xlu1 %7810, %v16995_v54   ;;  %vm16485_vm8 = vcmp.lt.f32.partialorder %v11174_v23, %v11128_v7  ;;  %vm16488_vm3 = vcmp.lt.f32.partialorder %v11169_v46, %v11142_v38  ;;  %v11206_v57 = vsel %vm16489_vm0, 3e+38, %v10721_v11  ;;  %vm16516_vm12 = vcmp.eq.s32.totalorder %v10861_v60, 5 }
 0x573   : > { %v11196_v34 = vsel %vm16485_vm8, 2, %v3747_v28  ;;  %v11201_v58 = vsel %vm16488_vm3, 2, %v3746_v37  ;;  %16996 = vst [vmem:[#allocation135_spill] sm:$0xff] %v11206_v57  ;;  %vm16998_vm7 = vcmp.eq.s32.totalorder %v10768_v16, 0  ;;  %vm16517_vm8 = vcmp.eq.s32.totalorder %v10917_v2, 5  ;;  %v17000_v28 = vld [vmem:[#allocation76_spill] sm:$0xff] }
 0x574   : > { %v11212_v54 = vsel %vm16998_vm7, 3e+38, %v16997_v6  ;;  %vm17001_vm2 = vcmp.eq.s32.totalorder %v10823_v24, 0  ;;  %v7866_v37 = vpack.i.bf16 %v7087_v19, %v7086_v47  ;;  %vm2982_vm3 = vcmp.eq.s32.totalorder %v10917_v2, 2 }
 0x575   : > { %16999 = vst [vmem:[#allocation75_spill] sm:$0xff] %v11212_v54  ;;  %v11218_v20 = vsel %vm17001_vm2, 3e+38, %v17000_v28  ;;  %vm2983_vm0 = vcmp.eq.s32.totalorder %v10861_v60, 2  ;;  %v11227_v11 = vsel %vm3719_vm1, %v11161_v13, %v11138_v42  ;;  %v11234_v6 = vsel %vm3718_vm5, %v11156_v56, %v11149_v48  ;;  %v17006_v13 = vld [vmem:[#allocation82_spill] sm:$0xff]  ;;  %v11280_v56 = vpop.f32.mrb[16].mxu0 }
 0x576   : > { %7857 = vperm.xlu1 %7810, %v7856_v44   ;;  %v3722_v19 = vsel %vm3706_vm11, %v10793_v45, %v10869_v8  ;;  %v3723_v44 = vsel %vm3707_vm9, %v10748_v21, %v10949_v31  ;;  %v11249_v47 = vsel %vm16516_vm12, 3e+38, %v10843_v29  ;;  %v11254_v28 = vsel %vm16517_vm8, 3e+38, %v10900_v25  ;;  %v17004_v25 = vld [vmem:[#allocation83_spill] sm:$0xff]  ;;  %17008 = vst [vmem:[#allocation137_spill] sm:$0xff] %v11280_v56 }
 0x577   : > { %17002 = vst [vmem:[#allocation76_spill] sm:$0xff] %v11249_v47  ;;  %17003 = vst [vmem:[#allocation136_spill] sm:$0xff] %v11254_v28  ;;  %v3751_v1 = vsel %vm3719_vm1, 1, %v16847_v40  ;;  %v3750_v57 = vsel %vm3718_vm5, 1, %v16847_v40  ;;  %v7090_v29 = vsel %vm2822_vm4, 1.0, %v16894_v35  ;;  %v7091_v47 = vsel %vm2823_vm13, 1.0, %v16894_v35 }
 0x578   : > { %v11273_v28 = vsel %vm2982_vm3, 3e+38, %v17004_v25  ;;  %v11278_v42 = vsel %vm2983_vm0, 3e+38, %v17006_v13  ;;  %vm3755_vm5 = vcmp.lt.f32.partialorder %v10775_v53, %v3723_v44  ;;  %v7098_v48 = vsel %vm2974_vm14, 1.0, %v16894_v35  ;;  %v11290_v25 = vpop.f32.mrb[17].mxu0 }
 0x579   : > { %17005 = vst [vmem:[#allocation83_spill] sm:$0xff] %v11273_v28  ;;  %17007 = vst [vmem:[#allocation82_spill] sm:$0xff] %v11278_v42  ;;  %vm3767_vm4 = vcmp.lt.f32.partialorder %v11278_v42, %v11227_v11  ;;  %vm3766_vm13 = vcmp.lt.f32.partialorder %v11273_v28, %v11234_v6  ;;  %vm2812_vm1 = vcmp.eq.s32.totalorder %v10446_v36, 1  ;;  %vm2813_vm2 = vcmp.eq.s32.totalorder %v10394_v49, 1  ;;  %v11304_v59 = vpop.f32.mrb[18].mxu0  ;;  %v8546_v21 = vld [vmem:[#allocation2 + $0x90] sm:$0xff] }
 0x57a   : > { %17009 = vst [vmem:[#allocation138_spill] sm:$0xff] %v11290_v25  ;;  %7867 = vperm.xlu1 %7810, %v7866_v37   ;;  %v11297_v13 = vsel %vm3767_vm4, 2, %v3751_v1  ;;  %v11302_v56 = vsel %vm3766_vm13, 2, %v3750_v57  ;;  %17010 = vst [vmem:[#allocation139_spill] sm:$0xff] %v11304_v59  ;;  %v7876_v9 = vpack.i.bf16 %v7091_v47, %v7090_v29  ;;  %v3738_v37 = vsel %vm3706_vm11, 1, %v16847_v40  ;;  %v11322_v47 = vpop.f32.mrb[19].mxu0 }
 0x57b   : > { %v3739_v25 = vsel %vm3707_vm9, 1, %v16847_v40  ;;  %v7099_v1 = vsel %vm2975_vm15, 1.0, %v16894_v35  ;;  %v11320_v57 = vsel %vm2665_vm6, 3e+38, %v17011_v26  ;;  %17013 = vst [vmem:[#allocation140_spill] sm:$0xff] %v11322_v47  ;;  %vm3754_vm14 = vcmp.lt.f32.partialorder %v10804_v33, %v3722_v19  ;;  %v8547_v26 = vld [vmem:[#allocation2 + $0x98] sm:$0xff] }
 0x57c   : > { %17012 = vst [vmem:[#allocation80_spill] sm:$0xff] %v11320_v57  ;;  %v7896_v29 = vpack.i.bf16 %v7099_v1, %v7098_v48  ;;  %vm3130_vm11 = vcmp.eq.s32.totalorder %v10356_v43, 3  ;;  %v11331_v59 = vsel %vm3759_vm10, %v11062_v14, %v10988_v27  ;;  %v11335_v45 = vsel %vm2812_vm1, 3e+38, %v8546_v21  ;;  %v17016_v1 = vld [vmem:[#allocation9_spill] sm:$0xff]  ;;  %v17018_v8 = vld [vmem:[#allocation8_spill] sm:$0xff] }
 0x57d   : > { %17014 = vst [vmem:[#allocation141_spill] sm:$0xff] %v11335_v45  ;;  %v11339_v31 = vsel %vm2813_vm2, 3e+38, %v8547_v26  ;;  %v11344_v48 = vsel %vm3755_vm5, %v10775_v53, %v3723_v44  ;;  %vm3131_vm15 = vcmp.eq.s32.totalorder %v10315_v55, 3  ;;  %v11348_v27 = vsel %vm3130_vm11, 1.0, %v16894_v35  ;;  %v17023_v44 = vld [vmem:[#allocation88_spill] sm:$0xff] }
 0x57e   : > { %17015 = vst [vmem:[#allocation142_spill] sm:$0xff] %v11339_v31  ;;  %7877 = vperm.xlu1 %7810, %v7876_v9   ;;  %v11351_v14 = vsel %vm3130_vm11, 3e+38, %v17016_v1  ;;  %v3787_v21 = vsel %vm3755_vm5, 2, %v3739_v25  ;;  %v11356_v26 = vsel %vm3131_vm15, 1.0, %v16894_v35  ;;  %v11364_v9 = vsel %vm3754_vm14, %v10804_v33, %v3722_v19  ;;  %v17024_v33 = vld [vmem:[#allocation11_spill] sm:$0xff] }
 0x57f   : > { %17017 = vst [vmem:[#allocation9_spill] sm:$0xff] %v11351_v14  ;;  %v11359_v47 = vsel %vm3131_vm15, 3e+38, %v17018_v8  ;;  %v3786_v40 = vsel %vm3754_vm14, 2, %v3738_v37  ;;  %vm2816_vm6 = vcmp.eq.s32.totalorder %v10631_v50, 1  ;;  %vm3802_vm9 = vcmp.lt.f32.partialorder %v11351_v14, %v11364_v9  ;;  %v17021_v37 = vld [vmem:[#allocation81_spill] sm:$0xff] }
 0x580   : > { %17019 = vst [vmem:[#allocation8_spill] sm:$0xff] %v11359_v47  ;;  %vm3803_vm10 = vcmp.lt.f32.partialorder %v11359_v47, %v11344_v48  ;;  %v7080_v8 = vsel %vm2812_vm1, 1.0, %v16894_v35  ;;  %vm2817_vm7 = vcmp.eq.s32.totalorder %v10579_v32, 1  ;;  %v11387_v25 = vsel %vm3802_vm9, 3, %v3786_v40 }
 0x581   : > { %v11382_v19 = vsel %vm3803_vm10, 3, %v3787_v21  ;;  %vm17022_vm5 = vcmp.eq.s32.totalorder %v11067_v62, 0  ;;  %v17025_v53 = vpack.i.bf16 %v17023_v44, %v17024_v33  ;;  %vm16518_vm1 = vcmp.lt.f32.partialorder %v11339_v31, %v10818_v30 }
 0x582   : > { %17020 = vst [vmem:[#allocation143_spill] sm:$0xff] %v11382_v19  ;;  %v11392_v1 = vsel %vm17022_vm5, 3e+38, %v17021_v37  ;;  %vm16532_vm14 = vcmp.lt.f32.partialorder %v11335_v45, %v10879_v0  ;;  %vm17026_vm11 = vcmp.eq.s32.totalorder %v10732_v41, 2  ;;  %v7081_v21 = vsel %vm2813_vm2, 1.0, %v16894_v35  ;;  %v8548_v37 = vld [vmem:[#allocation2 + $0xb0] sm:$0xff] }
 0x583   : > { %7887 = vperm.xlu1 %7810, %v17025_v53   ;;  %v7102_v40 = vsel %vm17026_vm11, 1.0, %v16894_v35  ;;  %v11409_v57 = vsel %vm2816_vm6, 3e+38, %v8548_v37  ;;  %vm3134_vm15 = vcmp.eq.s32.totalorder %v10543_v3, 3  ;;  %vm3135_vm5 = vcmp.eq.s32.totalorder %v10482_v63, 3 }
 0x584   : > { %17027 = vst [vmem:[#allocation81_spill] sm:$0xff] %v11409_v57  ;;  %v17028_v53 = vpack.i.bf16 %v10840_v10, %v10835_v4  ;;  %vm17029_vm11 = vcmp.lt.f32.partialorder %v11092_v51, %v11001_v52  ;;  %v7851_v44 = vpack.i.bf16 %v7081_v21, %v7080_v8  ;;  %vm17030_vm2 = vcmp.eq.s32.totalorder %v10673_v17, 2  ;;  %v17032_v21 = vld [vmem:[#allocation15_spill] sm:$0xff] }
 0x585   : > { %v11421_v33 = vsel %vm17029_vm11, %v11092_v51, %v11001_v52  ;;  %v7103_v37 = vsel %vm17030_vm2, 1.0, %v16894_v35  ;;  %v11428_v19 = vsel %vm2817_vm7, 3e+38, %v8549_v12  ;;  %v11435_v4 = vsel %vm16518_vm1, %v11339_v31, %v10818_v30  ;;  %v17034_v51 = vld [vmem:[#allocation14_spill] sm:$0xff]  ;;  %v17052_v31 = vld [vmem:[#allocation7_spill] sm:$0xff] }
 0x586   : > { %7806 = vperm.xlu0 %7804, %v17028_v53   ;;  %17031 = vst [vmem:[#allocation88_spill] sm:$0xff] %v11428_v19  ;;  %v11442_v10 = vsel %vm16532_vm14, %v11335_v45, %v10879_v0  ;;  %v7906_v52 = vpack.i.bf16 %v7103_v37, %v7102_v40  ;;  %v7084_v12 = vsel %vm2816_vm6, 1.0, %v16894_v35  ;;  %v7085_v8 = vsel %vm2817_vm7, 1.0, %v16894_v35  ;;  %v17060_v45 = vld [vmem:[#allocation109_spill] sm:$0xff] }
 0x587   : > { %7897 = vperm.xlu1 %7810, %v7896_v29   ;;  %vm16530_vm11 = vcmp.lt.f32.partialorder %v11409_v57, %v11108_v39  ;;  %v11455_v53 = vsel %vm3134_vm15, 3e+38, %v17032_v21  ;;  %v11460_v40 = vsel %vm3135_vm5, 3e+38, %v17034_v51  ;;  %vm16529_vm6 = vcmp.lt.f32.partialorder %v11428_v19, %v10975_v5  ;;  %v11485_v21 = vpop.f32.mrb[20].mxu0 }
 0x588   : > { %17033 = vst [vmem:[#allocation11_spill] sm:$0xff] %v11455_v53  ;;  %17035 = vst [vmem:[#allocation15_spill] sm:$0xff] %v11460_v40  ;;  %vm2821_vm2 = vcmp.eq.s32.totalorder %v10768_v16, 1  ;;  %vm3807_vm7 = vcmp.lt.f32.partialorder %v11460_v40, %v11331_v59  ;;  %vm3806_vm12 = vcmp.lt.f32.partialorder %v11455_v53, %v11421_v33  ;;  %v7106_v29 = vsel %vm2982_vm3, 1.0, %v16894_v35 }
 0x589   : > { %vm2820_vm8 = vcmp.eq.s32.totalorder %v10823_v24, 1  ;;  %v11477_v51 = vsel %vm3807_vm7, 3, %v11097_v15  ;;  %v11483_v37 = vsel %vm3806_vm12, 3, %v11115_v18  ;;  %17036 = vst [vmem:[#allocation14_spill] sm:$0xff] %v11485_v21  ;;  %vm17037_vm3 = vcmp.lt.f32.partialorder %v11174_v23, %v11128_v7  ;;  %v11508_v21 = vpop.f32.mrb[21].mxu0 }
 0x58a   : > { %7852 = vperm.xlu0 %7804, %v7851_v44   ;;  %v11492_v44 = vsel %vm17037_vm3, %v11174_v23, %v11128_v7  ;;  %vm17038_vm1 = vcmp.lt.f32.partialorder %v11169_v46, %v11142_v38  ;;  %v7861_v30 = vpack.i.bf16 %v7085_v8, %v7084_v12  ;;  %v11506_v18 = vsel %vm16530_vm11, %v11409_v57, %v11108_v39  ;;  %v8550_v12 = vld [vmem:[#allocation2 + $0xd8] sm:$0xff]  ;;  %v11525_v23 = vpop.f32.mrb[22].mxu0 }
 0x58b   : > { %v11499_v15 = vsel %vm17038_vm1, %v11169_v46, %v11142_v38  ;;  %17039 = vst [vmem:[#allocation144_spill] sm:$0xff] %v11508_v21  ;;  %7907 = vperm.xlu1 %7810, %v7906_v52   ;;  %v11515_v7 = vsel %vm16529_vm6, %v11428_v19, %v10975_v5  ;;  %v7107_v38 = vsel %vm2983_vm0, 1.0, %v16894_v35  ;;  %v11522_v8 = vsel %vm2821_vm2, 3e+38, %v8550_v12  ;;  %17041 = vst [vmem:[#allocation146_spill] sm:$0xff] %v11525_v23  ;;  %v11544_v23 = vpop.f32.mrb[23].mxu0 }
 0x58c   : > { %17040 = vst [vmem:[#allocation145_spill] sm:$0xff] %v11522_v8  ;;  %vm3138_vm1 = vcmp.eq.s32.totalorder %v10732_v41, 3  ;;  %v11532_v52 = vsel %vm3767_vm4, %v11278_v42, %v11227_v11  ;;  %v7916_v46 = vpack.i.bf16 %v7107_v38, %v7106_v29  ;;  %v11539_v21 = vsel %vm3766_vm13, %v11273_v28, %v11234_v6  ;;  %17042 = vst [vmem:[#allocation147_spill] sm:$0xff] %v11544_v23  ;;  %v17043_v29 = vld [vmem:[#allocation19_spill] sm:$0xff]  ;;  %v8551_v38 = vld [vmem:[#allocation2 + $0xd0] sm:$0xff] }
 0x58d   : > { %v7088_v12 = vsel %vm2820_vm8, 1.0, %v16894_v35  ;;  %v7089_v11 = vsel %vm2821_vm2, 1.0, %v16894_v35  ;;  %vm2824_vm0 = vcmp.eq.s32.totalorder %v11067_v62, 1  ;;  %vm3139_vm4 = vcmp.eq.s32.totalorder %v10673_v17, 3 }
 0x58e   : > { %7862 = vperm.xlu0 %7804, %v7861_v30   ;;  %v11554_v6 = vsel %vm3138_vm1, 3e+38, %v17043_v29  ;;  %v11558_v42 = vsel %vm2820_vm8, 3e+38, %v8551_v38  ;;  %vm16531_vm13 = vcmp.lt.f32.partialorder %v11522_v8, %v11212_v54  ;;  %v17045_v30 = vld [vmem:[#allocation18_spill] sm:$0xff]  ;;  %v7871_v23 = vpack.i.bf16 %v7089_v11, %v7088_v12 }
 0x58f   : > { %17044 = vst [vmem:[#allocation19_spill] sm:$0xff] %v11554_v6  ;;  %v11565_v28 = vsel %vm3139_vm4, 3e+38, %v17045_v30  ;;  %vm3810_vm2 = vcmp.lt.f32.partialorder %v11554_v6, %v11499_v15  ;;  %7917 = vperm.xlu1 %7810, %v7916_v46   ;;  %vm2825_vm3 = vcmp.eq.s32.totalorder %v11017_v22, 1  ;;  %v7092_v38 = vsel %vm2824_vm0, 1.0, %v16894_v35 }
 0x590   : > { %17046 = vst [vmem:[#allocation18_spill] sm:$0xff] %v11565_v28  ;;  %vm3811_vm6 = vcmp.lt.f32.partialorder %v11565_v28, %v11492_v44  ;;  %v11576_v29 = vsel %vm3810_vm2, 3, %v11201_v58  ;;  %v7114_v46 = vsel %vm3134_vm15, 1.0, %v16894_v35  ;;  %vm2972_vm8 = vcmp.eq.s32.totalorder %v10446_v36, 2 }
 0x591   : > { %v11589_v12 = vsel %vm3811_vm6, 3, %v11196_v34  ;;  %v11596_v58 = vsel %vm16531_vm13, %v11522_v8, %v11212_v54  ;;  %v3819_v11 = vsel %vm3803_vm10, %v11359_v47, %v11344_v48  ;;  %vm2973_vm15 = vcmp.eq.s32.totalorder %v10394_v49, 2  ;;  %v8552_v48 = vld [vmem:[#allocation2 + $0xf0] sm:$0xff] }
 0x592   : > { %7872 = vperm.xlu0 %7804, %v7871_v23   ;;  %vm3142_vm11 = vcmp.eq.s32.totalorder %v10917_v2, 3  ;;  %v7093_v34 = vsel %vm2825_vm3, 1.0, %v16894_v35  ;;  %v7115_v30 = vsel %vm3135_vm5, 1.0, %v16894_v35  ;;  %vm16542_vm13 = vcmp.eq.s32.totalorder %v10631_v50, 2 }
 0x593   : > { %vm3143_vm14 = vcmp.eq.s32.totalorder %v10861_v60, 3  ;;  %v17047_v23 = vpack.i.bf16 %v11356_v26, %v11348_v27  ;;  %v11618_v47 = vsel %vm2824_vm0, 3e+38, %v8552_v48  ;;  %v7881_v54 = vpack.i.bf16 %v7093_v34, %v7092_v38  ;;  %v17049_v38 = vld [vmem:[#allocation22_spill] sm:$0xff] }
 0x594   : > { %v7936_v8 = vpack.i.bf16 %v7115_v30, %v7114_v46  ;;  %v7096_v5 = vsel %vm2972_vm8, 1.0, %v16894_v35  ;;  %vm16585_vm10 = vcmp.lt.f32.partialorder %v11558_v42, %v11218_v20  ;;  %v7097_v19 = vsel %vm2973_vm15, 1.0, %v16894_v35 }
 0x595   : > { %7927 = vperm.xlu1 %7810, %v17047_v23   ;;  %v7118_v27 = vsel %vm3138_vm1, 1.0, %v16894_v35  ;;  %v11634_v26 = vsel %vm3142_vm11, 3e+38, %v16876_v61  ;;  %v11639_v46 = vsel %vm3143_vm14, 3e+38, %v17049_v38  ;;  %vm2977_vm5 = vcmp.eq.s32.totalorder %v10579_v32, 2 }
 0x596   : > { %17048 = vst [vmem:[#allocation148_spill] sm:$0xff] %v11634_v26  ;;  %17050 = vst [vmem:[#allocation22_spill] sm:$0xff] %v11639_v46  ;;  %7882 = vperm.xlu0 %7804, %v7881_v54   ;;  %v7100_v34 = vsel %vm16542_vm13, 1.0, %v16894_v35  ;;  %vm16543_vm1 = vcmp.lt.f32.partialorder %v11639_v46, %v11532_v52  ;;  %vm16560_vm0 = vcmp.lt.f32.partialorder %v11634_v26, %v11539_v21  ;;  %v7122_v61 = vsel %vm3142_vm11, 1.0, %v16894_v35 }
 0x597   : > { %v11656_v54 = vsel %vm16543_vm1, 3, %v11297_v13  ;;  %v11662_v30 = vsel %vm16560_vm0, 3, %v11302_v56  ;;  %vm16553_vm13 = vcmp.eq.s32.totalorder %v10823_v24, 2  ;;  %v3818_v23 = vsel %vm3802_vm9, %v11351_v14, %v11364_v9  ;;  %v11686_v14 = vpop.f32.mrb[24].mxu0 }
 0x598   : > { %vm16570_vm11 = vcmp.lt.f32.partialorder %v11618_v47, %v11392_v1  ;;  %v7891_v13 = vpack.i.bf16 %v7097_v19, %v7096_v5  ;;  %vm16554_vm1 = vcmp.eq.s32.totalorder %v10768_v16, 2  ;;  %v7119_v56 = vsel %vm3139_vm4, 1.0, %v16894_v35  ;;  %17051 = vst [vmem:[#allocation149_spill] sm:$0xff] %v11686_v14 }
 0x599   : > { %7937 = vperm.xlu1 %7810, %v7936_v8   ;;  %v7101_v48 = vsel %vm2977_vm5, 1.0, %v16894_v35  ;;  %v7123_v38 = vsel %vm3143_vm14, 1.0, %v16894_v35  ;;  %vm3290_vm9 = vcmp.eq.s32.totalorder %v10356_v43, 4  ;;  %v7946_v9 = vpack.i.bf16 %v7119_v56, %v7118_v27  ;;  %v11696_v27 = vpop.f32.mrb[25].mxu0 }
 0x59a   : > { %7892 = vperm.xlu0 %7804, %v7891_v13   ;;  %v7901_v8 = vpack.i.bf16 %v7101_v48, %v7100_v34  ;;  %v7956_v5 = vpack.i.bf16 %v7123_v38, %v7122_v61  ;;  %v7104_v19 = vsel %vm16553_vm13, 1.0, %v16894_v35  ;;  %v7105_v39 = vsel %vm16554_vm1, 1.0, %v16894_v35  ;;  %17054 = vst [vmem:[#allocation150_spill] sm:$0xff] %v11696_v27  ;;  %v17055_v61 = vld [vmem:[#allocation26_spill] sm:$0xff]  ;;  %v11704_v56 = vpop.f32.mrb[26].mxu0 }
 0x59b   : > { %vm3291_vm4 = vcmp.eq.s32.totalorder %v10315_v55, 4  ;;  %v7126_v57 = vsel %vm3290_vm9, 1.0, %v16894_v35  ;;  %v11694_v0 = vsel %vm3290_vm9, 3e+38, %v17052_v31  ;;  %vm2984_vm13 = vcmp.eq.s32.totalorder %v11067_v62, 2  ;;  %17057 = vst [vmem:[#allocation151_spill] sm:$0xff] %v11704_v56 }
 0x59c   : > { %17053 = vst [vmem:[#allocation7_spill] sm:$0xff] %v11694_v0  ;;  %v7127_v34 = vsel %vm3291_vm4, 1.0, %v16894_v35  ;;  %v11700_v13 = vsel %vm3291_vm4, 3e+38, %v17055_v61  ;;  %vm3850_vm14 = vcmp.lt.f32.partialorder %v11694_v0, %v3818_v23  ;;  %v11709_v14 = vpop.f32.mrb[27].mxu0  ;;  %v17059_v61 = vld [vmem:[#allocation143_spill] sm:$0xff] }
 0x59d   : > { %7947 = vperm.xlu1 %7810, %v7946_v9   ;;  %17056 = vst [vmem:[#allocation26_spill] sm:$0xff] %v11700_v13  ;;  %vm3851_vm1 = vcmp.lt.f32.partialorder %v11700_v13, %v3819_v11  ;;  %v7966_v48 = vpack.i.bf16 %v7127_v34, %v7126_v57  ;;  %v3866_v31 = vsel %vm3850_vm14, %v11694_v0, %v3818_v23  ;;  %v3882_v38 = vsel %vm3850_vm14, 4, %v11387_v25  ;;  %v17061_v55 = vld [vmem:[#allocation103_spill] sm:$0xff] }
 0x59e   : > { %17058 = vst [vmem:[#allocation152_spill] sm:$0xff] %v11709_v14  ;;  %7902 = vperm.xlu0 %7804, %v7901_v8   ;;  %v3867_v9 = vsel %vm3851_vm1, %v11700_v13, %v3819_v11  ;;  %v3883_v27 = vsel %vm3851_vm1, 4, %v17059_v61  ;;  %vm3898_vm9 = vcmp.lt.f32.partialorder %v17060_v45, %v3866_v31  ;;  %vm2985_vm4 = vcmp.eq.s32.totalorder %v11017_v22, 2  ;;  %v8555_v13 = vld [vmem:[#allocation2 + $0x118] sm:$0xff] }
 0x59f   : > { %vm3899_vm0 = vcmp.lt.f32.partialorder %v17061_v55, %v3867_v9  ;;  %v3914_v56 = vsel %vm3898_vm9, %v17060_v45, %v3866_v31  ;;  %v11717_v57 = vsel %vm3898_vm9, 5, %v3882_v38  ;;  %v7108_v25 = vsel %vm2984_vm13, 1.0, %v16894_v35  ;;  %v8553_v31 = vld [vmem:[#allocation2 + $0xf8] sm:$0xff] }
 0x5a0   : > { %17062 = vst [vmem:[#allocation143_spill] sm:$0xff] %v11717_v57  ;;  %v11727_v11 = vsel %vm16585_vm10, %v11558_v42, %v11218_v20  ;;  %v7911_v23 = vpack.i.bf16 %v7105_v39, %v7104_v19  ;;  %v3915_v8 = vsel %vm3899_vm0, %v17061_v55, %v3867_v9  ;;  %v11730_v34 = vsel %vm3899_vm0, 5, %v3883_v27  ;;  %v8554_v19 = vld [vmem:[#allocation2 + $0x110] sm:$0xff] }
 0x5a1   : > { %7957 = vperm.xlu1 %7810, %v7956_v5   ;;  %17063 = vst [vmem:[#allocation153_spill] sm:$0xff] %v11730_v34  ;;  %vm17064_vm1 = vcmask 7168   ;;  %v11735_v38 = vsel %vm2825_vm3, 3e+38, %v8553_v31  ;;  %v3822_v61 = vsel %vm3806_vm12, %v11455_v53, %v11421_v33  ;;  %v7109_v39 = vsel %vm2985_vm4, 1.0, %v16894_v35  ;;  %v17134_v34 = vld [vmem:[#allocation20_spill] sm:$0xff] }
 0x5a2   : > { %6236 = vst.msk [vmem:[#allocation2 + $0x80] sm:$0xff] %vm17064_vm1, %v3914_v56  ;;  %vm17065_vm14 = vmmov %vm17064_vm1  ;;  %vm3294_vm0 = vcmp.eq.s32.totalorder %v10543_v3, 4  ;;  %v11752_v5 = vsel %vm16570_vm11, %v11618_v47, %v11392_v1  ;;  %v3823_v33 = vsel %vm3807_vm7, %v11460_v40, %v11331_v59  ;;  %v11761_v27 = vsel %vm2972_vm8, 3e+38, %v8554_v19  ;;  %7912 = vperm.xlu0 %7804, %v7911_v23   ;;  %v17069_v59 = vld [vmem:[#allocation29_spill] sm:$0xff] }
 0x5a3   : > { %6237 = vst.msk [vmem:[#allocation2 + $0x88] sm:$0xff] %vm17065_vm14, %v3915_v8  ;;  %17066 = vst [vmem:[#allocation154_spill] sm:$0xff] %v11761_v27  ;;  %v7921_v56 = vpack.i.bf16 %v7109_v39, %v7108_v25  ;;  %vm3295_vm12 = vcmp.eq.s32.totalorder %v10482_v63, 4  ;;  %v7130_v9 = vsel %vm3294_vm0, 1.0, %v16894_v35  ;;  %v17067_v8 = vld [vmem:[#allocation30_spill] sm:$0xff]  ;;  %vm3132_vm3 = vcmp.eq.s32.totalorder %v10446_v36, 3 }
 0x5a4   : > { %v11766_v31 = vsel %vm3294_vm0, 3e+38, %v17067_v8  ;;  %v7131_v14 = vsel %vm3295_vm12, 1.0, %v16894_v35  ;;  %v11771_v55 = vsel %vm3295_vm12, 3e+38, %v17069_v59  ;;  %vm3133_vm8 = vcmp.eq.s32.totalorder %v10394_v49, 3 }
 0x5a5   : > { %17068 = vst [vmem:[#allocation30_spill] sm:$0xff] %v11766_v31  ;;  %7967 = vperm.xlu1 %7810, %v7966_v48   ;;  %17070 = vst [vmem:[#allocation29_spill] sm:$0xff] %v11771_v55  ;;  %vm3854_vm7 = vcmp.lt.f32.partialorder %v11766_v31, %v3822_v61  ;;  %v17071_v25 = vld [vmem:[#allocation80_spill] sm:$0xff]  ;;  %vm3855_vm1 = vcmp.lt.f32.partialorder %v11771_v55, %v3823_v33  ;;  %v7976_v23 = vpack.i.bf16 %v7131_v14, %v7130_v9  ;;  %v17072_v59 = vld [vmem:[#allocation123_spill] sm:$0xff] }
 0x5a6   : > { %vm16578_vm9 = vcmp.lt.f32.partialorder %v11735_v38, %v17071_v25  ;;  %v3870_v39 = vsel %vm3854_vm7, %v11766_v31, %v3822_v61  ;;  %v3886_v19 = vsel %vm3854_vm7, 4, %v11483_v37  ;;  %7922 = vperm.xlu0 %7804, %v7921_v56   ;;  %v3871_v48 = vsel %vm3855_vm1, %v11771_v55, %v3823_v33  ;;  %v17073_v14 = vld [vmem:[#allocation122_spill] sm:$0xff]  ;;  %v8556_v9 = vld [vmem:[#allocation2 + $0x138] sm:$0xff] }
 0x5a7   : > { %v3887_v8 = vsel %vm3855_vm1, 4, %v11477_v51  ;;  %vm3902_vm14 = vcmp.lt.f32.partialorder %v17072_v59, %v3870_v39  ;;  %v7112_v45 = vsel %vm3132_vm3, 1.0, %v16894_v35  ;;  %v11788_v0 = vsel %vm2973_vm15, 3e+38, %v8555_v13  ;;  %v17084_v55 = vld [vmem:[#allocation131_spill] sm:$0xff] }
 0x5a8   : > { %vm3903_vm0 = vcmp.lt.f32.partialorder %v17073_v14, %v3871_v48  ;;  %v3918_v37 = vsel %vm3902_vm14, %v17072_v59, %v3870_v39  ;;  %v11792_v61 = vsel %vm3902_vm14, 5, %v3886_v19  ;;  %vm3757_vm12 = vcmp.lt.f32.partialorder %v11788_v0, %v11435_v4  ;;  %v17083_v59 = vld [vmem:[#allocation135_spill] sm:$0xff] }
 0x5a9   : > { %17074 = vst [vmem:[#allocation80_spill] sm:$0xff] %v11792_v61  ;;  %v3919_v51 = vsel %vm3903_vm0, %v17073_v14, %v3871_v48  ;;  %v11797_v33 = vsel %vm3903_vm0, 5, %v3887_v8  ;;  %vm17076_vm7 = vcmask 7168   ;;  %7977 = vperm.xlu1 %7810, %v7976_v23   ;;  %v7113_v13 = vsel %vm3133_vm8, 1.0, %v16894_v35  ;;  %v17079_v8 = vld [vmem:[#allocation34_spill] sm:$0xff] }
 0x5aa   : > { %17075 = vst [vmem:[#allocation155_spill] sm:$0xff] %v11797_v33  ;;  %6240 = vst.msk [vmem:[#allocation2 + $0xa0] sm:$0xff] %vm17076_vm7, %v3918_v37  ;;  %v3826_v56 = vsel %vm3810_vm2, %v11554_v6, %v11499_v15  ;;  %v11810_v39 = vsel %vm2977_vm5, 3e+38, %v8556_v9  ;;  %v7931_v19 = vpack.i.bf16 %v7113_v13, %v7112_v45  ;;  %vm3298_vm1 = vcmp.eq.s32.totalorder %v10732_v41, 4  ;;  %v8557_v15 = vld [vmem:[#allocation2 + $0x130] sm:$0xff] }
 0x5ab   : > { %vm17077_vm15 = vmmov %vm17076_vm7  ;;  %vm3756_vm14 = vcmp.lt.f32.partialorder %v11761_v27, %v11442_v10  ;;  %v3827_v23 = vsel %vm3811_vm6, %v11565_v28, %v11492_v44  ;;  %vm17078_vm2 = vcmp.eq.s32.totalorder %v10631_v50, 2  ;;  %vm16579_vm5 = vcmp.lt.f32.partialorder %v11810_v39, %v11515_v7  ;;  %v17132_v33 = vld [vmem:[#allocation21_spill] sm:$0xff] }
 0x5ac   : > { %6241 = vst.msk [vmem:[#allocation2 + $0xa8] sm:$0xff] %vm17077_vm15, %v3919_v51  ;;  %v11823_v48 = vsel %vm17078_vm2, 3e+38, %v8557_v15  ;;  %7932 = vperm.xlu0 %7804, %v7931_v19   ;;  %vm3299_vm0 = vcmp.eq.s32.totalorder %v10673_v17, 4  ;;  %v7134_v45 = vsel %vm3298_vm1, 1.0, %v16894_v35  ;;  %vm3136_vm7 = vcmp.eq.s32.totalorder %v10631_v50, 3 }
 0x5ad   : > { %v11830_v37 = vsel %vm3298_vm1, 3e+38, %v17079_v8  ;;  %v7135_v44 = vsel %vm3299_vm0, 1.0, %v16894_v35  ;;  %v17081_v51 = vld [vmem:[#allocation33_spill] sm:$0xff]  ;;  %vm3137_vm15 = vcmp.eq.s32.totalorder %v10579_v32, 3 }
 0x5ae   : > { %17080 = vst [vmem:[#allocation34_spill] sm:$0xff] %v11830_v37  ;;  %v11835_v13 = vsel %vm3299_vm0, 3e+38, %v17081_v51  ;;  %vm3858_vm6 = vcmp.lt.f32.partialorder %v11830_v37, %v3826_v56  ;;  %v7986_v9 = vpack.i.bf16 %v7135_v44, %v7134_v45  ;;  %v7116_v51 = vsel %vm3136_vm7, 1.0, %v16894_v35 }
 0x5af   : > { %17082 = vst [vmem:[#allocation33_spill] sm:$0xff] %v11835_v13  ;;  %vm3859_vm2 = vcmp.lt.f32.partialorder %v11835_v13, %v3827_v23  ;;  %v3874_v19 = vsel %vm3858_vm6, %v11830_v37, %v3826_v56  ;;  %v3890_v15 = vsel %vm3858_vm6, 4, %v11576_v29  ;;  %vm3760_vm0 = vcmp.lt.f32.partialorder %v11823_v48, %v11506_v18  ;;  %v11854_v29 = vpop.f32.mrb[28].mxu0 }
 0x5b0   : > { %v3875_v8 = vsel %vm3859_vm2, %v11835_v13, %v3827_v23  ;;  %v3891_v14 = vsel %vm3859_vm2, 4, %v11589_v12  ;;  %vm3906_vm1 = vcmp.lt.f32.partialorder %v17083_v59, %v3874_v19  ;;  %7987 = vperm.xlu1 %7810, %v7986_v9   ;;  %17086 = vst [vmem:[#allocation157_spill] sm:$0xff] %v11854_v29  ;;  %v11861_v12 = vsel %vm16578_vm9, %v11735_v38, %v17071_v25  ;;  %v11870_v9 = vpop.f32.mrb[29].mxu0  ;;  %v17098_v13 = vld [vmem:[#allocation37_spill] sm:$0xff] }
 0x5b1   : > { %vm3907_vm11 = vcmp.lt.f32.partialorder %v17084_v55, %v3875_v8  ;;  %v3922_v45 = vsel %vm3906_vm1, %v17083_v59, %v3874_v19  ;;  %v11852_v56 = vsel %vm3906_vm1, 5, %v3890_v15  ;;  %17087 = vst [vmem:[#allocation158_spill] sm:$0xff] %v11861_v12  ;;  %vm17089_vm6 = vcmask 7168   ;;  %17090 = vst [vmem:[#allocation160_spill] sm:$0xff] %v11870_v9 }
 0x5b2   : > { %17085 = vst [vmem:[#allocation156_spill] sm:$0xff] %v11852_v56  ;;  %v3923_v23 = vsel %vm3907_vm11, %v17084_v55, %v3875_v8  ;;  %v11864_v44 = vsel %vm3907_vm11, 5, %v3891_v14  ;;  %6244 = vst.msk [vmem:[#allocation2 + $0xc0] sm:$0xff] %vm17089_vm6, %v3922_v45  ;;  %v7117_v19 = vsel %vm3137_vm15, 1.0, %v16894_v35  ;;  %v11877_v15 = vsel %vm3757_vm12, %v11788_v0, %v11435_v4  ;;  %v11886_v45 = vpop.f32.mrb[30].mxu0 }
 0x5b3   : > { %17088 = vst [vmem:[#allocation159_spill] sm:$0xff] %v11864_v44  ;;  %vm17091_vm11 = vcmp.lt.f32.partialorder %v11634_v26, %v11539_v21  ;;  %vm17092_vm2 = vmmov %vm17089_vm6  ;;  %v7941_v8 = vpack.i.bf16 %v7117_v19, %v7116_v51  ;;  %vm3302_vm1 = vcmp.eq.s32.totalorder %v10917_v2, 4  ;;  %v11893_v9 = vsel %vm3756_vm14, %v11761_v27, %v11442_v10  ;;  %v11914_v19 = vpop.f32.mrb[31].mxu0 }
 0x5b4   : > { %v3830_v14 = vsel %vm17091_vm11, %v11634_v26, %v11539_v21  ;;  %6245 = vst.msk [vmem:[#allocation2 + $0xc8] sm:$0xff] %vm17092_vm2, %v3923_v23  ;;  %17093 = vst [vmem:[#allocation161_spill] sm:$0xff] %v11886_v45  ;;  %v11900_v21 = vsel %vm16579_vm5, %v11810_v39, %v11515_v7  ;;  %v11907_v51 = vsel %vm3760_vm0, %v11823_v48, %v11506_v18  ;;  %vm3303_vm11 = vcmp.eq.s32.totalorder %v10861_v60, 4  ;;  %v17096_v45 = vld [vmem:[#allocation38_spill] sm:$0xff] }
 0x5b5   : > { %vm17094_vm6 = vcmp.lt.f32.partialorder %v11639_v46, %v11532_v52  ;;  %17095 = vst [vmem:[#allocation162_spill] sm:$0xff] %v11914_v19  ;;  %7942 = vperm.xlu0 %7804, %v7941_v8   ;;  %v7138_v29 = vsel %vm3302_vm1, 1.0, %v16894_v35  ;;  %v11919_v55 = vsel %vm3302_vm1, 3e+38, %v17096_v45  ;;  %vm3140_vm2 = vcmp.eq.s32.totalorder %v10823_v24, 3  ;;  %v8558_v26 = vld [vmem:[#allocation2 + $0x150] sm:$0xff] }
 0x5b6   : > { %v3831_v23 = vsel %vm17094_vm6, %v11639_v46, %v11532_v52  ;;  %17097 = vst [vmem:[#allocation38_spill] sm:$0xff] %v11919_v55  ;;  %v7139_v59 = vsel %vm3303_vm11, 1.0, %v16894_v35  ;;  %v11924_v37 = vsel %vm3303_vm11, 3e+38, %v17098_v13  ;;  %vm3862_vm9 = vcmp.lt.f32.partialorder %v11919_v55, %v3830_v14  ;;  %v17100_v46 = vld [vmem:[#allocation136_spill] sm:$0xff] }
 0x5b7   : > { %17099 = vst [vmem:[#allocation37_spill] sm:$0xff] %v11924_v37  ;;  %vm3141_vm6 = vcmp.eq.s32.totalorder %v10768_v16, 3  ;;  %vm3863_vm5 = vcmp.lt.f32.partialorder %v11924_v37, %v3831_v23  ;;  %v7996_v52 = vpack.i.bf16 %v7139_v59, %v7138_v29  ;;  %v3878_v8 = vsel %vm3862_vm9, %v11919_v55, %v3830_v14  ;;  %v17102_v59 = vld [vmem:[#allocation76_spill] sm:$0xff]  ;;  %v8559_v14 = vld [vmem:[#allocation2 + $0x158] sm:$0xff] }
 0x5b8   : > { %v3894_v19 = vsel %vm3862_vm9, 4, %v11662_v30  ;;  %v3879_v45 = vsel %vm3863_vm5, %v11924_v37, %v3831_v23  ;;  %v3895_v31 = vsel %vm3863_vm5, 4, %v11656_v54  ;;  %vm3910_vm1 = vcmp.lt.f32.partialorder %v17100_v46, %v3878_v8  ;;  %v17119_v55 = vld [vmem:[#allocation16_spill] sm:$0xff] }
 0x5b9   : > { %v7120_v13 = vsel %vm3140_vm2, 1.0, %v16894_v35  ;;  %vm17101_vm11 = vcmp.eq.s32.totalorder %v10823_v24, 2  ;;  %vm3911_vm10 = vcmp.lt.f32.partialorder %v17102_v59, %v3879_v45  ;;  %v3926_v29 = vsel %vm3910_vm1, %v17100_v46, %v3878_v8  ;;  %7997 = vperm.xlu1 %7810, %v7996_v52  }
 0x5ba   : > { %v11939_v28 = vsel %vm17101_vm11, 3e+38, %v8558_v26  ;;  %v11943_v30 = vsel %vm3910_vm1, 5, %v3894_v19  ;;  %vm17104_vm9 = vcmp.eq.s32.totalorder %v10768_v16, 2  ;;  %v3927_v23 = vsel %vm3911_vm10, %v17102_v59, %v3879_v45  ;;  %v17107_v19 = vld [vmem:[#allocation12_spill] sm:$0xff]  ;;  %v8560_v45 = vld [vmem:[#allocation2 + $0x178] sm:$0xff] }
 0x5bb   : > { %17103 = vst [vmem:[#allocation163_spill] sm:$0xff] %v11943_v30  ;;  %v11947_v54 = vsel %vm17104_vm9, 3e+38, %v8559_v14  ;;  %v11950_v37 = vsel %vm3911_vm10, 5, %v3895_v31  ;;  %vm17106_vm5 = vcmask 7168   ;;  %v7121_v26 = vsel %vm3141_vm6, 1.0, %v16894_v35 }
 0x5bc   : > { %17105 = vst [vmem:[#allocation164_spill] sm:$0xff] %v11950_v37  ;;  %6248 = vst.msk [vmem:[#allocation2 + $0xe0] sm:$0xff] %vm17106_vm5, %v3926_v29  ;;  %vm16591_vm1 = vcmp.lt.f32.partialorder %v11947_v54, %v11596_v58  ;;  %v11961_v52 = vsel %vm3133_vm8, 3e+38, %v17107_v19  ;;  %v7951_v8 = vpack.i.bf16 %v7121_v26, %v7120_v13  ;;  %vm17109_vm10 = vcmp.eq.s32.totalorder %v10356_v43, 5  ;;  %v17111_v14 = vld [vmem:[#allocation13_spill] sm:$0xff] }
 0x5bd   : > { %vm17108_vm11 = vmmov %vm17106_vm5  ;;  %v7142_v31 = vsel %vm17109_vm10, 1.0, %v16894_v35  ;;  %vm3764_vm9 = vcmp.lt.f32.partialorder %v11939_v28, %v11727_v11  ;;  %v11971_v29 = vsel %vm2985_vm4, 3e+38, %v8560_v45  ;;  %v11976_v19 = vsel %vm3132_vm3, 3e+38, %v17111_v14  ;;  %v17112_v43 = vld [vmem:[#allocation84_spill] sm:$0xff] }
 0x5be   : > { %6249 = vst.msk [vmem:[#allocation2 + $0xe8] sm:$0xff] %vm17108_vm11, %v3927_v23  ;;  %17110 = vst [vmem:[#allocation12_spill] sm:$0xff] %v11971_v29  ;;  %vm16592_vm8 = vcmp.lt.f32.partialorder %v11961_v52, %v11877_v15  ;;  %vm16596_vm5 = vcmp.lt.f32.partialorder %v11976_v19, %v11893_v9  ;;  %7952 = vperm.xlu0 %7804, %v7951_v8   ;;  %vm17113_vm11 = vcmp.eq.s32.totalorder %v17112_v43, 5  ;;  %vm3144_vm10 = vcmp.eq.s32.totalorder %v11067_v62, 3  ;;  %v17117_v59 = vld [vmem:[#allocation17_spill] sm:$0xff] }
 0x5bf   : > { %v7143_v13 = vsel %vm17113_vm11, 1.0, %v16894_v35  ;;  %vm3145_vm4 = vcmp.eq.s32.totalorder %v11017_v22, 3  ;;  %v7124_v26 = vsel %vm3144_vm10, 1.0, %v16894_v35  ;;  %vm17114_vm3 = vcmp.eq.s32.totalorder %v10543_v3, 5  ;;  %v12012_v3 = vpop.xlane.xlu0 %1951 }
 0x5c0   : > { %v8006_v23 = vpack.i.bf16 %v7143_v13, %v7142_v31  ;;  %v7125_v45 = vsel %vm3145_vm4, 1.0, %v16894_v35  ;;  %v7146_v8 = vsel %vm17114_vm3, 1.0, %v16894_v35  ;;  %v12001_v14 = vsel %vm16591_vm1, %v11947_v54, %v11596_v58  ;;  %17116 = vst [vmem:[#allocation84_spill] sm:$0xff] %v12012_v3  ;;  %v17151_v3 = vld [vmem:[#allocation126_spill] sm:$0xff] }
 0x5c1   : > { %17115 = vst [vmem:[#allocation13_spill] sm:$0xff] %v12001_v14  ;;  %vm16606_vm11 = vcmp.lt.f32.partialorder %v11971_v29, %v11861_v12  ;;  %v12010_v31 = vsel %vm16592_vm8, %v11961_v52, %v11877_v15  ;;  %v7961_v43 = vpack.i.bf16 %v7125_v45, %v7124_v26  ;;  %v12019_v13 = vsel %vm16596_vm5, %v11976_v19, %v11893_v9 }
 0x5c2   : > { %v12024_v46 = vsel %vm3136_vm7, 3e+38, %v17117_v59  ;;  %v12029_v6 = vsel %vm3137_vm15, 3e+38, %v17119_v55  ;;  %8007 = vperm.xlu1 %7810, %v8006_v23   ;;  %vm17121_vm3 = vcmp.eq.s32.totalorder %v10482_v63, 5  ;;  %vm3292_vm8 = vcmp.eq.s32.totalorder %v10446_v36, 4 }
 0x5c3   : > { %17118 = vst [vmem:[#allocation17_spill] sm:$0xff] %v12024_v46  ;;  %17120 = vst [vmem:[#allocation16_spill] sm:$0xff] %v12029_v6  ;;  %v7147_v26 = vsel %vm17121_vm3, 1.0, %v16894_v35  ;;  %vm16607_vm1 = vcmp.lt.f32.partialorder %v12029_v6, %v11900_v21  ;;  %7962 = vperm.xlu0 %7804, %v7961_v43   ;;  %vm3293_vm7 = vcmp.eq.s32.totalorder %v10394_v49, 4  ;;  %v7128_v59 = vsel %vm3292_vm8, 1.0, %v16894_v35  ;;  %v17122_v55 = vld [vmem:[#allocation28_spill] sm:$0xff] }
 0x5c4   : > { %v8016_v45 = vpack.i.bf16 %v7147_v26, %v7146_v8  ;;  %v7129_v40 = vsel %vm3293_vm7, 1.0, %v16894_v35  ;;  %v12041_v53 = vsel %vm3292_vm8, 3e+38, %v17122_v55  ;;  %v17124_v23 = vld [vmem:[#allocation27_spill] sm:$0xff]  ;;  %vm3808_vm15 = vcmp.lt.f32.partialorder %v12024_v46, %v11907_v51  ;;  %v12052_v8 = vpop.xlane.xlu0 %1937  ;;  %v8561_v26 = vld [vmem:[#allocation2 + $0x170] sm:$0xff] }
 0x5c5   : > { %17123 = vst [vmem:[#allocation28_spill] sm:$0xff] %v12041_v53  ;;  %v12044_v37 = vsel %vm3293_vm7, 3e+38, %v17124_v23  ;;  %v7971_v63 = vpack.i.bf16 %v7129_v40, %v7128_v59  ;;  %vm16598_vm5 = vcmp.lt.f32.partialorder %v12041_v53, %v12019_v13  ;;  %17126 = vst [vmem:[#allocation165_spill] sm:$0xff] %v12052_v8  ;;  %v12059_v43 = vsel %vm3764_vm9, %v11939_v28, %v11727_v11  ;;  %v17129_v23 = vld [vmem:[#allocation111_spill] sm:$0xff] }
 0x5c6   : > { %17125 = vst [vmem:[#allocation27_spill] sm:$0xff] %v12044_v37  ;;  %vm16597_vm3 = vcmp.lt.f32.partialorder %v12044_v37, %v12010_v31  ;;  %v12063_v55 = vsel %vm2984_vm13, 3e+38, %v8561_v26  ;;  %8017 = vperm.xlu1 %7810, %v8016_v45   ;;  %v12077_v59 = vsel %vm16598_vm5, %v12041_v53, %v12019_v13  ;;  %vm3460_vm8 = vcmp.eq.s32.totalorder %v10823_v24, 5  ;;  %v17130_v26 = vld [vmem:[#allocation118_spill] sm:$0xff] }
 0x5c7   : > { %v12070_v40 = vsel %vm16597_vm3, %v12044_v37, %v12010_v31  ;;  %v12085_v45 = vsel %vm16606_vm11, %v11971_v29, %v11861_v12  ;;  %vm16620_vm13 = vcmp.lt.f32.partialorder %v12063_v55, %v11752_v5  ;;  %vm16610_vm3 = vcmp.lt.f32.partialorder %v17130_v26, %v12077_v59  ;;  %7972 = vperm.xlu0 %7804, %v7971_v63   ;;  %v17155_v12 = vld [vmem:[#allocation25_spill] sm:$0xff] }
 0x5c8   : > { %17127 = vst [vmem:[#allocation166_spill] sm:$0xff] %v12070_v40  ;;  %17128 = vst [vmem:[#allocation167_spill] sm:$0xff] %v12085_v45  ;;  %vm16608_vm7 = vcmp.lt.f32.partialorder %v17129_v23, %v12070_v40  ;;  %vm3461_vm5 = vcmp.eq.s32.totalorder %v10768_v16, 5  ;;  %v12099_v30 = vsel %vm16607_vm1, %v12029_v6, %v11900_v21  ;;  %v12106_v44 = vsel %vm3808_vm15, %v12024_v46, %v11907_v51  ;;  %v12136_v8 = vpop.xlane.xlu0 %1979 }
 0x5c9   : > { %17131 = vst [vmem:[#allocation168_spill] sm:$0xff] %v12099_v30  ;;  %v3917_v63 = vsel %vm16608_vm7, %v17129_v23, %v12070_v40  ;;  %v3916_v56 = vsel %vm16610_vm3, %v17130_v26, %v12077_v59  ;;  %v12121_v61 = vsel %vm3140_vm2, 3e+38, %v17132_v33  ;;  %v12126_v57 = vsel %vm3141_vm6, 3e+38, %v17134_v34  ;;  %17140 = vst [vmem:[#allocation169_spill] sm:$0xff] %v12136_v8 }
 0x5ca   : > { %17133 = vst [vmem:[#allocation21_spill] sm:$0xff] %v12121_v61  ;;  %17135 = vst [vmem:[#allocation20_spill] sm:$0xff] %v12126_v57  ;;  %vm17136_vm11 = vcmask 7168   ;;  %vm17138_vm7 = vcmp.eq.s32.totalorder %v10732_v41, 5  ;;  %vm17139_vm3 = vcmp.eq.s32.totalorder %v10673_v17, 5  ;;  %vm16615_vm2 = vcmp.lt.f32.partialorder %v12126_v57, %v12001_v14 }
 0x5cb   : > { %6239 = vst.msk [vmem:[#allocation2 + $0x98] sm:$0xff] %vm17136_vm11, %v3917_v63  ;;  %vm17137_vm1 = vmmov %vm17136_vm11  ;;  %v7150_v60 = vsel %vm17138_vm7, 1.0, %v16894_v35  ;;  %v7151_v2 = vsel %vm17139_vm3, 1.0, %v16894_v35  ;;  %vm3296_vm6 = vcmp.eq.s32.totalorder %v10631_v50, 4  ;;  %vm3297_vm11 = vcmp.eq.s32.totalorder %v10579_v32, 4 }
 0x5cc   : > { %6238 = vst.msk [vmem:[#allocation2 + $0x90] sm:$0xff] %vm17137_vm1, %v3916_v56  ;;  %v8026_v33 = vpack.i.bf16 %v7151_v2, %v7150_v60  ;;  %vm3812_vm1 = vcmp.lt.f32.partialorder %v12121_v61, %v12059_v43  ;;  %v7132_v41 = vsel %vm3296_vm6, 1.0, %v16894_v35  ;;  %v7133_v34 = vsel %vm3297_vm11, 1.0, %v16894_v35  ;;  %v17141_v56 = vld [vmem:[#allocation32_spill] sm:$0xff]  ;;  %v17144_v2 = vld [vmem:[#allocation31_spill] sm:$0xff] }
 0x5cd   : > { %v12147_v17 = vsel %vm3296_vm6, 3e+38, %v17141_v56  ;;  %v12154_v60 = vsel %vm16620_vm13, %v12063_v55, %v11752_v5  ;;  %v12157_v63 = vsel %vm3297_vm11, 3e+38, %v17144_v2  ;;  %v7981_v8 = vpack.i.bf16 %v7133_v34, %v7132_v41  ;;  %v12178_v41 = vpop.xlane.xlu0 %1965 }
 0x5ce   : > { %17142 = vst [vmem:[#allocation32_spill] sm:$0xff] %v12147_v17  ;;  %17143 = vst [vmem:[#allocation170_spill] sm:$0xff] %v12154_v60  ;;  %8027 = vperm.xlu1 %7810, %v8026_v33   ;;  %vm3856_vm3 = vcmp.lt.f32.partialorder %v12147_v17, %v12106_v44  ;;  %v12166_v56 = vsel %vm16615_vm2, %v12126_v57, %v12001_v14  ;;  %vm16630_vm7 = vcmp.lt.f32.partialorder %v12157_v63, %v12099_v30  ;;  %v17154_v57 = vld [vmem:[#allocation124_spill] sm:$0xff] }
 0x5cf   : > { %17145 = vst [vmem:[#allocation31_spill] sm:$0xff] %v12157_v63  ;;  %17146 = vst [vmem:[#allocation171_spill] sm:$0xff] %v12166_v56  ;;  %v12175_v33 = vsel %vm3856_vm3, %v12147_v17, %v12106_v44  ;;  %vm3300_vm6 = vcmp.eq.s32.totalorder %v10823_v24, 4  ;;  %v12185_v34 = vsel %vm3812_vm1, %v12121_v61, %v12059_v43  ;;  %v12192_v2 = vsel %vm16630_vm7, %v12157_v63, %v12099_v30  ;;  %v17158_v30 = vld [vmem:[#allocation36_spill] sm:$0xff]  ;;  %v17271_v17 = vld [vmem:[#allocation81_spill] sm:$0xff] }
 0x5d0   : > { %17147 = vst [vmem:[#allocation172_spill] sm:$0xff] %v12175_v33  ;;  %17148 = vst [vmem:[#allocation173_spill] sm:$0xff] %v12178_v41  ;;  %vm16629_vm11 = vcmp.lt.f32.partialorder %v17151_v3, %v12175_v33  ;;  %7982 = vperm.xlu0 %7804, %v7981_v8   ;;  %vm3301_vm2 = vcmp.eq.s32.totalorder %v10768_v16, 4  ;;  %v17152_v41 = vld [vmem:[#allocation24_spill] sm:$0xff]  ;;  %vm16635_vm13 = vcmp.lt.f32.partialorder %v17154_v57, %v12192_v2  ;;  %v7136_v23 = vsel %vm3300_vm6, 1.0, %v16894_v35  ;;  %v17227_v16 = vld [vmem:[#allocation126_spill] sm:$0xff] }
 0x5d1   : > { %17149 = vst [vmem:[#allocation174_spill] sm:$0xff] %v12185_v34  ;;  %17150 = vst [vmem:[#allocation175_spill] sm:$0xff] %v12192_v2  ;;  %v12200_v14 = vsel %vm3144_vm10, 3e+38, %v17152_v41  ;;  %v3920_v40 = vsel %vm16629_vm11, %v17151_v3, %v12175_v33  ;;  %v12213_v8 = vsel %vm3145_vm4, 3e+38, %v17155_v12  ;;  %v3921_v41 = vsel %vm16635_vm13, %v17154_v57, %v12192_v2  ;;  %v12233_v2 = vpop.xlane.xlu0 %2007 }
 0x5d2   : > { %17153 = vst [vmem:[#allocation24_spill] sm:$0xff] %v12200_v14  ;;  %17156 = vst [vmem:[#allocation25_spill] sm:$0xff] %v12213_v8  ;;  %vm17157_vm10 = vcmask 7168   ;;  %v7137_v29 = vsel %vm3301_vm2, 1.0, %v16894_v35  ;;  %v12223_v63 = vsel %vm3300_vm6, 3e+38, %v17158_v30  ;;  %vm16637_vm11 = vcmp.lt.f32.partialorder %v12200_v14, %v12154_v60 }
 0x5d3   : > { %6242 = vst.msk [vmem:[#allocation2 + $0xb0] sm:$0xff] %vm17157_vm10, %v3920_v40  ;;  %17159 = vst [vmem:[#allocation36_spill] sm:$0xff] %v12223_v63  ;;  %v17161_v12 = vld [vmem:[#allocation35_spill] sm:$0xff]  ;;  %v7991_v3 = vpack.i.bf16 %v7137_v29, %v7136_v23  ;;  %vm16638_vm4 = vcmp.lt.f32.partialorder %v12223_v63, %v12185_v34  ;;  %v17164_v40 = vld [vmem:[#allocation112_spill] sm:$0xff]  ;;  %vm16644_vm6 = vcmp.lt.f32.partialorder %v12213_v8, %v12085_v45  ;;  %v7152_v51 = vsel %vm3460_vm8, 1.0, %v16894_v35 }
 0x5d4   : > { %vm17160_vm7 = vmmov %vm17157_vm10  ;;  %v12229_v33 = vsel %vm3301_vm2, 3e+38, %v17161_v12  ;;  %17163 = vst [vmem:[#allocation176_spill] sm:$0xff] %v12233_v2  ;;  %v12238_v57 = vsel %vm3460_vm8, 3e+38, %v17164_v40  ;;  %v12249_v30 = vsel %vm16638_vm4, %v12223_v63, %v12185_v34  ;;  %v17167_v29 = vld [vmem:[#allocation105_spill] sm:$0xff]  ;;  %v12271_v12 = vsel %vm16637_vm11, %v12200_v14, %v12154_v60 }
 0x5d5   : > { %6243 = vst.msk [vmem:[#allocation2 + $0xb8] sm:$0xff] %vm17160_vm7, %v3921_v41  ;;  %17162 = vst [vmem:[#allocation35_spill] sm:$0xff] %v12229_v33  ;;  %vm16636_vm7 = vcmp.lt.f32.partialorder %v12229_v33, %v12166_v56  ;;  %v12254_v23 = vsel %vm3461_vm5, 3e+38, %v17167_v29  ;;  %vm3465_vm2 = vcmp.eq.s32.totalorder %v11017_v22, 5  ;;  %vm16643_vm10 = vcmp.lt.f32.partialorder %v12238_v57, %v12249_v30  ;;  %7992 = vperm.xlu0 %7804, %v7991_v3   ;;  %v12295_v2 = vpop.xlane.xlu0 %1993  ;;  %v17181_v60 = vld [vmem:[#allocation40_spill] sm:$0xff] }
 0x5d6   : > { %17165 = vst [vmem:[#allocation112_spill] sm:$0xff] %v12238_v57  ;;  %17166 = vst [vmem:[#allocation177_spill] sm:$0xff] %v12249_v30  ;;  %v12262_v41 = vsel %vm16636_vm7, %v12229_v33, %v12166_v56  ;;  %v3924_v40 = vsel %vm16643_vm10, %v12238_v57, %v12249_v30  ;;  %vm3464_vm7 = vcmp.eq.s32.totalorder %v11067_v62, 5  ;;  %v12286_v3 = vsel %vm16644_vm6, %v12213_v8, %v12085_v45  ;;  %v17172_v30 = vld [vmem:[#allocation125_spill] sm:$0xff]  ;;  %v17175_v33 = vld [vmem:[#allocation39_spill] sm:$0xff] }
 0x5d7   : > { %17168 = vst [vmem:[#allocation105_spill] sm:$0xff] %v12254_v23  ;;  %17169 = vst [vmem:[#allocation178_spill] sm:$0xff] %v12262_v41  ;;  %vm16662_vm13 = vcmp.lt.f32.partialorder %v12254_v23, %v12262_v41  ;;  %vm17170_vm11 = vcmask 7168   ;;  %vm3304_vm4 = vcmp.eq.s32.totalorder %v11067_v62, 4  ;;  %v12300_v57 = vsel %vm3465_vm2, 3e+38, %v17172_v30 }
 0x5d8   : > { %v3925_v29 = vsel %vm16662_vm13, %v12254_v23, %v12262_v41  ;;  %6246 = vst.msk [vmem:[#allocation2 + $0xd0] sm:$0xff] %vm17170_vm11, %v3924_v40  ;;  %17171 = vst [vmem:[#allocation179_spill] sm:$0xff] %v12295_v2  ;;  %vm3305_vm6 = vcmp.eq.s32.totalorder %v11017_v22, 4  ;;  %v7140_v56 = vsel %vm3304_vm4, 1.0, %v16894_v35  ;;  %v12306_v45 = vsel %vm3304_vm4, 3e+38, %v17175_v33 }
 0x5d9   : > { %17173 = vst [vmem:[#allocation125_spill] sm:$0xff] %v12300_v57  ;;  %vm17174_vm10 = vmmov %vm17170_vm11  ;;  %v17177_v41 = vmov 0   ;;  %v17178_v40 = vld [vmem:[#allocation141_spill] sm:$0xff]  ;;  %v17179_v23 = vld [vmem:[#allocation62_spill] sm:$0xff]  ;;  %v7141_v2 = vsel %vm3305_vm6, 1.0, %v16894_v35  ;;  %vm17214_vm8 = vcmp.lt.f32.partialorder %v17130_v26, %v12077_v59 }
 0x5da   : > { %6247 = vst.msk [vmem:[#allocation2 + $0xd8] sm:$0xff] %vm17174_vm10, %v3925_v29  ;;  %17176 = vst [vmem:[#allocation39_spill] sm:$0xff] %v12306_v45  ;;  %vm17180_vm11 = vcmp.lt.f32.partialorder %v17178_v40, %v17179_v23  ;;  %v12314_v14 = vsel %vm3305_vm6, 3e+38, %v17181_v60  ;;  %vm3864_vm10 = vcmp.lt.f32.partialorder %v12306_v45, %v12271_v12  ;;  %v17183_v30 = vld [vmem:[#allocation128_spill] sm:$0xff]  ;;  %v8001_v33 = vpack.i.bf16 %v7141_v2, %v7140_v56  ;;  %v17185_v60 = vld [vmem:[#allocation142_spill] sm:$0xff]  ;;  %v12349_v2 = vpop.xlane.xlu0 %2035 }
 0x5db   : > { %v3740_v8 = vsel %vm17180_vm11, 1, %v17177_v41  ;;  %17182 = vst [vmem:[#allocation40_spill] sm:$0xff] %v12314_v14  ;;  %v12321_v29 = vsel %vm3464_vm7, 3e+38, %v17183_v30  ;;  %vm16664_vm4 = vcmp.lt.f32.partialorder %v12314_v14, %v12286_v3  ;;  %v12330_v40 = vsel %vm3864_vm10, %v12306_v45, %v12271_v12  ;;  %v17186_v23 = vld [vmem:[#allocation61_spill] sm:$0xff]  ;;  %v17189_v30 = vld [vmem:[#allocation68_spill] sm:$0xff] }
 0x5dc   : > { %17184 = vst [vmem:[#allocation128_spill] sm:$0xff] %v12321_v29  ;;  %vm17187_vm6 = vcmp.lt.f32.partialorder %v17185_v60, %v17186_v23  ;;  %v17188_v34 = vld [vmem:[#allocation81_spill] sm:$0xff]  ;;  %v12345_v56 = vsel %vm16664_vm4, %v12314_v14, %v12286_v3  ;;  %vm16665_vm13 = vcmp.lt.f32.partialorder %v12321_v29, %v12330_v40  ;;  %17191 = vst [vmem:[#allocation180_spill] sm:$0xff] %v12349_v2  ;;  %v3788_v60 = vsel %vm3756_vm14, 2, %v3740_v8  ;;  %v17193_v2 = vld [vmem:[#allocation88_spill] sm:$0xff] }
 0x5dd   : > { %v3741_v22 = vsel %vm17187_vm6, 1, %v17177_v41  ;;  %vm17190_vm11 = vcmp.lt.f32.partialorder %v17188_v34, %v17189_v30  ;;  %vm3913_vm6 = vcmp.lt.f32.partialorder %v12300_v57, %v12345_v56  ;;  %v3928_v34 = vsel %vm16665_vm13, %v12321_v29, %v12330_v40  ;;  %8002 = vperm.xlu0 %7804, %v8001_v33   ;;  %v17194_v23 = vld [vmem:[#allocation67_spill] sm:$0xff]  ;;  %v17220_v43 = vld [vmem:[#allocation12_spill] sm:$0xff]  ;;  %v17260_v45 = vld [vmem:[#allocation10_spill] sm:$0xff] }
 0x5de   : > { %v3744_v63 = vsel %vm17190_vm11, 1, %v17177_v41  ;;  %vm17192_vm11 = vcmp.eq.s32.totalorder %v10446_v36, 5  ;;  %vm17195_vm4 = vcmp.lt.f32.partialorder %v17193_v2, %v17194_v23  ;;  %v3929_v8 = vsel %vm3913_vm6, %v12300_v57, %v12345_v56  ;;  %v12394_v4 = vpop.xlane.xlu0 %2021  ;;  %v17223_v59 = vld [vmem:[#allocation111_spill] sm:$0xff]  ;;  %v17239_v62 = vld [vmem:[#allocation124_spill] sm:$0xff]  ;;  %v17255_v12 = vld [vmem:[#allocation178_spill] sm:$0xff] }
 0x5df   : > { %v7144_v30 = vsel %vm17192_vm11, 1.0, %v16894_v35  ;;  %v3745_v10 = vsel %vm17195_vm4, 1, %v17177_v41  ;;  %vm17196_vm14 = vcmask 7168   ;;  %vm17197_vm13 = vcmp.eq.s32.totalorder %v10394_v49, 5  ;;  %v17267_v57 = vld [vmem:[#allocation142_spill] sm:$0xff] }
 0x5e0   : > { %6250 = vst.msk [vmem:[#allocation2 + $0xf0] sm:$0xff] %vm17196_vm14, %v3928_v34  ;;  %v7145_v33 = vsel %vm17197_vm13, 1.0, %v16894_v35  ;;  %v3789_v36 = vsel %vm3757_vm12, 2, %v3741_v22  ;;  %v3792_v27 = vsel %vm3760_vm0, 2, %v3744_v63  ;;  %vm17198_vm4 = vmmov %vm17196_vm14  ;;  %vm17199_vm11 = vcmp.lt.f32.partialorder %v11558_v42, %v11218_v20 }
 0x5e1   : > { %6251 = vst.msk [vmem:[#allocation2 + $0xf8] sm:$0xff] %vm17198_vm4, %v3929_v8  ;;  %v8011_v2 = vpack.i.bf16 %v7145_v33, %v7144_v30  ;;  %v3748_v34 = vsel %vm17199_vm11, 1, %v17177_v41  ;;  %vm17200_vm14 = vcmp.lt.f32.partialorder %v11976_v19, %v11893_v9  ;;  %vm17201_vm13 = vcmp.eq.s32.totalorder %v10631_v50, 5  ;;  %v17206_v30 = vld [vmem:[#allocation75_spill] sm:$0xff] }
 0x5e2   : > { %v3836_v49 = vsel %vm17200_vm14, 3, %v3788_v60  ;;  %v7148_v22 = vsel %vm17201_vm13, 1.0, %v16894_v35  ;;  %vm17202_vm12 = vcmp.lt.f32.partialorder %v11810_v39, %v11515_v7  ;;  %vm17203_vm0 = vcmp.lt.f32.partialorder %v11961_v52, %v11877_v15  ;;  %v17205_v60 = vld [vmem:[#allocation145_spill] sm:$0xff]  ;;  %v12428_v11 = vpop.xlane.xlu0 %2063 }
 0x5e3   : > { %v3793_v18 = vsel %vm17202_vm12, 2, %v3745_v10  ;;  %8012 = vperm.xlu0 %7804, %v8011_v2   ;;  %v3837_v63 = vsel %vm17203_vm0, 3, %v3789_v36  ;;  %v3840_v9 = vsel %vm3808_vm15, 3, %v3792_v27  ;;  %vm17204_vm4 = vcmp.eq.s32.totalorder %v10579_v32, 5 }
 0x5e4   : > { %v7149_v50 = vsel %vm17204_vm4, 1.0, %v16894_v35  ;;  %vm17207_vm11 = vcmp.lt.f32.partialorder %v17205_v60, %v17206_v30  ;;  %v3796_v7 = vsel %vm3764_vm9, 2, %v3748_v34  ;;  %vm17208_vm14 = vcmp.lt.f32.partialorder %v12041_v53, %v12019_v13  ;;  %v17217_v34 = vld [vmem:[#allocation31_spill] sm:$0xff] }
 0x5e5   : > { %v3749_v8 = vsel %vm17207_vm11, 1, %v17177_v41  ;;  %v3884_v15 = vsel %vm17208_vm14, 4, %v3836_v49  ;;  %v8021_v2 = vpack.i.bf16 %v7149_v50, %v7148_v22  ;;  %vm17209_vm15 = vcmp.lt.f32.partialorder %v11618_v47, %v11392_v1 }
 0x5e6   : > { %v3752_v32 = vsel %vm17209_vm15, 1, %v17177_v41  ;;  %vm17210_vm13 = vcmp.lt.f32.partialorder %v12029_v6, %v11900_v21  ;;  %vm17211_vm9 = vcmp.lt.f32.partialorder %v11735_v38, %v17071_v25  ;;  %vm17212_vm12 = vcmp.lt.f32.partialorder %v12044_v37, %v12010_v31 }
 0x5e7   : > { %v3841_v27 = vsel %vm17210_vm13, 3, %v3793_v18  ;;  %v3753_v13 = vsel %vm17211_vm9, 1, %v17177_v41  ;;  %v3885_v10 = vsel %vm17212_vm12, 4, %v3837_v63  ;;  %v3888_v21 = vsel %vm3856_vm3, 4, %v3840_v9  ;;  %8022 = vperm.xlu0 %7804, %v8021_v2   ;;  %v17221_v18 = vld [vmem:[#allocation158_spill] sm:$0xff]  ;;  %v17230_v2 = vld [vmem:[#allocation20_spill] sm:$0xff] }
 0x5e8   : > { %vm17213_vm0 = vcmp.lt.f32.partialorder %v11947_v54, %v11596_v58  ;;  %v3844_v33 = vsel %vm3812_vm1, 3, %v3796_v7  ;;  %v12449_v36 = vsel %vm17214_vm8, 5, %v3884_v15  ;;  %v7153_v31 = vsel %vm3461_vm5, 1.0, %v16894_v35  ;;  %v17218_v58 = vld [vmem:[#allocation168_spill] sm:$0xff]  ;;  %v17224_v9 = vld [vmem:[#allocation166_spill] sm:$0xff]  ;;  %v12476_v15 = vpop.xlane.xlu0 %2049 }
 0x5e9   : > { %v3797_v24 = vsel %vm17213_vm0, 2, %v3749_v8  ;;  %17215 = vst [vmem:[#allocation67_spill] sm:$0xff] %v12449_v36  ;;  %vm17216_vm3 = vcmp.lt.f32.partialorder %v12063_v55, %v11752_v5  ;;  %vm17219_vm4 = vcmp.lt.f32.partialorder %v17217_v34, %v17218_v58  ;;  %v8031_v22 = vpack.i.bf16 %v7153_v31, %v7152_v51  ;;  %v17228_v8 = vld [vmem:[#allocation172_spill] sm:$0xff] }
 0x5ea   : > { %v3800_v44 = vsel %vm17216_vm3, 2, %v3752_v32  ;;  %v3889_v49 = vsel %vm17219_vm4, 4, %v3841_v27  ;;  %vm17222_vm1 = vcmp.lt.f32.partialorder %v17220_v43, %v17221_v18  ;;  %vm17225_vm11 = vcmp.lt.f32.partialorder %v17223_v59, %v17224_v9  ;;  %v17231_v32 = vld [vmem:[#allocation13_spill] sm:$0xff]  ;;  %v17233_v51 = vld [vmem:[#allocation36_spill] sm:$0xff]  ;;  %v12488_v18 = vpop.permute.xlu1 %7812  ;;  %v17240_v9 = vld [vmem:[#allocation175_spill] sm:$0xff] }
 0x5eb   : > { %v3801_v63 = vsel %vm17222_vm1, 2, %v3753_v13  ;;  %v12466_v50 = vsel %vm17225_vm11, 5, %v3885_v10  ;;  %vm17229_vm5 = vcmp.lt.f32.partialorder %v17227_v16, %v17228_v8  ;;  %v7156_v5 = vsel %vm3464_vm7, 1.0, %v16894_v35  ;;  %v17234_v13 = vld [vmem:[#allocation174_spill] sm:$0xff]  ;;  %8032 = vperm.xlu0 %7804, %v8031_v22   ;;  %v17236_v31 = vld [vmem:[#allocation24_spill] sm:$0xff] }
 0x5ec   : > { %17226 = vst [vmem:[#allocation145_spill] sm:$0xff] %v12466_v50  ;;  %v12471_v7 = vsel %vm17229_vm5, 5, %v3888_v21  ;;  %vm17232_vm14 = vcmp.lt.f32.partialorder %v17230_v2, %v17231_v32  ;;  %vm17235_vm15 = vcmp.lt.f32.partialorder %v17233_v51, %v17234_v13  ;;  %vm3948_vm13 = vcmp.eq.s32.totalorder %v12449_v36, 0  ;;  %v17237_v21 = vld [vmem:[#allocation170_spill] sm:$0xff]  ;;  %v17243_v13 = vld [vmem:[#allocation25_spill] sm:$0xff]  ;;  %v17257_v59 = vld [vmem:[#allocation84_spill] sm:$0xff] }
 0x5ed   : > { %v3845_v27 = vsel %vm17232_vm14, 3, %v3797_v24  ;;  %v3892_v10 = vsel %vm17235_vm15, 4, %v3844_v33  ;;  %vm17238_vm9 = vcmp.lt.f32.partialorder %v17236_v31, %v17237_v21  ;;  %vm17241_vm7 = vcmp.lt.f32.partialorder %v17239_v62, %v17240_v9  ;;  %v17244_v33 = vld [vmem:[#allocation167_spill] sm:$0xff]  ;;  %v17249_v9 = vld [vmem:[#allocation112_spill] sm:$0xff] }
 0x5ee   : > { %v3848_v58 = vsel %vm17238_vm9, 3, %v3800_v44  ;;  %v12493_v8 = vsel %vm17241_vm7, 5, %v3889_v49  ;;  %v7157_v32 = vsel %vm3465_vm2, 1.0, %v16894_v35  ;;  %vm17245_vm12 = vcmp.lt.f32.partialorder %v17243_v13, %v17244_v33  ;;  %v17246_v44 = vld [vmem:[#allocation35_spill] sm:$0xff]  ;;  %v17250_v49 = vld [vmem:[#allocation177_spill] sm:$0xff]  ;;  %v7818_v13 = vpop.permute.xlu1 %7817 }
 0x5ef   : > { %v3849_v22 = vsel %vm17245_vm12, 3, %v3801_v63  ;;  %v8041_v16 = vpack.i.bf16 %v7157_v32, %v7156_v5  ;;  %vm3949_vm0 = vcmp.eq.s32.totalorder %v12466_v50, 0  ;;  %vm3952_vm8 = vcmp.eq.s32.totalorder %v12471_v7, 0  ;;  %v17247_v21 = vld [vmem:[#allocation171_spill] sm:$0xff]  ;;  %v17252_v33 = vld [vmem:[#allocation85_spill] sm:$0xff]  ;;  %v12515_v5 = vpop.xlane.xlu0 %2091 }
 0x5f0   : > { %vm17248_vm3 = vcmp.lt.f32.partialorder %v17246_v44, %v17247_v21  ;;  %vm17251_vm4 = vcmp.lt.f32.partialorder %v17249_v9, %v17250_v49  ;;  %v7160_v24 = vsel %vm3948_vm13, 1.0, %v16894_v35  ;;  %v1947_v63 = vand.u32 65535, %v17252_v33  ;;  %v17254_v9 = vld [vmem:[#allocation105_spill] sm:$0xff] }
 0x5f1   : > { %v3893_v26 = vsel %vm17248_vm3, 4, %v3845_v27  ;;  %v12509_v62 = vsel %vm17251_vm4, 5, %v3892_v10  ;;  %v7815_v32 = vunpack.i.h.bf16 %v12488_v18  ;;  %v3896_v21 = vsel %vm3864_vm10, 4, %v3848_v58  ;;  %8042 = vperm.xlu0 %7804, %v8041_v16   ;;  %v17270_v44 = vld [vmem:[#allocation89_spill] sm:$0xff] }
 0x5f2   : > { %vm3953_vm2 = vcmp.eq.s32.totalorder %v12493_v8, 0  ;;  %v7814_v27 = vunpack.i.l.bf16 %v12488_v18  ;;  %vm17253_vm1 = vcmp.lt.f32.partialorder %v12314_v14, %v12286_v3  ;;  %v7161_v49 = vsel %vm3949_vm0, 1.0, %v16894_v35  ;;  %v17258_v18 = vld [vmem:[#allocation23_spill] sm:$0xff] }
 0x5f3   : > { %v3897_v10 = vsel %vm17253_vm1, 4, %v3849_v22  ;;  %v7164_v33 = vsel %vm3952_vm8, 1.0, %v16894_v35  ;;  %vm17256_vm10 = vcmp.lt.f32.partialorder %v17254_v9, %v17255_v12  ;;  %v8051_v58 = vpack.i.bf16 %v7161_v49, %v7160_v24  ;;  %v17261_v24 = vld [vmem:[#allocation62_spill] sm:$0xff]  ;;  %v12568_v56 = vpop.xlane.xlu0 %2077 }
 0x5f4   : > { %v12535_v16 = vsel %vm17256_vm10, 5, %v3893_v26  ;;  %vm1953_vm11 = vcmp.eq.f32.partialorder %v17258_v18, %v17257_v59  ;;  %vm3956_vm5 = vcmp.eq.s32.totalorder %v12509_v62, 0  ;;  %vm17259_vm14 = vcmp.lt.f32.partialorder %v12321_v29, %v12330_v40  ;;  %v17262_v40 = vld [vmem:[#allocation61_spill] sm:$0xff] }
 0x5f5   : > { %v12543_v3 = vsel %vm17259_vm14, 5, %v3896_v21  ;;  %v7165_v22 = vsel %vm3953_vm2, 1.0, %v16894_v35  ;;  %v1949_v14 = vcvt.s32.f32 %v1947_v63  ;;  %v1933_v12 = vand.u32 65535, %v17260_v45  ;;  %8052 = vperm.xlu0 %7804, %v8051_v58  }
 0x5f6   : > { %v12552_v26 = vsel %vm3913_vm6, 5, %v3897_v10  ;;  %v12557_v49 = vsel %vm3948_vm13, 3e+38, %v17261_v24  ;;  %v12562_v21 = vsel %vm3949_vm0, 3e+38, %v17262_v40  ;;  %v8061_v18 = vpack.i.bf16 %v7165_v22, %v7164_v33  ;;  %v17263_v10 = vld [vmem:[#allocation165_spill] sm:$0xff] }
 0x5f7   : > { %v1954_v63 = vsel %vm1953_vm11, %v1949_v14, inf  ;;  %vm3957_vm15 = vcmp.eq.s32.totalorder %v12535_v16, 0  ;;  %v7168_v45 = vsel %vm3956_vm5, 1.0, %v16894_v35  ;;  %vm4108_vm6 = vcmp.eq.s32.totalorder %v12449_v36, 1  ;;  %v17264_v24 = vld [vmem:[#allocation86_spill] sm:$0xff]  ;;  %v17265_v33 = vld [vmem:[#allocation141_spill] sm:$0xff]  ;;  %v12620_v34 = vpop.xlane.xlu0 %2119 }
 0x5f8   : > { %1955 = vmin.xlane.f32.xlu1 %v1954_v63  ;;  %vm1939_vm13 = vcmp.eq.f32.partialorder %v17264_v24, %v17263_v10  ;;  %vm3960_vm9 = vcmp.eq.s32.totalorder %v12543_v3, 0  ;;  %vm4109_vm7 = vcmp.eq.s32.totalorder %v12466_v50, 1  ;;  %v12578_v14 = vsel %vm4108_vm6, 3e+38, %v17265_v33  ;;  %v17266_v22 = vld [vmem:[#allocation87_spill] sm:$0xff]  ;;  %v17268_v63 = vld [vmem:[#allocation68_spill] sm:$0xff] }
 0x5f9   : > { %v1935_v58 = vcvt.s32.f32 %v1933_v12  ;;  %v1975_v40 = vand.u32 65535, %v17266_v22  ;;  %v12584_v29 = vsel %vm4109_vm7, 3e+38, %v17267_v57  ;;  %vm5004_vm12 = vcmp.lt.f32.partialorder %v12578_v14, %v12557_v49  ;;  %8062 = vperm.xlu0 %7804, %v8061_v18   ;;  %v2362_v57 = vld [vmem:[#allocation3 + $0x10] sm:$0xff]  ;;  %v2363_v22 = vld [vmem:[#allocation3 + $0x18] sm:$0xff]  ;;  %v17269_v18 = vld [vmem:[#allocation169_spill] sm:$0xff] }
 0x5fa   : > { %v12591_v9 = vsel %vm3952_vm8, 3e+38, %v17268_v63  ;;  %v12596_v33 = vsel %vm3953_vm2, 3e+38, %v17194_v23  ;;  %v7169_v12 = vsel %vm3957_vm15, 1.0, %v16894_v35  ;;  %vm5005_vm0 = vcmp.lt.f32.partialorder %v12584_v29, %v12562_v21 }
 0x5fb   : > { %v8071_v51 = vpack.i.bf16 %v7169_v12, %v7168_v45  ;;  %v1940_v63 = vsel %vm1939_vm13, %v1935_v58, inf  ;;  %vm3961_vm8 = vcmp.eq.s32.totalorder %v12552_v26, 0  ;;  %vm4112_vm3 = vcmp.eq.s32.totalorder %v12471_v7, 1  ;;  %v17272_v58 = vld [vmem:[#allocation90_spill] sm:$0xff] }
 0x5fc   : > { %1941 = vmin.xlane.f32.xlu1 %v1940_v63  ;;  %v7172_v23 = vsel %vm3960_vm9, 1.0, %v16894_v35  ;;  %vm1981_vm4 = vcmp.eq.f32.partialorder %v17270_v44, %v17269_v18  ;;  %vm4113_vm2 = vcmp.eq.s32.totalorder %v12493_v8, 1  ;;  %v12617_v45 = vsel %vm4112_vm3, 3e+38, %v17271_v17  ;;  %v17273_v63 = vld [vmem:[#allocation88_spill] sm:$0xff] }
 0x5fd   : > { %v1977_v24 = vcvt.s32.f32 %v1975_v40  ;;  %v1961_v12 = vand.u32 65535, %v17272_v58  ;;  %v12625_v37 = vsel %vm4113_vm2, 3e+38, %v17273_v63  ;;  %vm5008_vm1 = vcmp.lt.f32.partialorder %v12617_v45, %v12591_v9  ;;  %8072 = vperm.xlu0 %7804, %v8071_v51   ;;  %v17278_v63 = vld [vmem:[#allocation92_spill] sm:$0xff] }
 0x5fe   : > { %v12629_v53 = vmul.f32 %v7815_v32, %v2363_v22  ;;  %v12631_v31 = vmul.f32 %v7814_v27, %v2362_v57  ;;  %v1958_v17 = vcvt.f32.s32 %v17257_v59  ;;  %vm5009_vm10 = vcmp.lt.f32.partialorder %v12625_v37, %v12596_v33  ;;  %v17276_v27 = vld [vmem:[#allocation173_spill] sm:$0xff]  ;;  %v17277_v57 = vld [vmem:[#allocation91_spill] sm:$0xff] }
 0x5ff   : > { %v12639_v40 = vsel %vm3956_vm5, 3e+38, %v11218_v20  ;;  %v12644_v58 = vsel %vm3957_vm15, 3e+38, %v17206_v30  ;;  %v7173_v32 = vsel %vm3961_vm8, 1.0, %v16894_v35  ;;  %v1982_v59 = vsel %vm1981_vm4, %v1977_v24, inf  ;;  %v12661_v24 = vpop.permute.xlu1 %7822 }
 0x600   : > { %17274 = vst [vmem:[#allocation75_spill] sm:$0xff] %v12629_v53  ;;  %17275 = vst [vmem:[#allocation168_spill] sm:$0xff] %v12631_v31  ;;  %v8081_v51 = vpack.i.bf16 %v7173_v32, %v7172_v23  ;;  %1983 = vmin.xlane.f32.xlu1 %v1982_v59  ;;  %vm1967_vm11 = vcmp.eq.f32.partialorder %v17277_v57, %v17276_v27  ;;  %vm4116_vm5 = vcmp.eq.s32.totalorder %v12509_v62, 1  ;;  %vm4117_vm14 = vcmp.eq.s32.totalorder %v12535_v16, 1  ;;  %v12681_v57 = vpop.xlane.xlu0 %2105  ;;  %v17281_v53 = vld [vmem:[#allocation94_spill] sm:$0xff] }
 0x601   : > { %v1944_v20 = vcvt.f32.s32 %v17263_v10  ;;  %v7176_v30 = vsel %vm4108_vm6, 1.0, %v16894_v35  ;;  %v1963_v22 = vcvt.s32.f32 %v1961_v12  ;;  %v2003_v31 = vand.u32 65535, %v17278_v63 }
 0x602   : > { %v7820_v44 = vunpack.i.h.bf16 %v7818_v13  ;;  %v12666_v23 = vsel %vm3960_vm9, 3e+38, %v11392_v1  ;;  %8082 = vperm.xlu0 %7804, %v8081_v51   ;;  %v12671_v10 = vsel %vm4116_vm5, 3e+38, %v11558_v42  ;;  %v12676_v12 = vsel %vm4117_vm14, 3e+38, %v17205_v60 }
 0x603   : > { %v7177_v32 = vsel %vm4109_vm7, 1.0, %v16894_v35  ;;  %v1968_v59 = vsel %vm1967_vm11, %v1963_v22, inf  ;;  %vm5013_vm15 = vcmp.lt.f32.partialorder %v12676_v12, %v12644_v58  ;;  %vm5012_vm6 = vcmp.lt.f32.partialorder %v12671_v10, %v12639_v40  ;;  %v17279_v51 = vld [vmem:[#allocation176_spill] sm:$0xff]  ;;  %v17280_v22 = vld [vmem:[#allocation93_spill] sm:$0xff]  ;;  %v12705_v6 = vpop.permute.xlu1 %7827 }
 0x604   : > { %v12690_v42 = vsel %vm3961_vm8, 3e+38, %v17071_v25  ;;  %v8091_v1 = vpack.i.bf16 %v7177_v32, %v7176_v30  ;;  %1969 = vmin.xlane.f32.xlu1 %v1968_v59  ;;  %v7180_v60 = vsel %vm4112_vm3, 1.0, %v16894_v35  ;;  %vm2009_vm13 = vcmp.eq.f32.partialorder %v17280_v22, %v17279_v51  ;;  %v2364_v30 = vld [vmem:[#allocation3 + $0x20] sm:$0xff]  ;;  %v2365_v32 = vld [vmem:[#allocation3 + $0x28] sm:$0xff]  ;;  %v17286_v22 = vld [vmem:[#allocation95_spill] sm:$0xff] }
 0x605   : > { %v2005_v63 = vcvt.s32.f32 %v2003_v31  ;;  %v1989_v2 = vand.u32 65535, %v17281_v53  ;;  %vm4120_vm9 = vcmp.eq.s32.totalorder %v12543_v3, 1  ;;  %vm4121_vm7 = vcmp.eq.s32.totalorder %v12552_v26, 1 }
 0x606   : > { %v12700_v61 = vshll.u32 %v1958_v17, 16  ;;  %v12702_v25 = vshll.u32 %v1944_v20, 16  ;;  %v7819_v59 = vunpack.i.l.bf16 %v7818_v13  ;;  %v1986_v46 = vcvt.f32.s32 %v17269_v18  ;;  %8092 = vperm.xlu0 %7804, %v8091_v1   ;;  %v12720_v13 = vpop.xlane.xlu0 %2147  ;;  %v17285_v1 = vld [vmem:[#allocation179_spill] sm:$0xff] }
 0x607   : > { %v7181_v53 = vsel %vm4113_vm2, 1.0, %v16894_v35  ;;  %v2010_v31 = vsel %vm2009_vm13, %v2005_v63, inf  ;;  %v12713_v17 = vsel %vm4120_vm9, 3e+38, %v11618_v47  ;;  %v12718_v20 = vsel %vm4121_vm7, 3e+38, %v11735_v38 }
 0x608   : > { %17282 = vst [vmem:[#allocation12_spill] sm:$0xff] %v12700_v61  ;;  %17283 = vst [vmem:[#allocation158_spill] sm:$0xff] %v12702_v25  ;;  %v8101_v18 = vpack.i.bf16 %v7181_v53, %v7180_v60  ;;  %2011 = vmin.xlane.f32.xlu1 %v2010_v31  ;;  %vm1995_vm8 = vcmp.eq.f32.partialorder %v17286_v22, %v17285_v1  ;;  %vm5017_vm3 = vcmp.lt.f32.partialorder %v12718_v20, %v12690_v42  ;;  %v17288_v25 = vld [vmem:[#allocation96_spill] sm:$0xff]  ;;  %v12739_v22 = vpop.permute.xlu1 %7832 }
 0x609   : > { %17284 = vst [vmem:[#allocation166_spill] sm:$0xff] %v12720_v13  ;;  %vm5016_vm4 = vcmp.lt.f32.partialorder %v12713_v17, %v12666_v23  ;;  %v12728_v47 = vmul.f32 %v7820_v44, %v2365_v32  ;;  %v7184_v38 = vsel %vm4116_vm5, 1.0, %v16894_v35  ;;  %v1991_v63 = vcvt.s32.f32 %v1989_v2 }
 0x60a   : > { %v2031_v61 = vand.u32 65535, %v17288_v25  ;;  %v12734_v60 = vmul.f32 %v7819_v59, %v2364_v30  ;;  %v12736_v53 = vshll.u32 %v1986_v46, 16  ;;  %v1972_v31 = vcvt.f32.s32 %v17276_v27  ;;  %8102 = vperm.xlu0 %7804, %v8101_v18   ;;  %v17291_v30 = vld [vmem:[#allocation180_spill] sm:$0xff]  ;;  %v17292_v59 = vld [vmem:[#allocation97_spill] sm:$0xff] }
 0x60b   : > { %17287 = vst [vmem:[#allocation172_spill] sm:$0xff] %v12728_v47  ;;  %v7185_v44 = vsel %vm4117_vm14, 1.0, %v16894_v35  ;;  %v1996_v32 = vsel %vm1995_vm8, %v1991_v63, inf  ;;  %vm4268_vm2 = vcmp.eq.s32.totalorder %v12449_v36, 2  ;;  %vm4269_vm11 = vcmp.eq.s32.totalorder %v12466_v50, 2 }
 0x60c   : > { %17289 = vst [vmem:[#allocation13_spill] sm:$0xff] %v12734_v60  ;;  %17290 = vst [vmem:[#allocation174_spill] sm:$0xff] %v12736_v53  ;;  %v12751_v46 = vsel %vm5005_vm0, %v12584_v29, %v12562_v21  ;;  %v7825_v2 = vunpack.i.h.bf16 %v12661_v24  ;;  %v5037_v27 = vsel %vm5005_vm0, 1, %v17177_v41  ;;  %v8111_v25 = vpack.i.bf16 %v7185_v44, %v7184_v38  ;;  %1997 = vmin.xlane.f32.xlu1 %v1996_v32  ;;  %v12772_v21 = vpop.xlane.xlu0 %2133  ;;  %v12774_v38 = vpop.permute.xlu1 %7837  ;;  %v17295_v32 = vld [vmem:[#allocation154_spill] sm:$0xff] }
 0x60d   : > { %vm2037_vm5 = vcmp.eq.f32.partialorder %v17292_v59, %v17291_v30  ;;  %v5036_v18 = vsel %vm5004_vm12, 1, %v17177_v41  ;;  %v7188_v63 = vsel %vm4120_vm9, 1.0, %v16894_v35  ;;  %v2033_v53 = vcvt.s32.f32 %v2031_v61  ;;  %17293 = vst [vmem:[#allocation170_spill] sm:$0xff] %v12772_v21  ;;  %17294 = vst [vmem:[#allocation175_spill] sm:$0xff] %v12774_v38  ;;  %v2367_v61 = vld [vmem:[#allocation3 + $0x38] sm:$0xff] }
 0x60e   : > { %v12770_v29 = vsel %vm4269_vm11, 3e+38, %v11788_v0  ;;  %8112 = vperm.xlu0 %7804, %v8111_v25   ;;  %v7189_v44 = vsel %vm4121_vm7, 1.0, %v16894_v35  ;;  %v12782_v59 = vsel %vm4268_vm2, 3e+38, %v17295_v32  ;;  %v12791_v0 = vsel %vm5004_vm12, %v12578_v14, %v12557_v49  ;;  %v17296_v32 = vld [vmem:[#allocation98_spill] sm:$0xff] }
 0x60f   : > { %vm5053_vm0 = vcmp.lt.f32.partialorder %v12770_v29, %v12751_v46  ;;  %v2038_v25 = vsel %vm2037_vm5, %v2033_v53, inf  ;;  %vm5052_vm14 = vcmp.lt.f32.partialorder %v12782_v59, %v12791_v0  ;;  %v2017_v47 = vand.u32 65535, %v17296_v32  ;;  %v17297_v14 = vld [vmem:[#allocation99_spill] sm:$0xff] }
 0x610   : > { %v12796_v60 = vsel %vm5053_vm0, 2, %v5037_v27  ;;  %v8121_v21 = vpack.i.bf16 %v7189_v44, %v7188_v63  ;;  %2039 = vmin.xlane.f32.xlu1 %v2038_v25  ;;  %v7192_v13 = vsel %vm4268_vm2, 1.0, %v16894_v35  ;;  %v12807_v49 = vsel %vm5052_vm14, 2, %v5036_v18  ;;  %v12815_v63 = vpop.permute.xlu0 %7806  ;;  %v12821_v18 = vpop.permute.xlu1 %7842 }
 0x611   : > { %vm2023_vm12 = vcmp.eq.f32.partialorder %v17297_v14, %v12394_v4  ;;  %v12811_v53 = vshll.u32 %v1972_v31, 16  ;;  %v2019_v27 = vcvt.s32.f32 %v2017_v47  ;;  %vm4272_vm13 = vcmp.eq.s32.totalorder %v12471_v7, 2  ;;  %17299 = vst [vmem:[#allocation167_spill] sm:$0xff] %v12815_v63 }
 0x612   : > { %vm4273_vm9 = vcmp.eq.s32.totalorder %v12493_v8, 2  ;;  %v12817_v44 = vmul.f32 %v7825_v2, %v2367_v61  ;;  %v7824_v25 = vunpack.i.l.bf16 %v12661_v24  ;;  %v2014_v32 = vcvt.f32.s32 %v17279_v51  ;;  %8122 = vperm.xlu0 %7804, %v8121_v21  }
 0x613   : > { %17298 = vst [vmem:[#allocation59_spill] sm:$0xff] %v12811_v53  ;;  %v7193_v31 = vsel %vm4269_vm11, 1.0, %v16894_v35  ;;  %v5041_v47 = vsel %vm5009_vm10, 1, %v17177_v41  ;;  %v5040_v2 = vsel %vm5008_vm1, 1, %v17177_v41  ;;  %v2024_v61 = vsel %vm2023_vm12, %v2019_v27, inf }
 0x614   : > { %17300 = vst [vmem:[#allocation171_spill] sm:$0xff] %v12817_v44  ;;  %v8131_v24 = vpack.i.bf16 %v7193_v31, %v7192_v13  ;;  %2025 = vmin.xlane.f32.xlu1 %v2024_v61  ;;  %v12837_v51 = vsel %vm4272_vm13, 3e+38, %v11823_v48  ;;  %v12842_v21 = vsel %vm4273_vm9, 3e+38, %v11810_v39  ;;  %v12849_v14 = vsel %vm5009_vm10, %v12625_v37, %v12596_v33  ;;  %v2366_v48 = vld [vmem:[#allocation3 + $0x30] sm:$0xff]  ;;  %v12866_v27 = vpop.permute.xlu0 %7852 }
 0x615   : > { %v12856_v13 = vsel %vm5008_vm1, %v12617_v45, %v12591_v9  ;;  %v7196_v39 = vsel %vm4272_vm13, 1.0, %v16894_v35  ;;  %vm5057_vm7 = vcmp.lt.f32.partialorder %v12842_v21, %v12849_v14  ;;  %v17301_v37 = vld [vmem:[#allocation100_spill] sm:$0xff]  ;;  %17302 = vst [vmem:[#allocation177_spill] sm:$0xff] %v12866_v27  ;;  %v2000_v31 = vcvt.f32.s32 %v17285_v1  ;;  %v17303_v61 = vld [vmem:[#allocation101_spill] sm:$0xff] }
 0x616   : > { %vm5056_vm8 = vcmp.lt.f32.partialorder %v12837_v51, %v12856_v13  ;;  %v2059_v33 = vand.u32 65535, %v17301_v37  ;;  %8132 = vperm.xlu0 %7804, %v8131_v24   ;;  %v12872_v9 = vsel %vm5057_vm7, 2, %v5041_v47  ;;  %vm2065_vm1 = vcmp.eq.f32.partialorder %v17303_v61, %v12428_v11  ;;  %v12896_v24 = vpop.permute.xlu1 %7847 }
 0x617   : > { %v12877_v45 = vsel %vm5056_vm8, 2, %v5040_v2  ;;  %v7197_v37 = vsel %vm4273_vm9, 1.0, %v16894_v35  ;;  %vm4276_vm10 = vcmp.eq.s32.totalorder %v12509_v62, 2  ;;  %vm4277_vm2 = vcmp.eq.s32.totalorder %v12535_v16, 2 }
 0x618   : > { %v2061_v53 = vcvt.s32.f32 %v2059_v33  ;;  %v12886_v1 = vmul.f32 %v7824_v25, %v2366_v48  ;;  %v5045_v47 = vsel %vm5013_vm15, 1, %v17177_v41  ;;  %v5044_v2 = vsel %vm5012_vm6, 1, %v17177_v41 }
 0x619   : > { %v8141_v61 = vpack.i.bf16 %v7197_v37, %v7196_v39  ;;  %v7200_v44 = vsel %vm4276_vm10, 1.0, %v16894_v35  ;;  %v12902_v25 = vsel %vm4277_vm2, 3e+38, %v11947_v54  ;;  %v12909_v48 = vsel %vm5013_vm15, %v12676_v12, %v12644_v58 }
 0x61a   : > { %17304 = vst [vmem:[#allocation85_spill] sm:$0xff] %v12886_v1  ;;  %v2066_v33 = vsel %vm2065_vm1, %v2061_v53, inf  ;;  %v12911_v1 = vpop.permute.xlu0 %7862  ;;  %v12913_v27 = vshll.u32 %v2014_v32, 16  ;;  %v12916_v53 = vsel %vm4276_vm10, 3e+38, %v11939_v28  ;;  %vm5061_vm11 = vcmp.lt.f32.partialorder %v12902_v25, %v12909_v48  ;;  %v17307_v28 = vld [vmem:[#allocation102_spill] sm:$0xff] }
 0x61b   : > { %17305 = vst [vmem:[#allocation178_spill] sm:$0xff] %v12911_v1  ;;  %8142 = vperm.xlu0 %7804, %v8141_v61   ;;  %2067 = vmin.xlane.f32.xlu1 %v2066_v33  ;;  %v12925_v54 = vsel %vm5012_vm6, %v12671_v10, %v12639_v40  ;;  %v7201_v58 = vsel %vm4277_vm2, 1.0, %v16894_v35  ;;  %v12933_v12 = vsel %vm5061_vm11, 2, %v5045_v47  ;;  %v2045_v32 = vand.u32 65535, %v17307_v28  ;;  %v17308_v10 = vld [vmem:[#allocation106_spill] sm:$0xff] }
 0x61c   : > { %17306 = vst [vmem:[#allocation84_spill] sm:$0xff] %v12913_v27  ;;  %vm5060_vm15 = vcmp.lt.f32.partialorder %v12916_v53, %v12925_v54  ;;  %v7830_v39 = vunpack.i.h.bf16 %v12705_v6  ;;  %v8151_v37 = vpack.i.bf16 %v7201_v58, %v7200_v44  ;;  %vm2051_vm6 = vcmp.eq.f32.partialorder %v17308_v10, %v12476_v15  ;;  %v2368_v10 = vld [vmem:[#allocation3 + $0x40] sm:$0xff] }
 0x61d   : > { %v12942_v40 = vsel %vm5060_vm15, 2, %v5044_v2  ;;  %v7829_v61 = vunpack.i.l.bf16 %v12705_v6  ;;  %v2042_v47 = vcvt.f32.s32 %v17291_v30  ;;  %v2047_v33 = vcvt.s32.f32 %v2045_v32  ;;  %v12956_v2 = vpop.permute.xlu1 %7857 }
 0x61e   : > { %vm4280_vm5 = vcmp.eq.s32.totalorder %v12543_v3, 2  ;;  %v12949_v27 = vpop.permute.xlu0 %7872  ;;  %v2028_v28 = vcvt.f32.s32 %v12394_v4  ;;  %v5049_v44 = vsel %vm5017_vm3, 1, %v17177_v41  ;;  %vm4281_vm12 = vcmp.eq.s32.totalorder %v12552_v26, 2 }
 0x61f   : > { %17309 = vst [vmem:[#allocation23_spill] sm:$0xff] %v12949_v27  ;;  %8152 = vperm.xlu0 %7804, %v8151_v37   ;;  %v7204_v6 = vsel %vm4280_vm5, 1.0, %v16894_v35  ;;  %v5048_v30 = vsel %vm5016_vm4, 1, %v17177_v41  ;;  %v2052_v58 = vsel %vm2051_vm6, %v2047_v33, inf  ;;  %v7205_v4 = vsel %vm4281_vm12, 1.0, %v16894_v35  ;;  %v2369_v27 = vld [vmem:[#allocation3 + $0x48] sm:$0xff] }
 0x620   : > { %v12966_v32 = vsel %vm4280_vm5, 3e+38, %v12063_v55  ;;  %2053 = vmin.xlane.f32.xlu1 %v2052_v58  ;;  %v12969_v37 = vsel %vm4281_vm12, 3e+38, %v17220_v43  ;;  %v12976_v1 = vsel %vm5017_vm3, %v12718_v20, %v12690_v42  ;;  %v8161_v41 = vpack.i.bf16 %v7205_v4, %v7204_v6  ;;  %v2370_v6 = vld [vmem:[#allocation3 + $0x50] sm:$0xff]  ;;  %v2371_v58 = vld [vmem:[#allocation3 + $0x58] sm:$0xff] }
 0x621   : > { %17310 = vst [vmem:[#allocation10_spill] sm:$0xff] %v12969_v37  ;;  %v12983_v55 = vsel %vm5016_vm4, %v12713_v17, %v12666_v23  ;;  %v7835_v33 = vunpack.i.h.bf16 %v12739_v22  ;;  %v7834_v43 = vunpack.i.l.bf16 %v12739_v22  ;;  %vm5065_vm13 = vcmp.lt.f32.partialorder %v12969_v37, %v12976_v1  ;;  %v17314_v22 = vld [vmem:[#allocation107_spill] sm:$0xff] }
 0x622   : > { %vm5064_vm9 = vcmp.lt.f32.partialorder %v12966_v32, %v12983_v55  ;;  %v12991_v42 = vpop.permute.xlu0 %7882  ;;  %v12993_v20 = vshll.u32 %v2000_v31, 16  ;;  %v12998_v23 = vsel %vm5065_vm13, 2, %v5049_v44  ;;  %v2087_v4 = vand.u32 65535, %v17314_v22  ;;  %v13016_v44 = vpop.permute.xlu1 %7867 }
 0x623   : > { %17311 = vst [vmem:[#allocation62_spill] sm:$0xff] %v12991_v42  ;;  %17313 = vst [vmem:[#allocation165_spill] sm:$0xff] %v12998_v23  ;;  %v13003_v17 = vsel %vm5064_vm9, 2, %v5048_v30  ;;  %8162 = vperm.xlu0 %7804, %v8161_v41   ;;  %v13006_v63 = vmul.f32 %v7830_v39, %v2369_v27  ;;  %v13008_v42 = vmul.f32 %v7829_v61, %v2368_v10  ;;  %v13010_v31 = vshll.u32 %v2042_v47, 16 }
 0x624   : > { %17312 = vst [vmem:[#allocation61_spill] sm:$0xff] %v12993_v20  ;;  %v17316_v20 = vld [vmem:[#allocation114_spill] sm:$0xff]  ;;  %v13014_v37 = vshll.u32 %v2028_v28, 16  ;;  %v2089_v23 = vcvt.s32.f32 %v2087_v4  ;;  %vm4428_vm4 = vcmp.eq.s32.totalorder %v12449_v36, 3  ;;  %vm4429_vm1 = vcmp.eq.s32.totalorder %v12466_v50, 3 }
 0x625   : > { %17315 = vst [vmem:[#allocation86_spill] sm:$0xff] %v13010_v31  ;;  %vm2093_vm3 = vcmp.eq.f32.partialorder %v17316_v20, %v12515_v5  ;;  %v13020_v41 = vmul.f32 %v7835_v33, %v2371_v58  ;;  %v13022_v27 = vmul.f32 %v7834_v43, %v2370_v6  ;;  %v2070_v39 = vcvt.f32.s32 %v12428_v11  ;;  %v17339_v31 = vld [vmem:[#allocation21_spill] sm:$0xff] }
 0x626   : > { %17317 = vst [vmem:[#allocation141_spill] sm:$0xff] %v13014_v37  ;;  %v7208_v61 = vsel %vm4428_vm4, 1.0, %v16894_v35  ;;  %v13028_v47 = vpop.permute.xlu0 %7892  ;;  %v2056_v28 = vcvt.f32.s32 %v12476_v15  ;;  %v7839_v30 = vunpack.i.l.bf16 %v12774_v38  ;;  %v2098_v10 = vcvt.f32.s32 %v12515_v5  ;;  %v2372_v15 = vld [vmem:[#allocation3 + $0x60] sm:$0xff] }
 0x627   : > { %17318 = vst [vmem:[#allocation87_spill] sm:$0xff] %v13028_v47  ;;  %v2094_v20 = vsel %vm2093_vm3, %v2089_v23, inf  ;;  %v2084_v33 = vcvt.f32.s32 %v12568_v56  ;;  %v7209_v43 = vsel %vm4429_vm1, 1.0, %v16894_v35  ;;  %v13036_v11 = vsel %vm4429_vm1, 3e+38, %v11961_v52  ;;  %v17352_v47 = vld [vmem:[#allocation24_spill] sm:$0xff] }
 0x628   : > { %2095 = vmin.xlane.f32.xlu1 %v2094_v20  ;;  %v13043_v6 = vsel %vm5053_vm0, %v12770_v29, %v12751_v46  ;;  %v13048_v5 = vsel %vm4428_vm4, 3e+38, %v11976_v19  ;;  %v8171_v58 = vpack.i.bf16 %v7209_v43, %v7208_v61  ;;  %v13057_v52 = vsel %vm5052_vm14, %v12782_v59, %v12791_v0  ;;  %v17319_v19 = vld [vmem:[#allocation115_spill] sm:$0xff]  ;;  %v13074_v0 = vpop.permute.xlu1 %7877 }
 0x629   : > { %vm5101_vm10 = vcmp.lt.f32.partialorder %v13036_v11, %v13043_v6  ;;  %v2126_v46 = vcvt.f32.s32 %v12620_v34  ;;  %vm5100_vm0 = vcmp.lt.f32.partialorder %v13048_v5, %v13057_v52  ;;  %v2073_v23 = vand.u32 65535, %v17319_v19  ;;  %17322 = vst [vmem:[#allocation169_spill] sm:$0xff] %v13074_v0 }
 0x62a   : > { %v13064_v29 = vsel %vm5101_vm10, 3, %v12796_v60  ;;  %v13069_v22 = vpop.permute.xlu0 %7902  ;;  %v13071_v4 = vshll.u32 %v2070_v39, 16  ;;  %v13080_v61 = vsel %vm5100_vm0, 3, %v12807_v49  ;;  %8172 = vperm.xlu0 %7804, %v8171_v58   ;;  %v17323_v60 = vld [vmem:[#allocation116_spill] sm:$0xff]  ;;  %v13084_v20 = vshll.u32 %v2056_v28, 16 }
 0x62b   : > { %17320 = vst [vmem:[#allocation142_spill] sm:$0xff] %v13069_v22  ;;  %vm2079_vm14 = vcmp.eq.f32.partialorder %v17323_v60, %v12568_v56  ;;  %v13086_v43 = vmul.f32 %v7839_v30, %v2372_v15  ;;  %v2075_v39 = vcvt.s32.f32 %v2073_v23  ;;  %vm4432_vm2 = vcmp.eq.s32.totalorder %v12471_v7, 3  ;;  %v2374_v15 = vld [vmem:[#allocation3 + $0x70] sm:$0xff]  ;;  %v2375_v23 = vld [vmem:[#allocation3 + $0x78] sm:$0xff]  ;;  %v17329_v60 = vld [vmem:[#allocation16_spill] sm:$0xff] }
 0x62c   : > { %17321 = vst [vmem:[#allocation68_spill] sm:$0xff] %v13071_v4  ;;  %17324 = vst [vmem:[#allocation89_spill] sm:$0xff] %v13084_v20  ;;  %v13089_v19 = vshll.u32 %v2098_v10, 16  ;;  %v13091_v59 = vshll.u32 %v2084_v33, 16  ;;  %vm4433_vm6 = vcmp.eq.s32.totalorder %v12493_v8, 3  ;;  %v7212_v49 = vsel %vm4432_vm2, 1.0, %v16894_v35 }
 0x62d   : > { %17325 = vst [vmem:[#allocation81_spill] sm:$0xff] %v13086_v43  ;;  %v13097_v58 = vshll.u32 %v2126_v46, 16  ;;  %v7845_v56 = vunpack.i.h.bf16 %v12821_v18  ;;  %v7844_v28 = vunpack.i.l.bf16 %v12821_v18  ;;  %v2080_v30 = vsel %vm2079_vm14, %v2075_v39, inf  ;;  %v17331_v18 = vld [vmem:[#allocation17_spill] sm:$0xff] }
 0x62e   : > { %17326 = vst [vmem:[#allocation90_spill] sm:$0xff] %v13089_v19  ;;  %17327 = vst [vmem:[#allocation88_spill] sm:$0xff] %v13091_v59  ;;  %v2112_v10 = vcvt.f32.s32 %v12681_v57  ;;  %2081 = vmin.xlane.f32.xlu1 %v2080_v30  ;;  %v7213_v33 = vsel %vm4433_vm6, 1.0, %v16894_v35  ;;  %v13104_v38 = vsel %vm4433_vm6, 3e+38, %v17329_v60  ;;  %v13111_v46 = vsel %vm5057_vm7, %v12842_v21, %v12849_v14  ;;  %v13113_v43 = vpop.permute.xlu0 %7912  ;;  %v17334_v19 = vld [vmem:[#allocation117_spill] sm:$0xff] }
 0x62f   : > { %17328 = vst [vmem:[#allocation173_spill] sm:$0xff] %v13097_v58  ;;  %17330 = vst [vmem:[#allocation91_spill] sm:$0xff] %v13113_v43  ;;  %v13118_v39 = vsel %vm4432_vm2, 3e+38, %v17331_v18  ;;  %vm5105_vm5 = vcmp.lt.f32.partialorder %v13104_v38, %v13111_v46  ;;  %v8181_v30 = vpack.i.bf16 %v7213_v33, %v7212_v49  ;;  %v13127_v60 = vsel %vm5056_vm8, %v12837_v51, %v12856_v13  ;;  %v13131_v58 = vpop.permute.xlu1 %7887  ;;  %v2381_v51 = vld [vmem:[#allocation3 + $0xa0] sm:$0xff]  ;;  %v2382_v13 = vld [vmem:[#allocation3 + $0xa8] sm:$0xff] }
 0x630   : > { %v7860_v21 = vunpack.i.h.bf16 %v12956_v2  ;;  %v7859_v14 = vunpack.i.l.bf16 %v12956_v2  ;;  %v13137_v18 = vsel %vm5105_vm5, 3, %v12872_v9  ;;  %vm5104_vm7 = vcmp.lt.f32.partialorder %v13118_v39, %v13127_v60 }
 0x631   : > { %v13141_v49 = vmul.f32 %v7845_v56, %v2375_v23  ;;  %v13143_v33 = vmul.f32 %v7844_v28, %v2374_v15  ;;  %v13149_v2 = vsel %vm5104_vm7, 3, %v12877_v45  ;;  %8182 = vperm.xlu0 %7804, %v8181_v30   ;;  %v2115_v59 = vand.u32 65535, %v17334_v19  ;;  %v17336_v56 = vld [vmem:[#allocation119_spill] sm:$0xff]  ;;  %v2378_v23 = vld [vmem:[#allocation3 + $0x88] sm:$0xff] }
 0x632   : > { %v13152_v9 = vshll.u32 %v2112_v10, 16  ;;  %v7850_v20 = vunpack.i.h.bf16 %v12896_v24  ;;  %vm2121_vm8 = vcmp.eq.f32.partialorder %v17336_v56, %v12620_v34  ;;  %vm4436_vm12 = vcmp.eq.s32.totalorder %v12509_v62, 3  ;;  %v13165_v34 = vpop.permute.xlu0 %7922  ;;  %v2377_v56 = vld [vmem:[#allocation3 + $0x80] sm:$0xff] }
 0x633   : > { %17332 = vst [vmem:[#allocation92_spill] sm:$0xff] %v13141_v49  ;;  %17333 = vst [vmem:[#allocation176_spill] sm:$0xff] %v13143_v33  ;;  %v7870_v28 = vunpack.i.h.bf16 %v13016_v44  ;;  %v2117_v15 = vcvt.s32.f32 %v2115_v59  ;;  %vm4437_vm3 = vcmp.eq.s32.totalorder %v12535_v16, 3  ;;  %v7216_v45 = vsel %vm4436_vm12, 1.0, %v16894_v35  ;;  %v17337_v49 = vld [vmem:[#allocation166_spill] sm:$0xff] }
 0x634   : > { %17335 = vst [vmem:[#allocation93_spill] sm:$0xff] %v13152_v9  ;;  %v7849_v19 = vunpack.i.l.bf16 %v12896_v24  ;;  %v2943_v10 = vmul.f32 %v7860_v21, %v2382_v13  ;;  %v2942_v30 = vmul.f32 %v7859_v14, %v2381_v51  ;;  %v2154_v33 = vcvt.f32.s32 %v17337_v49  ;;  %v2386_v9 = vld [vmem:[#allocation3 + $0xc8] sm:$0xff]  ;;  %17338 = vst [vmem:[#allocation94_spill] sm:$0xff] %v13165_v34  ;;  %v13176_v24 = vpop.permute.xlu1 %7897  ;;  %v17340_v21 = vld [vmem:[#allocation20_spill] sm:$0xff] }
 0x635   : > { %v7869_v4 = vunpack.i.l.bf16 %v13016_v44  ;;  %v2122_v59 = vsel %vm2121_vm8, %v2117_v15, inf  ;;  %v7217_v37 = vsel %vm4437_vm3, 1.0, %v16894_v35  ;;  %v13174_v43 = vsel %vm4436_vm12, 3e+38, %v17339_v31  ;;  %v2385_v15 = vld [vmem:[#allocation3 + $0xc0] sm:$0xff]  ;;  %v2390_v34 = vld [vmem:[#allocation3 + $0xe8] sm:$0xff] }
 0x636   : > { %2123 = vmin.xlane.f32.xlu1 %v2122_v59  ;;  %v13181_v14 = vsel %vm4437_vm3, 3e+38, %v17340_v21  ;;  %v13188_v44 = vsel %vm5061_vm11, %v12902_v25, %v12909_v48  ;;  %v8191_v51 = vpack.i.bf16 %v7217_v37, %v7216_v45  ;;  %v13195_v31 = vsel %vm5060_vm15, %v12916_v53, %v12925_v54  ;;  %v17341_v25 = vld [vmem:[#allocation170_spill] sm:$0xff]  ;;  %v17342_v54 = vld [vmem:[#allocation172_spill] sm:$0xff] }
 0x637   : > { %v2939_v13 = vmul.f32 %v7850_v20, %v2378_v23  ;;  %v2947_v59 = vmul.f32 %v7870_v28, %v2386_v9  ;;  %vm5109_vm4 = vcmp.lt.f32.partialorder %v13181_v14, %v13188_v44  ;;  %vm5108_vm1 = vcmp.lt.f32.partialorder %v13174_v43, %v13195_v31  ;;  %v17343_v9 = vld [vmem:[#allocation13_spill] sm:$0xff]  ;;  %v17345_v23 = vld [vmem:[#allocation120_spill] sm:$0xff] }
 0x638   : > { %v13201_v21 = vmul.f32 %v7849_v19, %v2377_v56  ;;  %v2140_v48 = vcvt.f32.s32 %v17341_v25  ;;  %v13208_v37 = vsel %vm5109_vm4, 3, %v12933_v12  ;;  %v13214_v53 = vsel %vm5108_vm1, 3, %v12942_v40  ;;  %8192 = vperm.xlu0 %7804, %v8191_v51   ;;  %v17346_v12 = vld [vmem:[#allocation121_spill] sm:$0xff]  ;;  %v13229_v40 = vpop.permute.xlu0 %7932  ;;  %v17348_v51 = vld [vmem:[#allocation167_spill] sm:$0xff] }
 0x639   : > { %v13217_v20 = vadd.f32 %v2943_v10, %v17342_v54  ;;  %v13220_v28 = vadd.f32 %v2942_v30, %v17343_v9  ;;  %v13222_v45 = vshll.u32 %v2154_v33, 16  ;;  %v2101_v19 = vand.u32 65535, %v17345_v23  ;;  %17347 = vst [vmem:[#allocation95_spill] sm:$0xff] %v13229_v40  ;;  %v2361_v9 = vld [vmem:[#allocation3 + $0x8] sm:$0xff]  ;;  %v13242_v23 = vpop.permute.xlu1 %7907 }
 0x63a   : > { %v2946_v56 = vmul.f32 %v7869_v4, %v2385_v15  ;;  %vm2107_vm11 = vcmp.eq.f32.partialorder %v17346_v12, %v12681_v57  ;;  %vm4440_vm15 = vcmp.eq.s32.totalorder %v12543_v3, 3  ;;  %vm4441_vm14 = vcmp.eq.s32.totalorder %v12552_v26, 3  ;;  %v2395_v40 = vld [vmem:[#allocation3 + $0x108] sm:$0xff] }
 0x63b   : > { %17344 = vst [vmem:[#allocation179_spill] sm:$0xff] %v13222_v45  ;;  %v13232_v10 = vadd.f32 %v2947_v59, %v13006_v63  ;;  %v7809_v30 = vunpack.i.h.bf16 %v17348_v51  ;;  %v2103_v54 = vcvt.s32.f32 %v2101_v19  ;;  %v7220_v33 = vsel %vm4440_vm15, 1.0, %v16894_v35  ;;  %v17350_v59 = vld [vmem:[#allocation25_spill] sm:$0xff]  ;;  %v17351_v19 = vld [vmem:[#allocation10_spill] sm:$0xff] }
 0x63c   : > { %v13238_v4 = vshll.u32 %v2140_v48, 16  ;;  %v7880_v57 = vunpack.i.h.bf16 %v13074_v0  ;;  %v7890_v15 = vunpack.i.h.bf16 %v13131_v58  ;;  %v7221_v12 = vsel %vm4441_vm14, 1.0, %v16894_v35  ;;  %v2399_v0 = vld [vmem:[#allocation3 + $0x128] sm:$0xff] }
 0x63d   : > { %v2108_v63 = vsel %vm2107_vm11, %v2103_v54, inf  ;;  %v13246_v45 = vsel %vm4441_vm14, 3e+38, %v17350_v59  ;;  %v13253_v48 = vsel %vm5065_vm13, %v17351_v19, %v12976_v1  ;;  %v7889_v22 = vunpack.i.l.bf16 %v13131_v58  ;;  %v13290_v19 = vpop.permute.xlu0 %7942 }
 0x63e   : > { %17349 = vst [vmem:[#allocation96_spill] sm:$0xff] %v13238_v4  ;;  %v8201_v4 = vpack.i.bf16 %v7221_v12, %v7220_v33  ;;  %2109 = vmin.xlane.f32.xlu1 %v2108_v63  ;;  %v13259_v54 = vsel %vm4440_vm15, 3e+38, %v17352_v47  ;;  %vm5113_vm2 = vcmp.lt.f32.partialorder %v13246_v45, %v13253_v48  ;;  %v13268_v1 = vsel %vm5064_vm9, %v12966_v32, %v12983_v55  ;;  %v2394_v33 = vld [vmem:[#allocation3 + $0x100] sm:$0xff]  ;;  %v17353_v63 = vld [vmem:[#allocation165_spill] sm:$0xff] }
 0x63f   : > { %v2779_v12 = vmul.f32 %v7809_v30, %v2361_v9  ;;  %v7808_v58 = vunpack.i.l.bf16 %v17348_v51  ;;  %v13275_v47 = vsel %vm5113_vm2, 3, %v17353_v63  ;;  %vm5112_vm13 = vcmp.lt.f32.partialorder %v13259_v54, %v13268_v1  ;;  %v2360_v55 = vld [vmem:[#allocation3] sm:$0xff]  ;;  %v17355_v30 = vld [vmem:[#allocation127_spill] sm:$0xff]  ;;  %17356 = vst [vmem:[#allocation97_spill] sm:$0xff] %v13290_v19 }
 0x640   : > { %17354 = vst [vmem:[#allocation180_spill] sm:$0xff] %v13275_v47  ;;  %8202 = vperm.xlu0 %7804, %v8201_v4   ;;  %v13280_v59 = vadd.f32 %v2946_v56, %v13008_v42  ;;  %v13287_v51 = vsel %vm5112_vm13, 3, %v13003_v17  ;;  %v2143_v9 = vand.u32 65535, %v17355_v30  ;;  %v13292_v63 = vmul.f32 %v7880_v57, %v2390_v34  ;;  %v17358_v42 = vld [vmem:[#allocation129_spill] sm:$0xff]  ;;  %v13301_v4 = vpop.permute.xlu1 %7917  ;;  %v17362_v19 = vld [vmem:[#allocation27_spill] sm:$0xff] }
 0x641   : > { %v13294_v47 = vmul.f32 %v7890_v15, %v2395_v40  ;;  %vm2149_vm9 = vcmp.eq.f32.partialorder %v17358_v42, %v17337_v49  ;;  %vm4588_vm6 = vcmp.eq.s32.totalorder %v12449_v36, 4  ;;  %v13299_v56 = vmul.f32 %v7889_v22, %v2394_v33  ;;  %17359 = vst [vmem:[#allocation98_spill] sm:$0xff] %v13301_v4  ;;  %v17360_v15 = vld [vmem:[#allocation177_spill] sm:$0xff]  ;;  %v17361_v33 = vld [vmem:[#allocation28_spill] sm:$0xff] }
 0x642   : > { %17357 = vst [vmem:[#allocation154_spill] sm:$0xff] %v13292_v63  ;;  %v2145_v32 = vcvt.s32.f32 %v2143_v9  ;;  %vm4589_vm8 = vcmp.eq.s32.totalorder %v12466_v50, 4  ;;  %v7224_v17 = vsel %vm4588_vm6, 1.0, %v16894_v35  ;;  %v13305_v30 = vadd.f32 %v2939_v13, %v2779_v12  ;;  %v2398_v9 = vld [vmem:[#allocation3 + $0x120] sm:$0xff] }
 0x643   : > { %v2778_v34 = vmul.f32 %v7808_v58, %v2360_v55  ;;  %v7900_v40 = vunpack.i.h.bf16 %v13176_v24  ;;  %v7899_v57 = vunpack.i.l.bf16 %v13176_v24  ;;  %v7855_v49 = vunpack.i.h.bf16 %v17360_v15  ;;  %v2380_v58 = vld [vmem:[#allocation3 + $0x98] sm:$0xff] }
 0x644   : > { %v2150_v42 = vsel %vm2149_vm9, %v2145_v32, inf  ;;  %v7225_v22 = vsel %vm4589_vm8, 1.0, %v16894_v35  ;;  %v13312_v63 = vsel %vm4588_vm6, 3e+38, %v17361_v33  ;;  %v13315_v50 = vsel %vm4589_vm8, 3e+38, %v17362_v19  ;;  %v13356_v36 = vpop.permute.xlu1 %7927 }
 0x645   : > { %2151 = vmin.xlane.f32.xlu1 %v2150_v42  ;;  %17363 = vst [vmem:[#allocation99_spill] sm:$0xff] %v13315_v50  ;;  %v13322_v24 = vsel %vm5101_vm10, %v13036_v11, %v13043_v6  ;;  %v8211_v13 = vpack.i.bf16 %v7225_v22, %v7224_v17  ;;  %v13329_v12 = vsel %vm5100_vm0, %v13048_v5, %v13057_v52  ;;  %v7854_v32 = vunpack.i.l.bf16 %v17360_v15  ;;  %v13337_v11 = vpop.permute.xlu0 %7952  ;;  %v2379_v6 = vld [vmem:[#allocation3 + $0x90] sm:$0xff]  ;;  %v2403_v19 = vld [vmem:[#allocation3 + $0x148] sm:$0xff] }
 0x646   : > { %v7910_v55 = vunpack.i.h.bf16 %v13242_v23  ;;  %vm5149_vm12 = vcmp.lt.f32.partialorder %v13315_v50, %v13322_v24  ;;  %vm5148_vm10 = vcmp.lt.f32.partialorder %v13312_v63, %v13329_v12  ;;  %17364 = vst [vmem:[#allocation100_spill] sm:$0xff] %v13337_v11  ;;  %v7909_v17 = vunpack.i.l.bf16 %v13242_v23  ;;  %v17367_v15 = vld [vmem:[#allocation69_spill] sm:$0xff]  ;;  %v2402_v11 = vld [vmem:[#allocation3 + $0x140] sm:$0xff] }
 0x647   : > { %v13344_v5 = vsel %vm5149_vm12, 4, %v13064_v29  ;;  %v13350_v52 = vsel %vm5148_vm10, 4, %v13080_v61  ;;  %8212 = vperm.xlu0 %7804, %v8211_v13   ;;  %v2129_v42 = vand.u32 65535, %v17367_v15  ;;  %v13354_v22 = vadd.f32 %v13201_v21, %v2778_v34  ;;  %v17368_v29 = vld [vmem:[#allocation130_spill] sm:$0xff] }
 0x648   : > { %17365 = vst [vmem:[#allocation101_spill] sm:$0xff] %v13344_v5  ;;  %17366 = vst [vmem:[#allocation102_spill] sm:$0xff] %v13350_v52  ;;  %v3103_v33 = vmul.f32 %v7900_v40, %v2399_v0  ;;  %v3102_v23 = vmul.f32 %v7899_v57, %v2398_v9  ;;  %vm2135_vm0 = vcmp.eq.f32.partialorder %v17368_v29, %v17341_v25  ;;  %vm4592_vm3 = vcmp.eq.s32.totalorder %v12471_v7, 4  ;;  %v17369_v15 = vld [vmem:[#allocation178_spill] sm:$0xff]  ;;  %v17371_v9 = vld [vmem:[#allocation23_spill] sm:$0xff] }
 0x649   : > { %v2941_v5 = vmul.f32 %v7855_v49, %v2380_v58  ;;  %v2131_v50 = vcvt.s32.f32 %v2129_v42  ;;  %vm4593_vm11 = vcmp.eq.s32.totalorder %v12493_v8, 4  ;;  %v2940_v61 = vmul.f32 %v7854_v32, %v2379_v6  ;;  %v13370_v21 = vpop.permute.xlu0 %7962  ;;  %v17372_v32 = vld [vmem:[#allocation31_spill] sm:$0xff] }
 0x64a   : > { %v3107_v13 = vmul.f32 %v7910_v55, %v2403_v19  ;;  %v7865_v52 = vunpack.i.h.bf16 %v17369_v15  ;;  %v13368_v0 = vsel %vm5105_vm5, %v13104_v38, %v13111_v46  ;;  %17370 = vst [vmem:[#allocation106_spill] sm:$0xff] %v13370_v21  ;;  %v3106_v25 = vmul.f32 %v7909_v17, %v2402_v11  ;;  %v2383_v46 = vld [vmem:[#allocation3 + $0xb0] sm:$0xff]  ;;  %v2384_v6 = vld [vmem:[#allocation3 + $0xb8] sm:$0xff] }
 0x64b   : > { %v2136_v34 = vsel %vm2135_vm0, %v2131_v50, inf  ;;  %v7228_v40 = vsel %vm4592_vm3, 1.0, %v16894_v35  ;;  %v7229_v57 = vsel %vm4593_vm11, 1.0, %v16894_v35  ;;  %v7864_v49 = vunpack.i.l.bf16 %v17369_v15  ;;  %v17373_v50 = vld [vmem:[#allocation32_spill] sm:$0xff]  ;;  %v2387_v15 = vld [vmem:[#allocation3 + $0xd0] sm:$0xff] }
 0x64c   : > { %v7875_v58 = vunpack.i.h.bf16 %v17371_v9  ;;  %2137 = vmin.xlane.f32.xlu1 %v2136_v34  ;;  %v13379_v55 = vsel %vm4593_vm11, 3e+38, %v17372_v32  ;;  %v8221_v38 = vpack.i.bf16 %v7229_v57, %v7228_v40  ;;  %v7874_v11 = vunpack.i.l.bf16 %v17371_v9  ;;  %v2388_v34 = vld [vmem:[#allocation3 + $0xd8] sm:$0xff]  ;;  %v13402_v40 = vpop.permute.xlu1 %7937 }
 0x64d   : > { %v13385_v19 = vsel %vm4592_vm3, 3e+38, %v17373_v50  ;;  %vm5153_vm5 = vcmp.lt.f32.partialorder %v13379_v55, %v13368_v0  ;;  %v13394_v17 = vsel %vm5104_vm7, %v13118_v39, %v13127_v60  ;;  %v13397_v42 = vadd.f32 %v3102_v23, %v13220_v28  ;;  %v17374_v39 = vld [vmem:[#allocation75_spill] sm:$0xff]  ;;  %v17375_v28 = vld [vmem:[#allocation168_spill] sm:$0xff] }
 0x64e   : > { %v13400_v29 = vadd.f32 %v3103_v33, %v13217_v20  ;;  %v13408_v57 = vsel %vm5153_vm5, 4, %v13137_v18  ;;  %vm5152_vm7 = vcmp.lt.f32.partialorder %v13385_v19, %v13394_v17  ;;  %8222 = vperm.xlu0 %7804, %v8221_v38   ;;  %v13413_v60 = vadd.f32 %v2941_v5, %v17374_v39  ;;  %v13425_v18 = vpop.permute.xlu0 %7972 }
 0x64f   : > { %v13416_v20 = vadd.f32 %v2940_v61, %v17375_v28  ;;  %v13422_v33 = vsel %vm5152_vm7, 4, %v13149_v2  ;;  %vm4596_vm15 = vcmp.eq.s32.totalorder %v12509_v62, 4  ;;  %17376 = vst [vmem:[#allocation107_spill] sm:$0xff] %v13425_v18  ;;  %v2945_v23 = vmul.f32 %v7865_v52, %v2384_v6  ;;  %v17378_v28 = vld [vmem:[#allocation35_spill] sm:$0xff] }
 0x650   : > { %v2944_v9 = vmul.f32 %v7864_v49, %v2383_v46  ;;  %vm4597_vm14 = vcmp.eq.s32.totalorder %v12535_v16, 4  ;;  %v7232_v5 = vsel %vm4596_vm15, 1.0, %v16894_v35  ;;  %v13430_v32 = vadd.f32 %v3106_v25, %v13280_v59  ;;  %v17379_v59 = vld [vmem:[#allocation36_spill] sm:$0xff]  ;;  %v17380_v49 = vld [vmem:[#allocation171_spill] sm:$0xff]  ;;  %v17381_v46 = vld [vmem:[#allocation85_spill] sm:$0xff] }
 0x651   : > { %v13433_v61 = vadd.f32 %v3107_v13, %v13232_v10  ;;  %v2949_v38 = vmul.f32 %v7875_v58, %v2388_v34  ;;  %v2948_v50 = vmul.f32 %v7874_v11, %v2387_v15  ;;  %v7929_v2 = vunpack.i.l.bf16 %v13356_v36 }
 0x652   : > { %v7233_v39 = vsel %vm4597_vm14, 1.0, %v16894_v35  ;;  %v13438_v21 = vsel %vm4597_vm14, 3e+38, %v17378_v28  ;;  %v13445_v52 = vsel %vm5109_vm4, %v13181_v14, %v13188_v44  ;;  %v13448_v25 = vsel %vm4596_vm15, 3e+38, %v17379_v59  ;;  %v13465_v44 = vpop.permute.xlu1 %7947  ;;  %v13486_v15 = vpop.permute.xlu0 %7982  ;;  %v17385_v28 = vld [vmem:[#allocation40_spill] sm:$0xff] }
 0x653   : > { %17377 = vst [vmem:[#allocation114_spill] sm:$0xff] %v13433_v61  ;;  %vm5157_vm9 = vcmp.lt.f32.partialorder %v13438_v21, %v13445_v52  ;;  %v8231_v10 = vpack.i.bf16 %v7233_v39, %v7232_v5  ;;  %v13457_v13 = vsel %vm5108_vm1, %v13174_v43, %v13195_v31  ;;  %v13460_v58 = vadd.f32 %v2945_v23, %v17380_v49  ;;  %v17383_v23 = vld [vmem:[#allocation42_spill] sm:$0xff] }
 0x654   : > { %v13463_v14 = vadd.f32 %v2944_v9, %v17381_v46  ;;  %v13471_v6 = vsel %vm5157_vm9, 4, %v13208_v37  ;;  %vm5156_vm4 = vcmp.lt.f32.partialorder %v13448_v25, %v13457_v13  ;;  %v13477_v31 = vadd.f32 %v2949_v38, %v13020_v41  ;;  %17382 = vst [vmem:[#allocation115_spill] sm:$0xff] %v13486_v15  ;;  %v17384_v38 = vld [vmem:[#allocation39_spill] sm:$0xff] }
 0x655   : > { %v13483_v11 = vsel %vm5156_vm4, 4, %v13214_v53  ;;  %8232 = vperm.xlu0 %7804, %v8231_v10   ;;  %vm4600_vm1 = vcmp.eq.s32.totalorder %v12543_v3, 4  ;;  %v13489_v37 = vadd.f32 %v2948_v50, %v13022_v27  ;;  %v7930_v34 = vunpack.i.h.bf16 %v13356_v36 }
 0x656   : > { %vm4601_vm6 = vcmp.eq.s32.totalorder %v12552_v26, 4  ;;  %v7236_v41 = vsel %vm4600_vm1, 1.0, %v16894_v35  ;;  %v3258_v9 = vmul.f32 %v7929_v2, %v17383_v23  ;;  %v7940_v5 = vunpack.i.h.bf16 %v13402_v40  ;;  %v13527_v46 = vpop.permute.xlu1 %7957 }
 0x657   : > { %v7237_v53 = vsel %vm4601_vm6, 1.0, %v16894_v35  ;;  %v13498_v39 = vsel %vm4600_vm1, 3e+38, %v17384_v38  ;;  %v13501_v59 = vsel %vm4601_vm6, 3e+38, %v17385_v28  ;;  %v13508_v36 = vsel %vm5113_vm2, %v13246_v45, %v13253_v48  ;;  %v17386_v45 = vld [vmem:[#allocation44_spill] sm:$0xff] }
 0x658   : > { %v8241_v27 = vpack.i.bf16 %v7237_v53, %v7236_v41  ;;  %v13515_v50 = vsel %vm5112_vm13, %v13259_v54, %v13268_v1  ;;  %v3114_v2 = vadd.f32 %v13299_v56, %v13354_v22  ;;  %v7939_v10 = vunpack.i.l.bf16 %v13402_v40  ;;  %17387 = vst [vmem:[#allocation116_spill] sm:$0xff] %v13527_v46  ;;  %v17388_v54 = vld [vmem:[#allocation180_spill] sm:$0xff]  ;;  %v17389_v22 = vld [vmem:[#allocation62_spill] sm:$0xff]  ;;  %v13545_v41 = vpop.permute.xlu0 %7992 }
 0x659   : > { %vm5161_vm8 = vcmp.lt.f32.partialorder %v13501_v59, %v13508_v36  ;;  %vm5160_vm2 = vcmp.lt.f32.partialorder %v13498_v39, %v13515_v50  ;;  %v3259_v48 = vmul.f32 %v7930_v34, %v17386_v45  ;;  %v3115_v49 = vadd.f32 %v13294_v47, %v13305_v30  ;;  %v17390_v47 = vld [vmem:[#allocation67_spill] sm:$0xff]  ;;  %v17391_v30 = vld [vmem:[#allocation145_spill] sm:$0xff]  ;;  %17392 = vst [vmem:[#allocation16_spill] sm:$0xff] %v13545_v41  ;;  %v17394_v38 = vld [vmem:[#allocation48_spill] sm:$0xff] }
 0x65a   : > { %v13533_v1 = vsel %vm5161_vm8, 4, %v17388_v54  ;;  %v13539_v56 = vsel %vm5160_vm2, 4, %v13287_v51  ;;  %8242 = vperm.xlu0 %7804, %v8241_v27   ;;  %v7884_v34 = vunpack.i.l.bf16 %v17389_v22  ;;  %vm4748_vm13 = vcmp.eq.s32.totalorder %v17390_v47, 5  ;;  %v17395_v54 = vld [vmem:[#allocation87_spill] sm:$0xff]  ;;  %v2391_v46 = vld [vmem:[#allocation3 + $0xf0] sm:$0xff] }
 0x65b   : > { %vm4749_vm0 = vcmp.eq.s32.totalorder %v17391_v30, 5  ;;  %v13547_v53 = vadd.f32 %v3258_v9, %v3114_v2  ;;  %v3263_v28 = vmul.f32 %v7940_v5, %v17394_v38  ;;  %v7895_v43 = vunpack.i.h.bf16 %v17395_v54  ;;  %v17396_v27 = vld [vmem:[#allocation46_spill] sm:$0xff]  ;;  %v17397_v22 = vld [vmem:[#allocation111_spill] sm:$0xff]  ;;  %v17400_v38 = vld [vmem:[#allocation101_spill] sm:$0xff] }
 0x65c   : > { %v7240_v51 = vsel %vm4748_vm13, 1.0, %v16894_v35  ;;  %v3262_v61 = vmul.f32 %v7939_v10, %v17396_v27  ;;  %v7241_v40 = vsel %vm4749_vm0, 1.0, %v16894_v35  ;;  %v4989_v4 = vsel %vm4749_vm0, 3e+38, %v17397_v22  ;;  %v17398_v47 = vld [vmem:[#allocation99_spill] sm:$0xff]  ;;  %v17399_v30 = vld [vmem:[#allocation118_spill] sm:$0xff] }
 0x65d   : > { %17393 = vst [vmem:[#allocation17_spill] sm:$0xff] %v13547_v53  ;;  %v5165_v9 = vsel %vm5149_vm12, %v17398_v47, %v13322_v24  ;;  %v2397_v2 = vld [vmem:[#allocation3 + $0x118] sm:$0xff]  ;;  %v4988_v5 = vsel %vm4748_vm13, 3e+38, %v17399_v30  ;;  %v8251_v53 = vpack.i.bf16 %v7241_v40, %v7240_v51  ;;  %v5164_v10 = vsel %vm5148_vm10, %v13312_v63, %v13329_v12  ;;  %v2396_v47 = vld [vmem:[#allocation3 + $0x110] sm:$0xff]  ;;  %v13574_v30 = vpop.permute.xlu1 %7967 }
 0x65e   : > { %vm5197_vm3 = vcmp.lt.f32.partialorder %v4989_v4, %v5165_v9  ;;  %v7894_v27 = vunpack.i.l.bf16 %v17395_v54  ;;  %vm5196_vm11 = vcmp.lt.f32.partialorder %v4988_v5, %v5164_v10  ;;  %v13570_v45 = vadd.f32 %v3259_v48, %v3115_v49  ;;  %v17405_v51 = vld [vmem:[#allocation102_spill] sm:$0xff]  ;;  %v17410_v49 = vld [vmem:[#allocation57_spill] sm:$0xff] }
 0x65f   : > { %v5213_v22 = vsel %vm5197_vm3, %v4989_v4, %v5165_v9  ;;  %v13568_v23 = vsel %vm5197_vm3, 5, %v17400_v38  ;;  %v13572_v24 = vmul.f32 %v7884_v34, %v2391_v46  ;;  %vm17404_vm12 = vcmask 7168   ;;  %8252 = vperm.xlu0 %7804, %v8251_v53   ;;  %v17408_v12 = vld [vmem:[#allocation58_spill] sm:$0xff]  ;;  %v13588_v34 = vpop.permute.xlu0 %8002 }
 0x660   : > { %17401 = vst [vmem:[#allocation117_spill] sm:$0xff] %v13568_v23  ;;  %17402 = vst [vmem:[#allocation119_spill] sm:$0xff] %v13570_v45  ;;  %v5212_v40 = vsel %vm5196_vm11, %v4988_v5, %v5164_v10  ;;  %v13578_v41 = vsel %vm5196_vm11, 5, %v17405_v51  ;;  %v3101_v63 = vmul.f32 %v7895_v43, %v2397_v2  ;;  %v7949_v4 = vunpack.i.l.bf16 %v13465_v44  ;;  %v17415_v5 = vld [vmem:[#allocation142_spill] sm:$0xff] }
 0x661   : > { %17403 = vst [vmem:[#allocation166_spill] sm:$0xff] %v13572_v24  ;;  %6271 = vst.msk [vmem:[#allocation2 + $0x118] sm:$0xff] %vm17404_vm12, %v5213_v22  ;;  %vm17409_vm15 = vcmp.eq.s32.totalorder %v17408_v12, 5  ;;  %vm17411_vm14 = vcmp.eq.s32.totalorder %v17410_v49, 5  ;;  %v13591_v38 = vadd.f32 %v3262_v61, %v13397_v42  ;;  %v13594_v53 = vadd.f32 %v3263_v28, %v13400_v29  ;;  %v17416_v61 = vld [vmem:[#allocation124_spill] sm:$0xff]  ;;  %v13614_v51 = vpop.permute.xlu1 %7977  ;;  %v17419_v12 = vld [vmem:[#allocation126_spill] sm:$0xff] }
 0x662   : > { %17406 = vst [vmem:[#allocation21_spill] sm:$0xff] %v13578_v41  ;;  %vm17407_vm10 = vmmov %vm17404_vm12  ;;  %v7154_v48 = vsel %vm17409_vm15, 1.0, %v16894_v35  ;;  %v7155_v46 = vsel %vm17411_vm14, 1.0, %v16894_v35  ;;  %vm4752_vm1 = vcmp.eq.s32.totalorder %v12471_v7, 5  ;;  %v3100_v54 = vmul.f32 %v7894_v27, %v2396_v47  ;;  %v17423_v7 = vld [vmem:[#allocation153_spill] sm:$0xff] }
 0x663   : > { %6270 = vst.msk [vmem:[#allocation2 + $0x110] sm:$0xff] %vm17407_vm10, %v5212_v40  ;;  %17412 = vst [vmem:[#allocation20_spill] sm:$0xff] %v13588_v34  ;;  %v8036_v43 = vpack.i.bf16 %v7155_v46, %v7154_v48  ;;  %v7950_v9 = vunpack.i.h.bf16 %v13465_v44  ;;  %vm4753_vm6 = vcmp.eq.s32.totalorder %v12493_v8, 5  ;;  %v7244_v2 = vsel %vm4752_vm1, 1.0, %v16894_v35  ;;  %v17417_v44 = vld [vmem:[#allocation50_spill] sm:$0xff]  ;;  %v13612_v40 = vpop.permute.xlu0 %8012  ;;  %v17476_v24 = vld [vmem:[#allocation65_spill] sm:$0xff] }
 0x664   : > { %17413 = vst [vmem:[#allocation170_spill] sm:$0xff] %v13591_v38  ;;  %17414 = vst [vmem:[#allocation172_spill] sm:$0xff] %v13594_v53  ;;  %v7904_v10 = vunpack.i.l.bf16 %v17415_v5  ;;  %v7245_v42 = vsel %vm4753_vm6, 1.0, %v16894_v35  ;;  %v4993_v29 = vsel %vm4753_vm6, 3e+38, %v17416_v61  ;;  %v5169_v28 = vsel %vm5153_vm5, %v13379_v55, %v13368_v0  ;;  %v2400_v8 = vld [vmem:[#allocation3 + $0x130] sm:$0xff] }
 0x665   : > { %8037 = vperm.xlu1 %7810, %v8036_v43   ;;  %v3266_v27 = vmul.f32 %v7949_v4, %v17417_v44  ;;  %v7905_v22 = vunpack.i.h.bf16 %v17415_v5  ;;  %vm5201_vm13 = vcmp.lt.f32.partialorder %v4993_v29, %v5169_v28  ;;  %v8261_v47 = vpack.i.bf16 %v7245_v42, %v7244_v2  ;;  %17418 = vst [vmem:[#allocation13_spill] sm:$0xff] %v13612_v40  ;;  %v2401_v55 = vld [vmem:[#allocation3 + $0x138] sm:$0xff]  ;;  %vm17421_vm5 = vmmov %vm17407_vm10 }
 0x666   : > { %v4992_v48 = vsel %vm4752_vm1, 3e+38, %v17419_v12  ;;  %v5217_v49 = vsel %vm5201_vm13, %v4993_v29, %v5169_v28  ;;  %v13620_v46 = vsel %vm5201_vm13, 5, %v13408_v57  ;;  %v5168_v0 = vsel %vm5152_vm7, %v13385_v19, %v13394_v17  ;;  %v17420_v4 = vld [vmem:[#allocation91_spill] sm:$0xff]  ;;  %v2404_v57 = vld [vmem:[#allocation3 + $0x150] sm:$0xff]  ;;  %vm17424_vm7 = vmmov %vm17421_vm5 }
 0x667   : > { %v7914_v43 = vunpack.i.l.bf16 %v17420_v4  ;;  %6275 = vst.msk [vmem:[#allocation2 + $0x138] sm:$0xff] %vm17421_vm5, %v5217_v49  ;;  %vm5200_vm0 = vcmp.lt.f32.partialorder %v4992_v48, %v5168_v0  ;;  %8262 = vperm.xlu0 %7804, %v8261_v47   ;;  %v17422_v2 = vld [vmem:[#allocation143_spill] sm:$0xff]  ;;  %vm3947_vm11 = vcmp.eq.s32.totalorder %v17423_v7, 0  ;;  %v3104_v5 = vmul.f32 %v7904_v10, %v2400_v8  ;;  %v17426_v8 = vld [vmem:[#allocation52_spill] sm:$0xff]  ;;  %v13669_v49 = vpop.permute.xlu1 %7987  ;;  %vm17438_vm6 = vmmov %vm17421_vm5 }
 0x668   : > { %vm3946_vm3 = vcmp.eq.s32.totalorder %v17422_v2, 0  ;;  %v5216_v42 = vsel %vm5200_vm0, %v4992_v48, %v5168_v0  ;;  %v13632_v61 = vsel %vm5200_vm0, 5, %v13422_v33  ;;  %v13638_v17 = vadd.f32 %v3100_v54, %v13416_v20  ;;  %v13648_v33 = vpop.permute.xlu0 %8022  ;;  %v2405_v48 = vld [vmem:[#allocation3 + $0x158] sm:$0xff]  ;;  %17429 = vst [vmem:[#allocation25_spill] sm:$0xff] %v13669_v49  ;;  %v17430_v0 = vld [vmem:[#allocation105_spill] sm:$0xff] }
 0x669   : > { %v7158_v19 = vsel %vm3946_vm3, 1.0, %v16894_v35  ;;  %v13641_v29 = vadd.f32 %v3101_v63, %v13413_v60  ;;  %v7915_v28 = vunpack.i.h.bf16 %v17420_v4  ;;  %6274 = vst.msk [vmem:[#allocation2 + $0x130] sm:$0xff] %vm17424_vm7, %v5216_v42  ;;  %v7159_v10 = vsel %vm3947_vm11, 1.0, %v16894_v35  ;;  %17425 = vst [vmem:[#allocation120_spill] sm:$0xff] %v13648_v33  ;;  %v17477_v34 = vld [vmem:[#allocation63_spill] sm:$0xff] }
 0x66a   : > { %v13651_v47 = vmul.f32 %v7950_v9, %v17426_v8  ;;  %v3105_v12 = vmul.f32 %v7905_v22, %v2401_v55  ;;  %v8046_v20 = vpack.i.bf16 %v7159_v10, %v7158_v19  ;;  %vm4756_vm12 = vcmp.eq.s32.totalorder %v12509_v62, 5  ;;  %v17496_v8 = vld [vmem:[#allocation108_spill] sm:$0xff] }
 0x66b   : > { %v3108_v60 = vmul.f32 %v7914_v43, %v2404_v57  ;;  %vm4757_vm10 = vcmp.eq.s32.totalorder %v12535_v16, 5  ;;  %v7248_v63 = vsel %vm4756_vm12, 1.0, %v16894_v35  ;;  %v5173_v54 = vsel %vm5157_vm9, %v13438_v21, %v13445_v52  ;;  %vm17434_vm9 = vmmov %vm17421_vm5 }
 0x66c   : > { %17427 = vst [vmem:[#allocation121_spill] sm:$0xff] %v13651_v47  ;;  %v13664_v9 = vadd.f32 %v3266_v27, %v13430_v32  ;;  %v13667_v22 = vadd.f32 %v3104_v5, %v13463_v14  ;;  %8047 = vperm.xlu1 %7810, %v8046_v20   ;;  %v7249_v16 = vsel %vm4757_vm10, 1.0, %v16894_v35  ;;  %v4997_v55 = vsel %vm4757_vm10, 3e+38, %v17430_v0  ;;  %v13678_v32 = vpop.permute.xlu0 %8032  ;;  %v17432_v14 = vld [vmem:[#allocation112_spill] sm:$0xff] }
 0x66d   : > { %v3109_v4 = vmul.f32 %v7915_v28, %v2405_v48  ;;  %vm5205_vm15 = vcmp.lt.f32.partialorder %v4997_v55, %v5173_v54  ;;  %v8271_v43 = vpack.i.bf16 %v7249_v16, %v7248_v63  ;;  %v5172_v21 = vsel %vm5156_vm4, %v13448_v25, %v13457_v13  ;;  %17431 = vst [vmem:[#allocation10_spill] sm:$0xff] %v13678_v32  ;;  %v17435_v25 = vld [vmem:[#allocation80_spill] sm:$0xff]  ;;  %v17436_v13 = vld [vmem:[#allocation155_spill] sm:$0xff] }
 0x66e   : > { %17428 = vst [vmem:[#allocation167_spill] sm:$0xff] %v13664_v9  ;;  %v13681_v52 = vadd.f32 %v3105_v12, %v13460_v58  ;;  %v4996_v27 = vsel %vm4756_vm12, 3e+38, %v17432_v14  ;;  %v5221_v5 = vsel %vm5205_vm15, %v4997_v55, %v5173_v54  ;;  %v13687_v57 = vsel %vm5205_vm15, 5, %v13471_v6  ;;  %v17440_v48 = vld [vmem:[#allocation95_spill] sm:$0xff]  ;;  %v17443_v55 = vld [vmem:[#allocation128_spill] sm:$0xff] }
 0x66f   : > { %v13690_v42 = vadd.f32 %v3108_v60, %v13489_v37  ;;  %6279 = vst.msk [vmem:[#allocation2 + $0x158] sm:$0xff] %vm17434_vm9, %v5221_v5  ;;  %vm5204_vm14 = vcmp.lt.f32.partialorder %v4996_v27, %v5172_v21  ;;  %8272 = vperm.xlu0 %7804, %v8271_v43   ;;  %vm3950_vm4 = vcmp.eq.s32.totalorder %v17435_v25, 0  ;;  %vm3951_vm1 = vcmp.eq.s32.totalorder %v17436_v13, 0  ;;  %v13713_v60 = vpop.permute.xlu1 %7997  ;;  %v17445_v5 = vld [vmem:[#allocation43_spill] sm:$0xff]  ;;  %v17473_v9 = vld [vmem:[#allocation104_spill] sm:$0xff] }
 0x670   : > { %v5220_v58 = vsel %vm5204_vm14, %v4996_v27, %v5172_v21  ;;  %v13696_v19 = vsel %vm5204_vm14, 5, %v13483_v11  ;;  %v7162_v62 = vsel %vm3950_vm4, 1.0, %v16894_v35  ;;  %v7163_v6 = vsel %vm3951_vm1, 1.0, %v16894_v35  ;;  %v13710_v11 = vpop.permute.xlu0 %8042  ;;  %17441 = vst [vmem:[#allocation129_spill] sm:$0xff] %v13713_v60  ;;  %v2408_v27 = vld [vmem:[#allocation3 + $0x170] sm:$0xff] }
 0x671   : > { %17433 = vst [vmem:[#allocation24_spill] sm:$0xff] %v13690_v42  ;;  %v13705_v37 = vadd.f32 %v3109_v4, %v13477_v31  ;;  %v7970_v28 = vunpack.i.h.bf16 %v13574_v30  ;;  %v7969_v10 = vunpack.i.l.bf16 %v13574_v30  ;;  %6278 = vst.msk [vmem:[#allocation2 + $0x150] sm:$0xff] %vm17438_vm6, %v5220_v58  ;;  %v8056_v12 = vpack.i.bf16 %v7163_v6, %v7162_v62  ;;  %v17442_v30 = vld [vmem:[#allocation94_spill] sm:$0xff] }
 0x672   : > { %17439 = vst [vmem:[#allocation127_spill] sm:$0xff] %v13710_v11  ;;  %v7935_v20 = vunpack.i.h.bf16 %v17440_v48  ;;  %vm4760_vm13 = vcmp.eq.s32.totalorder %v12543_v3, 5  ;;  %vm4761_vm5 = vcmp.eq.s32.totalorder %v12552_v26, 5  ;;  %v5177_v31 = vsel %vm5161_vm8, %v13501_v59, %v13508_v36  ;;  %v17444_v3 = vld [vmem:[#allocation125_spill] sm:$0xff]  ;;  %v17464_v11 = vld [vmem:[#allocation164_spill] sm:$0xff] }
 0x673   : > { %17437 = vst [vmem:[#allocation165_spill] sm:$0xff] %v13705_v37  ;;  %v7924_v63 = vunpack.i.l.bf16 %v17442_v30  ;;  %v7934_v54 = vunpack.i.l.bf16 %v17440_v48  ;;  %8057 = vperm.xlu1 %7810, %v8056_v12   ;;  %v7252_v16 = vsel %vm4760_vm13, 1.0, %v16894_v35  ;;  %v7253_v0 = vsel %vm4761_vm5, 1.0, %v16894_v35  ;;  %v17446_v48 = vld [vmem:[#allocation41_spill] sm:$0xff] }
 0x674   : > { %v5000_v4 = vsel %vm4760_vm13, 3e+38, %v17443_v55  ;;  %v5001_v43 = vsel %vm4761_vm5, 3e+38, %v17444_v3  ;;  %v8281_v26 = vpack.i.bf16 %v7253_v0, %v7252_v16  ;;  %v5176_v59 = vsel %vm5160_vm2, %v13498_v39, %v13515_v50  ;;  %v13735_v14 = vpop.permute.xlu0 %8052  ;;  %vm17447_vm2 = vmmov %vm17438_vm6  ;;  %v17449_v50 = vld [vmem:[#allocation156_spill] sm:$0xff]  ;;  %v13755_v55 = vpop.permute.xlu1 %8007  ;;  %v17457_v3 = vld [vmem:[#allocation147_spill] sm:$0xff] }
 0x675   : > { %v7980_v36 = vunpack.i.h.bf16 %v13614_v51  ;;  %v7979_v21 = vunpack.i.l.bf16 %v13614_v51  ;;  %vm5209_vm8 = vcmp.lt.f32.partialorder %v5001_v43, %v5177_v31  ;;  %vm5208_vm0 = vcmp.lt.f32.partialorder %v5000_v4, %v5176_v59  ;;  %vm17448_vm7 = vmmov %vm17447_vm2  ;;  %v17450_v51 = vld [vmem:[#allocation159_spill] sm:$0xff]  ;;  %17455 = vst [vmem:[#allocation27_spill] sm:$0xff] %v13755_v55 }
 0x676   : > { %v3261_v58 = vmul.f32 %v7935_v20, %v17445_v5  ;;  %v5225_v62 = vsel %vm5209_vm8, %v5001_v43, %v5177_v31  ;;  %v13739_v6 = vsel %vm5209_vm8, 5, %v13533_v1  ;;  %v5224_v12 = vsel %vm5208_vm0, %v5000_v4, %v5176_v59  ;;  %8282 = vperm.xlu0 %7804, %v8281_v26   ;;  %v17451_v20 = vld [vmem:[#allocation140_spill] sm:$0xff]  ;;  %v17453_v1 = vld [vmem:[#allocation138_spill] sm:$0xff] }
 0x677   : > { %v3260_v16 = vmul.f32 %v7934_v54, %v17446_v48  ;;  %6283 = vst.msk [vmem:[#allocation2 + $0x178] sm:$0xff] %vm17447_vm2, %v5225_v62  ;;  %v13744_v39 = vsel %vm5208_vm0, 5, %v13539_v56  ;;  %vm3954_vm12 = vcmp.eq.s32.totalorder %v17449_v50, 0  ;;  %vm3955_vm10 = vcmp.eq.s32.totalorder %v17450_v51, 0  ;;  %v17459_v26 = vld [vmem:[#allocation144_spill] sm:$0xff]  ;;  %v17505_v48 = vld [vmem:[#allocation77_spill] sm:$0xff] }
 0x678   : > { %6282 = vst.msk [vmem:[#allocation2 + $0x170] sm:$0xff] %vm17448_vm7, %v5224_v12  ;;  %v13750_v31 = vmul.f32 %v7970_v28, %v17451_v20  ;;  %v13753_v0 = vmul.f32 %v7969_v10, %v17453_v1  ;;  %v7166_v54 = vsel %vm3954_vm12, 1.0, %v16894_v35  ;;  %v7167_v56 = vsel %vm3955_vm10, 1.0, %v16894_v35  ;;  %v13769_v10 = vpop.permute.xlu0 %8062 }
 0x679   : > { %v13763_v4 = vmul.f32 %v7924_v63, %v2408_v27  ;;  %v13766_v43 = vmul.f32 %v7980_v36, %v17457_v3  ;;  %v8066_v28 = vpack.i.bf16 %v7167_v56, %v7166_v54  ;;  %vm5244_vm15 = vcmp.eq.s32.totalorder %v13578_v41, 0  ;;  %v17463_v54 = vld [vmem:[#allocation163_spill] sm:$0xff] }
 0x67a   : > { %17452 = vst [vmem:[#allocation177_spill] sm:$0xff] %v13750_v31  ;;  %17454 = vst [vmem:[#allocation28_spill] sm:$0xff] %v13753_v0  ;;  %v13772_v59 = vmul.f32 %v7979_v21, %v17459_v26  ;;  %v13775_v62 = vadd.f32 %v3261_v58, %v13641_v29  ;;  %vm5245_vm9 = vcmp.eq.s32.totalorder %v13568_v23, 0  ;;  %v7256_v12 = vsel %vm5244_vm15, 1.0, %v16894_v35  ;;  %v17465_v58 = vld [vmem:[#allocation97_spill] sm:$0xff]  ;;  %v17490_v31 = vld [vmem:[#allocation71_spill] sm:$0xff] }
 0x67b   : > { %17456 = vst [vmem:[#allocation69_spill] sm:$0xff] %v13763_v4  ;;  %17458 = vst [vmem:[#allocation130_spill] sm:$0xff] %v13766_v43  ;;  %v13780_v63 = vadd.f32 %v3260_v16, %v13638_v17  ;;  %v7989_v36 = vunpack.i.l.bf16 %v13669_v49  ;;  %8067 = vperm.xlu1 %7810, %v8066_v28   ;;  %v7257_v27 = vsel %vm5245_vm9, 1.0, %v16894_v35  ;;  %vm3958_vm14 = vcmp.eq.s32.totalorder %v17463_v54, 0  ;;  %v17466_v16 = vld [vmem:[#allocation5_spill] sm:$0xff]  ;;  %v17479_v43 = vld [vmem:[#allocation66_spill] sm:$0xff] }
 0x67c   : > { %17460 = vst [vmem:[#allocation178_spill] sm:$0xff] %v13772_v59  ;;  %17461 = vst [vmem:[#allocation23_spill] sm:$0xff] %v13775_v62  ;;  %v8291_v56 = vpack.i.bf16 %v7257_v27, %v7256_v12  ;;  %vm3959_vm6 = vcmp.eq.s32.totalorder %v17464_v11, 0  ;;  %v7170_v29 = vsel %vm3958_vm14, 1.0, %v16894_v35  ;;  %v7945_v32 = vunpack.i.h.bf16 %v17465_v58  ;;  %v13800_v12 = vpop.permute.xlu0 %8072  ;;  %v13802_v27 = vpop.permute.xlu1 %8017  ;;  %v17493_v0 = vld [vmem:[#allocation134_spill] sm:$0xff] }
 0x67d   : > { %17462 = vst [vmem:[#allocation31_spill] sm:$0xff] %v13780_v63  ;;  %v7944_v17 = vunpack.i.l.bf16 %v17465_v58  ;;  %v13795_v28 = vsel %vm3946_vm3, 3e+38, %v17466_v16  ;;  %v7171_v21 = vsel %vm3959_vm6, 1.0, %v16894_v35  ;;  %17467 = vst [vmem:[#allocation32_spill] sm:$0xff] %v13802_v27  ;;  %vm5248_vm13 = vcmp.eq.s32.totalorder %v13632_v61, 0 }
 0x67e   : > { %8292 = vperm.xlu0 %7804, %v8291_v56   ;;  %v8076_v33 = vpack.i.bf16 %v7171_v21, %v7170_v29  ;;  %vm5249_vm5 = vcmp.eq.s32.totalorder %v13620_v46, 0  ;;  %vm4106_vm8 = vcmp.eq.s32.totalorder %v17422_v2, 1  ;;  %v17468_v58 = vld [vmem:[#allocation150_spill] sm:$0xff]  ;;  %v17470_v16 = vld [vmem:[#allocation4_spill] sm:$0xff]  ;;  %v7260_v60 = vsel %vm5248_vm13, 1.0, %v16894_v35 }
 0x67f   : > { %v13808_v40 = vmul.f32 %v7989_v36, %v17468_v58  ;;  %v13813_v55 = vsel %vm3947_vm11, 3e+38, %v17470_v16  ;;  %v7261_v27 = vsel %vm5249_vm5, 1.0, %v16894_v35  ;;  %vm4107_vm3 = vcmp.eq.s32.totalorder %v17423_v7, 1  ;;  %v17471_v29 = vld [vmem:[#allocation110_spill] sm:$0xff]  ;;  %v17472_v36 = vld [vmem:[#allocation47_spill] sm:$0xff] }
 0x680   : > { %8077 = vperm.xlu1 %7810, %v8076_v33   ;;  %v8301_v21 = vpack.i.bf16 %v7261_v27, %v7260_v60  ;;  %v7174_v56 = vsel %vm4106_vm8, 1.0, %v16894_v35  ;;  %v13820_v4 = vsel %vm4106_vm8, 3e+38, %v17471_v29  ;;  %v3265_v47 = vmul.f32 %v7945_v32, %v17472_v36  ;;  %v17474_v33 = vld [vmem:[#allocation45_spill] sm:$0xff]  ;;  %v17475_v27 = vld [vmem:[#allocation100_spill] sm:$0xff]  ;;  %v17494_v58 = vld [vmem:[#allocation78_spill] sm:$0xff] }
 0x681   : > { %17469 = vst [vmem:[#allocation75_spill] sm:$0xff] %v13808_v40  ;;  %v7175_v40 = vsel %vm4107_vm3, 1.0, %v16894_v35  ;;  %v13825_v16 = vsel %vm4107_vm3, 3e+38, %v17473_v9  ;;  %vm5002_vm11 = vcmp.lt.f32.partialorder %v13820_v4, %v13795_v28  ;;  %v13829_v49 = vpop.permute.xlu0 %8082  ;;  %v3264_v60 = vmul.f32 %v7944_v17, %v17474_v33  ;;  %v17498_v33 = vld [vmem:[#allocation113_spill] sm:$0xff] }
 0x682   : > { %v7955_v30 = vunpack.i.h.bf16 %v17475_v27  ;;  %8302 = vperm.xlu0 %7804, %v8301_v21   ;;  %vm5003_vm0 = vcmp.lt.f32.partialorder %v13825_v16, %v13813_v55  ;;  %v8086_v29 = vpack.i.bf16 %v7175_v40, %v7174_v56  ;;  %v7954_v32 = vunpack.i.l.bf16 %v17475_v27  ;;  %v13848_v21 = vpop.permute.xlu1 %8027 }
 0x683   : > { %v13839_v9 = vsel %vm3950_vm4, 3e+38, %v17476_v24  ;;  %vm5252_vm2 = vcmp.eq.s32.totalorder %v13696_v19, 0  ;;  %vm5253_vm7 = vcmp.eq.s32.totalorder %v13687_v57, 0  ;;  %v13846_v17 = vsel %vm3951_vm1, 3e+38, %v17477_v34 }
 0x684   : > { %17478 = vst [vmem:[#allocation168_spill] sm:$0xff] %v13848_v21  ;;  %8087 = vperm.xlu1 %7810, %v8086_v29   ;;  %v7264_v40 = vsel %vm5252_vm2, 1.0, %v16894_v35  ;;  %v7265_v56 = vsel %vm5253_vm7, 1.0, %v16894_v35  ;;  %vm4110_vm15 = vcmp.eq.s32.totalorder %v17435_v25, 1  ;;  %vm4111_vm4 = vcmp.eq.s32.totalorder %v17436_v13, 1  ;;  %v17481_v21 = vld [vmem:[#allocation64_spill] sm:$0xff] }
 0x685   : > { %v8311_v24 = vpack.i.bf16 %v7265_v56, %v7264_v40  ;;  %v7178_v27 = vsel %vm4110_vm15, 1.0, %v16894_v35  ;;  %v13856_v53 = vsel %vm4110_vm15, 3e+38, %v17479_v43  ;;  %v13858_v59 = vpop.permute.xlu0 %8092  ;;  %v13861_v34 = vadd.f32 %v3264_v60, %v13667_v22  ;;  %v17483_v56 = vld [vmem:[#allocation51_spill] sm:$0xff]  ;;  %v17485_v43 = vld [vmem:[#allocation49_spill] sm:$0xff] }
 0x686   : > { %v7179_v29 = vsel %vm4111_vm4, 1.0, %v16894_v35  ;;  %v13865_v38 = vsel %vm4111_vm4, 3e+38, %v17481_v21  ;;  %vm5006_vm1 = vcmp.lt.f32.partialorder %v13856_v53, %v13839_v9  ;;  %v13870_v40 = vadd.f32 %v3265_v47, %v13681_v52  ;;  %v13887_v47 = vpop.xlane.xlu1 %1955  ;;  %v17488_v52 = vld [vmem:[#allocation70_spill] sm:$0xff] }
 0x687   : > { %17480 = vst [vmem:[#allocation35_spill] sm:$0xff] %v13861_v34  ;;  %v13873_v37 = vmul.f32 %v7955_v30, %v17483_v56  ;;  %8312 = vperm.xlu0 %7804, %v8311_v24   ;;  %vm5007_vm9 = vcmp.lt.f32.partialorder %v13865_v38, %v13846_v17  ;;  %v8096_v22 = vpack.i.bf16 %v7179_v29, %v7178_v27  ;;  %v17487_v34 = vld [vmem:[#allocation73_spill] sm:$0xff]  ;;  %vm5256_vm13 = vcmp.eq.s32.totalorder %v13744_v39, 0  ;;  %v17489_v29 = vld [vmem:[#allocation74_spill] sm:$0xff] }
 0x688   : > { %17482 = vst [vmem:[#allocation36_spill] sm:$0xff] %v13870_v40  ;;  %v13878_v60 = vmul.f32 %v7954_v32, %v17485_v43  ;;  %v13883_v21 = vsel %vm3954_vm12, 3e+38, %v17487_v34  ;;  %vm5257_vm5 = vcmp.eq.s32.totalorder %v13739_v6, 0  ;;  %v13892_v30 = vsel %vm3955_vm10, 3e+38, %v17488_v52 }
 0x689   : > { %17484 = vst [vmem:[#allocation171_spill] sm:$0xff] %v13873_v37  ;;  %8097 = vperm.xlu1 %7810, %v8096_v22   ;;  %v7268_v32 = vsel %vm5256_vm13, 1.0, %v16894_v35  ;;  %v7269_v24 = vsel %vm5257_vm5, 1.0, %v16894_v35  ;;  %vm4114_vm8 = vcmp.eq.s32.totalorder %v17449_v50, 1  ;;  %vm4115_vm12 = vcmp.eq.s32.totalorder %v17450_v51, 1  ;;  %v13909_v45 = vpop.permute.xlu0 %8102  ;;  %v17492_v37 = vld [vmem:[#allocation132_spill] sm:$0xff] }
 0x68a   : > { %17486 = vst [vmem:[#allocation85_spill] sm:$0xff] %v13878_v60  ;;  %v8321_v27 = vpack.i.bf16 %v7269_v24, %v7268_v32  ;;  %v7182_v34 = vsel %vm4114_vm8, 1.0, %v16894_v35  ;;  %v13900_v40 = vsel %vm4114_vm8, 3e+38, %v17489_v29  ;;  %v7183_v52 = vsel %vm4115_vm12, 1.0, %v16894_v35  ;;  %v17491_v24 = vld [vmem:[#allocation133_spill] sm:$0xff] }
 0x68b   : > { %v13905_v22 = vsel %vm4115_vm12, 3e+38, %v17490_v31  ;;  %vm5010_vm10 = vcmp.lt.f32.partialorder %v13900_v40, %v13883_v21  ;;  %v13915_v62 = vsel %vm3958_vm14, 3e+38, %v17491_v24  ;;  %v8106_v29 = vpack.i.bf16 %v7183_v52, %v7182_v34  ;;  %v13931_v52 = vpop.xlane.xlu1 %1941 }
 0x68c   : > { %8322 = vperm.xlu0 %7804, %v8321_v27   ;;  %vm5011_vm3 = vcmp.lt.f32.partialorder %v13905_v22, %v13892_v30  ;;  %v13922_v31 = vsel %vm3959_vm6, 3e+38, %v17492_v37  ;;  %vm5404_vm2 = vcmp.eq.s32.totalorder %v13578_v41, 1  ;;  %vm5405_vm7 = vcmp.eq.s32.totalorder %v13568_v23, 1 }
 0x68d   : > { %vm4118_vm15 = vcmp.eq.s32.totalorder %v17463_v54, 1  ;;  %8107 = vperm.xlu1 %7810, %v8106_v29   ;;  %v7272_v24 = vsel %vm5404_vm2, 1.0, %v16894_v35  ;;  %v7273_v27 = vsel %vm5405_vm7, 1.0, %v16894_v35  ;;  %vm4119_vm14 = vcmp.eq.s32.totalorder %v17464_v11, 1 }
 0x68e   : > { %v7186_v34 = vsel %vm4118_vm15, 1.0, %v16894_v35  ;;  %v8331_v32 = vpack.i.bf16 %v7273_v27, %v7272_v24  ;;  %v7187_v37 = vsel %vm4119_vm14, 1.0, %v16894_v35  ;;  %v13935_v63 = vsel %vm4118_vm15, 3e+38, %v17493_v0  ;;  %v13961_v27 = vpop.permute.xlu0 %8112 }
 0x68f   : > { %v13938_v26 = vsel %vm4119_vm14, 3e+38, %v17494_v58  ;;  %v17495_v29 = vmov 0   ;;  %v8116_v1 = vpack.i.bf16 %v7187_v37, %v7186_v34  ;;  %vm5014_vm4 = vcmp.lt.f32.partialorder %v13935_v63, %v13915_v62  ;;  %v13986_v43 = vpop.xlane.xlu1 %1983 }
 0x690   : > { %v5034_v3 = vsel %vm5002_vm11, 1, %v17495_v29  ;;  %vm5015_vm6 = vcmp.lt.f32.partialorder %v13938_v26, %v13922_v31  ;;  %v5035_v0 = vsel %vm5003_vm0, 1, %v17495_v29  ;;  %v5039_v58 = vsel %vm5007_vm9, 1, %v17495_v29  ;;  %8332 = vperm.xlu0 %7804, %v8331_v32   ;;  %17497 = vst [vmem:[#allocation39_spill] sm:$0xff] %v13986_v43 }
 0x691   : > { %v5038_v24 = vsel %vm5006_vm1, 1, %v17495_v29  ;;  %vm5408_vm13 = vcmp.eq.s32.totalorder %v13632_v61, 1  ;;  %8117 = vperm.xlu1 %7810, %v8116_v1   ;;  %vm5409_vm5 = vcmp.eq.s32.totalorder %v13620_v46, 1  ;;  %vm4266_vm8 = vcmp.eq.s32.totalorder %v17422_v2, 2 }
 0x692   : > { %v7276_v34 = vsel %vm5408_vm13, 1.0, %v16894_v35  ;;  %vm4267_vm12 = vcmp.eq.s32.totalorder %v17423_v7, 2  ;;  %v13971_v37 = vsel %vm5010_vm10, 1, %v17495_v29  ;;  %v7277_v32 = vsel %vm5409_vm5, 1.0, %v16894_v35 }
 0x693   : > { %v7190_v20 = vsel %vm4266_vm8, 1.0, %v16894_v35  ;;  %v7191_v1 = vsel %vm4267_vm12, 1.0, %v16894_v35  ;;  %v8341_v44 = vpack.i.bf16 %v7277_v32, %v7276_v34  ;;  %v13977_v18 = vsel %vm4267_vm12, 3e+38, %v17496_v8 }
 0x694   : > { %v13984_v60 = vsel %vm5003_vm0, %v13825_v16, %v13813_v55  ;;  %v8126_v42 = vpack.i.bf16 %v7191_v1, %v7190_v20  ;;  %v5043_v56 = vsel %vm5011_vm3, 1, %v17495_v29  ;;  %v13993_v34 = vsel %vm4266_vm8, 3e+38, %v17498_v33  ;;  %v17500_v33 = vld [vmem:[#allocation72_spill] sm:$0xff] }
 0x695   : > { %vm5051_vm2 = vcmp.lt.f32.partialorder %v13977_v18, %v13984_v60  ;;  %v14002_v8 = vsel %vm5002_vm11, %v13820_v4, %v13795_v28  ;;  %8342 = vperm.xlu0 %7804, %v8341_v44   ;;  %vm5412_vm7 = vcmp.eq.s32.totalorder %v13696_v19, 1  ;;  %vm5413_vm15 = vcmp.eq.s32.totalorder %v13687_v57, 1  ;;  %v14021_v28 = vpop.permute.xlu0 %8122 }
 0x696   : > { %v14007_v20 = vsel %vm5051_vm2, 2, %v5035_v0  ;;  %vm5050_vm0 = vcmp.lt.f32.partialorder %v13993_v34, %v14002_v8  ;;  %8127 = vperm.xlu1 %7810, %v8126_v42   ;;  %v7280_v44 = vsel %vm5412_vm7, 1.0, %v16894_v35  ;;  %v7281_v4 = vsel %vm5413_vm15, 1.0, %v16894_v35  ;;  %17499 = vst [vmem:[#allocation40_spill] sm:$0xff] %v14021_v28 }
 0x697   : > { %v14016_v55 = vsel %vm5050_vm0, 2, %v5034_v3  ;;  %vm4270_vm11 = vcmp.eq.s32.totalorder %v17435_v25, 2  ;;  %v8351_v16 = vpack.i.bf16 %v7281_v4, %v7280_v44  ;;  %vm4271_vm14 = vcmp.eq.s32.totalorder %v17436_v13, 2  ;;  %v17501_v3 = vld [vmem:[#allocation60_spill] sm:$0xff] }
 0x698   : > { %v7194_v42 = vsel %vm4270_vm11, 1.0, %v16894_v35  ;;  %v14026_v0 = vsel %vm4270_vm11, 3e+38, %v17500_v33  ;;  %v7195_v32 = vsel %vm4271_vm14, 1.0, %v16894_v35  ;;  %v14030_v1 = vsel %vm4271_vm14, 3e+38, %v17501_v3 }
 0x699   : > { %v14037_v36 = vsel %vm5007_vm9, %v13865_v38, %v13846_v17  ;;  %v14044_v44 = vsel %vm5006_vm1, %v13856_v53, %v13839_v9  ;;  %v5047_v4 = vsel %vm5015_vm6, 1, %v17495_v29  ;;  %8352 = vperm.xlu0 %7804, %v8351_v16   ;;  %v8136_v33 = vpack.i.bf16 %v7195_v32, %v7194_v42  ;;  %v14054_v38 = vpop.xlane.xlu1 %1969  ;;  %v17503_v32 = vld [vmem:[#allocation79_spill] sm:$0xff]  ;;  %v14081_v3 = vpop.permute.xlu0 %8132 }
 0x69a   : > { %vm5055_vm13 = vcmp.lt.f32.partialorder %v14030_v1, %v14037_v36  ;;  %vm5054_vm9 = vcmp.lt.f32.partialorder %v14026_v0, %v14044_v44  ;;  %17502 = vst [vmem:[#allocation180_spill] sm:$0xff] %v14054_v38  ;;  %v5046_v53 = vsel %vm5014_vm4, 1, %v17495_v29  ;;  %vm5416_vm1 = vcmp.eq.s32.totalorder %v13744_v39, 1  ;;  %17504 = vst [vmem:[#allocation67_spill] sm:$0xff] %v14081_v3 }
 0x69b   : > { %v14063_v9 = vsel %vm5055_vm13, 2, %v5039_v58  ;;  %v14068_v17 = vsel %vm5054_vm9, 2, %v5038_v24  ;;  %8137 = vperm.xlu1 %7810, %v8136_v33   ;;  %vm5417_vm5 = vcmp.eq.s32.totalorder %v13739_v6, 1  ;;  %v7284_v16 = vsel %vm5416_vm1, 1.0, %v16894_v35 }
 0x69c   : > { %vm4274_vm8 = vcmp.eq.s32.totalorder %v17449_v50, 2  ;;  %vm4275_vm12 = vcmp.eq.s32.totalorder %v17450_v51, 2  ;;  %v7285_v29 = vsel %vm5417_vm5, 1.0, %v16894_v35  ;;  %v14091_v5 = vsel %vm5011_vm3, %v13905_v22, %v13892_v30 }
 0x69d   : > { %v7198_v58 = vsel %vm4274_vm8, 1.0, %v16894_v35  ;;  %v7199_v42 = vsel %vm4275_vm12, 1.0, %v16894_v35  ;;  %v14079_v24 = vsel %vm4274_vm8, 3e+38, %v17503_v32  ;;  %v8361_v33 = vpack.i.bf16 %v7285_v29, %v7284_v16 }
 0x69e   : > { %v14084_v15 = vsel %vm4275_vm12, 3e+38, %v17505_v48  ;;  %v8146_v38 = vpack.i.bf16 %v7199_v42, %v7198_v58  ;;  %v14100_v16 = vsel %vm5010_vm10, %v13900_v40, %v13883_v21  ;;  %v8055_v48 = vunpack.i.h.bf16 %v13735_v14  ;;  %v14113_v40 = vpop.xlane.xlu1 %2011  ;;  %v8562_v21 = vld [vmem:[#allocation3 + $0x18] sm:$0xff] }
 0x69f   : > { %vm5059_vm7 = vcmp.lt.f32.partialorder %v14084_v15, %v14091_v5  ;;  %v8054_v29 = vunpack.i.l.bf16 %v13735_v14  ;;  %8362 = vperm.xlu0 %7804, %v8361_v33   ;;  %vm5058_vm3 = vcmp.lt.f32.partialorder %v14079_v24, %v14100_v16  ;;  %vm5564_vm15 = vcmp.eq.s32.totalorder %v13578_v41, 2  ;;  %17506 = vst [vmem:[#allocation145_spill] sm:$0xff] %v14113_v40  ;;  %v17509_v40 = vld [vmem:[#allocation82_spill] sm:$0xff] }
 0x6a0   : > { %v14107_v30 = vsel %vm5059_vm7, 2, %v5043_v56  ;;  %8147 = vperm.xlu1 %7810, %v8146_v38   ;;  %vm5565_vm11 = vcmp.eq.s32.totalorder %v13568_v23, 2  ;;  %v14119_v14 = vsel %vm5058_vm3, 2, %v13971_v37  ;;  %v14121_v22 = vmul.f32 %v8562_v21, %v8055_v48  ;;  %v8563_v56 = vld [vmem:[#allocation3 + $0x10] sm:$0xff] }
 0x6a1   : > { %v14123_v58 = vmul.f32 %v8563_v56, %v8054_v29  ;;  %v7288_v38 = vsel %vm5564_vm15, 1.0, %v16894_v35  ;;  %v7289_v42 = vsel %vm5565_vm11, 1.0, %v16894_v35  ;;  %vm4278_vm10 = vcmp.eq.s32.totalorder %v17463_v54, 2  ;;  %v17507_v29 = vld [vmem:[#allocation83_spill] sm:$0xff]  ;;  %v14141_v56 = vpop.permute.xlu0 %8142 }
 0x6a2   : > { %vm4279_vm14 = vcmp.eq.s32.totalorder %v17464_v11, 2  ;;  %v14134_v37 = vsel %vm5015_vm6, %v13938_v26, %v13922_v31  ;;  %v8371_v32 = vpack.i.bf16 %v7289_v42, %v7288_v38  ;;  %v7202_v33 = vsel %vm4278_vm10, 1.0, %v16894_v35  ;;  %17508 = vst [vmem:[#allocation87_spill] sm:$0xff] %v14141_v56 }
 0x6a3   : > { %v7203_v48 = vsel %vm4279_vm14, 1.0, %v16894_v35  ;;  %v14139_v21 = vsel %vm4278_vm10, 3e+38, %v17507_v29  ;;  %v14144_v3 = vsel %vm4279_vm14, 3e+38, %v17509_v40  ;;  %v14151_v26 = vsel %vm5014_vm4, %v13935_v63, %v13915_v62  ;;  %v8564_v63 = vld [vmem:[#allocation3 + $0x38] sm:$0xff] }
 0x6a4   : > { %v8156_v28 = vpack.i.bf16 %v7203_v48, %v7202_v33  ;;  %v8065_v31 = vunpack.i.h.bf16 %v13769_v10  ;;  %8372 = vperm.xlu0 %7804, %v8371_v32   ;;  %vm5063_vm6 = vcmp.lt.f32.partialorder %v14144_v3, %v14134_v37  ;;  %vm5062_vm1 = vcmp.lt.f32.partialorder %v14139_v21, %v14151_v26  ;;  %v14173_v32 = vpop.xlane.xlu1 %1997 }
 0x6a5   : > { %v8064_v40 = vunpack.i.l.bf16 %v13769_v10  ;;  %vm5568_vm5 = vcmp.eq.s32.totalorder %v13632_v61, 2  ;;  %v14163_v38 = vsel %vm5063_vm6, 2, %v5047_v4  ;;  %v14168_v62 = vsel %vm5062_vm1, 2, %v5046_v53  ;;  %17510 = vst [vmem:[#allocation111_spill] sm:$0xff] %v14173_v32  ;;  %v8565_v10 = vld [vmem:[#allocation3 + $0x30] sm:$0xff]  ;;  %v17511_v53 = vld [vmem:[#allocation9_spill] sm:$0xff] }
 0x6a6   : > { %8157 = vperm.xlu1 %7810, %v8156_v28   ;;  %v14170_v42 = vmul.f32 %v8564_v63, %v8065_v31  ;;  %vm5569_vm4 = vcmp.eq.s32.totalorder %v13620_v46, 2  ;;  %v7292_v48 = vsel %vm5568_vm5, 1.0, %v16894_v35  ;;  %vm4426_vm8 = vcmp.eq.s32.totalorder %v17422_v2, 3  ;;  %v17512_v32 = vld [vmem:[#allocation8_spill] sm:$0xff] }
 0x6a7   : > { %v14175_v33 = vmul.f32 %v8565_v10, %v8064_v40  ;;  %v7293_v4 = vsel %vm5569_vm4, 1.0, %v16894_v35  ;;  %vm4427_vm12 = vcmp.eq.s32.totalorder %v17423_v7, 3  ;;  %v7206_v28 = vsel %vm4426_vm8, 1.0, %v16894_v35 }
 0x6a8   : > { %v8381_v29 = vpack.i.bf16 %v7293_v4, %v7292_v48  ;;  %v14183_v31 = vsel %vm4426_vm8, 3e+38, %v17511_v53  ;;  %v7207_v63 = vsel %vm4427_vm12, 1.0, %v16894_v35  ;;  %v14187_v56 = vsel %vm4427_vm12, 3e+38, %v17512_v32  ;;  %v14203_v48 = vpop.permute.xlu0 %8152  ;;  %v8566_v4 = vld [vmem:[#allocation3 + $0x58] sm:$0xff] }
 0x6a9   : > { %v14194_v40 = vsel %vm5051_vm2, %v13977_v18, %v13984_v60  ;;  %v14201_v10 = vsel %vm5050_vm0, %v13993_v34, %v14002_v8  ;;  %17513 = vst [vmem:[#allocation99_spill] sm:$0xff] %v14203_v48  ;;  %v8166_v32 = vpack.i.bf16 %v7207_v63, %v7206_v28  ;;  %v8075_v18 = vunpack.i.h.bf16 %v13800_v12  ;;  %v8567_v53 = vld [vmem:[#allocation3 + $0x50] sm:$0xff] }
 0x6aa   : > { %8382 = vperm.xlu0 %7804, %v8381_v29   ;;  %vm5099_vm15 = vcmp.lt.f32.partialorder %v14187_v56, %v14194_v40  ;;  %vm5098_vm11 = vcmp.lt.f32.partialorder %v14183_v31, %v14201_v10  ;;  %v8074_v8 = vunpack.i.l.bf16 %v13800_v12  ;;  %vm5572_vm2 = vcmp.eq.s32.totalorder %v13696_v19, 2 }
 0x6ab   : > { %v14214_v60 = vsel %vm5099_vm15, 3, %v14007_v20  ;;  %v14220_v34 = vsel %vm5098_vm11, 3, %v14016_v55  ;;  %8167 = vperm.xlu1 %7810, %v8166_v32   ;;  %v14224_v29 = vmul.f32 %v8566_v4, %v8075_v18  ;;  %vm5573_vm0 = vcmp.eq.s32.totalorder %v13687_v57, 2  ;;  %v14229_v20 = vpop.xlane.xlu1 %2039  ;;  %v17516_v4 = vld [vmem:[#allocation11_spill] sm:$0xff] }
 0x6ac   : > { %v7296_v28 = vsel %vm5572_vm2, 1.0, %v16894_v35  ;;  %vm4430_vm10 = vcmp.eq.s32.totalorder %v17435_v25, 3  ;;  %17515 = vst [vmem:[#allocation101_spill] sm:$0xff] %v14229_v20  ;;  %v14231_v63 = vmul.f32 %v8567_v53, %v8074_v8  ;;  %v7297_v55 = vsel %vm5573_vm0, 1.0, %v16894_v35 }
 0x6ad   : > { %17514 = vst [vmem:[#allocation118_spill] sm:$0xff] %v14224_v29  ;;  %vm4431_vm14 = vcmp.eq.s32.totalorder %v17436_v13, 3  ;;  %v7210_v12 = vsel %vm4430_vm10, 1.0, %v16894_v35  ;;  %v8391_v32 = vpack.i.bf16 %v7297_v55, %v7296_v28  ;;  %v14238_v48 = vsel %vm4430_vm10, 3e+38, %v17516_v4  ;;  %v17517_v29 = vld [vmem:[#allocation15_spill] sm:$0xff]  ;;  %v14258_v4 = vpop.permute.xlu0 %8162 }
 0x6ae   : > { %v7211_v18 = vsel %vm4431_vm14, 1.0, %v16894_v35  ;;  %v14241_v43 = vsel %vm4431_vm14, 3e+38, %v17517_v29  ;;  %v14248_v8 = vsel %vm5055_vm13, %v14030_v1, %v14037_v36  ;;  %v14255_v28 = vsel %vm5054_vm9, %v14026_v0, %v14044_v44  ;;  %17518 = vst [vmem:[#allocation102_spill] sm:$0xff] %v14258_v4  ;;  %v8568_v44 = vld [vmem:[#allocation3 + $0x78] sm:$0xff] }
 0x6af   : > { %v8176_v53 = vpack.i.bf16 %v7211_v18, %v7210_v12  ;;  %v8085_v55 = vunpack.i.h.bf16 %v13829_v49  ;;  %8392 = vperm.xlu0 %7804, %v8391_v32   ;;  %vm5103_vm5 = vcmp.lt.f32.partialorder %v14241_v43, %v14248_v8  ;;  %vm5102_vm13 = vcmp.lt.f32.partialorder %v14238_v48, %v14255_v28  ;;  %v14286_v18 = vpop.xlane.xlu1 %2025 }
 0x6b0   : > { %v8084_v36 = vunpack.i.l.bf16 %v13829_v49  ;;  %vm5576_vm4 = vcmp.eq.s32.totalorder %v13744_v39, 2  ;;  %v14270_v0 = vsel %vm5103_vm5, 3, %v14063_v9  ;;  %v14276_v1 = vsel %vm5102_vm13, 3, %v14068_v17  ;;  %v8569_v49 = vld [vmem:[#allocation3 + $0x70] sm:$0xff]  ;;  %17519 = vst [vmem:[#allocation58_spill] sm:$0xff] %v14286_v18 }
 0x6b1   : > { %8177 = vperm.xlu1 %7810, %v8176_v53   ;;  %v14278_v29 = vmul.f32 %v8568_v44, %v8085_v55  ;;  %vm5577_vm9 = vcmp.eq.s32.totalorder %v13739_v6, 2  ;;  %v7300_v32 = vsel %vm5576_vm4, 1.0, %v16894_v35  ;;  %vm4434_vm8 = vcmp.eq.s32.totalorder %v17449_v50, 3  ;;  %v17520_v53 = vld [vmem:[#allocation19_spill] sm:$0xff] }
 0x6b2   : > { %v14281_v12 = vmul.f32 %v8569_v49, %v8084_v36  ;;  %v7301_v9 = vsel %vm5577_vm9, 1.0, %v16894_v35  ;;  %vm4435_vm12 = vcmp.eq.s32.totalorder %v17450_v51, 3  ;;  %v7214_v17 = vsel %vm4434_vm8, 1.0, %v16894_v35  ;;  %v17521_v36 = vld [vmem:[#allocation18_spill] sm:$0xff] }
 0x6b3   : > { %v8401_v4 = vpack.i.bf16 %v7301_v9, %v7300_v32  ;;  %v14291_v55 = vsel %vm4434_vm8, 3e+38, %v17520_v53  ;;  %v7215_v44 = vsel %vm4435_vm12, 1.0, %v16894_v35  ;;  %v14295_v49 = vsel %vm4435_vm12, 3e+38, %v17521_v36  ;;  %v14316_v36 = vpop.permute.xlu0 %8172 }
 0x6b4   : > { %v14302_v20 = vsel %vm5059_vm7, %v14084_v15, %v14091_v5  ;;  %v14309_v32 = vsel %vm5058_vm3, %v14079_v24, %v14100_v16  ;;  %v8186_v9 = vpack.i.bf16 %v7215_v44, %v7214_v17  ;;  %v8095_v53 = vunpack.i.h.bf16 %v13858_v59  ;;  %17522 = vst [vmem:[#allocation57_spill] sm:$0xff] %v14316_v36  ;;  %v8570_v16 = vld [vmem:[#allocation3 + $0x98] sm:$0xff]  ;;  %v8571_v44 = vld [vmem:[#allocation3 + $0x90] sm:$0xff] }
 0x6b5   : > { %8402 = vperm.xlu0 %7804, %v8401_v4   ;;  %vm5107_vm2 = vcmp.lt.f32.partialorder %v14295_v49, %v14302_v20  ;;  %vm5106_vm0 = vcmp.lt.f32.partialorder %v14291_v55, %v14309_v32  ;;  %v8094_v24 = vunpack.i.l.bf16 %v13858_v59  ;;  %vm5724_vm7 = vcmp.eq.s32.totalorder %v13578_v41, 3  ;;  %v14338_v59 = vpop.xlane.xlu1 %2067 }
 0x6b6   : > { %v14322_v15 = vsel %vm5107_vm2, 3, %v14107_v30  ;;  %v14328_v5 = vsel %vm5106_vm0, 3, %v14119_v14  ;;  %8187 = vperm.xlu1 %7810, %v8186_v9   ;;  %v4237_v4 = vmul.f32 %v8570_v16, %v8095_v53  ;;  %vm5725_vm3 = vcmp.eq.s32.totalorder %v13568_v23, 3  ;;  %17523 = vst [vmem:[#allocation142_spill] sm:$0xff] %v14338_v59  ;;  %v17524_v53 = vld [vmem:[#allocation12_spill] sm:$0xff] }
 0x6b7   : > { %v7304_v17 = vsel %vm5724_vm7, 1.0, %v16894_v35  ;;  %v1957_v30 = vcvt.f32.s32 %v13887_v47  ;;  %v4236_v36 = vmul.f32 %v8571_v44, %v8094_v24  ;;  %v7305_v18 = vsel %vm5725_vm3, 1.0, %v16894_v35  ;;  %v17525_v44 = vld [vmem:[#allocation148_spill] sm:$0xff] }
 0x6b8   : > { %vm4438_vm10 = vcmp.eq.s32.totalorder %v17463_v54, 3  ;;  %vm4439_vm14 = vcmp.eq.s32.totalorder %v17464_v11, 3  ;;  %v14341_v14 = vadd.f32 %v4237_v4, %v14121_v22  ;;  %v8411_v9 = vpack.i.bf16 %v7305_v18, %v7304_v17  ;;  %v17526_v11 = vld [vmem:[#allocation22_spill] sm:$0xff] }
 0x6b9   : > { %v14344_v16 = vadd.s32 %v17524_v53, %v1957_v30  ;;  %v7218_v23 = vsel %vm4438_vm10, 1.0, %v16894_v35  ;;  %v14348_v47 = vadd.f32 %v4236_v36, %v14123_v58  ;;  %v7219_v24 = vsel %vm4439_vm14, 1.0, %v16894_v35 }
 0x6ba   : > { %v14352_v54 = vsel %vm4438_vm10, 3e+38, %v17525_v44  ;;  %v14355_v41 = vsel %vm4439_vm14, 3e+38, %v17526_v11  ;;  %8412 = vperm.xlu0 %7804, %v8411_v9   ;;  %v14362_v22 = vsel %vm5063_vm6, %v14144_v3, %v14134_v37  ;;  %v8196_v18 = vpack.i.bf16 %v7219_v24, %v7218_v23  ;;  %v14372_v11 = vpop.permute.xlu0 %8182  ;;  %v14396_v9 = vpop.xlane.xlu1 %2053  ;;  %v17529_v44 = vld [vmem:[#allocation158_spill] sm:$0xff] }
 0x6bb   : > { %v14369_v58 = vsel %vm5062_vm1, %v14139_v21, %v14151_v26  ;;  %v8105_v36 = vunpack.i.h.bf16 %v13909_v45  ;;  %17527 = vst [vmem:[#allocation124_spill] sm:$0xff] %v14372_v11  ;;  %vm5111_vm4 = vcmp.lt.f32.partialorder %v14355_v41, %v14362_v22  ;;  %v8104_v3 = vunpack.i.l.bf16 %v13909_v45  ;;  %v8572_v21 = vld [vmem:[#allocation3 + $0xb8] sm:$0xff]  ;;  %v8573_v45 = vld [vmem:[#allocation3 + $0xb0] sm:$0xff]  ;;  %17528 = vst [vmem:[#allocation126_spill] sm:$0xff] %v14396_v9 }
 0x6bc   : > { %vm5110_vm9 = vcmp.lt.f32.partialorder %v14352_v54, %v14369_v58  ;;  %vm5728_vm6 = vcmp.eq.s32.totalorder %v13632_v61, 3  ;;  %v14384_v23 = vsel %vm5111_vm4, 3, %v14163_v38  ;;  %8197 = vperm.xlu1 %7810, %v8196_v18   ;;  %vm5729_vm1 = vcmp.eq.s32.totalorder %v13620_v46, 3 }
 0x6bd   : > { %v14390_v37 = vsel %vm5110_vm9, 3, %v14168_v62  ;;  %v4241_v26 = vmul.f32 %v8572_v21, %v8105_v36  ;;  %v4240_v4 = vmul.f32 %v8573_v45, %v8104_v3  ;;  %v7308_v17 = vsel %vm5728_vm6, 1.0, %v16894_v35  ;;  %v17530_v3 = vld [vmem:[#allocation7_spill] sm:$0xff] }
 0x6be   : > { %v7309_v30 = vsel %vm5729_vm1, 1.0, %v16894_v35  ;;  %v1943_v38 = vcvt.f32.s32 %v13931_v52  ;;  %vm4586_vm8 = vcmp.eq.s32.totalorder %v17422_v2, 4  ;;  %vm4587_vm12 = vcmp.eq.s32.totalorder %v17423_v7, 4 }
 0x6bf   : > { %v14399_v53 = vadd.f32 %v4241_v26, %v14170_v42  ;;  %v8421_v62 = vpack.i.bf16 %v7309_v30, %v7308_v17  ;;  %v14404_v24 = vadd.f32 %v4240_v4, %v14175_v33  ;;  %v7222_v36 = vsel %vm4586_vm8, 1.0, %v16894_v35  ;;  %v17531_v42 = vld [vmem:[#allocation26_spill] sm:$0xff]  ;;  %v14424_v4 = vpop.permute.xlu0 %8192 }
 0x6c0   : > { %v14407_v18 = vadd.s32 %v17529_v44, %v1943_v38  ;;  %v7223_v52 = vsel %vm4587_vm12, 1.0, %v16894_v35  ;;  %v14412_v21 = vsel %vm4586_vm8, 3e+38, %v17530_v3  ;;  %v14415_v26 = vsel %vm4587_vm12, 3e+38, %v17531_v42  ;;  %17532 = vst [vmem:[#allocation91_spill] sm:$0xff] %v14424_v4  ;;  %v14454_v44 = vpop.xlane.xlu1 %2095 }
 0x6c1   : > { %8422 = vperm.xlu0 %7804, %v8421_v62   ;;  %v14422_v33 = vsel %vm5099_vm15, %v14187_v56, %v14194_v40  ;;  %v8206_v45 = vpack.i.bf16 %v7223_v52, %v7222_v36  ;;  %v14433_v17 = vsel %vm5098_vm11, %v14183_v31, %v14201_v10  ;;  %v8115_v30 = vunpack.i.h.bf16 %v13961_v27  ;;  %v8575_v10 = vld [vmem:[#allocation3 + $0xd0] sm:$0xff]  ;;  %17533 = vst [vmem:[#allocation143_spill] sm:$0xff] %v14454_v44  ;;  %v17534_v52 = vld [vmem:[#allocation39_spill] sm:$0xff] }
 0x6c2   : > { %vm5147_vm7 = vcmp.lt.f32.partialorder %v14415_v26, %v14422_v33  ;;  %v8114_v38 = vunpack.i.l.bf16 %v13961_v27  ;;  %vm5146_vm15 = vcmp.lt.f32.partialorder %v14412_v21, %v14433_v17  ;;  %vm5732_vm3 = vcmp.eq.s32.totalorder %v13696_v19, 3  ;;  %v8574_v27 = vld [vmem:[#allocation3 + $0xd8] sm:$0xff]  ;;  %v17537_v4 = vld [vmem:[#allocation30_spill] sm:$0xff] }
 0x6c3   : > { %v14441_v56 = vsel %vm5147_vm7, 4, %v14214_v60  ;;  %8207 = vperm.xlu1 %7810, %v8206_v45   ;;  %vm5733_vm10 = vcmp.eq.s32.totalorder %v13687_v57, 3  ;;  %v14451_v31 = vsel %vm5146_vm15, 4, %v14220_v34  ;;  %v4245_v40 = vmul.f32 %v8574_v27, %v8115_v30  ;;  %v17535_v34 = vld [vmem:[#allocation118_spill] sm:$0xff]  ;;  %v14475_v59 = vpop.permute.xlu0 %8202 }
 0x6c4   : > { %v4244_v62 = vmul.f32 %v8575_v10, %v8114_v38  ;;  %v7312_v60 = vsel %vm5732_vm3, 1.0, %v16894_v35  ;;  %v7313_v36 = vsel %vm5733_vm10, 1.0, %v16894_v35  ;;  %v1985_v3 = vcvt.f32.s32 %v17534_v52  ;;  %v17536_v27 = vld [vmem:[#allocation174_spill] sm:$0xff]  ;;  %v17538_v52 = vld [vmem:[#allocation29_spill] sm:$0xff]  ;;  %17539 = vst [vmem:[#allocation153_spill] sm:$0xff] %v14475_v59 }
 0x6c5   : > { %vm4590_vm11 = vcmp.eq.s32.totalorder %v17435_v25, 4  ;;  %vm4591_vm14 = vcmp.eq.s32.totalorder %v17436_v13, 4  ;;  %v14464_v45 = vadd.f32 %v4245_v40, %v17535_v34  ;;  %v8431_v30 = vpack.i.bf16 %v7313_v36, %v7312_v60  ;;  %v2392_v36 = vld [vmem:[#allocation3 + $0xf8] sm:$0xff]  ;;  %v8576_v34 = vld [vmem:[#allocation3 + $0xf0] sm:$0xff] }
 0x6c6   : > { %v14461_v42 = vadd.f32 %v4244_v62, %v14231_v63  ;;  %v7226_v38 = vsel %vm4590_vm11, 1.0, %v16894_v35  ;;  %v1988_v10 = vadd.s32 %v17536_v27, %v1985_v3  ;;  %v7227_v44 = vsel %vm4591_vm14, 1.0, %v16894_v35  ;;  %v17540_v62 = vld [vmem:[#allocation40_spill] sm:$0xff]  ;;  %v17541_v3 = vld [vmem:[#allocation6_spill] sm:$0xff] }
 0x6c7   : > { %v14470_v9 = vsel %vm4590_vm11, 3e+38, %v17537_v4  ;;  %v14473_v11 = vsel %vm4591_vm14, 3e+38, %v17538_v52  ;;  %8432 = vperm.xlu0 %7804, %v8431_v30   ;;  %v14482_v63 = vsel %vm5103_vm5, %v14241_v43, %v14248_v8  ;;  %v8216_v40 = vpack.i.bf16 %v7227_v44, %v7226_v38  ;;  %v14511_v44 = vpop.xlane.xlu1 %2081  ;;  %v17543_v27 = vld [vmem:[#allocation180_spill] sm:$0xff] }
 0x6c8   : > { %v14489_v4 = vsel %vm5102_vm13, %v14238_v48, %v14255_v28  ;;  %v8125_v60 = vunpack.i.h.bf16 %v17540_v62  ;;  %vm2160_vm6 = vcmp.eq.s32.totalorder %v17541_v3, %v1988_v10  ;;  %vm5151_vm1 = vcmp.lt.f32.partialorder %v14473_v11, %v14482_v63  ;;  %17542 = vst [vmem:[#allocation105_spill] sm:$0xff] %v14511_v44  ;;  %v17556_v44 = vld [vmem:[#allocation84_spill] sm:$0xff] }
 0x6c9   : > { %vm5150_vm5 = vcmp.lt.f32.partialorder %v14470_v9, %v14489_v4  ;;  %v8124_v43 = vunpack.i.l.bf16 %v17540_v62  ;;  %v14502_v8 = vsel %vm5151_vm1, 4, %v14270_v0  ;;  %8217 = vperm.xlu1 %7810, %v8216_v40   ;;  %vm5736_vm13 = vcmp.eq.s32.totalorder %v13744_v39, 3 }
 0x6ca   : > { %v14508_v48 = vsel %vm5150_vm5, 4, %v14276_v1  ;;  %v4249_v28 = vmul.f32 %v8125_v60, %v2392_v36  ;;  %vm5737_vm8 = vcmp.eq.s32.totalorder %v13739_v6, 3  ;;  %v7316_v38 = vsel %vm5736_vm13, 1.0, %v16894_v35  ;;  %v17546_v60 = vld [vmem:[#allocation59_spill] sm:$0xff] }
 0x6cb   : > { %v4248_v30 = vmul.f32 %v8576_v34, %v8124_v43  ;;  %vm2157_vm12 = vcmp.eq.s32.totalorder %v17541_v3, %v14407_v18  ;;  %v7317_v1 = vsel %vm5737_vm8, 1.0, %v16894_v35  ;;  %vm2158_vm3 = vcmp.eq.s32.totalorder %v17541_v3, %v14344_v16  ;;  %v14529_v18 = vpop.permute.xlu0 %8212 }
 0x6cc   : > { %v14518_v0 = vadd.f32 %v4249_v28, %v14278_v29  ;;  %v1971_v52 = vcvt.f32.s32 %v17543_v27  ;;  %v8441_v62 = vpack.i.bf16 %v7317_v1, %v7316_v38  ;;  %vm7046_vm10 = vmpackc.low %vm2158_vm3, %vm2157_vm12  ;;  %vm4594_vm11 = vcmp.eq.s32.totalorder %v17449_v50, 4  ;;  %17544 = vst [vmem:[#allocation112_spill] sm:$0xff] %v14529_v18  ;;  %v17547_v28 = vld [vmem:[#allocation34_spill] sm:$0xff]  ;;  %v17554_v18 = vld [vmem:[#allocation163_spill] sm:$0xff] }
 0x6cd   : > { %v14525_v40 = vadd.f32 %v4248_v30, %v14281_v12  ;;  %vm4595_vm14 = vcmp.eq.s32.totalorder %v17450_v51, 4  ;;  %v17545_v29 = vmov 1.0|1.0   ;;  %v7230_v43 = vsel %vm4594_vm11, 1.0, %v16894_v35  ;;  %v17548_v12 = vld [vmem:[#allocation33_spill] sm:$0xff] }
 0x6ce   : > { %7601 = vmatprep.mubr.msk.bf16.mxu0 %vm7046_vm10, %v17545_v29  ;;  %v1974_v36 = vadd.s32 %v17546_v60, %v1971_v52  ;;  %v7231_v16 = vsel %vm4595_vm14, 1.0, %v16894_v35  ;;  %v14536_v34 = vsel %vm4594_vm11, 3e+38, %v17547_v28  ;;  %8442 = vperm.xlu0 %7804, %v8441_v62   ;;  %v14539_v30 = vsel %vm4595_vm14, 3e+38, %v17548_v12  ;;  %v17549_v52 = vld [vmem:[#allocation67_spill] sm:$0xff] }
 0x6cf   : > { %v14546_v38 = vsel %vm5107_vm2, %v14295_v49, %v14302_v20  ;;  %v8226_v1 = vpack.i.bf16 %v7231_v16, %v7230_v43  ;;  %v14553_v27 = vsel %vm5106_vm0, %v14291_v55, %v14309_v32  ;;  %v8135_v62 = vunpack.i.h.bf16 %v17549_v52  ;;  %v14561_v20 = vpop.xlane.xlu1 %2123  ;;  %v17551_v60 = vld [vmem:[#allocation21_spill] sm:$0xff]  ;;  %v8578_v12 = vld [vmem:[#allocation3 + $0x110] sm:$0xff] }
 0x6d0   : > { %vm2159_vm13 = vcmp.eq.s32.totalorder %v17541_v3, %v1974_v36  ;;  %vm5155_vm8 = vcmp.lt.f32.partialorder %v14539_v30, %v14546_v38  ;;  %vm5154_vm12 = vcmp.lt.f32.partialorder %v14536_v34, %v14553_v27  ;;  %17550 = vst [vmem:[#allocation80_spill] sm:$0xff] %v14561_v20  ;;  %v8134_v32 = vunpack.i.l.bf16 %v17549_v52  ;;  %v8577_v36 = vld [vmem:[#allocation3 + $0x118] sm:$0xff]  ;;  %v17552_v43 = vld [vmem:[#allocation117_spill] sm:$0xff]  ;;  %v14586_v52 = vpop.permute.xlu0 %8222 }
 0x6d1   : > { %vm7048_vm2 = vmpackc.low %vm2160_vm6, %vm2159_vm13  ;;  %v14569_v55 = vsel %vm5155_vm8, 4, %v14322_v15  ;;  %v14575_v49 = vsel %vm5154_vm12, 4, %v14328_v5  ;;  %8227 = vperm.xlu1 %7810, %v8226_v1   ;;  %vm5884_vm0 = vcmp.eq.s32.totalorder %v17551_v60, 4  ;;  %v4397_v10 = vmul.f32 %v8577_v36, %v8135_v62  ;;  %v17553_v28 = vld [vmem:[#allocation145_spill] sm:$0xff]  ;;  %v17555_v1 = vld [vmem:[#allocation164_spill] sm:$0xff] }
 0x6d2   : > { %vm5885_vm6 = vcmp.eq.s32.totalorder %v17552_v43, 4  ;;  %v7320_v16 = vsel %vm5884_vm0, 1.0, %v16894_v35  ;;  %v2013_v15 = vcvt.f32.s32 %v17553_v28  ;;  %7602 = vmatmul.mubr.msk.bf16.vlgmr.msra.gmra.mrb[32].mxu0 %vm7048_vm2, %v17545_v29  ;;  %v4396_v20 = vmul.f32 %v8578_v12, %v8134_v32  ;;  %v17557_v12 = vld [vmem:[#allocation38_spill] sm:$0xff] }
 0x6d3   : > { %v7321_v5 = vsel %vm5885_vm6, 1.0, %v16894_v35  ;;  %vm4598_vm3 = vcmp.eq.s32.totalorder %v17554_v18, 4  ;;  %vm4599_vm10 = vcmp.eq.s32.totalorder %v17555_v1, 4  ;;  %v14589_v62 = vadd.f32 %v4397_v10, %v14341_v14  ;;  %v17558_v1 = vld [vmem:[#allocation37_spill] sm:$0xff] }
 0x6d4   : > { %v8451_v36 = vpack.i.bf16 %v7321_v5, %v7320_v16  ;;  %v14592_v59 = vadd.s32 %v17556_v44, %v2013_v15  ;;  %v7234_v28 = vsel %vm4598_vm3, 1.0, %v16894_v35  ;;  %v14596_v43 = vadd.f32 %v4396_v20, %v14348_v47  ;;  %v17559_v20 = vld [vmem:[#allocation87_spill] sm:$0xff]  ;;  %v14620_v16 = vpop.xlane.xlu1 %2109  ;;  %v14644_v5 = vld [vmem:[#allocation3 + $0x130] sm:$0xff] }
 0x6d5   : > { %v7235_v32 = vsel %vm4599_vm10, 1.0, %v16894_v35  ;;  %v14600_v18 = vsel %vm4598_vm3, 3e+38, %v17557_v12  ;;  %v14603_v60 = vsel %vm4599_vm10, 3e+38, %v17558_v1  ;;  %v14610_v14 = vsel %vm5111_vm4, %v14355_v41, %v14362_v22  ;;  %17561 = vst [vmem:[#allocation95_spill] sm:$0xff] %v14644_v5  ;;  %v14650_v12 = vpop.permute.xlu0 %8232 }
 0x6d6   : > { %8452 = vperm.xlu0 %7804, %v8451_v36   ;;  %v8236_v44 = vpack.i.bf16 %v7235_v32, %v7234_v28  ;;  %v14617_v47 = vsel %vm5110_vm9, %v14352_v54, %v14369_v58  ;;  %v8145_v10 = vunpack.i.h.bf16 %v17559_v20  ;;  %vm5159_vm11 = vcmp.lt.f32.partialorder %v14603_v60, %v14610_v14  ;;  %v14640_v58 = vld [vmem:[#allocation3 + $0x138] sm:$0xff]  ;;  %17563 = vst [vmem:[#allocation128_spill] sm:$0xff] %v14650_v12 }
 0x6d7   : > { %vm5158_vm14 = vcmp.lt.f32.partialorder %v14600_v18, %v14617_v47  ;;  %v8144_v41 = vunpack.i.l.bf16 %v17559_v20  ;;  %vm5888_vm4 = vcmp.eq.s32.totalorder %v13632_v61, 4  ;;  %v14632_v54 = vsel %vm5159_vm11, 4, %v14384_v23  ;;  %17560 = vst [vmem:[#allocation155_spill] sm:$0xff] %v14640_v58  ;;  %v17562_v28 = vld [vmem:[#allocation111_spill] sm:$0xff] }
 0x6d8   : > { %v14638_v22 = vsel %vm5158_vm14, 4, %v14390_v37  ;;  %8237 = vperm.xlu1 %7810, %v8236_v44   ;;  %v4401_v15 = vmul.f32 %v14640_v58, %v8145_v10  ;;  %vm5889_vm9 = vcmp.eq.s32.totalorder %v13620_v46, 4  ;;  %v7324_v23 = vsel %vm5888_vm4, 1.0, %v16894_v35  ;;  %v17564_v10 = vld [vmem:[#allocation61_spill] sm:$0xff] }
 0x6d9   : > { %v4400_v1 = vmul.f32 %v14644_v5, %v8144_v41  ;;  %v7325_v36 = vsel %vm5889_vm9, 1.0, %v16894_v35  ;;  %v1999_v32 = vcvt.f32.s32 %v17562_v28  ;;  %vm4746_vm13 = vcmp.eq.s32.totalorder %v17422_v2, 5  ;;  %v17565_v58 = vld [vmem:[#allocation109_spill] sm:$0xff] }
 0x6da   : > { %v14653_v37 = vadd.f32 %v4401_v15, %v14399_v53  ;;  %v8461_v44 = vpack.i.bf16 %v7325_v36, %v7324_v23  ;;  %vm4747_vm2 = vcmp.eq.s32.totalorder %v17423_v7, 5  ;;  %v7238_v5 = vsel %vm4746_vm13, 1.0, %v16894_v35  ;;  %v17566_v53 = vld [vmem:[#allocation103_spill] sm:$0xff] }
 0x6db   : > { %v14658_v20 = vadd.f32 %v4400_v1, %v14404_v24  ;;  %v14661_v41 = vadd.s32 %v17564_v10, %v1999_v32  ;;  %v7239_v28 = vsel %vm4747_vm2, 1.0, %v16894_v35  ;;  %v4986_v12 = vsel %vm4746_vm13, 3e+38, %v17565_v58  ;;  %v14672_v24 = vpop.xlane.xlu1 %2151  ;;  %v17567_v23 = vld [vmem:[#allocation99_spill] sm:$0xff] }
 0x6dc   : > { %8462 = vperm.xlu0 %7804, %v8461_v44   ;;  %v4987_v15 = vsel %vm4747_vm2, 3e+38, %v17566_v53  ;;  %v5163_v2 = vsel %vm5147_vm7, %v14415_v26, %v14422_v33  ;;  %v8246_v7 = vpack.i.bf16 %v7239_v28, %v7238_v5  ;;  %v5162_v1 = vsel %vm5146_vm15, %v14412_v21, %v14433_v17  ;;  %v14689_v5 = vld [vmem:[#allocation3 + $0x158] sm:$0xff]  ;;  %v14692_v17 = vld [vmem:[#allocation3 + $0x150] sm:$0xff] }
 0x6dd   : > { %vm5195_vm0 = vcmp.lt.f32.partialorder %v4987_v15, %v5163_v2  ;;  %v8155_v58 = vunpack.i.h.bf16 %v17567_v23  ;;  %v8154_v36 = vunpack.i.l.bf16 %v17567_v23  ;;  %vm5194_vm6 = vcmp.lt.f32.partialorder %v4986_v12, %v5162_v1 }
 0x6de   : > { %v5211_v32 = vsel %vm5195_vm0, %v4987_v15, %v5163_v2  ;;  %v14682_v44 = vsel %vm5195_vm0, 5, %v14441_v56  ;;  %8247 = vperm.xlu1 %7810, %v8246_v7   ;;  %vm5892_vm7 = vcmp.eq.s32.totalorder %v13696_v19, 4  ;;  %vm17568_vm3 = vcmask 7168   ;;  %v14695_v56 = vpop.permute.xlu0 %8242 }
 0x6df   : > { %6269 = vst.msk [vmem:[#allocation2 + $0x108] sm:$0xff] %vm17568_vm3, %v5211_v32  ;;  %v5210_v26 = vsel %vm5194_vm6, %v4986_v12, %v5162_v1  ;;  %v14687_v33 = vsel %vm5194_vm6, 5, %v14451_v31  ;;  %v4405_v21 = vmul.f32 %v14689_v5, %v8155_v58  ;;  %v4404_v10 = vmul.f32 %v14692_v17, %v8154_v36  ;;  %vm17569_vm15 = vmmov %vm17568_vm3  ;;  %v17570_v12 = vld [vmem:[#allocation101_spill] sm:$0xff]  ;;  %v17571_v1 = vld [vmem:[#allocation86_spill] sm:$0xff]  ;;  %v14713_v32 = vpop.xlane.xlu1 %2137 }
 0x6e0   : > { %6268 = vst.msk [vmem:[#allocation2 + $0x100] sm:$0xff] %vm17569_vm15, %v5210_v26  ;;  %vm5893_vm10 = vcmp.eq.s32.totalorder %v13687_v57, 4  ;;  %v7328_v28 = vsel %vm5892_vm7, 1.0, %v16894_v35  ;;  %v2041_v53 = vcvt.f32.s32 %v17570_v12  ;;  %vm4750_vm4 = vcmp.eq.s32.totalorder %v17435_v25, 5  ;;  %v17572_v25 = vld [vmem:[#allocation123_spill] sm:$0xff]  ;;  %vm17576_vm0 = vmmov %vm17568_vm3 }
 0x6e1   : > { %v14703_v31 = vadd.f32 %v4404_v10, %v14461_v42  ;;  %v14706_v15 = vadd.f32 %v4405_v21, %v14464_v45  ;;  %v7329_v2 = vsel %vm5893_vm10, 1.0, %v16894_v35  ;;  %vm4751_vm9 = vcmp.eq.s32.totalorder %v17436_v13, 5  ;;  %v17573_v42 = vld [vmem:[#allocation122_spill] sm:$0xff]  ;;  %vm17577_vm6 = vmmov %vm17576_vm0 }
 0x6e2   : > { %v8471_v7 = vpack.i.bf16 %v7329_v2, %v7328_v28  ;;  %v2044_v23 = vadd.s32 %v17571_v1, %v2041_v53  ;;  %v7242_v58 = vsel %vm4750_vm4, 1.0, %v16894_v35  ;;  %v7243_v36 = vsel %vm4751_vm9, 1.0, %v16894_v35  ;;  %v17574_v28 = vld [vmem:[#allocation102_spill] sm:$0xff]  ;;  %v14729_v53 = vld [vmem:[#allocation3 + $0x178] sm:$0xff] }
 0x6e3   : > { %v4990_v26 = vsel %vm4750_vm4, 3e+38, %v17572_v25  ;;  %v4991_v10 = vsel %vm4751_vm9, 3e+38, %v17573_v42  ;;  %v5167_v45 = vsel %vm5151_vm1, %v14473_v11, %v14482_v63  ;;  %v8256_v13 = vpack.i.bf16 %v7243_v36, %v7242_v58  ;;  %v14735_v63 = vpop.permute.xlu0 %8252 }
 0x6e4   : > { %8472 = vperm.xlu0 %7804, %v8471_v7   ;;  %vm2164_vm13 = vcmp.eq.s32.totalorder %v17541_v3, %v2044_v23  ;;  %vm5199_vm2 = vcmp.lt.f32.partialorder %v4991_v10, %v5167_v45  ;;  %v5166_v21 = vsel %vm5150_vm5, %v14470_v9, %v14489_v4  ;;  %v8165_v12 = vunpack.i.h.bf16 %v17574_v28  ;;  %17575 = vst [vmem:[#allocation125_spill] sm:$0xff] %v14735_v63  ;;  %v14744_v4 = vld [vmem:[#allocation3 + $0x170] sm:$0xff]  ;;  %v17589_v23 = vld [vmem:[#allocation117_spill] sm:$0xff] }
 0x6e5   : > { %v5215_v2 = vsel %vm5199_vm2, %v4991_v10, %v5167_v45  ;;  %v14732_v1 = vsel %vm5199_vm2, 5, %v14502_v8  ;;  %vm5198_vm1 = vcmp.lt.f32.partialorder %v4990_v26, %v5166_v21  ;;  %8257 = vperm.xlu1 %7810, %v8256_v13   ;;  %v8164_v11 = vunpack.i.l.bf16 %v17574_v28  ;;  %v14758_v10 = vpop.permute.xlu1 %8037  ;;  %v17581_v28 = vld [vmem:[#allocation135_spill] sm:$0xff] }
 0x6e6   : > { %6273 = vst.msk [vmem:[#allocation2 + $0x128] sm:$0xff] %vm17576_vm0, %v5215_v2  ;;  %v5214_v7 = vsel %vm5198_vm1, %v4990_v26, %v5166_v21  ;;  %v14739_v58 = vsel %vm5198_vm1, 5, %v14508_v48  ;;  %v4409_v9 = vmul.f32 %v8165_v12, %v14729_v53  ;;  %vm5896_vm5 = vcmp.eq.s32.totalorder %v13744_v39, 4  ;;  %v17578_v26 = vld [vmem:[#allocation58_spill] sm:$0xff]  ;;  %17579 = vst [vmem:[#allocation156_spill] sm:$0xff] %v14758_v10  ;;  %v17582_v2 = vld [vmem:[#allocation131_spill] sm:$0xff] }
 0x6e7   : > { %6272 = vst.msk [vmem:[#allocation2 + $0x120] sm:$0xff] %vm17577_vm6, %v5214_v7  ;;  %v4408_v8 = vmul.f32 %v14744_v4, %v8164_v11  ;;  %vm5897_vm7 = vcmp.eq.s32.totalorder %v13739_v6, 4  ;;  %v7332_v36 = vsel %vm5896_vm5, 1.0, %v16894_v35  ;;  %vm2161_vm3 = vcmp.eq.s32.totalorder %v17541_v3, %v14661_v41  ;;  %v14781_v7 = vpop.permute.xlu0 %8262 }
 0x6e8   : > { %v14752_v48 = vadd.f32 %v4409_v9, %v14518_v0  ;;  %v7333_v25 = vsel %vm5897_vm7, 1.0, %v16894_v35  ;;  %vm2162_vm15 = vcmp.eq.s32.totalorder %v17541_v3, %v14592_v59  ;;  %v2027_v42 = vcvt.f32.s32 %v17578_v26  ;;  %v17580_v0 = vld [vmem:[#allocation141_spill] sm:$0xff]  ;;  %17583 = vst [vmem:[#allocation159_spill] sm:$0xff] %v14781_v7 }
 0x6e9   : > { %v14761_v45 = vadd.f32 %v4408_v8, %v14525_v40  ;;  %v8481_v13 = vpack.i.bf16 %v7333_v25, %v7332_v36  ;;  %vm7050_vm10 = vmpackc.low %vm2162_vm15, %vm2161_vm3  ;;  %vm4754_vm4 = vcmp.eq.s32.totalorder %v17449_v50, 5  ;;  %vm4755_vm9 = vcmp.eq.s32.totalorder %v17450_v51, 5  ;;  %v17584_v9 = vld [vmem:[#allocation57_spill] sm:$0xff] }
 0x6ea   : > { %7605 = vmatprep.mubr.msk.bf16.mxu1 %vm7050_vm10, %v17545_v29  ;;  %v2030_v41 = vadd.s32 %v17580_v0, %v2027_v42  ;;  %v7246_v21 = vsel %vm4754_vm4, 1.0, %v16894_v35  ;;  %v7247_v59 = vsel %vm4755_vm9, 1.0, %v16894_v35  ;;  %v4994_v12 = vsel %vm4754_vm4, 3e+38, %v17581_v28  ;;  %v17588_v42 = vld [vmem:[#allocation21_spill] sm:$0xff] }
 0x6eb   : > { %8482 = vperm.xlu0 %7804, %v8481_v13   ;;  %v4995_v40 = vsel %vm4755_vm9, 3e+38, %v17582_v2  ;;  %v5171_v50 = vsel %vm5155_vm8, %v14539_v30, %v14546_v38  ;;  %v8266_v51 = vpack.i.bf16 %v7247_v59, %v7246_v21  ;;  %v5170_v11 = vsel %vm5154_vm12, %v14536_v34, %v14553_v27  ;;  %vm17585_vm8 = vmmov %vm17577_vm6  ;;  %v17587_v34 = vld [vmem:[#allocation43_spill] sm:$0xff]  ;;  %v17592_v59 = vld [vmem:[#allocation41_spill] sm:$0xff] }
 0x6ec   : > { %vm2163_vm2 = vcmp.eq.s32.totalorder %v17541_v3, %v2030_v41  ;;  %vm5203_vm1 = vcmp.lt.f32.partialorder %v4995_v40, %v5171_v50  ;;  %vm5202_vm0 = vcmp.lt.f32.partialorder %v4994_v12, %v5170_v11  ;;  %v8175_v8 = vunpack.i.h.bf16 %v17584_v9  ;;  %vm17586_vm12 = vmmov %vm17577_vm6  ;;  %v17590_v13 = vld [vmem:[#allocation115_spill] sm:$0xff] }
 0x6ed   : > { %vm7052_vm5 = vmpackc.low %vm2164_vm13, %vm2163_vm2  ;;  %v5219_v36 = vsel %vm5203_vm1, %v4995_v40, %v5171_v50  ;;  %v14788_v30 = vsel %vm5203_vm1, 5, %v14569_v55  ;;  %v5218_v38 = vsel %vm5202_vm0, %v4994_v12, %v5170_v11  ;;  %v14791_v25 = vsel %vm5202_vm0, 5, %v14575_v49  ;;  %8267 = vperm.xlu1 %7810, %v8266_v51   ;;  %v14800_v55 = vpop.permute.xlu1 %8047  ;;  %v17591_v21 = vld [vmem:[#allocation163_spill] sm:$0xff]  ;;  %v17593_v40 = vld [vmem:[#allocation164_spill] sm:$0xff] }
 0x6ee   : > { %6277 = vst.msk [vmem:[#allocation2 + $0x148] sm:$0xff] %vm17585_vm8, %v5219_v36  ;;  %v4557_v27 = vmul.f32 %v8175_v8, %v17587_v34  ;;  %v8174_v26 = vunpack.i.l.bf16 %v17584_v9  ;;  %vm6044_vm6 = vcmp.eq.s32.totalorder %v17588_v42, 5  ;;  %vm6045_vm13 = vcmp.eq.s32.totalorder %v17589_v23, 5  ;;  %7606 = vmatmul.mubr.msk.bf16.vlgmr.msra.gmra.mrb[16].mxu1 %vm7052_vm5, %v17545_v29  ;;  %v17594_v50 = vld [vmem:[#allocation142_spill] sm:$0xff]  ;;  %v17595_v8 = vld [vmem:[#allocation136_spill] sm:$0xff]  ;;  %vm17599_vm4 = vmmov %vm17585_vm8 }
 0x6ef   : > { %6276 = vst.msk [vmem:[#allocation2 + $0x140] sm:$0xff] %vm17586_vm12, %v5218_v38  ;;  %v7336_v0 = vsel %vm6044_vm6, 1.0, %v16894_v35  ;;  %v7337_v41 = vsel %vm6045_vm13, 1.0, %v16894_v35  ;;  %vm4758_vm7 = vcmp.eq.s32.totalorder %v17591_v21, 5  ;;  %vm4759_vm3 = vcmp.eq.s32.totalorder %v17593_v40, 5  ;;  %v14815_v38 = vpop.permute.xlu0 %8272  ;;  %v17618_v49 = vld [vmem:[#allocation139_spill] sm:$0xff] }
 0x6f0   : > { %v4556_v28 = vmul.f32 %v8174_v26, %v17592_v59  ;;  %v14808_v12 = vadd.f32 %v4557_v27, %v14589_v62  ;;  %v8491_v2 = vpack.i.bf16 %v7337_v41, %v7336_v0  ;;  %v2069_v51 = vcvt.f32.s32 %v17594_v50  ;;  %17596 = vst [vmem:[#allocation97_spill] sm:$0xff] %v14815_v38  ;;  %v17597_v26 = vld [vmem:[#allocation76_spill] sm:$0xff]  ;;  %v17601_v50 = vld [vmem:[#allocation45_spill] sm:$0xff] }
 0x6f1   : > { %v7250_v11 = vsel %vm4758_vm7, 1.0, %v16894_v35  ;;  %v7251_v9 = vsel %vm4759_vm3, 1.0, %v16894_v35  ;;  %v4998_v36 = vsel %vm4758_vm7, 3e+38, %v17595_v8  ;;  %v4999_v62 = vsel %vm4759_vm3, 3e+38, %v17597_v26 }
 0x6f2   : > { %v14818_v42 = vadd.f32 %v4556_v28, %v14596_v43  ;;  %8492 = vperm.xlu0 %7804, %v8491_v2   ;;  %v5175_v27 = vsel %vm5159_vm11, %v14603_v60, %v14610_v14  ;;  %v8276_v23 = vpack.i.bf16 %v7251_v9, %v7250_v11  ;;  %v5174_v0 = vsel %vm5158_vm14, %v14600_v18, %v14617_v47  ;;  %v17598_v41 = vld [vmem:[#allocation124_spill] sm:$0xff]  ;;  %v14837_v60 = vpop.permute.xlu1 %8057  ;;  %v17600_v18 = vld [vmem:[#allocation47_spill] sm:$0xff]  ;;  %vm17602_vm14 = vmmov %vm17599_vm4 }
 0x6f3   : > { %vm5207_vm15 = vcmp.lt.f32.partialorder %v4999_v62, %v5175_v27  ;;  %v8185_v43 = vunpack.i.h.bf16 %v17598_v41  ;;  %v8184_v21 = vunpack.i.l.bf16 %v17598_v41  ;;  %vm5206_vm10 = vcmp.lt.f32.partialorder %v4998_v36, %v5174_v0  ;;  %v17603_v9 = vld [vmem:[#allocation126_spill] sm:$0xff]  ;;  %v17619_v38 = vld [vmem:[#allocation137_spill] sm:$0xff] }
 0x6f4   : > { %v5223_v28 = vsel %vm5207_vm15, %v4999_v62, %v5175_v27  ;;  %v14834_v2 = vsel %vm5207_vm15, 5, %v14632_v54  ;;  %8277 = vperm.xlu1 %7810, %v8276_v23   ;;  %vm6048_vm11 = vcmp.eq.s32.totalorder %v13632_v61, 5  ;;  %v5222_v14 = vsel %vm5206_vm10, %v4998_v36, %v5174_v0  ;;  %v17605_v62 = vld [vmem:[#allocation68_spill] sm:$0xff] }
 0x6f5   : > { %6281 = vst.msk [vmem:[#allocation2 + $0x168] sm:$0xff] %vm17599_vm4, %v5223_v28  ;;  %v14841_v40 = vsel %vm5206_vm10, 5, %v14638_v22  ;;  %v4561_v47 = vmul.f32 %v8185_v43, %v17600_v18  ;;  %v4560_v11 = vmul.f32 %v8184_v21, %v17601_v50  ;;  %vm6049_vm9 = vcmp.eq.s32.totalorder %v13620_v46, 5  ;;  %v14858_v26 = vpop.permute.xlu0 %8282  ;;  %v17606_v43 = vld [vmem:[#allocation91_spill] sm:$0xff] }
 0x6f6   : > { %6280 = vst.msk [vmem:[#allocation2 + $0x160] sm:$0xff] %vm17602_vm14, %v5222_v14  ;;  %v7340_v54 = vsel %vm6048_vm11, 1.0, %v16894_v35  ;;  %v2055_v61 = vcvt.f32.s32 %v17603_v9  ;;  %vm5242_vm2 = vcmp.eq.s32.totalorder %v14687_v33, 0  ;;  %v7341_v36 = vsel %vm6049_vm9, 1.0, %v16894_v35  ;;  %17604 = vst [vmem:[#allocation5_spill] sm:$0xff] %v14858_v26 }
 0x6f7   : > { %v14851_v8 = vadd.f32 %v4560_v11, %v14658_v20  ;;  %v14854_v22 = vadd.f32 %v4561_v47, %v14653_v37  ;;  %vm5243_vm1 = vcmp.eq.s32.totalorder %v14682_v44, 0  ;;  %v2072_v46 = vadd.s32 %v17605_v62, %v2069_v51  ;;  %v17607_v37 = vld [vmem:[#allocation89_spill] sm:$0xff]  ;;  %v17608_v47 = vld [vmem:[#allocation51_spill] sm:$0xff] }
 0x6f8   : > { %v8501_v27 = vpack.i.bf16 %v7341_v36, %v7340_v54  ;;  %v7254_v23 = vsel %vm5242_vm2, 1.0, %v16894_v35  ;;  %v7255_v0 = vsel %vm5243_vm1, 1.0, %v16894_v35  ;;  %v8195_v20 = vunpack.i.h.bf16 %v17606_v43  ;;  %v17609_v54 = vld [vmem:[#allocation49_spill] sm:$0xff]  ;;  %v17610_v62 = vld [vmem:[#allocation143_spill] sm:$0xff] }
 0x6f9   : > { %v8286_v41 = vpack.i.bf16 %v7255_v0, %v7254_v23  ;;  %v8194_v21 = vunpack.i.l.bf16 %v17606_v43  ;;  %vm6052_vm0 = vcmp.eq.s32.totalorder %v13696_v19, 5  ;;  %v2058_v28 = vadd.s32 %v17607_v37, %v2055_v61  ;;  %v17611_v43 = vld [vmem:[#allocation153_spill] sm:$0xff] }
 0x6fa   : > { %8502 = vperm.xlu0 %7804, %v8501_v27   ;;  %vm6053_vm5 = vcmp.eq.s32.totalorder %v13687_v57, 5  ;;  %v7344_v14 = vsel %vm6052_vm0, 1.0, %v16894_v35  ;;  %vm5246_vm8 = vcmp.eq.s32.totalorder %v14739_v58, 0  ;;  %v14870_v51 = vpop.permute.xlu1 %8067  ;;  %v4565_v11 = vmul.f32 %v8195_v20, %v17608_v47  ;;  %v15228_v47 = vld [vmem:[#allocation3 + $0xe8] sm:$0xff] }
 0x6fb   : > { %8287 = vperm.xlu1 %7810, %v8286_v41   ;;  %v4564_v9 = vmul.f32 %v8194_v21, %v17609_v54  ;;  %v7345_v36 = vsel %vm6053_vm5, 1.0, %v16894_v35  ;;  %vm5247_vm12 = vcmp.eq.s32.totalorder %v14732_v1, 0  ;;  %v2097_v61 = vcvt.f32.s32 %v17610_v62 }
 0x6fc   : > { %v8511_v19 = vpack.i.bf16 %v7345_v36, %v7344_v14  ;;  %v7258_v57 = vsel %vm5246_vm8, 1.0, %v16894_v35  ;;  %v7259_v27 = vsel %vm5247_vm12, 1.0, %v16894_v35  ;;  %v14883_v0 = vadd.f32 %v4565_v11, %v14706_v15  ;;  %v17613_v36 = vld [vmem:[#allocation53_spill] sm:$0xff] }
 0x6fd   : > { %v14880_v23 = vadd.f32 %v4564_v9, %v14703_v31  ;;  %v8296_v41 = vpack.i.bf16 %v7259_v27, %v7258_v57  ;;  %v8205_v20 = vunpack.i.h.bf16 %v17611_v43  ;;  %v14886_v21 = vpop.permute.xlu0 %8292  ;;  %v8204_v37 = vunpack.i.l.bf16 %v17611_v43  ;;  %v17612_v31 = vld [vmem:[#allocation55_spill] sm:$0xff] }
 0x6fe   : > { %8512 = vperm.xlu0 %7804, %v8511_v19   ;;  %vm6056_vm6 = vcmp.eq.s32.totalorder %v13744_v39, 5  ;;  %vm6057_vm13 = vcmp.eq.s32.totalorder %v13739_v6, 5  ;;  %vm2165_vm7 = vcmp.eq.s32.totalorder %v17541_v3, %v2058_v28  ;;  %vm2166_vm3 = vcmp.eq.s32.totalorder %v17541_v3, %v2072_v46  ;;  %v17614_v39 = vld [vmem:[#allocation105_spill] sm:$0xff]  ;;  %v17615_v46 = vld [vmem:[#allocation112_spill] sm:$0xff] }
 0x6ff   : > { %8297 = vperm.xlu1 %7810, %v8296_v41   ;;  %v4569_v14 = vmul.f32 %v8205_v20, %v17612_v31  ;;  %v7348_v15 = vsel %vm6056_vm6, 1.0, %v16894_v35  ;;  %v7349_v11 = vsel %vm6057_vm13, 1.0, %v16894_v35  ;;  %v14896_v9 = vpop.permute.xlu1 %8077  ;;  %v4568_v19 = vmul.f32 %v8204_v37, %v17613_v36  ;;  %vm7054_vm15 = vmpackc.low %vm2166_vm3, %vm2165_vm7  ;;  %v17616_v20 = vld [vmem:[#allocation88_spill] sm:$0xff] }
 0x700   : > { %v8521_v62 = vpack.i.bf16 %v7349_v11, %v7348_v15  ;;  %v2083_v57 = vcvt.f32.s32 %v17614_v39  ;;  %vm5250_vm10 = vcmp.eq.s32.totalorder %v14791_v25, 0  ;;  %7609 = vmatprep.mubr.msk.bf16.mxu1 %vm7054_vm15, %v17545_v29  ;;  %vm5251_vm11 = vcmp.eq.s32.totalorder %v14788_v30, 0 }
 0x701   : > { %v14902_v6 = vadd.f32 %v4569_v14, %v14752_v48  ;;  %v7262_v28 = vsel %vm5250_vm10, 1.0, %v16894_v35  ;;  %v8215_v27 = vunpack.i.h.bf16 %v17615_v46  ;;  %v14908_v41 = vpop.permute.xlu0 %8302  ;;  %v14911_v43 = vadd.f32 %v4568_v19, %v14761_v45  ;;  %v17617_v14 = vld [vmem:[#allocation90_spill] sm:$0xff] }
 0x702   : > { %8522 = vperm.xlu0 %7804, %v8521_v62   ;;  %v2086_v37 = vadd.s32 %v17616_v20, %v2083_v57  ;;  %v7263_v15 = vsel %vm5251_vm11, 1.0, %v16894_v35  ;;  %v8214_v48 = vunpack.i.l.bf16 %v17615_v46  ;;  %v2100_v11 = vadd.s32 %v17617_v14, %v2097_v61  ;;  %v17621_v61 = vld [vmem:[#allocation80_spill] sm:$0xff] }
 0x703   : > { %v8306_v39 = vpack.i.bf16 %v7263_v15, %v7262_v28  ;;  %v4717_v26 = vmul.f32 %v8215_v27, %v17618_v49  ;;  %vm5254_vm4 = vcmp.eq.s32.totalorder %v14841_v40, 0  ;;  %v14919_v10 = vpop.permute.xlu1 %8087  ;;  %vm5255_vm14 = vcmp.eq.s32.totalorder %v14834_v2, 0  ;;  %v17623_v15 = vld [vmem:[#allocation146_spill] sm:$0xff] }
 0x704   : > { %v4716_v7 = vmul.f32 %v8214_v48, %v17619_v38  ;;  %v7266_v45 = vsel %vm5254_vm4, 1.0, %v16894_v35  ;;  %v8225_v19 = vunpack.i.h.bf16 %v14586_v52  ;;  %v2125_v57 = vcvt.f32.s32 %v17621_v61 }
 0x705   : > { %8307 = vperm.xlu1 %7810, %v8306_v39   ;;  %v14926_v62 = vadd.f32 %v4717_v26, %v14808_v12  ;;  %v7267_v28 = vsel %vm5255_vm14, 1.0, %v16894_v35  ;;  %v8224_v46 = vunpack.i.l.bf16 %v14586_v52  ;;  %vm2167_vm9 = vcmp.eq.s32.totalorder %v17541_v3, %v2086_v37  ;;  %v17624_v39 = vld [vmem:[#allocation14_spill] sm:$0xff] }
 0x706   : > { %v14932_v27 = vadd.f32 %v4716_v7, %v14818_v42  ;;  %v8316_v20 = vpack.i.bf16 %v7267_v28, %v7266_v45  ;;  %v4721_v48 = vmul.f32 %v8225_v19, %v17623_v15  ;;  %v14936_v14 = vpop.permute.xlu0 %8312  ;;  %vm2168_vm2 = vcmp.eq.s32.totalorder %v17541_v3, %v2100_v11  ;;  %v17626_v42 = vld [vmem:[#allocation128_spill] sm:$0xff]  ;;  %v17627_v45 = vld [vmem:[#allocation173_spill] sm:$0xff] }
 0x707   : > { %17620 = vst [vmem:[#allocation4_spill] sm:$0xff] %v14926_v62  ;;  %v4720_v63 = vmul.f32 %v8224_v46, %v17624_v39  ;;  %v2111_v12 = vcvt.f32.s32 %v14620_v16  ;;  %vm5402_vm1 = vcmp.eq.s32.totalorder %v14687_v33, 1  ;;  %vm7056_vm0 = vmpackc.low %vm2168_vm2, %vm2167_vm9  ;;  %vm5403_vm5 = vcmp.eq.s32.totalorder %v14682_v44, 1  ;;  %v17629_v16 = vld [vmem:[#allocation93_spill] sm:$0xff]  ;;  %v17630_v46 = vld [vmem:[#allocation151_spill] sm:$0xff] }
 0x708   : > { %17622 = vst [vmem:[#allocation110_spill] sm:$0xff] %v14932_v27  ;;  %v14943_v52 = vadd.f32 %v4721_v48, %v14854_v22  ;;  %v7270_v7 = vsel %vm5402_vm1, 1.0, %v16894_v35  ;;  %v8235_v26 = vunpack.i.h.bf16 %v17626_v42  ;;  %v14948_v37 = vpop.permute.xlu1 %8097  ;;  %v2128_v19 = vadd.s32 %v17627_v45, %v2125_v57  ;;  %7610 = vmatmul.mubr.msk.bf16.gmra.mrb[20].mxu1 %vm7056_vm0, %v17545_v29  ;;  %v17631_v57 = vld [vmem:[#allocation149_spill] sm:$0xff]  ;;  %v17634_v45 = vld [vmem:[#allocation179_spill] sm:$0xff] }
 0x709   : > { %8317 = vperm.xlu1 %7810, %v8316_v20   ;;  %v14952_v11 = vadd.f32 %v4720_v63, %v14851_v8  ;;  %v2114_v22 = vadd.s32 %v17629_v16, %v2111_v12  ;;  %v8234_v61 = vunpack.i.l.bf16 %v17626_v42  ;;  %v7271_v28 = vsel %vm5403_vm5, 1.0, %v16894_v35 }
 0x70a   : > { %17625 = vst [vmem:[#allocation104_spill] sm:$0xff] %v14943_v52  ;;  %v4725_v48 = vmul.f32 %v8235_v26, %v17630_v46  ;;  %v2153_v52 = vcvt.f32.s32 %v14672_v24  ;;  %vm5406_vm8 = vcmp.eq.s32.totalorder %v14739_v58, 1  ;;  %v8326_v62 = vpack.i.bf16 %v7271_v28, %v7270_v7 }
 0x70b   : > { %17628 = vst [vmem:[#allocation100_spill] sm:$0xff] %v14952_v11  ;;  %v4724_v20 = vmul.f32 %v8234_v61, %v17631_v57  ;;  %vm5407_vm12 = vcmp.eq.s32.totalorder %v14732_v1, 1  ;;  %v8245_v63 = vunpack.i.h.bf16 %v14695_v56  ;;  %v14964_v8 = vpop.permute.xlu0 %8322  ;;  %v7984_v12 = vunpack.i.l.bf16 %v17590_v13  ;;  %v17635_v61 = vld [vmem:[#allocation161_spill] sm:$0xff] }
 0x70c   : > { %v14968_v42 = vadd.f32 %v4725_v48, %v14883_v0  ;;  %v7274_v26 = vsel %vm5406_vm8, 1.0, %v16894_v35  ;;  %v8244_v24 = vunpack.i.l.bf16 %v14695_v56  ;;  %v2156_v16 = vadd.s32 %v17634_v45, %v2153_v52  ;;  %v14978_v11 = vpop.permute.xlu1 %8107  ;;  %v17636_v0 = vld [vmem:[#allocation157_spill] sm:$0xff]  ;;  %v17638_v52 = vld [vmem:[#allocation24_spill] sm:$0xff] }
 0x70d   : > { %8327 = vperm.xlu1 %7810, %v8326_v62   ;;  %v14973_v7 = vadd.f32 %v4724_v20, %v14880_v23  ;;  %v4729_v28 = vmul.f32 %v8245_v63, %v17635_v61  ;;  %vm2169_vm6 = vcmp.eq.s32.totalorder %v17541_v3, %v2114_v22  ;;  %v7275_v27 = vsel %vm5407_vm12, 1.0, %v16894_v35  ;;  %v17639_v22 = vld [vmem:[#allocation85_spill] sm:$0xff]  ;;  %v15054_v61 = vld [vmem:[#allocation3] sm:$0xff] }
 0x70e   : > { %17632 = vst [vmem:[#allocation65_spill] sm:$0xff] %v14968_v42  ;;  %v4728_v48 = vmul.f32 %v8244_v24, %v17636_v0  ;;  %vm2170_vm13 = vcmp.eq.s32.totalorder %v17541_v3, %v2128_v19  ;;  %vm5410_vm7 = vcmp.eq.s32.totalorder %v14791_v25, 1  ;;  %v8336_v56 = vpack.i.bf16 %v7275_v27, %v7274_v26  ;;  %v17643_v19 = vld [vmem:[#allocation107_spill] sm:$0xff]  ;;  %17654 = vst [vmem:[#allocation134_spill] sm:$0xff] %v15054_v61  ;;  %v15088_v63 = vld [vmem:[#allocation3 + $0x40] sm:$0xff] }
 0x70f   : > { %17633 = vst [vmem:[#allocation63_spill] sm:$0xff] %v14973_v7  ;;  %v14985_v23 = vadd.f32 %v4729_v28, %v14902_v6  ;;  %vm7058_vm3 = vmpackc.low %vm2170_vm13, %vm2169_vm6  ;;  %vm5411_vm15 = vcmp.eq.s32.totalorder %v14788_v30, 1  ;;  %v2139_v62 = vcvt.f32.s32 %v14713_v32  ;;  %v14991_v20 = vadd.f32 %v17639_v22, %v17638_v52  ;;  %v14999_v6 = vpop.permute.xlu0 %8332  ;;  %v17648_v22 = vld [vmem:[#allocation96_spill] sm:$0xff] }
 0x710   : > { %v14995_v24 = vadd.f32 %v4728_v48, %v14911_v43  ;;  %7613 = vmatprep.mubr.msk.bf16.mxu1 %vm7058_vm3, %v17545_v29  ;;  %v7278_v27 = vsel %vm5410_vm7, 1.0, %v16894_v35  ;;  %v17644_v26 = vunpack.i.h.bf16 %v17643_v19  ;;  %v17646_v32 = vunpack.i.l.bf16 %v17643_v19  ;;  %v15013_v48 = vpop.permute.xlu1 %8117  ;;  %17658 = vst [vmem:[#allocation72_spill] sm:$0xff] %v15088_v63 }
 0x711   : > { %17637 = vst [vmem:[#allocation66_spill] sm:$0xff] %v14985_v23  ;;  %17640 = vst [vmem:[#allocation64_spill] sm:$0xff] %v14991_v20  ;;  %8337 = vperm.xlu1 %7810, %v8336_v56   ;;  %v2142_v43 = vadd.s32 %v17648_v22, %v2139_v62  ;;  %vm5414_vm10 = vcmp.eq.s32.totalorder %v14841_v40, 1  ;;  %v17649_v45 = vunpack.i.h.bf16 %v17590_v13  ;;  %v7279_v19 = vsel %vm5411_vm15, 1.0, %v16894_v35 }
 0x712   : > { %17642 = vst [vmem:[#allocation73_spill] sm:$0xff] %v14995_v24  ;;  %v15004_v28 = vmul.f32 %v17644_v26, %v17618_v49  ;;  %v15009_v52 = vmul.f32 %v17646_v32, %v17619_v38  ;;  %v15021_v26 = vmul.f32 %v7984_v12, %v17624_v39  ;;  %vm5415_vm11 = vcmp.eq.s32.totalorder %v14834_v2, 1  ;;  %v15049_v32 = vld [vmem:[#allocation3 + $0x8] sm:$0xff] }
 0x713   : > { %v15018_v23 = vmul.f32 %v17649_v45, %v17623_v15  ;;  %v8346_v56 = vpack.i.bf16 %v7279_v19, %v7278_v27  ;;  %v7282_v62 = vsel %vm5414_vm10, 1.0, %v16894_v35  ;;  %vm2171_vm4 = vcmp.eq.s32.totalorder %v17541_v3, %v2142_v43  ;;  %17653 = vst [vmem:[#allocation132_spill] sm:$0xff] %v15049_v32  ;;  %v15066_v19 = vld [vmem:[#allocation3 + $0x20] sm:$0xff]  ;;  %v15105_v39 = vld [vmem:[#allocation3 + $0x68] sm:$0xff] }
 0x714   : > { %17645 = vst [vmem:[#allocation70_spill] sm:$0xff] %v15004_v28  ;;  %17647 = vst [vmem:[#allocation74_spill] sm:$0xff] %v15009_v52  ;;  %vm2172_vm14 = vcmp.eq.s32.totalorder %v17541_v3, %v2156_v16  ;;  %vm5562_vm2 = vcmp.eq.s32.totalorder %v14687_v33, 2  ;;  %vm5563_vm1 = vcmp.eq.s32.totalorder %v14682_v44, 2  ;;  %v8050_v13 = vunpack.i.h.bf16 %v14800_v55  ;;  %v15039_v16 = vpop.permute.xlu0 %8342  ;;  %v15120_v15 = vld [vmem:[#allocation3 + $0x60] sm:$0xff]  ;;  %v15207_v49 = vld [vmem:[#allocation3 + $0xc8] sm:$0xff] }
 0x715   : > { %17650 = vst [vmem:[#allocation71_spill] sm:$0xff] %v15018_v23  ;;  %17651 = vst [vmem:[#allocation133_spill] sm:$0xff] %v15021_v26  ;;  %v8049_v12 = vunpack.i.l.bf16 %v14800_v55  ;;  %8347 = vperm.xlu1 %7810, %v8346_v56   ;;  %v7283_v27 = vsel %vm5415_vm11, 1.0, %v16894_v35  ;;  %v7286_v22 = vsel %vm5562_vm2, 1.0, %v16894_v35  ;;  %v7287_v3 = vsel %vm5563_vm1, 1.0, %v16894_v35  ;;  %v15041_v43 = vpop.permute.xlu1 %8127  ;;  %v15135_v26 = vld [vmem:[#allocation3 + $0x88] sm:$0xff] }
 0x716   : > { %vm7060_vm9 = vmpackc.low %vm2172_vm14, %vm2171_vm4  ;;  %v8356_v24 = vpack.i.bf16 %v7283_v27, %v7282_v62  ;;  %v8366_v42 = vpack.i.bf16 %v7287_v3, %v7286_v22  ;;  %vm5566_vm0 = vcmp.eq.s32.totalorder %v14739_v58, 2  ;;  %vm5567_vm5 = vcmp.eq.s32.totalorder %v14732_v1, 2  ;;  %v15061_v3 = vld [vmem:[#allocation3 + $0x28] sm:$0xff]  ;;  %17656 = vst [vmem:[#allocation108_spill] sm:$0xff] %v15066_v19 }
 0x717   : > { %7614 = vmatmul.mubr.msk.bf16.gmra.mrb[24].mxu1 %vm7060_vm9, %v17545_v29  ;;  %v7290_v55 = vsel %vm5566_vm0, 1.0, %v16894_v35  ;;  %v8060_v29 = vunpack.i.h.bf16 %v14837_v60  ;;  %v8059_v56 = vunpack.i.l.bf16 %v14837_v60  ;;  %v15052_v7 = vmul.f32 %v15049_v32, %v8050_v13  ;;  %17655 = vst [vmem:[#allocation78_spill] sm:$0xff] %v15061_v3  ;;  %17659 = vst [vmem:[#allocation60_spill] sm:$0xff] %v15105_v39 }
 0x718   : > { %v15057_v62 = vmul.f32 %v15054_v61, %v8049_v12  ;;  %v7291_v27 = vsel %vm5567_vm5, 1.0, %v16894_v35  ;;  %vm5570_vm8 = vcmp.eq.s32.totalorder %v14791_v25, 2  ;;  %vm5571_vm12 = vcmp.eq.s32.totalorder %v14788_v30, 2  ;;  %v15072_v12 = vpop.permute.xlu0 %8352  ;;  %17660 = vst [vmem:[#allocation79_spill] sm:$0xff] %v15120_v15  ;;  %17661 = vst [vmem:[#allocation77_spill] sm:$0xff] %v15135_v26 }
 0x719   : > { %8357 = vperm.xlu1 %7810, %v8356_v24   ;;  %v8376_v22 = vpack.i.bf16 %v7291_v27, %v7290_v55  ;;  %v15064_v60 = vmul.f32 %v15061_v3, %v8060_v29  ;;  %v15069_v13 = vmul.f32 %v15066_v19, %v8059_v56  ;;  %v7294_v32 = vsel %vm5570_vm8, 1.0, %v16894_v35  ;;  %v15083_v19 = vld [vmem:[#allocation3 + $0x48] sm:$0xff]  ;;  %17665 = vst [vmem:[#allocation8_spill] sm:$0xff] %v15207_v49 }
 0x71a   : > { %v7295_v61 = vsel %vm5571_vm12, 1.0, %v16894_v35  ;;  %v8070_v24 = vunpack.i.h.bf16 %v14870_v51  ;;  %v8069_v55 = vunpack.i.l.bf16 %v14870_v51  ;;  %v8295_v29 = vunpack.i.h.bf16 %v14886_v21  ;;  %v15081_v56 = vpop.permute.xlu1 %8137  ;;  %17657 = vst [vmem:[#allocation113_spill] sm:$0xff] %v15083_v19 }
 0x71b   : > { %v8386_v27 = vpack.i.bf16 %v7295_v61, %v7294_v32  ;;  %v8294_v3 = vunpack.i.l.bf16 %v14886_v21  ;;  %vm5574_vm6 = vcmp.eq.s32.totalorder %v14841_v40, 2  ;;  %vm5575_vm13 = vcmp.eq.s32.totalorder %v14834_v2, 2  ;;  %v8590_v21 = vld [vmem:[#allocation3 + $0x18] sm:$0xff]  ;;  %v8591_v32 = vld [vmem:[#allocation3 + $0x10] sm:$0xff] }
 0x71c   : > { %v15086_v0 = vmul.f32 %v15083_v19, %v8070_v24  ;;  %v15091_v20 = vmul.f32 %v15088_v63, %v8069_v55  ;;  %v15095_v51 = vsel %vm5574_vm6, 1.0, %v16894_v35  ;;  %v15097_v61 = vmul.f32 %v8590_v21, %v8295_v29 }
 0x71d   : > { %8367 = vperm.xlu1 %7810, %v8366_v42   ;;  %v15099_v23 = vmul.f32 %v8591_v32, %v8294_v3  ;;  %v15102_v24 = vsel %vm5575_vm13, 1.0, %v16894_v35  ;;  %v8080_v19 = vunpack.i.h.bf16 %v14896_v9  ;;  %v8079_v63 = vunpack.i.l.bf16 %v14896_v9  ;;  %v8593_v9 = vld [vmem:[#allocation3 + $0x38] sm:$0xff] }
 0x71e   : > { %v8396_v55 = vpack.i.bf16 %v15102_v24, %v15095_v51  ;;  %v8305_v42 = vunpack.i.h.bf16 %v14908_v41  ;;  %v8304_v29 = vunpack.i.l.bf16 %v14908_v41  ;;  %vm5722_vm7 = vcmp.eq.s32.totalorder %v14687_v33, 3  ;;  %v15118_v32 = vpop.permute.xlu0 %8362  ;;  %v8594_v41 = vld [vmem:[#allocation3 + $0x30] sm:$0xff] }
 0x71f   : > { %v15113_v21 = vmul.f32 %v8080_v19, %v15105_v39  ;;  %vm5723_vm3 = vcmp.eq.s32.totalorder %v14682_v44, 3  ;;  %v8090_v3 = vunpack.i.h.bf16 %v14919_v10  ;;  %v15123_v51 = vmul.f32 %v15120_v15, %v8079_v63 }
 0x720   : > { %v15125_v24 = vmul.f32 %v8593_v9, %v8305_v42  ;;  %v15127_v46 = vmul.f32 %v8594_v41, %v8304_v29  ;;  %v15130_v19 = vsel %vm5722_vm7, 1.0, %v16894_v35  ;;  %v15133_v39 = vsel %vm5723_vm3, 1.0, %v16894_v35  ;;  %v15140_v42 = vpop.permute.xlu1 %8147 }
 0x721   : > { %8377 = vperm.xlu1 %7810, %v8376_v22   ;;  %v4235_v28 = vmul.f32 %v15135_v26, %v8090_v3  ;;  %v8089_v63 = vunpack.i.l.bf16 %v14919_v10  ;;  %v8315_v15 = vunpack.i.h.bf16 %v14936_v14  ;;  %v8406_v29 = vpack.i.bf16 %v15133_v39, %v15130_v19  ;;  %v15147_v22 = vld [vmem:[#allocation3 + $0x80] sm:$0xff]  ;;  %v8597_v10 = vld [vmem:[#allocation3 + $0x58] sm:$0xff]  ;;  %v8598_v39 = vld [vmem:[#allocation3 + $0x50] sm:$0xff] }
 0x722   : > { %v8314_v9 = vunpack.i.l.bf16 %v14936_v14  ;;  %vm5726_vm15 = vcmp.eq.s32.totalorder %v14739_v58, 3  ;;  %vm5727_vm10 = vcmp.eq.s32.totalorder %v14732_v1, 3  ;;  %17662 = vst [vmem:[#allocation83_spill] sm:$0xff] %v15147_v22  ;;  %v8100_v57 = vunpack.i.h.bf16 %v14948_v37 }
 0x723   : > { %v4234_v41 = vmul.f32 %v15147_v22, %v8089_v63  ;;  %v15151_v3 = vadd.f32 %v4235_v28, %v15052_v7  ;;  %v15153_v26 = vmul.f32 %v8597_v10, %v8315_v15  ;;  %v15156_v45 = vsel %vm5726_vm15, 1.0, %v16894_v35  ;;  %v15174_v10 = vld [vmem:[#allocation3 + $0xa8] sm:$0xff]  ;;  %v15177_v22 = vld [vmem:[#allocation3 + $0xa0] sm:$0xff] }
 0x724   : > { %v15158_v19 = vmul.f32 %v8598_v39, %v8314_v9  ;;  %v15161_v14 = vsel %vm5727_vm10, 1.0, %v16894_v35  ;;  %v8099_v52 = vunpack.i.l.bf16 %v14948_v37  ;;  %v8325_v28 = vunpack.i.h.bf16 %v14964_v8  ;;  %v15172_v9 = vpop.permute.xlu0 %8372  ;;  %17663 = vst [vmem:[#allocation82_spill] sm:$0xff] %v15174_v10  ;;  %17664 = vst [vmem:[#allocation9_spill] sm:$0xff] %v15177_v22 }
 0x725   : > { %8387 = vperm.xlu1 %7810, %v8386_v27   ;;  %v15166_v7 = vadd.f32 %v4234_v41, %v15057_v62  ;;  %v8324_v63 = vunpack.i.l.bf16 %v14964_v8  ;;  %v4239_v39 = vmul.f32 %v15174_v10, %v8100_v57  ;;  %vm5730_vm11 = vcmp.eq.s32.totalorder %v14791_v25, 3  ;;  %v8601_v62 = vld [vmem:[#allocation3 + $0x78] sm:$0xff]  ;;  %v8602_v41 = vld [vmem:[#allocation3 + $0x70] sm:$0xff]  ;;  %v15192_v57 = vpop.permute.xlu1 %8157 }
 0x726   : > { %v4238_v37 = vmul.f32 %v15177_v22, %v8099_v52  ;;  %vm5731_vm4 = vcmp.eq.s32.totalorder %v14788_v30, 3  ;;  %v15182_v27 = vmul.f32 %v8601_v62, %v8325_v28  ;;  %v15187_v8 = vsel %vm5730_vm11, 1.0, %v16894_v35 }
 0x727   : > { %v15184_v15 = vmul.f32 %v8602_v41, %v8324_v63  ;;  %v15190_v38 = vsel %vm5731_vm4, 1.0, %v16894_v35  ;;  %v15198_v22 = vadd.f32 %v4239_v39, %v15064_v60  ;;  %v8110_v63 = vunpack.i.h.bf16 %v14978_v11 }
 0x728   : > { %v15195_v52 = vadd.f32 %v4238_v37, %v15069_v13  ;;  %v8109_v62 = vunpack.i.l.bf16 %v14978_v11  ;;  %v8335_v41 = vunpack.i.h.bf16 %v14999_v6  ;;  %v8334_v10 = vunpack.i.l.bf16 %v14999_v6  ;;  %v8605_v37 = vld [vmem:[#allocation3 + $0x98] sm:$0xff]  ;;  %v8606_v6 = vld [vmem:[#allocation3 + $0x90] sm:$0xff] }
 0x729   : > { %8397 = vperm.xlu1 %7810, %v8396_v55   ;;  %vm5734_vm14 = vcmp.eq.s32.totalorder %v14841_v40, 3  ;;  %v4243_v13 = vmul.f32 %v15207_v49, %v8110_v63  ;;  %vm5735_vm9 = vcmp.eq.s32.totalorder %v14834_v2, 3  ;;  %v8120_v39 = vunpack.i.h.bf16 %v15013_v48  ;;  %v15215_v55 = vld [vmem:[#allocation3 + $0xc0] sm:$0xff]  ;;  %v15221_v54 = vpop.permute.xlu0 %8382  ;;  %v15272_v49 = vld [vmem:[#allocation3 + $0x108] sm:$0xff] }
 0x72a   : > { %v15212_v60 = vsel %vm5734_vm14, 1.0, %v16894_v35  ;;  %17666 = vst [vmem:[#allocation11_spill] sm:$0xff] %v15215_v55  ;;  %v4242_v11 = vmul.f32 %v15215_v55, %v8109_v62  ;;  %v5533_v28 = vmul.f32 %v8605_v37, %v8335_v41  ;;  %v5532_v36 = vmul.f32 %v8606_v6, %v8334_v10  ;;  %v15232_v41 = vld [vmem:[#allocation3 + $0xe0] sm:$0xff]  ;;  %v15244_v6 = vpop.permute.xlu1 %8167 }
 0x72b   : > { %v15219_v31 = vsel %vm5735_vm9, 1.0, %v16894_v35  ;;  %v15224_v63 = vadd.f32 %v4243_v13, %v15086_v0  ;;  %v4247_v50 = vmul.f32 %v15228_v47, %v8120_v39  ;;  %v8119_v62 = vunpack.i.l.bf16 %v15013_v48 }
 0x72c   : > { %v15235_v10 = vadd.f32 %v4242_v11, %v15091_v20  ;;  %v15238_v37 = vadd.f32 %v5532_v36, %v15099_v23  ;;  %v15241_v0 = vadd.f32 %v5533_v28, %v15097_v61  ;;  %v8345_v13 = vunpack.i.h.bf16 %v15039_v16  ;;  %v8608_v20 = vld [vmem:[#allocation3 + $0xb8] sm:$0xff]  ;;  %v8609_v28 = vld [vmem:[#allocation3 + $0xb0] sm:$0xff] }
 0x72d   : > { %8407 = vperm.xlu1 %7810, %v8406_v29   ;;  %v4246_v39 = vmul.f32 %v8119_v62, %v15232_v41  ;;  %v15248_v48 = vadd.f32 %v4247_v50, %v15113_v21  ;;  %v8344_v29 = vunpack.i.l.bf16 %v15039_v16  ;;  %vm5882_vm2 = vcmp.eq.s32.totalorder %v14687_v33, 4 }
 0x72e   : > { %v5537_v11 = vmul.f32 %v8608_v20, %v8345_v13  ;;  %vm5883_vm1 = vcmp.eq.s32.totalorder %v14682_v44, 4  ;;  %v15254_v36 = vsel %vm5882_vm2, 1.0, %v16894_v35  ;;  %v8130_v23 = vunpack.i.h.bf16 %v15041_v43 }
 0x72f   : > { %v15258_v61 = vadd.f32 %v4246_v39, %v15123_v51  ;;  %v5536_v62 = vmul.f32 %v8609_v28, %v8344_v29  ;;  %v15261_v50 = vsel %vm5883_vm1, 1.0, %v16894_v35  ;;  %v8129_v16 = vunpack.i.l.bf16 %v15041_v43  ;;  %v15276_v29 = vpop.permute.xlu0 %8392  ;;  %v15281_v28 = vld [vmem:[#allocation3 + $0x100] sm:$0xff] }
 0x730   : > { %v17667_v21 = vpack.i.bf16 %v15161_v14, %v15156_v45  ;;  %v15268_v13 = vadd.f32 %v5537_v11, %v15125_v24  ;;  %v4395_v51 = vmul.f32 %v15272_v49, %v8130_v23  ;;  %v8355_v39 = vunpack.i.h.bf16 %v15072_v12  ;;  %v8612_v11 = vld [vmem:[#allocation3 + $0xd8] sm:$0xff] }
 0x731   : > { %v15279_v43 = vadd.f32 %v5536_v62, %v15127_v46  ;;  %v4394_v45 = vmul.f32 %v15281_v28, %v8129_v16  ;;  %v8354_v24 = vunpack.i.l.bf16 %v15072_v12  ;;  %vm5886_vm0 = vcmp.eq.s32.totalorder %v14739_v58, 4  ;;  %v15293_v46 = vpop.permute.xlu1 %8177  ;;  %v8613_v16 = vld [vmem:[#allocation3 + $0xd0] sm:$0xff] }
 0x732   : > { %8417 = vperm.xlu1 %7810, %v17667_v21   ;;  %v15287_v14 = vadd.f32 %v4395_v51, %v15151_v3  ;;  %v5541_v23 = vmul.f32 %v8612_v11, %v8355_v39  ;;  %vm5887_vm5 = vcmp.eq.s32.totalorder %v14732_v1, 4  ;;  %v15291_v21 = vsel %vm5886_vm0, 1.0, %v16894_v35 }
 0x733   : > { %v15296_v62 = vadd.f32 %v4394_v45, %v15166_v7  ;;  %v5540_v20 = vmul.f32 %v8613_v16, %v8354_v24  ;;  %v15299_v12 = vsel %vm5887_vm5, 1.0, %v16894_v35  ;;  %v8140_v3 = vunpack.i.h.bf16 %v15081_v56  ;;  %v15315_v16 = vld [vmem:[#allocation3 + $0x128] sm:$0xff] }
 0x734   : > { %v17668_v51 = vpack.i.bf16 %v15190_v38, %v15187_v8  ;;  %v15306_v39 = vadd.f32 %v5541_v23, %v15153_v26  ;;  %v8456_v11 = vpack.i.bf16 %v15299_v12, %v15291_v21  ;;  %v8139_v7 = vunpack.i.l.bf16 %v15081_v56  ;;  %17669 = vst [vmem:[#allocation15_spill] sm:$0xff] %v15315_v16  ;;  %v15320_v26 = vld [vmem:[#allocation3 + $0x120] sm:$0xff]  ;;  %v15323_v23 = vld [vmem:[#allocation3 + $0xf8] sm:$0xff] }
 0x735   : > { %v8365_v45 = vunpack.i.h.bf16 %v15118_v32  ;;  %v15313_v24 = vadd.f32 %v5540_v20, %v15158_v19  ;;  %v4399_v55 = vmul.f32 %v15315_v16, %v8140_v3  ;;  %v8364_v38 = vunpack.i.l.bf16 %v15118_v32  ;;  %17670 = vst [vmem:[#allocation19_spill] sm:$0xff] %v15320_v26  ;;  %v15330_v20 = vpop.permute.xlu0 %8402  ;;  %v8617_v32 = vld [vmem:[#allocation3 + $0xf0] sm:$0xff]  ;;  %v15356_v16 = vld [vmem:[#allocation3 + $0x148] sm:$0xff] }
 0x736   : > { %8427 = vperm.xlu1 %7810, %v17668_v51   ;;  %vm5890_vm8 = vcmp.eq.s32.totalorder %v14791_v25, 4  ;;  %v4398_v8 = vmul.f32 %v15320_v26, %v8139_v7  ;;  %vm5891_vm12 = vcmp.eq.s32.totalorder %v14788_v30, 4  ;;  %v8150_v51 = vunpack.i.h.bf16 %v15140_v42  ;;  %17672 = vst [vmem:[#allocation18_spill] sm:$0xff] %v15356_v16 }
 0x737   : > { %v5545_v56 = vmul.f32 %v15323_v23, %v8365_v45  ;;  %v15328_v19 = vsel %vm5890_vm8, 1.0, %v16894_v35  ;;  %v15333_v21 = vadd.f32 %v4399_v55, %v15198_v22  ;;  %v5544_v12 = vmul.f32 %v8617_v32, %v8364_v38  ;;  %v15351_v38 = vpop.permute.xlu1 %8187 }
 0x738   : > { %v15336_v3 = vsel %vm5891_vm12, 1.0, %v16894_v35  ;;  %v17671_v7 = vpack.i.bf16 %v15219_v31, %v15212_v60  ;;  %v15343_v45 = vadd.f32 %v4398_v8, %v15195_v52  ;;  %v8149_v55 = vunpack.i.l.bf16 %v15140_v42 }
 0x739   : > { %v15346_v26 = vadd.f32 %v5545_v56, %v15182_v27  ;;  %v8466_v22 = vpack.i.bf16 %v15336_v3, %v15328_v19  ;;  %v15354_v32 = vadd.f32 %v5544_v12, %v15184_v15  ;;  %v4403_v31 = vmul.f32 %v15356_v16, %v8150_v51  ;;  %v15361_v27 = vld [vmem:[#allocation3 + $0x140] sm:$0xff]  ;;  %v15367_v15 = vld [vmem:[#allocation3 + $0x168] sm:$0xff]  ;;  %v8620_v19 = vld [vmem:[#allocation3 + $0x118] sm:$0xff] }
 0x73a   : > { %8437 = vperm.xlu1 %7810, %v17671_v7   ;;  %v8375_v52 = vunpack.i.h.bf16 %v15172_v9  ;;  %v8374_v60 = vunpack.i.l.bf16 %v15172_v9  ;;  %17673 = vst [vmem:[#allocation12_spill] sm:$0xff] %v15361_v27  ;;  %v4402_v8 = vmul.f32 %v15361_v27, %v8149_v55  ;;  %vm5894_vm6 = vcmp.eq.s32.totalorder %v14841_v40, 4  ;;  %v8621_v3 = vld [vmem:[#allocation3 + $0x110] sm:$0xff] }
 0x73b   : > { %vm5895_vm13 = vcmp.eq.s32.totalorder %v14834_v2, 4  ;;  %v8160_v42 = vunpack.i.h.bf16 %v15192_v57  ;;  %v15370_v56 = vadd.f32 %v4403_v31, %v15224_v63  ;;  %v7330_v9 = vsel %vm5894_vm6, 1.0, %v16894_v35  ;;  %v15382_v31 = vpop.permute.xlu0 %8412 }
 0x73c   : > { %v5693_v12 = vmul.f32 %v8620_v19, %v8375_v52  ;;  %v5692_v51 = vmul.f32 %v8621_v3, %v8374_v60  ;;  %v17674_v7 = vpack.i.bf16 %v15261_v50, %v15254_v36  ;;  %v15377_v55 = vadd.f32 %v4402_v8, %v15235_v10  ;;  %v15384_v52 = vld [vmem:[#allocation3 + $0x160] sm:$0xff]  ;;  %v17675_v3 = vld [vmem:[#allocation155_spill] sm:$0xff] }
 0x73d   : > { %v7331_v27 = vsel %vm5895_vm13, 1.0, %v16894_v35  ;;  %v4407_v16 = vmul.f32 %v8160_v42, %v15367_v15  ;;  %v8159_v63 = vunpack.i.l.bf16 %v15192_v57  ;;  %v8385_v10 = vunpack.i.h.bf16 %v15221_v54  ;;  %v15399_v42 = vpop.permute.xlu1 %8197 }
 0x73e   : > { %8447 = vperm.xlu1 %7810, %v17674_v7   ;;  %v15387_v60 = vadd.f32 %v5692_v51, %v15238_v37  ;;  %v15390_v19 = vadd.f32 %v5693_v12, %v15241_v0  ;;  %v8476_v36 = vpack.i.bf16 %v7331_v27, %v7330_v9  ;;  %v8384_v57 = vunpack.i.l.bf16 %v15221_v54  ;;  %v17677_v7 = vld [vmem:[#allocation44_spill] sm:$0xff] }
 0x73f   : > { %v4406_v50 = vmul.f32 %v8159_v63, %v15384_v52  ;;  %v15395_v8 = vadd.f32 %v4407_v16, %v15248_v48  ;;  %vm6042_vm7 = vcmp.eq.s32.totalorder %v14687_v33, 5  ;;  %v5697_v37 = vmul.f32 %v17675_v3, %v8385_v10  ;;  %v17676_v48 = vld [vmem:[#allocation95_spill] sm:$0xff] }
 0x740   : > { %vm6043_vm3 = vcmp.eq.s32.totalorder %v14682_v44, 5  ;;  %v7334_v0 = vsel %vm6042_vm7, 1.0, %v16894_v35  ;;  %v8170_v27 = vunpack.i.h.bf16 %v15244_v6  ;;  %v5696_v16 = vmul.f32 %v17676_v48, %v8384_v57  ;;  %v15422_v57 = vpop.permute.xlu0 %8422 }
 0x741   : > { %v15406_v12 = vadd.f32 %v4406_v50, %v15258_v61  ;;  %v7335_v54 = vsel %vm6043_vm3, 1.0, %v16894_v35  ;;  %v8169_v33 = vunpack.i.l.bf16 %v15244_v6  ;;  %v15412_v51 = vadd.f32 %v5697_v37, %v15268_v13 }
 0x742   : > { %8457 = vperm.xlu1 %7810, %v8456_v11   ;;  %v8486_v9 = vpack.i.bf16 %v7335_v54, %v7334_v0  ;;  %v4555_v44 = vmul.f32 %v8170_v27, %v17677_v7  ;;  %v8395_v63 = vunpack.i.h.bf16 %v15276_v29  ;;  %v15417_v10 = vadd.f32 %v5696_v16, %v15279_v43  ;;  %v17678_v11 = vld [vmem:[#allocation42_spill] sm:$0xff]  ;;  %v8208_v0 = vpop.permute.xlu1 %8207 }
 0x743   : > { %v4554_v61 = vmul.f32 %v8169_v33, %v17678_v11  ;;  %v8394_v50 = vunpack.i.l.bf16 %v15276_v29  ;;  %vm6046_vm15 = vcmp.eq.s32.totalorder %v14739_v58, 5  ;;  %vm6047_vm10 = vcmp.eq.s32.totalorder %v14732_v1, 5  ;;  %v17680_v16 = vld [vmem:[#allocation46_spill] sm:$0xff] }
 0x744   : > { %v15425_v6 = vadd.f32 %v4555_v44, %v15287_v14  ;;  %v5701_v13 = vmul.f32 %v14689_v5, %v8395_v63  ;;  %v7338_v3 = vsel %vm6046_vm15, 1.0, %v16894_v35  ;;  %v7339_v29 = vsel %vm6047_vm10, 1.0, %v16894_v35 }
 0x745   : > { %v15431_v43 = vadd.f32 %v4554_v61, %v15296_v62  ;;  %v5700_v37 = vmul.f32 %v14692_v17, %v8394_v50  ;;  %v8180_v58 = vunpack.i.h.bf16 %v15293_v46  ;;  %v8496_v27 = vpack.i.bf16 %v7339_v29, %v7338_v3  ;;  %v17679_v62 = vld [vmem:[#allocation48_spill] sm:$0xff] }
 0x746   : > { %8467 = vperm.xlu1 %7810, %v8466_v22   ;;  %v15437_v14 = vadd.f32 %v5701_v13, %v15306_v39  ;;  %v8179_v5 = vunpack.i.l.bf16 %v15293_v46  ;;  %v8405_v1 = vunpack.i.h.bf16 %v15330_v20  ;;  %v8404_v17 = vunpack.i.l.bf16 %v15330_v20  ;;  %v8433_v20 = vpop.permute.xlu0 %8432 }
 0x747   : > { %v15442_v22 = vadd.f32 %v5700_v37, %v15313_v24  ;;  %v4559_v48 = vmul.f32 %v8180_v58, %v17679_v62  ;;  %vm6050_vm11 = vcmp.eq.s32.totalorder %v14791_v25, 5  ;;  %vm6051_vm4 = vcmp.eq.s32.totalorder %v14788_v30, 5  ;;  %v17682_v37 = vld [vmem:[#allocation50_spill] sm:$0xff] }
 0x748   : > { %v4558_v54 = vmul.f32 %v8179_v5, %v17680_v16  ;;  %v5705_v33 = vmul.f32 %v8405_v1, %v14729_v53  ;;  %v7342_v39 = vsel %vm6050_vm11, 1.0, %v16894_v35  ;;  %v5704_v24 = vmul.f32 %v14744_v4, %v8404_v17  ;;  %v8218_v3 = vpop.permute.xlu1 %8217  ;;  %v17683_v1 = vld [vmem:[#allocation56_spill] sm:$0xff] }
 0x749   : > { %v4575_v46 = vadd.f32 %v4559_v48, %v15333_v21  ;;  %v7343_v44 = vsel %vm6051_vm4, 1.0, %v16894_v35  ;;  %v8190_v63 = vunpack.i.h.bf16 %v15351_v38  ;;  %v8189_v30 = vunpack.i.l.bf16 %v15351_v38  ;;  %v17681_v21 = vld [vmem:[#allocation52_spill] sm:$0xff] }
 0x74a   : > { %8477 = vperm.xlu1 %7810, %v8476_v36   ;;  %v15456_v25 = vadd.f32 %v4558_v54, %v15343_v45  ;;  %v15459_v61 = vadd.f32 %v5705_v33, %v15346_v26  ;;  %v8506_v53 = vpack.i.bf16 %v7343_v44, %v7342_v39  ;;  %v15463_v36 = vadd.f32 %v5704_v24, %v15354_v32  ;;  %v17684_v54 = vld [vmem:[#allocation54_spill] sm:$0xff] }
 0x74b   : > { %v4563_v50 = vmul.f32 %v8190_v63, %v17681_v21  ;;  %v8415_v4 = vunpack.i.h.bf16 %v15382_v31  ;;  %v8414_v13 = vunpack.i.l.bf16 %v15382_v31  ;;  %v4562_v29 = vmul.f32 %v8189_v30, %v17682_v37  ;;  %v17685_v63 = vld [vmem:[#allocation45_spill] sm:$0xff] }
 0x74c   : > { %vm6054_vm14 = vcmp.eq.s32.totalorder %v14841_v40, 5  ;;  %vm6055_vm9 = vcmp.eq.s32.totalorder %v14834_v2, 5  ;;  %v8200_v26 = vunpack.i.h.bf16 %v15399_v42  ;;  %v8199_v40 = vunpack.i.l.bf16 %v15399_v42 }
 0x74d   : > { %v4579_v45 = vadd.f32 %v4563_v50, %v15370_v56  ;;  %v5853_v38 = vmul.f32 %v8415_v4, %v17587_v34  ;;  %v5852_v32 = vmul.f32 %v8414_v13, %v17592_v59  ;;  %v7346_v58 = vsel %vm6054_vm14, 1.0, %v16894_v35  ;;  %v8443_v34 = vpop.permute.xlu0 %8442  ;;  %v17686_v50 = vld [vmem:[#allocation140_spill] sm:$0xff] }
 0x74e   : > { %8487 = vperm.xlu1 %7810, %v8486_v9   ;;  %v4578_v31 = vadd.f32 %v4562_v29, %v15377_v55  ;;  %v7347_v5 = vsel %vm6055_vm9, 1.0, %v16894_v35  ;;  %v4567_v48 = vmul.f32 %v8200_v26, %v17683_v1  ;;  %v8425_v56 = vunpack.i.h.bf16 %v15422_v57  ;;  %v17687_v29 = vld [vmem:[#allocation138_spill] sm:$0xff] }
 0x74f   : > { %v5868_v2 = vadd.f32 %v5852_v32, %v15387_v60  ;;  %v5869_v9 = vadd.f32 %v5853_v38, %v15390_v19  ;;  %v8516_v17 = vpack.i.bf16 %v7347_v5, %v7346_v58  ;;  %v4566_v59 = vmul.f32 %v8199_v40, %v17684_v54 }
 0x750   : > { %v15485_v33 = vadd.f32 %v4567_v48, %v15395_v8  ;;  %v8424_v55 = vunpack.i.l.bf16 %v15422_v57  ;;  %v8210_v35 = vunpack.i.h.bf16 %v8208_v0  ;;  %v5857_v39 = vmul.f32 %v8425_v56, %v17600_v18  ;;  %v8228_v44 = vpop.permute.xlu1 %8227  ;;  %v17688_v57 = vld [vmem:[#allocation51_spill] sm:$0xff] }
 0x751   : > { %v8209_v42 = vunpack.i.l.bf16 %v8208_v0  ;;  %v8435_v24 = vunpack.i.h.bf16 %v8433_v20  ;;  %v8434_v60 = vunpack.i.l.bf16 %v8433_v20  ;;  %v4582_v19 = vadd.f32 %v4566_v59, %v15406_v12  ;;  %v17690_v0 = vld [vmem:[#allocation147_spill] sm:$0xff]  ;;  %v17691_v59 = vld [vmem:[#allocation144_spill] sm:$0xff] }
 0x752   : > { %8497 = vperm.xlu1 %7810, %v8496_v27   ;;  %v5856_v30 = vmul.f32 %v8424_v55, %v17685_v63  ;;  %v4715_v4 = vmul.f32 %v8210_v35, %v17686_v50  ;;  %v8220_v13 = vunpack.i.h.bf16 %v8218_v3  ;;  %v5873_v8 = vadd.f32 %v5857_v39, %v15412_v51  ;;  %v17689_v27 = vld [vmem:[#allocation49_spill] sm:$0xff] }
 0x753   : > { %v4714_v26 = vmul.f32 %v8209_v42, %v17687_v29  ;;  %v5861_v38 = vmul.f32 %v8435_v24, %v17688_v57  ;;  %v5860_v32 = vmul.f32 %v8434_v60, %v17689_v27  ;;  %v8219_v58 = vunpack.i.l.bf16 %v8218_v3  ;;  %v17694_v42 = vld [vmem:[#allocation53_spill] sm:$0xff] }
 0x754   : > { %v5872_v18 = vadd.f32 %v5856_v30, %v15417_v10  ;;  %v4719_v20 = vmul.f32 %v8220_v13, %v17690_v0  ;;  %v8445_v5 = vunpack.i.h.bf16 %v8443_v34  ;;  %v8444_v40 = vunpack.i.l.bf16 %v8443_v34  ;;  %v17693_v10 = vld [vmem:[#allocation55_spill] sm:$0xff]  ;;  %v17696_v34 = vld [vmem:[#allocation152_spill] sm:$0xff]  ;;  %v17699_v27 = vld [vmem:[#allocation137_spill] sm:$0xff] }
 0x755   : > { %v15499_v12 = vadd.f32 %v4714_v26, %v15431_v43  ;;  %v15502_v48 = vadd.f32 %v5860_v32, %v15442_v22  ;;  %v15505_v51 = vadd.f32 %v5861_v38, %v15437_v14  ;;  %v8453_v56 = vpop.permute.xlu0 %8452  ;;  %v4718_v55 = vmul.f32 %v8219_v58, %v17691_v59  ;;  %v17697_v26 = vld [vmem:[#allocation150_spill] sm:$0xff]  ;;  %v17698_v38 = vld [vmem:[#allocation139_spill] sm:$0xff]  ;;  %v17728_v59 = vld [vmem:[#allocation36_spill] sm:$0xff] }
 0x756   : > { %8507 = vperm.xlu1 %7810, %v8506_v53   ;;  %v15508_v35 = vadd.f32 %v4719_v20, %v4575_v46  ;;  %v5865_v39 = vmul.f32 %v8445_v5, %v17693_v10  ;;  %v8230_v3 = vunpack.i.h.bf16 %v8228_v44  ;;  %v5864_v53 = vmul.f32 %v8444_v40, %v17694_v42  ;;  %v17702_v5 = vld [vmem:[#allocation31_spill] sm:$0xff]  ;;  %v17703_v40 = vld [vmem:[#allocation74_spill] sm:$0xff]  ;;  %v17759_v29 = vld [vmem:[#allocation157_spill] sm:$0xff] }
 0x757   : > { %v8229_v24 = vunpack.i.l.bf16 %v8228_v44  ;;  %v8455_v43 = vunpack.i.h.bf16 %v8453_v56  ;;  %v8454_v60 = vunpack.i.l.bf16 %v8453_v56  ;;  %v8238_v63 = vpop.permute.xlu1 %8237  ;;  %v15513_v22 = vadd.f32 %v4718_v55, %v15456_v25  ;;  %v17701_v25 = vld [vmem:[#allocation162_spill] sm:$0xff]  ;;  %v17705_v55 = vld [vmem:[#allocation16_spill] sm:$0xff] }
 0x758   : > { %17692 = vst [vmem:[#allocation148_spill] sm:$0xff] %v15508_v35  ;;  %v15516_v14 = vadd.f32 %v5865_v39, %v15459_v61  ;;  %v4723_v30 = vmul.f32 %v8230_v3, %v17696_v34  ;;  %v8240_v13 = vunpack.i.h.bf16 %v8238_v63  ;;  %v15520_v46 = vadd.f32 %v5864_v53, %v15463_v36 }
 0x759   : > { %17695 = vst [vmem:[#allocation22_spill] sm:$0xff] %v15513_v22  ;;  %v4722_v57 = vmul.f32 %v8229_v24, %v17697_v26  ;;  %v6013_v44 = vmul.f32 %v8455_v43, %v17698_v38  ;;  %v6012_v32 = vmul.f32 %v8454_v60, %v17699_v27  ;;  %v8239_v61 = vunpack.i.l.bf16 %v8238_v63  ;;  %v17708_v43 = vld [vmem:[#allocation160_spill] sm:$0xff]  ;;  %v17709_v63 = vld [vmem:[#allocation17_spill] sm:$0xff]  ;;  %v17725_v22 = vld [vmem:[#allocation170_spill] sm:$0xff] }
 0x75a   : > { %8517 = vperm.xlu1 %7810, %v8516_v17   ;;  %v15525_v20 = vadd.f32 %v4723_v30, %v4579_v45  ;;  %v15528_v58 = vmul.f32 %v8240_v13, %v17701_v25  ;;  %v15532_v56 = vadd.f32 %v17703_v40, %v17702_v5  ;;  %v17704_v17 = vld [vmem:[#allocation149_spill] sm:$0xff]  ;;  %v17706_v36 = vunpack.i.l.bf16 %v17705_v55  ;;  %v17710_v38 = vld [vmem:[#allocation28_spill] sm:$0xff]  ;;  %v17711_v5 = vld [vmem:[#allocation23_spill] sm:$0xff] }
 0x75b   : > { %v15537_v3 = vadd.f32 %v4722_v57, %v4578_v31  ;;  %v15539_v53 = vadd.f32 %v6012_v32, %v5868_v2  ;;  %v15541_v24 = vadd.f32 %v6013_v44, %v5869_v9  ;;  %v8463_v45 = vpop.permute.xlu0 %8462  ;;  %v4726_v60 = vmul.f32 %v8239_v61, %v17708_v43  ;;  %v17712_v40 = vld [vmem:[#allocation70_spill] sm:$0xff]  ;;  %v17714_v31 = vld [vmem:[#allocation177_spill] sm:$0xff]  ;;  %v17715_v9 = vld [vmem:[#allocation35_spill] sm:$0xff] }
 0x75c   : > { %17700 = vst [vmem:[#allocation158_spill] sm:$0xff] %v15525_v20  ;;  %v3428_v39 = vmul.f32 %v17706_v36, %v17704_v17  ;;  %v8465_v30 = vunpack.i.h.bf16 %v8463_v45  ;;  %v8464_v13 = vunpack.i.l.bf16 %v8463_v45  ;;  %v15546_v27 = vadd.f32 %v17710_v38, %v17709_v63  ;;  %v17713_v36 = vld [vmem:[#allocation119_spill] sm:$0xff]  ;;  %v17716_v44 = vld [vmem:[#allocation133_spill] sm:$0xff] }
 0x75d   : > { %17707 = vst [vmem:[#allocation7_spill] sm:$0xff] %v15537_v3  ;;  %v15550_v20 = vadd.f32 %v17712_v40, %v17711_v5  ;;  %v15554_v57 = vadd.f32 %v17714_v31, %v17713_v36  ;;  %v15557_v2 = vadd.f32 %v4715_v4, %v15425_v6  ;;  %v15561_v32 = vadd.f32 %v17716_v44, %v17715_v9  ;;  %v17718_v61 = vld [vmem:[#allocation151_spill] sm:$0xff]  ;;  %v17721_v3 = vld [vmem:[#allocation146_spill] sm:$0xff]  ;;  %v17723_v26 = vld [vmem:[#allocation165_spill] sm:$0xff] }
 0x75e   : > { %v17719_v45 = vunpack.i.h.bf16 %v17705_v55  ;;  %v15566_v38 = vadd.f32 %v4726_v60, %v4582_v19  ;;  %v6017_v5 = vmul.f32 %v8465_v30, %v17721_v3  ;;  %v17722_v40 = vld [vmem:[#allocation14_spill] sm:$0xff]  ;;  %v17724_v36 = vld [vmem:[#allocation171_spill] sm:$0xff]  ;;  %v17734_v19 = vld [vmem:[#allocation20_spill] sm:$0xff]  ;;  %vm6219_vm2 = vcmask 523264  }
 0x75f   : > { %17717 = vst [vmem:[#allocation26_spill] sm:$0xff] %v15561_v32  ;;  %v6016_v35 = vmul.f32 %v8464_v13, %v17722_v40  ;;  %v3285_v31 = vadd.f32 %v17724_v36, %v17723_v26  ;;  %v17726_v6 = vld [vmem:[#allocation178_spill] sm:$0xff]  ;;  %v17729_v9 = vld [vmem:[#allocation71_spill] sm:$0xff]  ;;  %v17731_v32 = vld [vmem:[#allocation172_spill] sm:$0xff]  ;;  %v8004_v60 = vunpack.i.l.bf16 %v17734_v19  ;;  %vm6380_vm1 = vcmask (!%p7350_p9), 261120  }
 0x760   : > { %v3429_v63 = vmul.f32 %v17719_v45, %v17718_v61  ;;  %17720 = vst [vmem:[#allocation39_spill] sm:$0xff] %v15566_v38  ;;  %v15574_v4 = vadd.f32 %v17726_v6, %v17725_v22  ;;  %v15578_v44 = vadd.f32 %v17729_v9, %v17728_v59  ;;  %v17732_v55 = vld [vmem:[#allocation130_spill] sm:$0xff]  ;;  %v15587_v30 = vadd.f32 %v6017_v5, %v5873_v8  ;;  %v17737_v13 = vld [vmem:[#allocation64_spill] sm:$0xff]  ;;  %v17742_v59 = vld [vmem:[#allocation25_spill] sm:$0xff] }
 0x761   : > { %v15582_v45 = vadd.f32 %v17732_v55, %v17731_v32  ;;  %v15585_v3 = vadd.f32 %v6016_v35, %v5872_v18  ;;  %v15590_v26 = vadd.f32 %v3428_v39, %v17737_v13  ;;  %v17739_v40 = vld [vmem:[#allocation176_spill] sm:$0xff]  ;;  %v17740_v22 = vld [vmem:[#allocation166_spill] sm:$0xff]  ;;  %v17743_v9 = vunpack.i.h.bf16 %v17742_v59  ;;  %v17744_v32 = vld [vmem:[#allocation167_spill] sm:$0xff] }
 0x762   : > { %17727 = vst [vmem:[#allocation118_spill] sm:$0xff] %v15574_v4  ;;  %17730 = vst [vmem:[#allocation174_spill] sm:$0xff] %v15578_v44  ;;  %v2968_v36 = vadd.f32 %v17740_v22, %v17739_v40  ;;  %v17741_v6 = vld [vmem:[#allocation94_spill] sm:$0xff]  ;;  %v17745_v55 = vld [vmem:[#allocation75_spill] sm:$0xff]  ;;  %v15609_v22 = vpop.permute.xlu1 %8247 }
 0x763   : > { %17733 = vst [vmem:[#allocation30_spill] sm:$0xff] %v15582_v45  ;;  %17735 = vst [vmem:[#allocation29_spill] sm:$0xff] %v15585_v3  ;;  %v7925_v38 = vunpack.i.h.bf16 %v17741_v6  ;;  %v3427_v44 = vmul.f32 %v17743_v9, %v17696_v34  ;;  %v15600_v45 = vadd.f32 %v17745_v55, %v17744_v32  ;;  %v17747_v18 = vld [vmem:[#allocation169_spill] sm:$0xff]  ;;  %v17749_v5 = vld [vmem:[#allocation98_spill] sm:$0xff]  ;;  %v15611_v6 = vadd.f32 %v3429_v63, %v3285_v31  ;;  %v8473_v3 = vpop.permute.xlu0 %8472 }
 0x764   : > { %17736 = vst [vmem:[#allocation40_spill] sm:$0xff] %v15587_v30  ;;  %17738 = vst [vmem:[#allocation6_spill] sm:$0xff] %v15590_v26  ;;  %v17748_v8 = vunpack.i.l.bf16 %v17747_v18  ;;  %v7920_v39 = vunpack.i.h.bf16 %v17749_v5  ;;  %v17750_v13 = vld [vmem:[#allocation106_spill] sm:$0xff]  ;;  %v17756_v55 = vld [vmem:[#allocation121_spill] sm:$0xff]  ;;  %v8474_v50 = vunpack.i.l.bf16 %v8473_v3  ;;  %v17760_v63 = vunpack.i.l.bf16 %v17749_v5 }
 0x765   : > { %17746 = vst [vmem:[#allocation180_spill] sm:$0xff] %v15600_v45  ;;  %v17751_v26 = vunpack.i.l.bf16 %v17750_v13  ;;  %17752 = vst [vmem:[#allocation59_spill] sm:$0xff] %v15611_v6  ;;  %v17753_v59 = vld [vmem:[#allocation62_spill] sm:$0xff]  ;;  %v17757_v34 = vld [vmem:[#allocation116_spill] sm:$0xff]  ;;  %v7965_v0 = vunpack.i.h.bf16 %v17750_v13 }
 0x766   : > { %v2950_v35 = vmul.f32 %v17748_v8, %v15232_v41  ;;  %v17754_v9 = vunpack.i.h.bf16 %v17753_v59  ;;  %v17755_v32 = vld [vmem:[#allocation114_spill] sm:$0xff]  ;;  %v7959_v18 = vunpack.i.l.bf16 %v17757_v34  ;;  %v17758_v8 = vld [vmem:[#allocation69_spill] sm:$0xff]  ;;  %v3110_v31 = vmul.f32 %v17760_v63, %v15384_v52  ;;  %v8622_v59 = vld [vmem:[#allocation3 + $0x178] sm:$0xff] }
 0x767   : > { %v3272_v40 = vmul.f32 %v17751_v26, %v17694_v42  ;;  %v3283_v45 = vadd.f32 %v17756_v55, %v17755_v32  ;;  %v3128_v4 = vadd.f32 %v17758_v8, %v2968_v36  ;;  %v3432_v42 = vmul.f32 %v8004_v60, %v17759_v29  ;;  %v17763_v60 = vld [vmem:[#allocation81_spill] sm:$0xff] }
 0x768   : > { %v2953_v30 = vmul.f32 %v15323_v23, %v17754_v9  ;;  %v8475_v26 = vunpack.i.h.bf16 %v8473_v3  ;;  %v3113_v23 = vmul.f32 %v8622_v59, %v7925_v38  ;;  %v17761_v9 = vld [vmem:[#allocation129_spill] sm:$0xff]  ;;  %v8005_v36 = vunpack.i.h.bf16 %v17734_v19  ;;  %v17764_v3 = vld [vmem:[#allocation92_spill] sm:$0xff] }
 0x769   : > { %v7999_v6 = vunpack.i.l.bf16 %v17761_v9  ;;  %v15626_v32 = vadd.f32 %v3427_v44, %v3283_v45  ;;  %v3288_v55 = vadd.f32 %v3272_v40, %v3128_v4  ;;  %v6020_v13 = vmul.f32 %v8474_v50, %v17704_v17  ;;  %v15642_v45 = vpop.permute.xlu1 %8257  ;;  %v17768_v50 = vld [vmem:[#allocation60_spill] sm:$0xff]  ;;  %v17769_v17 = vld [vmem:[#allocation175_spill] sm:$0xff] }
 0x76a   : > { %v6021_v8 = vmul.f32 %v8475_v26, %v17718_v61  ;;  %v2966_v37 = vadd.f32 %v2950_v35, %v17763_v60  ;;  %v2969_v21 = vadd.f32 %v2953_v30, %v17764_v3  ;;  %v7960_v5 = vunpack.i.h.bf16 %v17757_v34  ;;  %v17772_v26 = vld [vmem:[#allocation154_spill] sm:$0xff] }
 0x76b   : > { %17762 = vst [vmem:[#allocation34_spill] sm:$0xff] %v15626_v32  ;;  %v3270_v63 = vmul.f32 %v7959_v18, %v17684_v54  ;;  %v3273_v38 = vmul.f32 %v7965_v0, %v17693_v10  ;;  %v15637_v44 = vadd.f32 %v6020_v13, %v15502_v48  ;;  %v15644_v61 = vadd.f32 %v3432_v42, %v3288_v55  ;;  %v17771_v10 = vld [vmem:[#allocation161_spill] sm:$0xff] }
 0x76c   : > { %v15640_v4 = vadd.f32 %v6021_v8, %v15505_v51  ;;  %v17770_v19 = vunpack.i.h.bf16 %v17769_v17  ;;  %v3111_v34 = vmul.f32 %v7920_v39, %v15367_v15  ;;  %v8000_v35 = vunpack.i.h.bf16 %v17761_v9  ;;  %v8483_v51 = vpop.permute.xlu0 %8482 }
 0x76d   : > { %17765 = vst [vmem:[#allocation33_spill] sm:$0xff] %v15637_v44  ;;  %17767 = vst [vmem:[#allocation145_spill] sm:$0xff] %v15644_v61  ;;  %v3126_v40 = vadd.f32 %v3110_v31, %v2966_v37  ;;  %v3129_v0 = vadd.f32 %v3113_v23, %v2969_v21  ;;  %v3430_v48 = vmul.f32 %v7999_v6, %v17708_v43  ;;  %v8485_v55 = vunpack.i.h.bf16 %v8483_v51  ;;  %v15658_v37 = vpop.permute.xlu1 %8267 }
 0x76e   : > { %17766 = vst [vmem:[#allocation67_spill] sm:$0xff] %v15640_v4  ;;  %v2791_v30 = vmul.f32 %v17770_v19, %v17768_v50  ;;  %v3433_v18 = vmul.f32 %v8005_v36, %v17771_v10  ;;  %v3271_v42 = vmul.f32 %v7960_v5, %v17683_v1  ;;  %v8484_v8 = vunpack.i.l.bf16 %v8483_v51  ;;  %v17794_v4 = vld [vmem:[#allocation9_spill] sm:$0xff] }
 0x76f   : > { %v3286_v13 = vadd.f32 %v3270_v63, %v3126_v40  ;;  %v3289_v60 = vadd.f32 %v3273_v38, %v3129_v0  ;;  %v3431_v39 = vmul.f32 %v8000_v35, %v17701_v25  ;;  %v6025_v9 = vmul.f32 %v8485_v55, %v17771_v10 }
 0x770   : > { %v2967_v59 = vadd.f32 %v17772_v26, %v2791_v30  ;;  %v6024_v21 = vmul.f32 %v8484_v8, %v17759_v29  ;;  %v15674_v38 = vadd.f32 %v15528_v58, %v15485_v33 }
 0x771   : > { %v15660_v6 = vadd.f32 %v3430_v48, %v3286_v13  ;;  %v15662_v31 = vadd.f32 %v3433_v18, %v3289_v60  ;;  %v15668_v5 = vadd.f32 %v6025_v9, %v15516_v14  ;;  %v17780_v48 = vld [vmem:[#allocation113_spill] sm:$0xff]  ;;  %v17781_v18 = vld [vmem:[#allocation8_spill] sm:$0xff]  ;;  %v17782_v13 = vld [vmem:[#allocation79_spill] sm:$0xff] }
 0x772   : > { %v3127_v3 = vadd.f32 %v3111_v34, %v2967_v59  ;;  %v15665_v36 = vadd.f32 %v6024_v21, %v15520_v46  ;;  %17778 = vst [vmem:[#allocation61_spill] sm:$0xff] %v15674_v38  ;;  %v17787_v38 = vld [vmem:[#allocation134_spill] sm:$0xff] }
 0x773   : > { %17773 = vst [vmem:[#allocation84_spill] sm:$0xff] %v15660_v6  ;;  %17774 = vst [vmem:[#allocation38_spill] sm:$0xff] %v15662_v31  ;;  %v15676_v29 = vpop.permute.xlu1 %8277  ;;  %v17789_v6 = vld [vmem:[#allocation78_spill] sm:$0xff] }
 0x774   : > { %v3287_v23 = vadd.f32 %v3271_v42, %v3127_v3  ;;  %17775 = vst [vmem:[#allocation37_spill] sm:$0xff] %v15665_v36  ;;  %17776 = vst [vmem:[#allocation87_spill] sm:$0xff] %v15668_v5  ;;  %v17788_v5 = vld [vmem:[#allocation132_spill] sm:$0xff] }
 0x775   : > { %17779 = vst [vmem:[#allocation109_spill] sm:$0xff] %v15676_v29 }
 0x776   : > { %v15670_v63 = vadd.f32 %v3431_v39, %v3287_v23 }
 0x778   : > { %17777 = vst [vmem:[#allocation111_spill] sm:$0xff] %v15670_v63 }
 0x77a   : > { %v8288_v17 = vpop.permute.xlu1 %8287 }
 0x77e   : > { %v8298_v19 = vpop.permute.xlu1 %8297 }
 0x784   : > { %v15678_v30 = vpop.permute.xlu1 %8307 }
 0x785   : > { %v8310_v46 = vunpack.i.h.bf16 %v15678_v30 }
 0x787   : > { %v5379_v10 = vmul.f32 %v17780_v48, %v8310_v46  ;;  %v17783_v46 = vld [vmem:[#allocation27_spill] sm:$0xff]  ;;  %v8289_v48 = vunpack.i.l.bf16 %v8288_v17 }
 0x788   : > { %v8318_v34 = vpop.permute.xlu1 %8317 }
 0x789   : > { %v8320_v33 = vunpack.i.h.bf16 %v8318_v34  ;;  %v8319_v58 = vunpack.i.l.bf16 %v8318_v34  ;;  %v5370_v63 = vmul.f32 %v17787_v38, %v8289_v48 }
 0x78b   : > { %v5383_v8 = vmul.f32 %v8320_v33, %v17768_v50  ;;  %v5382_v60 = vmul.f32 %v17782_v13, %v8319_v58  ;;  %v8290_v50 = vunpack.i.h.bf16 %v8288_v17  ;;  %v8300_v33 = vunpack.i.h.bf16 %v8298_v19 }
 0x78c   : > { %v8328_v35 = vpop.permute.xlu1 %8327  ;;  %v8299_v58 = vunpack.i.l.bf16 %v8298_v19  ;;  %v8249_v17 = vunpack.i.l.bf16 %v15609_v22 }
 0x78d   : > { %v8329_v21 = vunpack.i.l.bf16 %v8328_v35  ;;  %v5371_v31 = vmul.f32 %v17788_v5, %v8290_v50 }
 0x790   : > { %v15680_v40 = vpop.permute.xlu1 %8337 }
 0x794   : > { %v15683_v14 = vpop.permute.xlu1 %8347 }
 0x795   : > { %v8350_v0 = vunpack.i.h.bf16 %v15683_v14 }
 0x797   : > { %v5539_v51 = vmul.f32 %v17781_v18, %v8350_v0  ;;  %v8010_v0 = vunpack.i.h.bf16 %v17783_v46  ;;  %v8493_v18 = vpop.permute.xlu0 %8492 }
 0x798   : > { %v8358_v26 = vpop.permute.xlu1 %8357  ;;  %v8494_v19 = vunpack.i.l.bf16 %v8493_v18 }
 0x799   : > { %v15688_v59 = vadd.f32 %v5539_v51, %v5379_v10  ;;  %v8360_v42 = vunpack.i.h.bf16 %v8358_v26  ;;  %v8359_v55 = vunpack.i.l.bf16 %v8358_v26  ;;  %v8009_v10 = vunpack.i.l.bf16 %v17783_v46 }
 0x79a   : > { %v8495_v46 = vunpack.i.h.bf16 %v8493_v18  ;;  %v8339_v18 = vunpack.i.l.bf16 %v15680_v40 }
 0x79b   : > { %v5543_v3 = vmul.f32 %v15228_v47, %v8360_v42  ;;  %v5542_v39 = vmul.f32 %v8359_v55, %v15232_v41  ;;  %v17784_v47 = vld [vmem:[#allocation13_spill] sm:$0xff]  ;;  %v8330_v42 = vunpack.i.h.bf16 %v8328_v35  ;;  %v17785_v55 = vld [vmem:[#allocation83_spill] sm:$0xff]  ;;  %v17790_v35 = vld [vmem:[#allocation108_spill] sm:$0xff] }
 0x79c   : > { %v15694_v9 = vpop.permute.xlu1 %8367  ;;  %v8015_v41 = vunpack.i.h.bf16 %v17784_v47  ;;  %v8014_v26 = vunpack.i.l.bf16 %v17784_v47  ;;  %v5530_v13 = vmul.f32 %v17785_v55, %v8329_v21  ;;  %v15714_v47 = vmul.f32 %v17789_v6, %v8300_v33 }
 0x79d   : > { %v15696_v23 = vadd.f32 %v5542_v39, %v5382_v60  ;;  %v15698_v34 = vadd.f32 %v5543_v3, %v5383_v8  ;;  %v17786_v8 = vld [vmem:[#allocation125_spill] sm:$0xff]  ;;  %v8250_v39 = vunpack.i.h.bf16 %v15609_v22  ;;  %v5374_v21 = vmul.f32 %v17790_v35, %v8299_v58  ;;  %v17792_v35 = vld [vmem:[#allocation110_spill] sm:$0xff] }
 0x79e   : > { %v8255_v60 = vunpack.i.h.bf16 %v17786_v8  ;;  %v8254_v3 = vunpack.i.l.bf16 %v17786_v8  ;;  %v8309_v55 = vunpack.i.l.bf16 %v15678_v30  ;;  %v17791_v8 = vld [vmem:[#allocation77_spill] sm:$0xff]  ;;  %v5546_v29 = vadd.f32 %v5530_v13, %v5370_v63 }
 0x79f   : > { %v5531_v61 = vmul.f32 %v17791_v8, %v8330_v42  ;;  %v8340_v22 = vunpack.i.h.bf16 %v15680_v40  ;;  %v8370_v38 = vunpack.i.h.bf16 %v15694_v9  ;;  %v8369_v33 = vunpack.i.l.bf16 %v15694_v9  ;;  %v17793_v8 = vld [vmem:[#allocation82_spill] sm:$0xff] }
 0x7a0   : > { %v15702_v51 = vpop.permute.xlu1 %8377 }
 0x7a1   : > { %v8380_v30 = vunpack.i.h.bf16 %v15702_v51  ;;  %v8379_v44 = vunpack.i.l.bf16 %v15702_v51  ;;  %v5690_v51 = vmul.f32 %v15281_v28, %v8369_v33  ;;  %v17797_v28 = vld [vmem:[#allocation19_spill] sm:$0xff] }
 0x7a4   : > { %v15718_v36 = vpop.permute.xlu1 %8387 }
 0x7a5   : > { %v7603_v32 = vpop.f32.mrb[32].mxu0 }
 0x7a6   : > { %v3580_v5 = vmul.f32 %v8014_v26, %v7603_v32  ;;  %v4876_v48 = vmul.f32 %v8254_v3, %v7603_v32  ;;  %v6172_v6 = vmul.f32 %v8494_v19, %v7603_v32  ;;  %v15724_v50 = vpop.f32.mrb[33].mxu0  ;;  %v5547_v19 = vadd.f32 %v5531_v61, %v5371_v31 }
 0x7a7   : > { %v3578_v58 = vmul.f32 %v8009_v10, %v15724_v50  ;;  %v4874_v63 = vmul.f32 %v8249_v17, %v15724_v50  ;;  %v7604_v42 = vpop.f32.mrb[34].mxu0  ;;  %v5535_v10 = vmul.f32 %v17793_v8, %v8340_v22  ;;  %v5534_v17 = vmul.f32 %v17794_v4, %v8339_v18 }
 0x7a8   : > { %v15730_v13 = vpop.permute.xlu1 %8397  ;;  %v15733_v40 = vadd.f32 %v3580_v5, %v15532_v56  ;;  %v15736_v26 = vadd.f32 %v4876_v48, %v17792_v35  ;;  %v15739_v32 = vadd.f32 %v6172_v6, %v15539_v53  ;;  %v3581_v3 = vmul.f32 %v8015_v41, %v7604_v42  ;;  %v15741_v9 = vpop.f32.mrb[35].mxu0  ;;  %v17795_v5 = vld [vmem:[#allocation15_spill] sm:$0xff] }
 0x7a9   : > { %v15753_v56 = vadd.f32 %v3578_v58, %v15546_v27  ;;  %v15756_v53 = vadd.f32 %v4874_v63, %v15499_v12  ;;  %v4877_v4 = vmul.f32 %v8255_v60, %v7604_v42  ;;  %v5691_v31 = vmul.f32 %v15272_v49, %v8370_v38  ;;  %v17796_v12 = vld [vmem:[#allocation4_spill] sm:$0xff] }
 0x7aa   : > { %6222 = vst.msk [vmem:[#allocation3 + $0x10] sm:$0xff] %vm6219_vm2, %v15733_v40  ;;  %6254 = vst.msk [vmem:[#allocation3 + $0x90] sm:$0xff] %vm6219_vm2, %v15736_v26  ;;  %v15759_v61 = vadd.f32 %v3581_v3, %v15550_v20  ;;  %v6173_v41 = vmul.f32 %v8495_v46, %v7604_v42  ;;  %v3579_v22 = vmul.f32 %v8010_v0, %v15741_v9  ;;  %v8349_v18 = vunpack.i.l.bf16 %v15683_v14  ;;  %v17800_v42 = vld [vmem:[#allocation72_spill] sm:$0xff]  ;;  %v17801_v3 = vld [vmem:[#allocation11_spill] sm:$0xff] }
 0x7ab   : > { %6286 = vst.msk [vmem:[#allocation3 + $0x110] sm:$0xff] %vm6219_vm2, %v15739_v32  ;;  %v5695_v48 = vmul.f32 %v17795_v5, %v8380_v30  ;;  %6220 = vst.msk [vmem:[#allocation3] sm:$0xff] %vm6219_vm2, %v15753_v56  ;;  %v15771_v20 = vadd.f32 %v4877_v4, %v17796_v12  ;;  %v4875_v49 = vmul.f32 %v8250_v39, %v15741_v9  ;;  %v8390_v14 = vunpack.i.h.bf16 %v15718_v36 }
 0x7ac   : > { %v8408_v27 = vpop.permute.xlu1 %8407  ;;  %6252 = vst.msk [vmem:[#allocation3 + $0x80] sm:$0xff] %vm6219_vm2, %v15756_v53  ;;  %6223 = vst.msk [vmem:[#allocation3 + $0x18] sm:$0xff] %vm6219_vm2, %v15759_v61  ;;  %v5694_v0 = vmul.f32 %v17797_v28, %v8379_v44  ;;  %v8389_v38 = vunpack.i.l.bf16 %v15718_v36  ;;  %v15780_v6 = vadd.f32 %v6173_v41, %v15541_v24  ;;  %v15785_v33 = vadd.f32 %v3579_v22, %v15554_v57 }
 0x7ad   : > { %v8410_v60 = vunpack.i.h.bf16 %v8408_v27  ;;  %v8409_v46 = vunpack.i.l.bf16 %v8408_v27  ;;  %6255 = vst.msk [vmem:[#allocation3 + $0x98] sm:$0xff] %vm6219_vm2, %v15771_v20  ;;  %v15788_v30 = vadd.f32 %v4875_v49, %v15557_v2  ;;  %v5706_v39 = vadd.f32 %v5690_v51, %v5546_v29 }
 0x7ae   : > { %17798 = vst [vmem:[#allocation103_spill] sm:$0xff] %v15785_v33  ;;  %v5707_v44 = vadd.f32 %v5691_v31, %v5547_v19  ;;  %v5378_v36 = vmul.f32 %v17800_v42, %v8309_v55  ;;  %v5550_v35 = vadd.f32 %v5534_v17, %v5374_v21  ;;  %v5551_v24 = vadd.f32 %v5535_v10, %v15714_v47  ;;  %v17802_v55 = vld [vmem:[#allocation18_spill] sm:$0xff]  ;;  %v17803_v19 = vld [vmem:[#allocation12_spill] sm:$0xff] }
 0x7af   : > { %17799 = vst [vmem:[#allocation99_spill] sm:$0xff] %v15788_v30  ;;  %v5851_v58 = vmul.f32 %v8410_v60, %v17677_v7  ;;  %v5850_v63 = vmul.f32 %v8409_v46, %v17678_v11  ;;  %v5538_v8 = vmul.f32 %v17801_v3, %v8349_v18  ;;  %6287 = vst.msk [vmem:[#allocation3 + $0x118] sm:$0xff] %vm6219_vm2, %v15780_v6  ;;  %v8400_v17 = vunpack.i.h.bf16 %v15730_v13  ;;  %v17804_v60 = vld [vmem:[#allocation52_spill] sm:$0xff] }
 0x7b0   : > { %6221 = vst.msk [vmem:[#allocation3 + $0x8] sm:$0xff] %vm6219_vm2, %v15785_v33  ;;  %6253 = vst.msk [vmem:[#allocation3 + $0x88] sm:$0xff] %vm6219_vm2, %v15788_v30  ;;  %v5710_v29 = vadd.f32 %v5694_v0, %v5550_v35  ;;  %v5711_v21 = vadd.f32 %v5695_v48, %v5551_v24  ;;  %v5699_v47 = vmul.f32 %v17802_v55, %v8390_v14  ;;  %v8399_v31 = vunpack.i.l.bf16 %v15730_v13  ;;  %v17805_v13 = vld [vmem:[#allocation50_spill] sm:$0xff]  ;;  %v17809_v55 = vld [vmem:[#allocation140_spill] sm:$0xff] }
 0x7b1   : > { %v8418_v4 = vpop.permute.xlu1 %8417  ;;  %v5866_v7 = vadd.f32 %v5850_v63, %v5706_v39  ;;  %v5867_v57 = vadd.f32 %v5851_v58, %v5707_v44  ;;  %v5698_v10 = vmul.f32 %v17803_v19, %v8389_v38  ;;  %v5554_v22 = vadd.f32 %v5538_v8, %v5378_v36  ;;  %v8503_v36 = vpop.permute.xlu0 %8502  ;;  %v17846_v30 = vld [vmem:[#allocation37_spill] sm:$0xff] }
 0x7b2   : > { %v8420_v11 = vunpack.i.h.bf16 %v8418_v4  ;;  %v8419_v2 = vunpack.i.l.bf16 %v8418_v4  ;;  %v5715_v48 = vadd.f32 %v5699_v47, %v15688_v59  ;;  %v5703_v0 = vmul.f32 %v8400_v17, %v15367_v15  ;;  %v17806_v4 = vld [vmem:[#allocation32_spill] sm:$0xff]  ;;  %v17810_v47 = vld [vmem:[#allocation138_spill] sm:$0xff] }
 0x7b3   : > { %v5714_v28 = vadd.f32 %v5698_v10, %v5554_v22  ;;  %v5702_v14 = vmul.f32 %v8399_v31, %v15384_v52  ;;  %v8260_v17 = vunpack.i.h.bf16 %v15642_v45  ;;  %v8259_v31 = vunpack.i.l.bf16 %v15642_v45 }
 0x7b4   : > { %v5855_v51 = vmul.f32 %v8420_v11, %v17679_v62  ;;  %v5854_v41 = vmul.f32 %v8419_v2, %v17680_v16  ;;  %v5719_v42 = vadd.f32 %v5703_v0, %v15698_v34  ;;  %v8020_v11 = vunpack.i.h.bf16 %v17806_v4 }
 0x7b5   : > { %v8428_v18 = vpop.permute.xlu1 %8427  ;;  %v5718_v63 = vadd.f32 %v5702_v14, %v15696_v23  ;;  %v8019_v2 = vunpack.i.l.bf16 %v17806_v4 }
 0x7b6   : > { %v5870_v5 = vadd.f32 %v5854_v41, %v5710_v29  ;;  %v5871_v27 = vadd.f32 %v5855_v51, %v5711_v21  ;;  %v8430_v12 = vunpack.i.h.bf16 %v8428_v18  ;;  %v8429_v49 = vunpack.i.l.bf16 %v8428_v18  ;;  %v17807_v29 = vld [vmem:[#allocation120_spill] sm:$0xff]  ;;  %v17808_v21 = vld [vmem:[#allocation159_spill] sm:$0xff] }
 0x7b7   : > { %v8025_v23 = vunpack.i.h.bf16 %v17807_v29  ;;  %v8024_v34 = vunpack.i.l.bf16 %v17807_v29  ;;  %v8264_v10 = vunpack.i.l.bf16 %v17808_v21  ;;  %v8504_v51 = vunpack.i.l.bf16 %v8503_v36 }
 0x7b8   : > { %v5859_v46 = vmul.f32 %v8430_v12, %v17804_v60  ;;  %v5858_v38 = vmul.f32 %v8429_v49, %v17805_v13  ;;  %v17811_v13 = vld [vmem:[#allocation147_spill] sm:$0xff] }
 0x7b9   : > { %v8438_v62 = vpop.permute.xlu1 %8437 }
 0x7ba   : > { %v15812_v39 = vadd.f32 %v5858_v38, %v5714_v28  ;;  %v15814_v16 = vadd.f32 %v5859_v46, %v5715_v48  ;;  %v8440_v44 = vunpack.i.h.bf16 %v8438_v62  ;;  %v8439_v58 = vunpack.i.l.bf16 %v8438_v62  ;;  %v17812_v62 = vld [vmem:[#allocation144_spill] sm:$0xff] }
 0x7bb   : > { %v8505_v48 = vunpack.i.h.bf16 %v8503_v36 }
 0x7bc   : > { %v5863_v59 = vmul.f32 %v8440_v44, %v17683_v1  ;;  %v5862_v15 = vmul.f32 %v8439_v58, %v17684_v54  ;;  %v8265_v1 = vunpack.i.h.bf16 %v17808_v21 }
 0x7bd   : > { %v8448_v52 = vpop.permute.xlu1 %8447 }
 0x7be   : > { %v15820_v35 = vadd.f32 %v5862_v15, %v5718_v63  ;;  %v15822_v24 = vadd.f32 %v5863_v59, %v5719_v42  ;;  %v8450_v3 = vunpack.i.h.bf16 %v8448_v52  ;;  %v8449_v8 = vunpack.i.l.bf16 %v8448_v52  ;;  %v17815_v52 = vld [vmem:[#allocation29_spill] sm:$0xff] }
 0x7c0   : > { %v6011_v54 = vmul.f32 %v8450_v3, %v17809_v55  ;;  %v6010_v19 = vmul.f32 %v8449_v8, %v17810_v47 }
 0x7c1   : > { %v8458_v41 = vpop.permute.xlu1 %8457  ;;  %v7607_v28 = vpop.f32.mrb[16].mxu1 }
 0x7c2   : > { %v15834_v22 = vadd.f32 %v6010_v19, %v5866_v7  ;;  %v15836_v18 = vadd.f32 %v6011_v54, %v5867_v57  ;;  %v8460_v12 = vunpack.i.h.bf16 %v8458_v41  ;;  %v8459_v49 = vunpack.i.l.bf16 %v8458_v41  ;;  %v2263_v46 = vpop.f32.mrb[17].mxu1  ;;  %v17813_v7 = vld [vmem:[#allocation26_spill] sm:$0xff]  ;;  %v17814_v57 = vld [vmem:[#allocation100_spill] sm:$0xff] }
 0x7c3   : > { %v3584_v0 = vmul.f32 %v8024_v34, %v7607_v28  ;;  %v4880_v14 = vmul.f32 %v8264_v10, %v7607_v28  ;;  %v6176_v60 = vmul.f32 %v8504_v51, %v7607_v28  ;;  %v3582_v58 = vmul.f32 %v8019_v2, %v2263_v46  ;;  %v7608_v63 = vpop.f32.mrb[18].mxu1  ;;  %v17816_v2 = vld [vmem:[#allocation118_spill] sm:$0xff]  ;;  %v17819_v19 = vld [vmem:[#allocation152_spill] sm:$0xff] }
 0x7c4   : > { %v6015_v38 = vmul.f32 %v8460_v12, %v17811_v13  ;;  %v6014_v44 = vmul.f32 %v8459_v49, %v17812_v62  ;;  %v4878_v45 = vmul.f32 %v8259_v31, %v2263_v46  ;;  %v3585_v3 = vmul.f32 %v8025_v23, %v7608_v63  ;;  %v2266_v8 = vpop.f32.mrb[19].mxu1  ;;  %v17817_v54 = vld [vmem:[#allocation22_spill] sm:$0xff]  ;;  %v17821_v28 = vld [vmem:[#allocation104_spill] sm:$0xff] }
 0x7c5   : > { %v8468_v42 = vpop.permute.xlu1 %8467  ;;  %v15841_v59 = vadd.f32 %v3584_v0, %v17813_v7  ;;  %v15844_v15 = vadd.f32 %v4880_v14, %v17814_v57  ;;  %v15847_v36 = vadd.f32 %v6176_v60, %v17815_v52  ;;  %v15856_v55 = vadd.f32 %v3582_v58, %v17816_v2  ;;  %v17818_v23 = vld [vmem:[#allocation174_spill] sm:$0xff]  ;;  %v17822_v13 = vld [vmem:[#allocation40_spill] sm:$0xff] }
 0x7c6   : > { %v6030_v4 = vadd.f32 %v6014_v44, %v5870_v5  ;;  %v6031_v29 = vadd.f32 %v6015_v38, %v5871_v27  ;;  %v8470_v34 = vunpack.i.h.bf16 %v8468_v42  ;;  %v8469_v21 = vunpack.i.l.bf16 %v8468_v42  ;;  %v17820_v31 = vld [vmem:[#allocation150_spill] sm:$0xff]  ;;  %v17824_v58 = vld [vmem:[#allocation148_spill] sm:$0xff] }
 0x7c7   : > { %6226 = vst.msk [vmem:[#allocation3 + $0x30] sm:$0xff] %vm6219_vm2, %v15841_v59  ;;  %6258 = vst.msk [vmem:[#allocation3 + $0xb0] sm:$0xff] %vm6219_vm2, %v15844_v15  ;;  %v15859_v47 = vadd.f32 %v4878_v45, %v17817_v54  ;;  %v15862_v5 = vadd.f32 %v3585_v3, %v17818_v23  ;;  %v4881_v27 = vmul.f32 %v8265_v1, %v7608_v63  ;;  %v17823_v62 = vld [vmem:[#allocation30_spill] sm:$0xff]  ;;  %v17827_v54 = vld [vmem:[#allocation168_spill] sm:$0xff] }
 0x7c8   : > { %6290 = vst.msk [vmem:[#allocation3 + $0x130] sm:$0xff] %vm6219_vm2, %v15847_v36  ;;  %v6019_v10 = vmul.f32 %v8470_v34, %v17819_v19  ;;  %v6018_v51 = vmul.f32 %v8469_v21, %v17820_v31  ;;  %v6177_v41 = vmul.f32 %v8505_v48, %v7608_v63  ;;  %v3583_v12 = vmul.f32 %v8020_v11, %v2266_v8  ;;  %v17828_v19 = vld [vmem:[#allocation10_spill] sm:$0xff] }
 0x7c9   : > { %v8478_v49 = vpop.permute.xlu1 %8477  ;;  %6224 = vst.msk [vmem:[#allocation3 + $0x20] sm:$0xff] %vm6219_vm2, %v15856_v55  ;;  %6256 = vst.msk [vmem:[#allocation3 + $0xa0] sm:$0xff] %vm6219_vm2, %v15859_v47  ;;  %v15871_v0 = vadd.f32 %v4881_v27, %v17821_v28  ;;  %v4879_v1 = vmul.f32 %v8260_v17, %v2266_v8  ;;  %v8030_v23 = vunpack.i.h.bf16 %v17827_v54  ;;  %v8029_v27 = vunpack.i.l.bf16 %v17827_v54 }
 0x7ca   : > { %6227 = vst.msk [vmem:[#allocation3 + $0x38] sm:$0xff] %vm6219_vm2, %v15862_v5  ;;  %v15876_v14 = vadd.f32 %v6018_v51, %v15812_v39  ;;  %v15879_v48 = vadd.f32 %v6019_v10, %v15814_v16  ;;  %v8480_v11 = vunpack.i.h.bf16 %v8478_v49  ;;  %v8479_v60 = vunpack.i.l.bf16 %v8478_v49 }
 0x7cb   : > { %v15882_v38 = vadd.f32 %v6177_v41, %v17822_v13  ;;  %6259 = vst.msk [vmem:[#allocation3 + $0xb8] sm:$0xff] %vm6219_vm2, %v15871_v0  ;;  %v15887_v44 = vadd.f32 %v3583_v12, %v17823_v62  ;;  %v15890_v45 = vadd.f32 %v4879_v1, %v17824_v58  ;;  %v8035_v10 = vunpack.i.h.bf16 %v17828_v19 }
 0x7cc   : > { %v6023_v39 = vmul.f32 %v8480_v11, %v17701_v25  ;;  %v6022_v17 = vmul.f32 %v8479_v60, %v17708_v43  ;;  %v8270_v51 = vunpack.i.h.bf16 %v15658_v37  ;;  %v8269_v41 = vunpack.i.l.bf16 %v15658_v37 }
 0x7cd   : > { %v8488_v16 = vpop.permute.xlu1 %8487  ;;  %6291 = vst.msk [vmem:[#allocation3 + $0x138] sm:$0xff] %vm6219_vm2, %v15882_v38  ;;  %6225 = vst.msk [vmem:[#allocation3 + $0x28] sm:$0xff] %vm6219_vm2, %v15887_v44 }
 0x7ce   : > { %6257 = vst.msk [vmem:[#allocation3 + $0xa8] sm:$0xff] %vm6219_vm2, %v15890_v45  ;;  %v15901_v63 = vadd.f32 %v6022_v17, %v15820_v35  ;;  %v8490_v42 = vunpack.i.h.bf16 %v8488_v16  ;;  %v8489_v7 = vunpack.i.l.bf16 %v8488_v16  ;;  %v15904_v57 = vadd.f32 %v6023_v39, %v15822_v24 }
 0x7d0   : > { %v6171_v25 = vmul.f32 %v8490_v42, %v15741_v9  ;;  %v6170_v43 = vmul.f32 %v8489_v7, %v15724_v50  ;;  %v17830_v42 = vld [vmem:[#allocation6_spill] sm:$0xff] }
 0x7d1   : > { %v8498_v52 = vpop.permute.xlu1 %8497 }
 0x7d2   : > { %v15909_v3 = vadd.f32 %v6170_v43, %v15834_v22  ;;  %v15912_v34 = vadd.f32 %v6171_v25, %v15836_v18  ;;  %v8500_v21 = vunpack.i.h.bf16 %v8498_v52  ;;  %v8499_v2 = vunpack.i.l.bf16 %v8498_v52  ;;  %v8513_v22 = vpop.permute.xlu0 %8512  ;;  %v17831_v25 = vld [vmem:[#allocation63_spill] sm:$0xff]  ;;  %v17832_v52 = vld [vmem:[#allocation33_spill] sm:$0xff] }
 0x7d3   : > { %v8515_v28 = vunpack.i.h.bf16 %v8513_v22 }
 0x7d4   : > { %17825 = vst [vmem:[#allocation101_spill] sm:$0xff] %v15909_v3  ;;  %17826 = vst [vmem:[#allocation86_spill] sm:$0xff] %v15912_v34  ;;  %v6174_v35 = vmul.f32 %v8499_v2, %v2263_v46  ;;  %v6175_v24 = vmul.f32 %v8500_v21, %v2266_v8  ;;  %v8034_v46 = vunpack.i.l.bf16 %v17828_v19  ;;  %v17829_v8 = vld [vmem:[#allocation97_spill] sm:$0xff]  ;;  %v17835_v19 = vld [vmem:[#allocation59_spill] sm:$0xff] }
 0x7d5   : > { %6284 = vst.msk [vmem:[#allocation3 + $0x100] sm:$0xff] %vm6219_vm2, %v15909_v3  ;;  %6285 = vst.msk [vmem:[#allocation3 + $0x108] sm:$0xff] %vm6219_vm2, %v15912_v34  ;;  %v8508_v18 = vpop.permute.xlu1 %8507  ;;  %v8275_v31 = vunpack.i.h.bf16 %v17829_v8 }
 0x7d6   : > { %v15918_v9 = vadd.f32 %v6174_v35, %v6030_v4  ;;  %v15920_v50 = vadd.f32 %v6175_v24, %v6031_v29  ;;  %v8274_v4 = vunpack.i.l.bf16 %v17829_v8  ;;  %v8514_v29 = vunpack.i.l.bf16 %v8513_v22  ;;  %v17833_v35 = vld [vmem:[#allocation180_spill] sm:$0xff]  ;;  %v17834_v22 = vld [vmem:[#allocation7_spill] sm:$0xff] }
 0x7d7   : > { %v8509_v12 = vunpack.i.l.bf16 %v8508_v18  ;;  %v8510_v62 = vunpack.i.h.bf16 %v8508_v18 }
 0x7d8   : > { %6288 = vst.msk [vmem:[#allocation3 + $0x120] sm:$0xff] %vm6219_vm2, %v15918_v9  ;;  %6289 = vst.msk [vmem:[#allocation3 + $0x128] sm:$0xff] %vm6219_vm2, %v15920_v50 }
 0x7db   : > { %v7611_v49 = vpop.f32.mrb[20].mxu1 }
 0x7dc   : > { %v3588_v1 = vmul.f32 %v8034_v46, %v7611_v49  ;;  %v4884_v11 = vmul.f32 %v8274_v4, %v7611_v49  ;;  %v6180_v60 = vmul.f32 %v8514_v29, %v7611_v49  ;;  %v2279_v13 = vpop.f32.mrb[21].mxu1  ;;  %v17839_v49 = vld [vmem:[#allocation158_spill] sm:$0xff] }
 0x7dd   : > { %v3586_v58 = vmul.f32 %v8029_v27, %v2279_v13  ;;  %v4882_v39 = vmul.f32 %v8269_v41, %v2279_v13  ;;  %v6178_v17 = vmul.f32 %v8509_v12, %v2279_v13  ;;  %v7612_v16 = vpop.f32.mrb[22].mxu1  ;;  %v17837_v41 = vld [vmem:[#allocation67_spill] sm:$0xff] }
 0x7de   : > { %v15935_v7 = vadd.f32 %v3588_v1, %v17830_v42  ;;  %v15938_v43 = vadd.f32 %v4884_v11, %v17831_v25  ;;  %v15941_v37 = vadd.f32 %v6180_v60, %v17832_v52  ;;  %v3589_v21 = vmul.f32 %v8035_v10, %v7612_v16  ;;  %v2282_v2 = vpop.f32.mrb[23].mxu1  ;;  %v8523_v1 = vpop.permute.xlu0 %8522  ;;  %v17840_v13 = vld [vmem:[#allocation127_spill] sm:$0xff] }
 0x7df   : > { %v15944_v24 = vadd.f32 %v3586_v58, %v17833_v35  ;;  %v15947_v18 = vadd.f32 %v4882_v39, %v17834_v22  ;;  %v15950_v54 = vadd.f32 %v6178_v17, %v15876_v14  ;;  %v4885_v27 = vmul.f32 %v8275_v31, %v7612_v16  ;;  %v17836_v14 = vld [vmem:[#allocation65_spill] sm:$0xff]  ;;  %v8518_v60 = vpop.permute.xlu1 %8517  ;;  %v17841_v39 = vld [vmem:[#allocation156_spill] sm:$0xff] }
 0x7e0   : > { %6230 = vst.msk [vmem:[#allocation3 + $0x50] sm:$0xff] %vm6219_vm2, %v15935_v7  ;;  %6262 = vst.msk [vmem:[#allocation3 + $0xd0] sm:$0xff] %vm6219_vm2, %v15938_v43  ;;  %v15959_v10 = vadd.f32 %v3589_v21, %v17835_v19  ;;  %v6181_v46 = vmul.f32 %v8515_v28, %v7612_v16  ;;  %v3587_v8 = vmul.f32 %v8030_v23, %v2282_v2  ;;  %v17838_v23 = vld [vmem:[#allocation34_spill] sm:$0xff]  ;;  %v8044_v58 = vunpack.i.l.bf16 %v17840_v13  ;;  %v17842_v16 = vld [vmem:[#allocation5_spill] sm:$0xff] }
 0x7e1   : > { %6294 = vst.msk [vmem:[#allocation3 + $0x150] sm:$0xff] %vm6219_vm2, %v15941_v37  ;;  %v4883_v4 = vmul.f32 %v8270_v51, %v2282_v2  ;;  %6228 = vst.msk [vmem:[#allocation3 + $0x40] sm:$0xff] %vm6219_vm2, %v15944_v24  ;;  %v15968_v29 = vadd.f32 %v4885_v27, %v17836_v14  ;;  %v6179_v31 = vmul.f32 %v8510_v62, %v2282_v2  ;;  %v8045_v62 = vunpack.i.h.bf16 %v17840_v13  ;;  %v17843_v21 = vld [vmem:[#allocation109_spill] sm:$0xff] }
 0x7e2   : > { %6260 = vst.msk [vmem:[#allocation3 + $0xc0] sm:$0xff] %vm6219_vm2, %v15947_v18  ;;  %6292 = vst.msk [vmem:[#allocation3 + $0x140] sm:$0xff] %vm6219_vm2, %v15950_v54  ;;  %v15971_v12 = vadd.f32 %v6181_v46, %v17837_v41  ;;  %v15976_v51 = vadd.f32 %v3587_v8, %v17838_v23  ;;  %v8039_v17 = vunpack.i.l.bf16 %v17841_v39  ;;  %v8284_v42 = vunpack.i.l.bf16 %v17842_v16 }
 0x7e3   : > { %6231 = vst.msk [vmem:[#allocation3 + $0x58] sm:$0xff] %vm6219_vm2, %v15959_v10  ;;  %v15979_v28 = vadd.f32 %v4883_v4, %v17839_v49  ;;  %6263 = vst.msk [vmem:[#allocation3 + $0xd8] sm:$0xff] %vm6219_vm2, %v15968_v29  ;;  %v15984_v11 = vadd.f32 %v6179_v31, %v15879_v48  ;;  %v8040_v48 = vunpack.i.h.bf16 %v17841_v39  ;;  %v8524_v25 = vunpack.i.l.bf16 %v8523_v1  ;;  %v17844_v39 = vld [vmem:[#allocation145_spill] sm:$0xff] }
 0x7e4   : > { %6295 = vst.msk [vmem:[#allocation3 + $0x158] sm:$0xff] %vm6219_vm2, %v15971_v12  ;;  %6229 = vst.msk [vmem:[#allocation3 + $0x48] sm:$0xff] %vm6219_vm2, %v15976_v51  ;;  %v8285_v52 = vunpack.i.h.bf16 %v17842_v16  ;;  %v8280_v2 = vunpack.i.h.bf16 %v17843_v21  ;;  %v8279_v35 = vunpack.i.l.bf16 %v17843_v21  ;;  %v8519_v22 = vunpack.i.l.bf16 %v8518_v60  ;;  %v17845_v16 = vld [vmem:[#allocation73_spill] sm:$0xff] }
 0x7e5   : > { %6261 = vst.msk [vmem:[#allocation3 + $0xc8] sm:$0xff] %vm6219_vm2, %v15979_v28  ;;  %6293 = vst.msk [vmem:[#allocation3 + $0x148] sm:$0xff] %vm6219_vm2, %v15984_v11  ;;  %v8525_v19 = vunpack.i.h.bf16 %v8523_v1  ;;  %v8520_v31 = vunpack.i.h.bf16 %v8518_v60 }
 0x7ea   : > { %v7615_v27 = vpop.f32.mrb[24].mxu1 }
 0x7eb   : > { %v3592_v46 = vmul.f32 %v8044_v58, %v7615_v27  ;;  %v4888_v8 = vmul.f32 %v8284_v42, %v7615_v27  ;;  %v6184_v4 = vmul.f32 %v8524_v25, %v7615_v27  ;;  %v2295_v14 = vpop.f32.mrb[25].mxu1  ;;  %v17847_v58 = vld [vmem:[#allocation84_spill] sm:$0xff]  ;;  %v17848_v25 = vld [vmem:[#allocation39_spill] sm:$0xff] }
 0x7ec   : > { %v3590_v41 = vmul.f32 %v8039_v17, %v2295_v14  ;;  %v4886_v23 = vmul.f32 %v8279_v35, %v2295_v14  ;;  %v6182_v49 = vmul.f32 %v8519_v22, %v2295_v14  ;;  %v7616_v13 = vpop.f32.mrb[26].mxu1 }
 0x7ed   : > { %v16003_v34 = vadd.f32 %v3592_v46, %v17844_v39  ;;  %v16006_v3 = vadd.f32 %v4888_v8, %v17845_v16  ;;  %v16009_v21 = vadd.f32 %v6184_v4, %v17846_v30  ;;  %v3593_v33 = vmul.f32 %v8045_v62, %v7616_v13  ;;  %v2298_v1 = vpop.f32.mrb[27].mxu1  ;;  %v17849_v30 = vld [vmem:[#allocation38_spill] sm:$0xff]  ;;  %v17851_v4 = vld [vmem:[#allocation87_spill] sm:$0xff]  ;;  %v6353_v39 = vld [vmem:[%s16267_s4 + $0x8] sm:$0xff] (!%p7350_p9) }
 0x7ee   : > { %v16012_v42 = vadd.f32 %v3590_v41, %v17847_v58  ;;  %v16015_v60 = vadd.f32 %v4886_v23, %v17848_v25  ;;  %v16018_v17 = vadd.f32 %v6182_v49, %v15901_v63  ;;  %v4889_v35 = vmul.f32 %v8285_v52, %v7616_v13  ;;  %v17850_v63 = vld [vmem:[#allocation66_spill] sm:$0xff]  ;;  %6303 = sbr.rel (%p7350_p9) target bundleno = 2296 (0x8f8), region = 56  ;;  %v6352_v23 = vld [vmem:[%s16267_s4] sm:$0xff] (!%p7350_p9) }
 0x7ef   : > { %6234 = vst.msk [vmem:[#allocation3 + $0x70] sm:$0xff] %vm6219_vm2, %v16003_v34  ;;  %6266 = vst.msk [vmem:[#allocation3 + $0xf0] sm:$0xff] %vm6219_vm2, %v16006_v3  ;;  %v16027_v62 = vadd.f32 %v3593_v33, %v17849_v30  ;;  %v6185_v22 = vmul.f32 %v8525_v19, %v7616_v13  ;;  %v3591_v27 = vmul.f32 %v8040_v48, %v2298_v1  ;;  %v17852_v33 = vld [vmem:[#allocation111_spill] sm:$0xff]  ;;  %v6378_v16 = vld [vmem:[%s16268_s5 + $0x10] sm:$0xff] (!%p7350_p9) }
 0x7f0   : > { %6298 = vst.msk [vmem:[#allocation3 + $0x170] sm:$0xff] %vm6219_vm2, %v16009_v21  ;;  %v4887_v46 = vmul.f32 %v8280_v2, %v2298_v1  ;;  %6232 = vst.msk [vmem:[#allocation3 + $0x60] sm:$0xff] %vm6219_vm2, %v16012_v42  ;;  %v16036_v52 = vadd.f32 %v4889_v35, %v17850_v63  ;;  %v6183_v8 = vmul.f32 %v8520_v31, %v2298_v1  ;;  %v17853_v2 = vld [vmem:[#allocation61_spill] sm:$0xff]  ;;  %v6379_v1 = vld [vmem:[%s16268_s5 + $0x18] sm:$0xff] (!%p7350_p9) }
 0x7f1   : > { %6264 = vst.msk [vmem:[#allocation3 + $0xe0] sm:$0xff] %vm6219_vm2, %v16015_v60  ;;  %6296 = vst.msk [vmem:[#allocation3 + $0x160] sm:$0xff] %vm6219_vm2, %v16018_v17  ;;  %v16039_v14 = vadd.f32 %v6185_v22, %v17851_v4  ;;  %v16044_v48 = vadd.f32 %v3591_v27, %v17852_v33  ;;  %v6377_v31 = vld [vmem:[%s16268_s5 + $0x8] sm:$0xff] (!%p7350_p9)  ;;  %v6306_v49 = vadd.f32 (!%p7350_p9), %v15736_v26, %v15733_v40  ;;  %v6354_v35 = vld [vmem:[%s16267_s4 + $0x10] sm:$0xff] (!%p7350_p9) }
 0x7f2   : > { %6235 = vst.msk [vmem:[#allocation3 + $0x78] sm:$0xff] %vm6219_vm2, %v16027_v62  ;;  %v16047_v19 = vadd.f32 %v4887_v46, %v17853_v2  ;;  %6267 = vst.msk [vmem:[#allocation3 + $0xf8] sm:$0xff] %vm6219_vm2, %v16036_v52  ;;  %v16052_v41 = vadd.f32 %v6183_v8, %v15904_v57  ;;  %v6376_v57 = vld [vmem:[%s16268_s5] sm:$0xff] (!%p7350_p9)  ;;  %v7697_v58 = vpack.c.bf16 (!%p7350_p9), %v6353_v39, %v6352_v23  ;;  %v6355_v40 = vld [vmem:[%s16267_s4 + $0x18] sm:$0xff] (!%p7350_p9) }
 0x7f3   : > { %6299 = vst.msk [vmem:[#allocation3 + $0x178] sm:$0xff] %vm6219_vm2, %v16039_v14  ;;  %6233 = vst.msk [vmem:[#allocation3 + $0x68] sm:$0xff] %vm6219_vm2, %v16044_v48  ;;  %v7689_v13 = vpack.c.bf16 (!%p7350_p9), %v6377_v31, %v6376_v57  ;;  %v7693_v25 = vpack.c.bf16 (!%p7350_p9), %v6379_v1, %v6378_v16  ;;  %v6360_v26 = vld [vmem:[%s8758_s21] sm:$0xff] (!%p7350_p9)  ;;  %v6322_v30 = vadd.f32 (!%p7350_p9), %v6306_v49, %v15739_v32  ;;  %v6357_v46 = vld [vmem:[%s16267_s4 + $0x28] sm:$0xff] (!%p7350_p9) }
 0x7f4   : > { %6265 = vst.msk [vmem:[#allocation3 + $0xe8] sm:$0xff] %vm6219_vm2, %v16047_v19  ;;  %6297 = vst.msk [vmem:[#allocation3 + $0x168] sm:$0xff] %vm6219_vm2, %v16052_v41  ;;  %v7701_v22 = vpack.c.bf16 (!%p7350_p9), %v6355_v40, %v6354_v35  ;;  %7625 = vmatprep.mubr.msk.f32.mxu0 (!%p7350_p9), %vm6380_vm1, %v6360_v26  ;;  %v6356_v27 = vld [vmem:[%s16267_s4 + $0x20] sm:$0xff] (!%p7350_p9)  ;;  %7729 = vmatprep.subr.bf16.mxu1 (!%p7350_p9), %v7697_v58  ;;  %v6358_v8 = vld [vmem:[%s16267_s4 + $0x30] sm:$0xff] (!%p7350_p9)  ;;  %v6307_v2 = vadd.f32 (!%p7350_p9), %v15771_v20, %v15759_v61 }
 0x7f5   : > { %7690 = vmatprep.subr.bf16.mxu0 %v7689_v13  ;;  %v6338_v63 = vmul.f32 0.33333334, %v6322_v30  ;;  %7733 = vmatpush3.bf16.msra.mxu1 %v7697_v58  ;;  %v7705_v32 = vpack.c.bf16 %v6357_v46, %v6356_v27  ;;  %v6359_v4 = vld [vmem:[%s16267_s4 + $0x38] sm:$0xff]  ;;  %v6361_v33 = vld [vmem:[%s8758_s21 + $0x8] sm:$0xff]  ;;  %v6362_v57 = vld [vmem:[%s8758_s21 + $0x10] sm:$0xff]  ;;  %v6308_v31 = vadd.f32 %v15859_v47, %v15856_v55  ;;  %v6309_v61 = vadd.f32 %v15890_v45, %v15887_v44 }
 0x7f6   : > { %7692 = vmatpush3.bf16.msra.mxu0 %v7689_v13  ;;  %7730 = vmatprep.subr.bf16.mxu1 %v7701_v22  ;;  %v7709_v23 = vpack.c.bf16 %v6359_v4, %v6358_v8  ;;  %v6363_v49 = vld [vmem:[%s8758_s21 + $0x18] sm:$0xff]  ;;  %v6323_v13 = vadd.f32 %v6307_v2, %v15780_v6  ;;  %v6364_v20 = vld [vmem:[%s8758_s21 + $0x20] sm:$0xff]  ;;  %v6310_v47 = vadd.f32 %v15844_v15, %v15841_v59  ;;  %v6365_v39 = vld [vmem:[%s8758_s21 + $0x28] sm:$0xff] }
 0x7f7   : > { %7694 = vmatprep.subr.bf16.mxu0 %v7693_v25  ;;  %7668 = vmatprep.mubr.msk.f32.mxu1 %vm6219_vm2, %v6338_v63  ;;  %v6324_v55 = vadd.f32 %v6308_v31, %v15918_v9  ;;  %v6325_v16 = vadd.f32 %v6309_v61, %v15920_v50  ;;  %v6311_v44 = vadd.f32 %v15871_v0, %v15862_v5  ;;  %v6366_v45 = vld [vmem:[%s8758_s21 + $0x30] sm:$0xff]  ;;  %v6367_v50 = vld [vmem:[%s8758_s21 + $0x38] sm:$0xff] }
 0x7f8   : > { %v6339_v6 = vmul.f32 0.33333334, %v6323_v13  ;;  %v6326_v59 = vadd.f32 %v6310_v47, %v15847_v36  ;;  %v6312_v15 = vadd.f32 %v15947_v18, %v15944_v24  ;;  %v6313_v0 = vadd.f32 %v15979_v28, %v15976_v51  ;;  %v6368_v36 = vld [vmem:[%s8758_s21 + $0x40] sm:$0xff] }
 0x7f9   : > { %7734 = vmatpush3.bf16.msra.mxu1 %v7701_v22  ;;  %v6340_v9 = vmul.f32 0.33333334, %v6324_v55  ;;  %v6341_v1 = vmul.f32 0.33333334, %v6325_v16  ;;  %v6327_v5 = vadd.f32 %v6311_v44, %v15882_v38  ;;  %v6314_v18 = vadd.f32 %v15938_v43, %v15935_v7  ;;  %v6369_v38 = vld [vmem:[%s8758_s21 + $0x48] sm:$0xff] }
 0x7fa   : > { %7696 = vmatpush3.bf16.msra.mxu0 %v7693_v25  ;;  %7731 = vmatprep.subr.bf16.mxu1 %v7705_v32  ;;  %v6328_v24 = vadd.f32 %v6312_v15, %v15950_v54  ;;  %v6329_v28 = vadd.f32 %v6313_v0, %v15984_v11  ;;  %v6315_v25 = vadd.f32 %v15968_v29, %v15959_v10  ;;  %v6370_v54 = vld [vmem:[%s8758_s21 + $0x50] sm:$0xff]  ;;  %v6371_v11 = vld [vmem:[%s8758_s21 + $0x58] sm:$0xff] }
 0x7fb   : > { %7698 = vmatprep.subr.bf16.mxu0 %v7697_v58  ;;  %v6343_v51 = vmul.f32 0.33333334, %v6327_v5  ;;  %v6330_v43 = vadd.f32 %v6314_v18, %v15941_v37  ;;  %v6316_v35 = vadd.f32 %v16015_v60, %v16012_v42  ;;  %v6317_v40 = vadd.f32 %v16047_v19, %v16044_v48  ;;  %v6372_v42 = vld [vmem:[%s8758_s21 + $0x60] sm:$0xff]  ;;  %v17856_v19 = vld [vmem:[#allocation101_spill] sm:$0xff] }
 0x7fc   : > { %v6344_v7 = vmul.f32 0.33333334, %v6328_v24  ;;  %v6345_v10 = vmul.f32 0.33333334, %v6329_v28  ;;  %v6331_v29 = vadd.f32 %v6315_v25, %v15971_v12  ;;  %v6304_v37 = vadd.f32 %v15756_v53, %v15753_v56  ;;  %v17855_v12 = vld [vmem:[#allocation99_spill] sm:$0xff]  ;;  %v6373_v56 = vld [vmem:[%s8758_s21 + $0x68] sm:$0xff] }
 0x7fd   : > { %7626 = vmatmul.mubr.msk.f32.vlgmr.msra.gmra.mrb[0].mxu0 %vm6380_vm1, %v6361_v33  ;;  %7735 = vmatpush3.bf16.msra.mxu1 %v7705_v32  ;;  %v6346_v60 = vmul.f32 0.33333334, %v6330_v43  ;;  %v6332_v26 = vadd.f32 %v6316_v35, %v16018_v17  ;;  %v6318_v30 = vadd.f32 %v16006_v3, %v16003_v34  ;;  %v6333_v48 = vadd.f32 %v6317_v40, %v16052_v41  ;;  %v6374_v3 = vld [vmem:[%s8758_s21 + $0x70] sm:$0xff]  ;;  %v6375_v41 = vld [vmem:[%s8758_s21 + $0x78] sm:$0xff] }
 0x7fe   : > { %7700 = vmatpush3.bf16.msra.mxu0 %v7697_v58  ;;  %7628 = vmatprep.mubr.msk.f32.mxu0 %vm6380_vm1, %v6362_v57  ;;  %v6342_v58 = vmul.f32 0.33333334, %v6326_v59  ;;  %v6347_v53 = vmul.f32 0.33333334, %v6331_v29  ;;  %v6320_v46 = vadd.f32 %v6304_v37, %v17856_v19  ;;  %v6319_v17 = vadd.f32 %v16036_v52, %v16027_v62 }
 0x7ff   : > { %7702 = vmatprep.subr.bf16.mxu0 %v7701_v22  ;;  %7732 = vmatprep.subr.bf16.mxu1 %v7709_v23  ;;  %v6348_v34 = vmul.f32 0.33333334, %v6332_v26  ;;  %v6334_v63 = vadd.f32 %v6318_v30, %v16009_v21  ;;  %v6349_v4 = vmul.f32 0.33333334, %v6333_v48 }
 0x800   : > { %v6336_v33 = vmul.f32 0.33333334, %v6320_v46  ;;  %v6335_v2 = vadd.f32 %v6319_v17, %v16039_v14 }
 0x801   : > { %7629 = vmatmul.mubr.msk.f32.gmra.mrb[2].mxu0 %vm6380_vm1, %v6363_v49  ;;  %7736 = vmatpush3.bf16.msra.mxu1 %v7709_v23  ;;  %v6350_v62 = vmul.f32 0.33333334, %v6334_v63  ;;  %v16198_v49 = vld [vmem:[%s16269_s6] ss:$0 sm:$0xff] }
 0x802   : > { %7631 = vmatprep.mubr.msk.f32.mxu0 %vm6380_vm1, %v6364_v20  ;;  %7704 = vmatpush3.bf16.msra.mxu0 %v7701_v22  ;;  %v17854_v22 = vld [vmem:[#allocation103_spill] sm:$0xff]  ;;  %v6351_v21 = vmul.f32 0.33333334, %v6335_v2 }
 0x803   : > { %7706 = vmatprep.subr.bf16.mxu0 %v7705_v32  ;;  %v6305_v27 = vadd.f32 %v17855_v12, %v17854_v22 }
 0x804   : > { %7669 = vmatmul.mubr.msk.f32.vlgmr.msra.gmra.mrb[0].mxu1 %vm6219_vm2, %v6339_v6 }
 0x805   : > { %7632 = vmatmul.mubr.msk.f32.gmra.mrb[4].mxu0 %vm6380_vm1, %v6365_v39  ;;  %7671 = vmatprep.mubr.msk.f32.mxu1 %vm6219_vm2, %v6340_v9 }
 0x806   : > { %7634 = vmatprep.mubr.msk.f32.mxu0 %vm6380_vm1, %v6366_v45  ;;  %7708 = vmatpush3.bf16.msra.mxu0 %v7705_v32  ;;  %v17857_v32 = vld [vmem:[#allocation86_spill] sm:$0xff] }
 0x807   : > { %7710 = vmatprep.subr.bf16.mxu0 %v7709_v23  ;;  %v6321_v8 = vadd.f32 %v6305_v27, %v17857_v32 }
 0x808   : > { %7672 = vmatmul.mubr.msk.f32.gmra.mrb[2].mxu1 %vm6219_vm2, %v6341_v1 }
 0x809   : > { %7635 = vmatmul.mubr.msk.f32.gmra.mrb[6].mxu0 %vm6380_vm1, %v6367_v50  ;;  %7674 = vmatprep.mubr.msk.f32.mxu1 %vm6219_vm2, %v6342_v58  ;;  %v6337_v52 = vmul.f32 0.33333334, %v6321_v8 }
 0x80a   : > { %7637 = vmatprep.mubr.msk.f32.mxu0 %vm6380_vm1, %v6368_v36  ;;  %7712 = vmatpush3.bf16.msra.mxu0 %v7709_v23 }
 0x80c   : > { %7675 = vmatmul.mubr.msk.f32.gmra.mrb[4].mxu1 %vm6219_vm2, %v6343_v51 }
 0x80d   : > { %7638 = vmatmul.mubr.msk.f32.gmra.mrb[8].mxu0 %vm6380_vm1, %v6369_v38  ;;  %7677 = vmatprep.mubr.msk.f32.mxu1 %vm6219_vm2, %v6344_v7 }
 0x80e   : > { %7640 = vmatprep.mubr.msk.f32.mxu0 %vm6380_vm1, %v6370_v54 }
 0x810   : > { %7678 = vmatmul.mubr.msk.f32.gmra.mrb[6].mxu1 %vm6219_vm2, %v6345_v10 }
 0x811   : > { %7641 = vmatmul.mubr.msk.f32.gmra.mrb[10].mxu0 %vm6380_vm1, %v6371_v11  ;;  %7680 = vmatprep.mubr.msk.f32.mxu1 %vm6219_vm2, %v6346_v60 }
 0x812   : > { %7643 = vmatprep.mubr.msk.f32.mxu0 %vm6380_vm1, %v6372_v42 }
 0x814   : > { %7681 = vmatmul.mubr.msk.f32.gmra.mrb[8].mxu1 %vm6219_vm2, %v6347_v53 }
 0x815   : > { %7644 = vmatmul.mubr.msk.f32.gmra.mrb[12].mxu0 %vm6380_vm1, %v6373_v56  ;;  %7683 = vmatprep.mubr.msk.f32.mxu1 %vm6219_vm2, %v6348_v34 }
 0x816   : > { %7646 = vmatprep.mubr.msk.f32.mxu0 %vm6380_vm1, %v6374_v3 }
 0x818   : > { %7684 = vmatmul.mubr.msk.f32.gmra.mrb[10].mxu1 %vm6219_vm2, %v6349_v4 }
 0x819   : > { %7647 = vmatmul.mubr.msk.f32.gmra.mrb[14].mxu0 %vm6380_vm1, %v6375_v41  ;;  %7686 = vmatprep.mubr.msk.f32.mxu1 %vm6219_vm2, %v6350_v62 }
 0x81a   : > { %7665 = vmatprep.mubr.msk.f32.mxu0 %vm6219_vm2, %v6336_v33 }
 0x81c   : > { %7687 = vmatmul.mubr.msk.f32.gmra.mrb[12].mxu1 %vm6219_vm2, %v6351_v21 }
 0x81d   : > { %7666 = vmatmul.mubr.msk.f32.vlgmr.msra.gmra.mrb[0].mxu0 %vm6219_vm2, %v6337_v52 }
 0x8d4   : > { %v7630_v57 = vpop.f32.mrb[2].mxu0 }
 0x8d5   : > { %v6505_v31 = vpop.f32.mrb[3].mxu0 }
 0x8d7   : > { %v7670_v23 = vpop.f32.mrb[0].mxu1 }
 0x8d8   : > { %v7633_v14 = vpop.f32.mrb[4].mxu0  ;;  %v6704_v61 = vadd.f32 %v7670_v23, %v7630_v57  ;;  %v6698_v20 = vpop.f32.mrb[1].mxu1 }
 0x8d9   : > { %v6515_v13 = vpop.f32.mrb[5].mxu0  ;;  %v6699_v55 = vadd.f32 %v6698_v20, %v6505_v31 }
 0x8da   : > { %v6777_v47 = vadd.f32 %v16198_v49, %v6704_v61 }
 0x8db   : > { %v6776_v6 = vadd.f32 %v16198_v49, %v6699_v55  ;;  %v7673_v16 = vpop.f32.mrb[2].mxu1 }
 0x8dc   : > { %v7636_v39 = vpop.f32.mrb[6].mxu0  ;;  %v6793_v45 = vmax.f32 %v6777_v47, 0.0  ;;  %v6714_v9 = vadd.f32 %v7673_v16, %v7633_v14  ;;  %v6708_v59 = vpop.f32.mrb[3].mxu1 }
 0x8dd   : > { %v6525_v44 = vpop.f32.mrb[7].mxu0  ;;  %v6792_v15 = vmax.f32 %v6776_v6, 0.0  ;;  %v6709_v50 = vadd.f32 %v6708_v59, %v6515_v13 }
 0x8de   : > { %6809 = vst.msk [vmem:[%s8763_s25 + $0x18] sm:$0xff] %vm6219_vm2, %v6793_v45  ;;  %v6779_v1 = vadd.f32 %v16198_v49, %v6714_v9 }
 0x8df   : > { %6808 = vst.msk [vmem:[%s8763_s25 + $0x10] sm:$0xff] %vm6219_vm2, %v6792_v15  ;;  %v6778_v0 = vadd.f32 %v16198_v49, %v6709_v50  ;;  %v7676_v36 = vpop.f32.mrb[4].mxu1 }
 0x8e0   : > { %v7639_v5 = vpop.f32.mrb[8].mxu0  ;;  %v6795_v24 = vmax.f32 %v6779_v1, 0.0  ;;  %v6724_v18 = vadd.f32 %v7676_v36, %v7636_v39  ;;  %v6718_v38 = vpop.f32.mrb[5].mxu1 }
 0x8e1   : > { %v6535_v58 = vpop.f32.mrb[9].mxu0  ;;  %v6794_v51 = vmax.f32 %v6778_v0, 0.0  ;;  %v6719_v28 = vadd.f32 %v6718_v38, %v6525_v44 }
 0x8e2   : > { %6811 = vst.msk [vmem:[%s8763_s25 + $0x28] sm:$0xff] %vm6219_vm2, %v6795_v24  ;;  %v6781_v25 = vadd.f32 %v16198_v49, %v6724_v18 }
 0x8e3   : > { %6810 = vst.msk [vmem:[%s8763_s25 + $0x20] sm:$0xff] %vm6219_vm2, %v6794_v51  ;;  %v6780_v7 = vadd.f32 %v16198_v49, %v6719_v28  ;;  %v7679_v43 = vpop.f32.mrb[6].mxu1 }
 0x8e4   : > { %v7642_v54 = vpop.f32.mrb[10].mxu0  ;;  %v6797_v11 = vmax.f32 %v6781_v25, 0.0  ;;  %v6734_v10 = vadd.f32 %v7679_v43, %v7639_v5  ;;  %v6728_v29 = vpop.f32.mrb[7].mxu1 }
 0x8e5   : > { %v6545_v35 = vpop.f32.mrb[11].mxu0  ;;  %v6796_v40 = vmax.f32 %v6780_v7, 0.0  ;;  %v6729_v37 = vadd.f32 %v6728_v29, %v6535_v58 }
 0x8e6   : > { %6813 = vst.msk [vmem:[%s8763_s25 + $0x38] sm:$0xff] %vm6219_vm2, %v6797_v11  ;;  %v6783_v42 = vadd.f32 %v16198_v49, %v6734_v10 }
 0x8e7   : > { %6812 = vst.msk [vmem:[%s8763_s25 + $0x30] sm:$0xff] %vm6219_vm2, %v6796_v40  ;;  %v6782_v26 = vadd.f32 %v16198_v49, %v6729_v37  ;;  %v7682_v30 = vpop.f32.mrb[8].mxu1 }
 0x8e8   : > { %v7645_v60 = vpop.f32.mrb[12].mxu0  ;;  %v6799_v12 = vmax.f32 %v6783_v42, 0.0  ;;  %v6744_v27 = vadd.f32 %v7682_v30, %v7642_v54  ;;  %v6738_v56 = vpop.f32.mrb[9].mxu1 }
 0x8e9   : > { %v6555_v22 = vpop.f32.mrb[13].mxu0  ;;  %v6798_v53 = vmax.f32 %v6782_v26, 0.0  ;;  %v6739_v48 = vadd.f32 %v6738_v56, %v6545_v35 }
 0x8ea   : > { %6815 = vst.msk [vmem:[%s8763_s25 + $0x48] sm:$0xff] %vm6219_vm2, %v6799_v12  ;;  %v6785_v19 = vadd.f32 %v16198_v49, %v6744_v27 }
 0x8eb   : > { %6814 = vst.msk [vmem:[%s8763_s25 + $0x40] sm:$0xff] %vm6219_vm2, %v6798_v53  ;;  %v6784_v17 = vadd.f32 %v16198_v49, %v6739_v48  ;;  %v7685_v3 = vpop.f32.mrb[10].mxu1 }
 0x8ec   : > { %v7648_v46 = vpop.f32.mrb[14].mxu0  ;;  %v6801_v63 = vmax.f32 %v6785_v19, 0.0  ;;  %v6754_v32 = vadd.f32 %v7685_v3, %v7645_v60  ;;  %v6748_v8 = vpop.f32.mrb[11].mxu1 }
 0x8ed   : > { %v6565_v34 = vpop.f32.mrb[15].mxu0  ;;  %v6800_v41 = vmax.f32 %v6784_v17, 0.0  ;;  %v6749_v4 = vadd.f32 %v6748_v8, %v6555_v22 }
 0x8ee   : > { %6817 = vst.msk [vmem:[%s8763_s25 + $0x58] sm:$0xff] %vm6219_vm2, %v6801_v63  ;;  %v6787_v33 = vadd.f32 %v16198_v49, %v6754_v32 }
 0x8ef   : > { %6816 = vst.msk [vmem:[%s8763_s25 + $0x50] sm:$0xff] %vm6219_vm2, %v6800_v41  ;;  %v6786_v62 = vadd.f32 %v16198_v49, %v6749_v4  ;;  %v7688_v21 = vpop.f32.mrb[12].mxu1 }
 0x8f0   : > { %v7667_v2 = vpop.f32.mrb[0].mxu0  ;;  %v6803_v31 = vmax.f32 %v6787_v33, 0.0  ;;  %v6764_v14 = vadd.f32 %v7688_v21, %v7648_v46  ;;  %v6758_v13 = vpop.f32.mrb[13].mxu1 }
 0x8f1   : > { %v6775_v52 = vadd.f32 %v7667_v2, %v16198_v49  ;;  %v6688_v57 = vpop.f32.mrb[1].mxu0  ;;  %v6802_v61 = vmax.f32 %v6786_v62, 0.0  ;;  %v6759_v55 = vadd.f32 %v6758_v13, %v6565_v34 }
 0x8f2   : > { %v6774_v23 = vadd.f32 %v16198_v49, %v6688_v57  ;;  %6819 = vst.msk [vmem:[%s8763_s25 + $0x68] sm:$0xff] %vm6219_vm2, %v6803_v31  ;;  %v6789_v47 = vadd.f32 %v16198_v49, %v6764_v14 }
 0x8f3   : > { %v6791_v20 = vmax.f32 %v6775_v52, 0.0  ;;  %6818 = vst.msk [vmem:[%s8763_s25 + $0x60] sm:$0xff] %vm6219_vm2, %v6802_v61  ;;  %v6788_v6 = vadd.f32 %v16198_v49, %v6759_v55 }
 0x8f4   : > { %v6790_v39 = vmax.f32 %v6774_v23, 0.0  ;;  %v6805_v16 = vmax.f32 %v6789_v47, 0.0 }
 0x8f5   : > { %6807 = vst.msk [vmem:[%s8763_s25 + $0x8] sm:$0xff] %vm6219_vm2, %v6791_v20  ;;  %v6804_v44 = vmax.f32 %v6788_v6, 0.0 }
 0x8f6   : > { %6806 = vst.msk [vmem:[%s8763_s25] sm:$0xff] %vm6219_vm2, %v6790_v39  ;;  %6821 = vst.msk [vmem:[%s8763_s25 + $0x78] sm:$0xff] %vm6219_vm2, %v6805_v16 }
 0x8f7   : > { %6820 = vst.msk [vmem:[%s8763_s25 + $0x70] sm:$0xff] %vm6219_vm2, %v6804_v44 }
 0x8f8 PF: > { %s17_s28 = sadd.s32 1, %s8661_s28   ;;  %s17858_s24 = smov %s8653_s26 }
 0x8f9   : > { %p14_p10 = scmp.ge.s32.totalorder %s17_s28, 8   ;;  %s17859_s25 = smov %s8657_s27 }
 0x8fa   : > { %s17860_s26 = smov %s17863_s29  ;;  %s17861_s27 = smov %s17867_s30 }
 0x8fb   :  { %16 = sbr.rel (!%p14_p10) target bundleno = 3 (0x3), region = 99 }

</bundles_post_ra>
